<compile_context>
chip_gen: v7x
topology: tpu7x:2x2x1
jax: 0.10.0
libtpu: 0.0.40
codegen_flags: <defaults>
</compile_context>

<pallas_src>
import jax
import jax.numpy as jnp
from jax.experimental import pallas as pl
from jax.experimental.pallas import tpu as pltpu

LANE = 128


def _ceil_to(x, m):
    return ((x + m - 1) // m) * m


def _make_mlp_kernel(sel_cols, col_shifts, k_pad, num_hidden):
    """Kernel refs = (field, M, b1, [W_i, b_i] * (num_hidden-1), w_out_row, b_out, out)."""

    def kernel(field_ref, *refs):
        out_ref = refs[-1]
        params = refs[:-1]
        tb = field_ref.shape[0]

        # ---- fused EMB (select + offset + lookup) + flatten + Linear1 (+ folded BN) ----
        # Multi-hot over the padded vocab: one 1 per selected field, at column
        # raw_id + field_offset (== the embedding-table row index).
        col = jax.lax.broadcasted_iota(jnp.int32, (tb, k_pad), 1)
        mh = jnp.zeros((tb, k_pad), jnp.float32)
        for c, shift in zip(sel_cols, col_shifts):
            ids = field_ref[:, c:c + 1] + shift            # (tb, 1) int32, static col+offset
            mh = jnp.where(col == ids, 1.0, mh)            # fields never collide

        m_tab, b1 = params[0], params[1]
        acc = jnp.dot(mh, m_tab[...], preferred_element_type=jnp.float32) + b1[...]
        acc = jnp.maximum(acc, 0.0)                        # ReLU (Dropout = identity, eval)

        i = 2
        for _ in range(num_hidden - 1):
            w, b = params[i], params[i + 1]
            i += 2
            acc = jnp.dot(acc, w[...], preferred_element_type=jnp.float32) + b[...]
            acc = jnp.maximum(acc, 0.0)

        # ---- final (hidden -> 1) layer on VPU multiply + XLU lane reduce (no N=1 MXU),
        #      producing a lane-dense (rows, 128) block directly. ----
        w_row, b_out = params[i], params[i + 1]            # (1, H_last), (1, 1) f32
        rows, lanes = out_ref.shape
        acc3 = acc.reshape(rows, lanes, acc.shape[-1])
        logit = jnp.sum(acc3 * w_row[...][None], axis=-1) + b_out[...]
        out_ref[...] = jax.nn.sigmoid(logit)               # f32 sigmoid on EUP

    return kernel


def fold_mlp_params(emb_table, orig_layers, w_out, b_out, sel_dims, embed_dim):
    """Fold eval-mode BatchNorm into each Linear and fold the embedding lookup + the
    embed-major flatten + the first Linear into a per-id projection table M so that
        layer1(flatten(emb(ids).T)) == multihot(ids + offsets) @ M + b1'.
    Returns (params_list, per-field column shifts, padded K)."""
    F = len(sel_dims)
    E = embed_dim
    vocab = int(sum(sel_dims))
    offs = [0]
    for d in sel_dims[:-1]:
        offs.append(offs[-1] + int(d))

    w1, b1, s1, t1 = orig_layers[0]
    # PyTorch flattens the *transposed* embedding (B, E, F) -> Linear row index = e*F + f.
    blocks = []
    for f in range(F):
        w1_f = w1[jnp.arange(E) * F + f, :]                               # (E, H1)
        blocks.append(emb_table[offs[f]:offs[f] + sel_dims[f]] @ w1_f)    # (dim_f, H1)
    m_tab = jnp.concatenate(blocks, axis=0) * s1                          # BN folded
    b1f = (b1 * s1 + t1).astype(jnp.float32)

    k_pad = _ceil_to(vocab, LANE)
    m_tab = jnp.pad(m_tab, ((0, k_pad - vocab), (0, 0))).astype(jnp.float32)

    params = [m_tab, b1f]
    for (w, b, s, t) in orig_layers[1:]:
        params.append((w * s).astype(jnp.float32))
        params.append((b * s + t).astype(jnp.float32))
    params.append(w_out.reshape(1, -1).astype(jnp.float32))               # (1, H_last)
    params.append(b_out.reshape(1, 1).astype(jnp.float32))
    return params, offs, k_pad


def mlp_forward_pallas(field, params, sel_cols, col_shifts, k_pad, num_hidden, *, tb=4096):
    """field: (B, num_fields) raw int32 ids.  Returns (B,) f32 probabilities."""
    B, num_fields = field.shape

    # --- batch tiling: single tile for small B; otherwise tiles that are multiples of
    #     1024 rows (lane-dense (tb/128, 128) output block), preferring an even tile
    #     count >= 2 so v7x's two TensorCores both get work on the "parallel" axis. ---
    if B <= 1024:
        tb_eff = max(_ceil_to(B, LANE), LANE)
        num_tiles = 1
    else:
        tb_cap = max(1024, _ceil_to(tb, 1024))
        tb_eff = min(tb_cap, _ceil_to(pl.cdiv(B, 2), 1024))      # guarantees >= 2 tiles
        num_tiles = pl.cdiv(B, tb_eff)
        if num_tiles % 2 == 1 and num_tiles > 1:
            alt = _ceil_to(pl.cdiv(B, num_tiles + 1), 1024)
            if pl.cdiv(B, alt) % 2 == 0:                          # even count at small cost
                tb_eff = alt
                num_tiles = pl.cdiv(B, alt)
    B_pad = num_tiles * tb_eff
    if B_pad != B:
        field = jnp.pad(field, ((0, B_pad - B), (0, 0)))          # padded rows discarded later

    # Only raw int32 ids stream from HBM per tile; all weights are tiny constant blocks.
    # NOTE: only add pipeline_mode=pl.Buffered(3) on this spec if the grid is long
    # (>= ~4 tiles) AND profiling shows exposed input DMA.
    in_specs = [pl.BlockSpec((tb_eff, num_fields), lambda i: (i, 0))]
    in_specs += [pl.BlockSpec(p.shape, lambda i: (0, 0)) for p in params]

    rows_per_tile = tb_eff // LANE
    out = pl.pallas_call(
        _make_mlp_kernel(tuple(sel_cols), tuple(col_shifts), k_pad, num_hidden),
        out_shape=jax.ShapeDtypeStruct((num_tiles * rows_per_tile, LANE), jnp.float32),
        grid=(num_tiles,),
        in_specs=in_specs,
        out_specs=pl.BlockSpec((rows_per_tile, LANE), lambda i: (i, 0)),
        compiler_params=pltpu.CompilerParams(
            dimension_semantics=("parallel",),
            # ~4-6 MiB actually used at tb=4096; 32 MiB raises v5e's 16 MiB scoped default
            # and stays within v7x's 32 MiB scoped / 64 MiB physical VMEM.
            vmem_limit_bytes=32 * 1024 * 1024,
        ),
    )(field, *params)
    return out.reshape(-1)[:B]                                    # lane-dense blocks -> (B,)


if __name__ == "__main__":
    # --- synthetic "args" configuration ---
    field_dims = [10, 7, 12, 6]
    decision = [1, 0, 1, 1]                  # which fields are kept
    embed_dim = 8
    mlp_dims = (32, 16)
    batch = 2000                              # > 1024 -> 2 tiles ("parallel" grid)
    bn_eps = 1e-5

    sel = [i * decision[i] for i in range(len(decision)) if decision[i]]   # [0, 2, 3]
    sel_dims = [field_dims[i] for i in sel]
    F = len(sel)
    E = embed_dim
    vocab = sum(sel_dims)
    in_dim0 = F * E
    assert len(mlp_dims) >= 1

    key = jax.random.PRNGKey(0)
    keys = jax.random.split(key, 16)

    # Embedding table: xavier_uniform_ over (sum(selected field_dims), embed_dim)
    lim = (6.0 / (vocab + E)) ** 0.5
    emb_table = jax.random.uniform(keys[0], (vocab, E), jnp.float32, -lim, lim)

    # Original (PyTorch-layout) parameters: Linear + BatchNorm1d (eval running stats).
    orig_layers = []
    in_dim = in_dim0
    kidx = 1
    for h in mlp_dims:
        bound = 1.0 / (in_dim ** 0.5)
        w = jax.random.uniform(keys[kidx], (in_dim, h), jnp.float32, -bound, bound)
        b = jax.random.uniform(keys[kidx + 1], (1, h), jnp.float32, -bound, bound)
        kidx += 2
        gamma = jnp.ones((1, h), jnp.float32)
        beta = jnp.zeros((1, h), jnp.float32)
        rmean = jnp.zeros((1, h), jnp.float32)
        rvar = jnp.ones((1, h), jnp.float32)
        scale = gamma / jnp.sqrt(rvar + bn_eps)
        shift = beta - rmean * scale
        orig_layers.append((w, b, scale, shift))
        in_dim = h
    bound = 1.0 / (in_dim ** 0.5)
    w_out = jax.random.uniform(keys[kidx], (in_dim, 1), jnp.float32, -bound, bound)
    b_out = jax.random.uniform(keys[kidx + 1], (1, 1), jnp.float32, -bound, bound)
    kidx += 2

    # Raw categorical input: one id column per (all) fields.
    cols = []
    for j, fd in enumerate(field_dims):
        cols.append(jax.random.randint(keys[kidx + j], (batch, 1), 0, fd, dtype=jnp.int32))
    field = jnp.concatenate(cols, axis=1)                    # (B, num_total_fields) int32

    # --- offline folding: EMB + flatten + Linear1 + eval-BN -> M; BN into later Linears ---
    params, offs, k_pad = fold_mlp_params(emb_table, orig_layers, w_out, b_out,
                                          sel_dims, embed_dim)

    # --- Pallas forward: raw int32 ids go straight into the kernel ---
    out = mlp_forward_pallas(field, params, sel, offs, k_pad, len(mlp_dims), tb=4096)
    out = jax.block_until_ready(out)

    # --- pure-JAX reference with the ORIGINAL layout and un-folded parameters ---
    def ref_forward():
        idx = field[:, jnp.array(sel, dtype=jnp.int32)] + jnp.array(offs, jnp.int32)[None, :]
        emb = emb_table[idx]                                  # (B, F, E)
        h = jnp.transpose(emb, (0, 2, 1)).reshape(batch, -1)  # PyTorch embed-major flatten
        for (w, b, s, t) in orig_layers:
            h = jnp.maximum((h @ w + b) * s + t, 0.0)
        return jax.nn.sigmoid(h @ w_out + b_out)[:, 0]

    ref = ref_forward()
    assert out.shape == (batch,)
    assert jnp.allclose(out, ref, atol=1e-2, rtol=1e-2), float(jnp.max(jnp.abs(out - ref)))
    print("KERNEL_OK")
</pallas_src>

<mosaic_0001>
module attributes {stable_mosaic.version = 11 : i64} {
  func.func @kernel(%arg0: i32, %arg1: memref<1024x4xi32, #tpu.memory_space<vmem>>, %arg2: memref<128x32xf32, #tpu.memory_space<vmem>>, %arg3: memref<1x32xf32, #tpu.memory_space<vmem>>, %arg4: memref<32x16xf32, #tpu.memory_space<vmem>>, %arg5: memref<1x16xf32, #tpu.memory_space<vmem>>, %arg6: memref<1x16xf32, #tpu.memory_space<vmem>>, %arg7: memref<1x1xf32, #tpu.memory_space<vmem>>, %arg8: memref<8x128xf32, #tpu.memory_space<vmem>>) attributes {dimension_semantics = [#tpu.dimension_semantics<parallel>], iteration_bounds = array<i64: 2>, scalar_prefetch = 0 : i64, scratch_operands = 0 : i64, tpu.core_type = #tpu.core_type<tc>, window_params = [{transform_indices = @transform_0, window_bounds = array<i64: 1024, 4>}, {pipeline_mode = #tpu.pipeline_mode<synchronous>, transform_indices = @transform_1, window_bounds = array<i64: 128, 32>}, {pipeline_mode = #tpu.pipeline_mode<synchronous>, transform_indices = @transform_2, window_bounds = array<i64: 1, 32>}, {pipeline_mode = #tpu.pipeline_mode<synchronous>, transform_indices = @transform_3, window_bounds = array<i64: 32, 16>}, {pipeline_mode = #tpu.pipeline_mode<synchronous>, transform_indices = @transform_4, window_bounds = array<i64: 1, 16>}, {pipeline_mode = #tpu.pipeline_mode<synchronous>, transform_indices = @transform_5, window_bounds = array<i64: 1, 16>}, {pipeline_mode = #tpu.pipeline_mode<synchronous>, transform_indices = @transform_6, window_bounds = array<i64: 1, 1>}, {transform_indices = @transform_7, window_bounds = array<i64: 8, 128>}]} {
    %0 = tpu.iota {dimensions = array<i32: 1>} : vector<1024x128xi32>
    %cst = arith.constant 0.000000e+00 : f32
    %1 = vector.broadcast %cst : f32 to vector<1024x128xf32>
    %c0 = arith.constant 0 : index
    %c0_0 = arith.constant 0 : index
    %2 = vector.load %arg1[%c0, %c0_0] : memref<1024x4xi32, #tpu.memory_space<vmem>>, vector<1024x1xi32>
    %c0_i32 = arith.constant 0 : i32
    %3 = vector.broadcast %c0_i32 : i32 to vector<1024x1xi32>
    %4 = arith.addi %2, %3 : vector<1024x1xi32>
    %5 = vector.broadcast %4 : vector<1024x1xi32> to vector<1024x128xi32>
    %6 = arith.cmpi eq, %0, %5 : vector<1024x128xi32>
    %cst_1 = arith.constant 1.000000e+00 : f32
    %7 = vector.broadcast %cst_1 : f32 to vector<1024x128xf32>
    %8 = arith.select %6, %7, %1 : vector<1024x128xi1>, vector<1024x128xf32>
    %c0_2 = arith.constant 0 : index
    %c2 = arith.constant 2 : index
    %9 = vector.load %arg1[%c0_2, %c2] : memref<1024x4xi32, #tpu.memory_space<vmem>>, vector<1024x1xi32>
    %c10_i32 = arith.constant 10 : i32
    %10 = vector.broadcast %c10_i32 : i32 to vector<1024x1xi32>
    %11 = arith.addi %9, %10 : vector<1024x1xi32>
    %12 = vector.broadcast %11 : vector<1024x1xi32> to vector<1024x128xi32>
    %13 = arith.cmpi eq, %0, %12 : vector<1024x128xi32>
    %cst_3 = arith.constant 1.000000e+00 : f32
    %14 = vector.broadcast %cst_3 : f32 to vector<1024x128xf32>
    %15 = arith.select %13, %14, %8 : vector<1024x128xi1>, vector<1024x128xf32>
    %c0_4 = arith.constant 0 : index
    %c3 = arith.constant 3 : index
    %16 = vector.load %arg1[%c0_4, %c3] : memref<1024x4xi32, #tpu.memory_space<vmem>>, vector<1024x1xi32>
    %c22_i32 = arith.constant 22 : i32
    %17 = vector.broadcast %c22_i32 : i32 to vector<1024x1xi32>
    %18 = arith.addi %16, %17 : vector<1024x1xi32>
    %19 = vector.broadcast %18 : vector<1024x1xi32> to vector<1024x128xi32>
    %20 = arith.cmpi eq, %0, %19 : vector<1024x128xi32>
    %cst_5 = arith.constant 1.000000e+00 : f32
    %21 = vector.broadcast %cst_5 : f32 to vector<1024x128xf32>
    %22 = arith.select %20, %21, %15 : vector<1024x128xi1>, vector<1024x128xf32>
    %c0_6 = arith.constant 0 : index
    %c0_7 = arith.constant 0 : index
    %23 = vector.load %arg2[%c0_6, %c0_7] : memref<128x32xf32, #tpu.memory_space<vmem>>, vector<128x32xf32>
    %cst_8 = arith.constant dense<0.000000e+00> : vector<1024x32xf32>
    %24 = tpu.matmul %22, %23, %cst_8 {dimension_numbers = #tpu.dot_dimension_numbers<[1], [0], [0], [1], [0, 0, 1, 1], [], []>} : vector<1024x128xf32>, vector<128x32xf32>, vector<1024x32xf32> -> vector<1024x32xf32>
    %c0_9 = arith.constant 0 : index
    %c0_10 = arith.constant 0 : index
    %25 = vector.load %arg3[%c0_9, %c0_10] : memref<1x32xf32, #tpu.memory_space<vmem>>, vector<1x32xf32>
    %26 = vector.broadcast %25 : vector<1x32xf32> to vector<1024x32xf32>
    %27 = arith.addf %24, %26 : vector<1024x32xf32>
    %cst_11 = arith.constant 0.000000e+00 : f32
    %28 = vector.broadcast %cst_11 : f32 to vector<1024x32xf32>
    %29 = arith.maximumf %27, %28 : vector<1024x32xf32>
    %c0_12 = arith.constant 0 : index
    %c0_13 = arith.constant 0 : index
    %30 = vector.load %arg4[%c0_12, %c0_13] : memref<32x16xf32, #tpu.memory_space<vmem>>, vector<32x16xf32>
    %cst_14 = arith.constant dense<0.000000e+00> : vector<1024x16xf32>
    %31 = tpu.matmul %29, %30, %cst_14 {dimension_numbers = #tpu.dot_dimension_numbers<[1], [0], [0], [1], [0, 0, 1, 1], [], []>} : vector<1024x32xf32>, vector<32x16xf32>, vector<1024x16xf32> -> vector<1024x16xf32>
    %c0_15 = arith.constant 0 : index
    %c0_16 = arith.constant 0 : index
    %32 = vector.load %arg5[%c0_15, %c0_16] : memref<1x16xf32, #tpu.memory_space<vmem>>, vector<1x16xf32>
    %33 = vector.broadcast %32 : vector<1x16xf32> to vector<1024x16xf32>
    %34 = arith.addf %31, %33 : vector<1024x16xf32>
    %cst_17 = arith.constant 0.000000e+00 : f32
    %35 = vector.broadcast %cst_17 : f32 to vector<1024x16xf32>
    %36 = arith.maximumf %34, %35 : vector<1024x16xf32>
    %37 = vector.shape_cast %36 : vector<1024x16xf32> to vector<8x128x16xf32>
    %c0_18 = arith.constant 0 : index
    %c0_19 = arith.constant 0 : index
    %38 = vector.load %arg6[%c0_18, %c0_19] : memref<1x16xf32, #tpu.memory_space<vmem>>, vector<1x16xf32>
    %39 = vector.shape_cast %38 : vector<1x16xf32> to vector<1x1x16xf32>
    %40 = vector.broadcast %39 : vector<1x1x16xf32> to vector<8x128x16xf32>
    %41 = arith.mulf %37, %40 : vector<8x128x16xf32>
    %cst_20 = arith.constant dense<0.000000e+00> : vector<8x128xf32>
    %42 = vector.multi_reduction <add>, %41, %cst_20 [2] : vector<8x128x16xf32> to vector<8x128xf32>
    %c0_21 = arith.constant 0 : index
    %c0_22 = arith.constant 0 : index
    %43 = vector.load %arg7[%c0_21, %c0_22] : memref<1x1xf32, #tpu.memory_space<vmem>>, vector<1x1xf32>
    %44 = vector.broadcast %43 : vector<1x1xf32> to vector<8x128xf32>
    %45 = arith.addf %42, %44 : vector<8x128xf32>
    %46 = arith.negf %45 : vector<8x128xf32>
    %47 = math.exp %46 : vector<8x128xf32>
    %cst_23 = arith.constant 1.000000e+00 : f32
    %48 = vector.broadcast %cst_23 : f32 to vector<8x128xf32>
    %49 = arith.addf %48, %47 : vector<8x128xf32>
    %50 = arith.divf %48, %49 : vector<8x128xf32>
    %c0_24 = arith.constant 0 : index
    %c0_25 = arith.constant 0 : index
    %51 = vector.load %arg8[%c0_24, %c0_25] : memref<8x128xf32, #tpu.memory_space<vmem>>, vector<8x128xf32>
    tpu.vector_store %arg8[%c0_24, %c0_25], %50 {strides = array<i32>} : memref<8x128xf32, #tpu.memory_space<vmem>>, vector<8x128xf32>,
    return
  }
  func.func @transform_0(%arg0: i32) -> (i32, i32) {
    %c0_i32 = arith.constant 0 : i32
    %c0_i32_0 = arith.constant 0 : i32
    return %arg0, %c0_i32 : i32, i32
  }
  func.func @transform_1(%arg0: i32) -> (i32, i32) {
    %c0_i32 = arith.constant 0 : i32
    %c0_i32_0 = arith.constant 0 : i32
    %c0_i32_1 = arith.constant 0 : i32
    return %c0_i32, %c0_i32_0 : i32, i32
  }
  func.func @transform_2(%arg0: i32) -> (i32, i32) {
    %c0_i32 = arith.constant 0 : i32
    %c0_i32_0 = arith.constant 0 : i32
    %c0_i32_1 = arith.constant 0 : i32
    return %c0_i32, %c0_i32_0 : i32, i32
  }
  func.func @transform_3(%arg0: i32) -> (i32, i32) {
    %c0_i32 = arith.constant 0 : i32
    %c0_i32_0 = arith.constant 0 : i32
    %c0_i32_1 = arith.constant 0 : i32
    return %c0_i32, %c0_i32_0 : i32, i32
  }
  func.func @transform_4(%arg0: i32) -> (i32, i32) {
    %c0_i32 = arith.constant 0 : i32
    %c0_i32_0 = arith.constant 0 : i32
    %c0_i32_1 = arith.constant 0 : i32
    return %c0_i32, %c0_i32_0 : i32, i32
  }
  func.func @transform_5(%arg0: i32) -> (i32, i32) {
    %c0_i32 = arith.constant 0 : i32
    %c0_i32_0 = arith.constant 0 : i32
    %c0_i32_1 = arith.constant 0 : i32
    return %c0_i32, %c0_i32_0 : i32, i32
  }
  func.func @transform_6(%arg0: i32) -> (i32, i32) {
    %c0_i32 = arith.constant 0 : i32
    %c0_i32_0 = arith.constant 0 : i32
    %c0_i32_1 = arith.constant 0 : i32
    return %c0_i32, %c0_i32_0 : i32, i32
  }
  func.func @transform_7(%arg0: i32) -> (i32, i32) {
    %c0_i32 = arith.constant 0 : i32
    %c0_i32_0 = arith.constant 0 : i32
    return %arg0, %c0_i32 : i32, i32
  }
}

</mosaic_0001>

<bundles_post_ra>
// kernel: tpu_custom_call.1
= control target key start
LH: loop header
LB: loop body
LE: loop exit
PB: predicated region body
PF: predicated region fallthrough
CT: control target
= control target key end

     0   :  { %s13634_s0 = inlined_call_operand.vmem [shape: s32[2048,4], index: 0, kind: input, shape index: {}]   ;;  %s13635_s1 = inlined_call_operand.vmem [shape: f32[128,32], index: 1, kind: input, shape index: {}]   ;;  %s13636_s2 = inlined_call_operand.vmem [shape: f32[1,32], index: 2, kind: input, shape index: {}]   ;;  %s13637_s3 = inlined_call_operand.vmem [shape: f32[32,16], index: 3, kind: input, shape index: {}]   ;;  %s13638_s4 = inlined_call_operand.vmem [shape: f32[1,16], index: 4, kind: input, shape index: {}]   ;;  %s13639_s5 = inlined_call_operand.vmem [shape: f32[1,16], index: 5, kind: input, shape index: {}]   ;;  %s13640_s6 = inlined_call_operand.<no memory space> [shape: f32[1,1], index: 6, kind: input, shape index: {}]   ;;  %s13641_s7 = inlined_call_operand.hbm [shape: f32[16,128], index: 7, kind: output, shape index: {}]  }
   0x1   :  { %v12_v0 = vstv %s13640_s6 }
   0x2   :  { %13 = vst [vmem:[#allocation2] sm:$0x1] %v12_v0 }
   0x3   :  { %14 = vsyncpa [#allocation4], 0 }
   0x4   :  { %16 = vsyncpa [#allocation4 + $0x1], 0  ;;  %s8811_s26 = smov 0   ;;  %s8813_s27 = smov 0  }
   0x5   :  { %s8815_s28 = smov 0   ;;  %s8817_s29 = smov 0  }
   0x6 LB: > { %s6976_s6 = sadd.s32 4294967295, %s8761_s29   ;;  %s6977_s30 = sadd.s32 4294967294, %s8761_s29   ;;  %s8761_s29 = sphi %s8817_s29, %s14678_s29   ;;  %s8757_s28 = sphi %s8815_s28, %s14677_s28   ;;  %s8753_s27 = sphi %s8813_s27, %s14676_s27   ;;  %s8749_s26 = sphi %s8811_s26, %s14675_s26  }
   0x7   : > { %s8834_s8 = sadd.s32 1, %s8761_s29   ;;  %s181_s9 = sadd.s32 1, %s8757_s28 }
   0x8   : > { %s178_s10 = ssub.s32 %s8761_s29, %s8834_s8  ;;  %p191_p0 = scmp.ne.s32.totalorder %s8757_s28, %s8753_s27 }
   0x9   : > { %p179_p1 = scmp.eq.s32.totalorder %s178_s10, 0  ;;  %p192_p2 = scmp.eq.s32.totalorder %s6976_s6, 1 }
   0xa   : > { %p197_p3 = scmp.ne.s32.totalorder %s8753_s27, %s8749_s26  ;;  %p198_p4 = scmp.eq.s32.totalorder %s6977_s30, 1 }
   0xb   : > { %s8844_s11 = scalar_select %p179_p1, %s8757_s28, %s181_s9  }
   0xc   : > { %p8846_p5 = por %p192_p2, %p191_p0  ;;  %p8850_p6 = por %p198_p4, %p197_p3 }
   0xd   : > { %p6980_p7 = scmp.ge.s32.totalorder %s8761_s29, 1  ;;  %p243_p8 = scmp.lt.s32.totalorder %s8761_s29, 3 }
   0xf   : > { %p244_p9 = pnand %p6980_p7, %p243_p8 }
  0x11   : > { %247 = sbr.rel (%p244_p9) target bundleno = 1770 (0x6ea), region = 48 }
  0x18   : > { %s8856_s14 = sshll.u32 %s6976_s6, 7  ;;  %v13642_v1 = vmov 0   ;;  %s272_s10 = sand.u32 1, %s8753_s27  }
  0x19   : > { %8032 = vset.pattern.permute.xlu1 %v13642_v1  ;;  %8031 = vset.pattern.permute.xlu0 %v13642_v1  ;;  %p276_p10 = scmp.lt.s32.totalorder %s8856_s14, 255  ;;  %s13590_s20 = scalar_lea.hbm %s13641_s7, %s8856_s14 }
  0x1a   : > { %s6905_s21 = scalar_lea.sflag [#allocation4], %s272_s10  ;;  %s8767_s23 = smov [#allocation3]  }
  0x1b   : > { %s277_s15 = scalar_select %p276_p10, %s8856_s14, 255 }
  0x1c   : > { %s8703_s24 = sshll.u32 %s8767_s23, 4  ;;  %s8704_s24 = int_to_ptr.vmem [resolvable:$false] %s8703_s24 }
  0x1d   : > { %s6983_s16 = sshll.u32 %s277_s15, 3  ;;  %s13541_s15 = sshll.u32 %s272_s10, 3 }
  0x1e   : > { %s8865_s19 = scalar_lea.vmem %s13634_s0, %s6983_s16  ;;  %s274_s16 = scalar_lea.vmem [#allocation3], %s13541_s15 }
  0x1f   : > { %v8868_v2 = vld [vmem:[%s8865_s19 + $0x10] sm:$0xff]  ;;  %v8871_v3 = vld [vmem:[%s8865_s19] sm:$0xff]  ;;  %v8876_v4 = vld [vmem:[%s8865_s19 + $0x18] sm:$0xff]  ;;  %s8705_s25 = scalar_lea.vmem %s8704_s24, 256 }
  0x20   : > { %418 = vperm.xlu1 %8032, %v8868_v2   ;;  %412 = vperm.xlu0 %8031, %v8871_v3   ;;  %v8879_v5 = vld [vmem:[%s8865_s19 + $0x8] sm:$0xff]  ;;  %v8887_v7 = vld [vmem:[%s8865_s19 + $0x20] sm:$0xff]  ;;  %v8892_v8 = vld [vmem:[%s8865_s19 + $0x38] sm:$0xff] }
  0x21   : > { %v8884_v6 = vld [vmem:[%s8865_s19 + $0x28] sm:$0xff]  ;;  %v8895_v9 = vld [vmem:[%s8865_s19 + $0x30] sm:$0xff]  ;;  %v8903_v11 = vld [vmem:[%s8865_s19 + $0x40] sm:$0xff] }
  0x22   : > { %v8900_v10 = vld [vmem:[%s8865_s19 + $0x48] sm:$0xff]  ;;  %v8908_v12 = vld [vmem:[%s8865_s19 + $0x58] sm:$0xff]  ;;  %v8911_v13 = vld [vmem:[%s8865_s19 + $0x50] sm:$0xff] }
  0x23   : > { %v8916_v14 = vld [vmem:[%s8865_s19 + $0x68] sm:$0xff]  ;;  %v8919_v15 = vld [vmem:[%s8865_s19 + $0x60] sm:$0xff]  ;;  %v8924_v16 = vld [vmem:[%s8865_s19 + $0x78] sm:$0xff] }
  0x24   : > { %421 = vperm.xlu1 %8032, %v8876_v4   ;;  %415 = vperm.xlu0 %8031, %v8879_v5   ;;  %v8927_v17 = vld [vmem:[%s8865_s19 + $0x70] sm:$0xff]  ;;  %v8932_v18 = vld [vmem:[%s8865_s19 + $0x88] sm:$0xff]  ;;  %v8935_v19 = vld [vmem:[%s8865_s19 + $0x80] sm:$0xff] }
  0x25   : > { %v8940_v20 = vld [vmem:[%s8865_s19 + $0x98] sm:$0xff]  ;;  %v8943_v21 = vld [vmem:[%s8865_s19 + $0x90] sm:$0xff]  ;;  %v8948_v22 = vld [vmem:[%s8865_s19 + $0xa8] sm:$0xff] }
  0x26   : > { %v8951_v23 = vld [vmem:[%s8865_s19 + $0xa0] sm:$0xff]  ;;  %v8956_v24 = vld [vmem:[%s8865_s19 + $0xb8] sm:$0xff]  ;;  %v8959_v25 = vld [vmem:[%s8865_s19 + $0xb0] sm:$0xff] }
  0x27   : > { %v8964_v26 = vld [vmem:[%s8865_s19 + $0xc8] sm:$0xff]  ;;  %v8967_v27 = vld [vmem:[%s8865_s19 + $0xc0] sm:$0xff]  ;;  %v8972_v28 = vld [vmem:[%s8865_s19 + $0xd8] sm:$0xff] }
  0x28   : > { %427 = vperm.xlu1 %8032, %v8884_v6   ;;  %424 = vperm.xlu0 %8031, %v8887_v7   ;;  %v8975_v29 = vld [vmem:[%s8865_s19 + $0xd0] sm:$0xff]  ;;  %v8980_v30 = vld [vmem:[%s8865_s19 + $0xe8] sm:$0xff]  ;;  %v8983_v31 = vld [vmem:[%s8865_s19 + $0xe0] sm:$0xff] }
  0x29   : > { %v8988_v32 = vld [vmem:[%s8865_s19 + $0xf8] sm:$0xff]  ;;  %v8991_v33 = vld [vmem:[%s8865_s19 + $0xf0] sm:$0xff]  ;;  %v8996_v34 = vld [vmem:[%s8865_s19 + $0x108] sm:$0xff] }
  0x2a   : > { %v8999_v35 = vld [vmem:[%s8865_s19 + $0x100] sm:$0xff]  ;;  %v9004_v36 = vld [vmem:[%s8865_s19 + $0x118] sm:$0xff]  ;;  %v9007_v37 = vld [vmem:[%s8865_s19 + $0x110] sm:$0xff] }
  0x2b   : > { %v9012_v38 = vld [vmem:[%s8865_s19 + $0x128] sm:$0xff]  ;;  %v9015_v39 = vld [vmem:[%s8865_s19 + $0x120] sm:$0xff]  ;;  %v9020_v40 = vld [vmem:[%s8865_s19 + $0x138] sm:$0xff] }
  0x2c   : > { %433 = vperm.xlu1 %8032, %v8892_v8   ;;  %430 = vperm.xlu0 %8031, %v8895_v9   ;;  %v9023_v41 = vld [vmem:[%s8865_s19 + $0x130] sm:$0xff]  ;;  %v9028_v42 = vld [vmem:[%s8865_s19 + $0x148] sm:$0xff]  ;;  %v9031_v43 = vld [vmem:[%s8865_s19 + $0x140] sm:$0xff] }
  0x2d   : > { %v9036_v44 = vld [vmem:[%s8865_s19 + $0x158] sm:$0xff]  ;;  %v9039_v45 = vld [vmem:[%s8865_s19 + $0x150] sm:$0xff]  ;;  %v9044_v46 = vld [vmem:[%s8865_s19 + $0x168] sm:$0xff] }
  0x2e   : > { %v9047_v47 = vld [vmem:[%s8865_s19 + $0x160] sm:$0xff]  ;;  %v9052_v48 = vld [vmem:[%s8865_s19 + $0x178] sm:$0xff]  ;;  %v9055_v49 = vld [vmem:[%s8865_s19 + $0x170] sm:$0xff] }
  0x2f   : > { %v9060_v50 = vld [vmem:[%s8865_s19 + $0x188] sm:$0xff]  ;;  %v9063_v51 = vld [vmem:[%s8865_s19 + $0x180] sm:$0xff]  ;;  %v9068_v52 = vld [vmem:[%s8865_s19 + $0x198] sm:$0xff] }
  0x30   : > { %439 = vperm.xlu1 %8032, %v8900_v10   ;;  %436 = vperm.xlu0 %8031, %v8903_v11   ;;  %v9071_v53 = vld [vmem:[%s8865_s19 + $0x190] sm:$0xff]  ;;  %v9076_v54 = vld [vmem:[%s8865_s19 + $0x1a8] sm:$0xff]  ;;  %v9079_v55 = vld [vmem:[%s8865_s19 + $0x1a0] sm:$0xff] }
  0x31   : > { %13859 = vst [vmem:[#allocation6_spill] sm:$0xff] %v9076_v54  ;;  %13860 = vst [vmem:[#allocation7_spill] sm:$0xff] %v9079_v55  ;;  %v9084_v56 = vld [vmem:[%s8865_s19 + $0x1b8] sm:$0xff]  ;;  %v9087_v57 = vld [vmem:[%s8865_s19 + $0x1b0] sm:$0xff] }
  0x32   : > { %13861 = vst [vmem:[#allocation8_spill] sm:$0xff] %v9084_v56  ;;  %13862 = vst [vmem:[#allocation9_spill] sm:$0xff] %v9087_v57  ;;  %v9092_v58 = vld [vmem:[%s8865_s19 + $0x1c8] sm:$0xff]  ;;  %v9095_v59 = vld [vmem:[%s8865_s19 + $0x1c0] sm:$0xff] }
  0x33   : > { %13863 = vst [vmem:[#allocation10_spill] sm:$0xff] %v9092_v58  ;;  %13864 = vst [vmem:[#allocation11_spill] sm:$0xff] %v9095_v59  ;;  %v9100_v60 = vld [vmem:[%s8865_s19 + $0x1d8] sm:$0xff]  ;;  %v9103_v61 = vld [vmem:[%s8865_s19 + $0x1d0] sm:$0xff] }
  0x34   : > { %445 = vperm.xlu1 %8032, %v8908_v12   ;;  %442 = vperm.xlu0 %8031, %v8911_v13   ;;  %13865 = vst [vmem:[#allocation12_spill] sm:$0xff] %v9100_v60  ;;  %13866 = vst [vmem:[#allocation13_spill] sm:$0xff] %v9103_v61  ;;  %v9108_v62 = vld [vmem:[%s8865_s19 + $0x1e8] sm:$0xff]  ;;  %v9111_v63 = vld [vmem:[%s8865_s19 + $0x1e0] sm:$0xff] }
  0x35   : > { %13867 = vst [vmem:[#allocation14_spill] sm:$0xff] %v9108_v62  ;;  %13868 = vst [vmem:[#allocation15_spill] sm:$0xff] %v9111_v63  ;;  %v9116_v0 = vld [vmem:[%s8865_s19 + $0x1f8] sm:$0xff]  ;;  %v9119_v1 = vld [vmem:[%s8865_s19 + $0x1f0] sm:$0xff] }
  0x36   : > { %13869 = vst [vmem:[#allocation16_spill] sm:$0xff] %v9116_v0  ;;  %13870 = vst [vmem:[#allocation17_spill] sm:$0xff] %v9119_v1 }
  0x38   : > { %451 = vperm.xlu1 %8032, %v8916_v14   ;;  %448 = vperm.xlu0 %8031, %v8919_v15  }
  0x3c   : > { %457 = vperm.xlu1 %8032, %v8924_v16   ;;  %454 = vperm.xlu0 %8031, %v8927_v17  }
  0x40   : > { %463 = vperm.xlu1 %8032, %v8932_v18   ;;  %460 = vperm.xlu0 %8031, %v8935_v19  }
  0x44   : > { %469 = vperm.xlu1 %8032, %v8940_v20   ;;  %466 = vperm.xlu0 %8031, %v8943_v21  }
  0x48   : > { %475 = vperm.xlu1 %8032, %v8948_v22   ;;  %472 = vperm.xlu0 %8031, %v8951_v23  }
  0x4c   : > { %481 = vperm.xlu1 %8032, %v8956_v24   ;;  %478 = vperm.xlu0 %8031, %v8959_v25  }
  0x50   : > { %487 = vperm.xlu1 %8032, %v8964_v26   ;;  %484 = vperm.xlu0 %8031, %v8967_v27  }
  0x54   : > { %493 = vperm.xlu1 %8032, %v8972_v28   ;;  %490 = vperm.xlu0 %8031, %v8975_v29  }
  0x58   : > { %499 = vperm.xlu1 %8032, %v8980_v30   ;;  %496 = vperm.xlu0 %8031, %v8983_v31  }
  0x5c   : > { %505 = vperm.xlu1 %8032, %v8988_v32   ;;  %502 = vperm.xlu0 %8031, %v8991_v33  }
  0x60   : > { %511 = vperm.xlu1 %8032, %v8996_v34   ;;  %508 = vperm.xlu0 %8031, %v8999_v35  }
  0x64   : > { %517 = vperm.xlu1 %8032, %v9004_v36   ;;  %514 = vperm.xlu0 %8031, %v9007_v37  }
  0x68   : > { %523 = vperm.xlu1 %8032, %v9012_v38   ;;  %520 = vperm.xlu0 %8031, %v9015_v39  }
  0x6c   : > { %529 = vperm.xlu1 %8032, %v9020_v40   ;;  %526 = vperm.xlu0 %8031, %v9023_v41  }
  0x70   : > { %535 = vperm.xlu1 %8032, %v9028_v42   ;;  %532 = vperm.xlu0 %8031, %v9031_v43  }
  0x74   : > { %541 = vperm.xlu1 %8032, %v9036_v44   ;;  %538 = vperm.xlu0 %8031, %v9039_v45  }
  0x78   : > { %547 = vperm.xlu1 %8032, %v9044_v46   ;;  %544 = vperm.xlu0 %8031, %v9047_v47  }
  0x7c   : > { %553 = vperm.xlu1 %8032, %v9052_v48   ;;  %550 = vperm.xlu0 %8031, %v9055_v49  }
  0x80   : > { %559 = vperm.xlu1 %8032, %v9060_v50   ;;  %556 = vperm.xlu0 %8031, %v9063_v51  }
  0x84   : > { %565 = vperm.xlu1 %8032, %v9068_v52   ;;  %562 = vperm.xlu0 %8031, %v9071_v53  }
  0x88   : > { %571 = vperm.xlu1 %8032, %v9076_v54   ;;  %568 = vperm.xlu0 %8031, %v9079_v55  }
  0x8c   : > { %577 = vperm.xlu1 %8032, %v9084_v56   ;;  %574 = vperm.xlu0 %8031, %v9087_v57   ;;  %v9422_v57 = vld [vmem:[%s8865_s19 + $0x390] sm:$0xff] }
  0x8d   : > { %13970 = vst [vmem:[#allocation117_spill] sm:$0xff] %v9422_v57 }
  0x90   : > { %583 = vperm.xlu1 %8032, %v9092_v58   ;;  %580 = vperm.xlu0 %8031, %v9095_v59   ;;  %v9139_v58 = vld [vmem:[%s8865_s19 + $0x210] sm:$0xff] }
  0x91   : > { %13876 = vst [vmem:[#allocation23_spill] sm:$0xff] %v9139_v58 }
  0x94   : > { %589 = vperm.xlu1 %8032, %v9100_v60   ;;  %586 = vperm.xlu0 %8031, %v9103_v61   ;;  %v9124_v61 = vld [vmem:[%s8865_s19 + $0x208] sm:$0xff]  ;;  %v9127_v60 = vld [vmem:[%s8865_s19 + $0x200] sm:$0xff] }
  0x95   : > { %13871 = vst [vmem:[#allocation18_spill] sm:$0xff] %v9124_v61  ;;  %13872 = vst [vmem:[#allocation19_spill] sm:$0xff] %v9127_v60 }
  0x98   : > { %595 = vperm.xlu1 %8032, %v9108_v62   ;;  %592 = vperm.xlu0 %8031, %v9111_v63   ;;  %v9136_v63 = vld [vmem:[%s8865_s19 + $0x218] sm:$0xff] }
  0x99   : > { %13875 = vst [vmem:[#allocation22_spill] sm:$0xff] %v9136_v63 }
  0x9c   : > { %601 = vperm.xlu1 %8032, %v9116_v0   ;;  %598 = vperm.xlu0 %8031, %v9119_v1  }
  0x9f   : > { %v9129_v59 = vpop.permute.xlu1 %418  ;;  %v9131_v62 = vpop.permute.xlu0 %412 }
  0xa0   : > { %13873 = vst [vmem:[#allocation20_spill] sm:$0xff] %v9129_v59  ;;  %13874 = vst [vmem:[#allocation21_spill] sm:$0xff] %v9131_v62  ;;  %607 = vperm.xlu1 %8032, %v9124_v61   ;;  %604 = vperm.xlu0 %8031, %v9127_v60   ;;  %v9148_v59 = vld [vmem:[%s8865_s19 + $0x228] sm:$0xff]  ;;  %v9151_v62 = vld [vmem:[%s8865_s19 + $0x220] sm:$0xff] }
  0xa1   : > { %13879 = vst [vmem:[#allocation26_spill] sm:$0xff] %v9148_v59  ;;  %13880 = vst [vmem:[#allocation27_spill] sm:$0xff] %v9151_v62 }
  0xa3   : > { %v9141_v0 = vpop.permute.xlu1 %421  ;;  %v9143_v1 = vpop.permute.xlu0 %415 }
  0xa4   : > { %13877 = vst [vmem:[#allocation24_spill] sm:$0xff] %v9141_v0  ;;  %13878 = vst [vmem:[#allocation25_spill] sm:$0xff] %v9143_v1  ;;  %613 = vperm.xlu1 %8032, %v9136_v63   ;;  %610 = vperm.xlu0 %8031, %v9139_v58   ;;  %v9160_v0 = vld [vmem:[%s8865_s19 + $0x238] sm:$0xff]  ;;  %v9163_v1 = vld [vmem:[%s8865_s19 + $0x230] sm:$0xff] }
  0xa5   : > { %13883 = vst [vmem:[#allocation30_spill] sm:$0xff] %v9160_v0  ;;  %13884 = vst [vmem:[#allocation31_spill] sm:$0xff] %v9163_v1 }
  0xa7   : > { %v9153_v61 = vpop.permute.xlu1 %427  ;;  %v9155_v60 = vpop.permute.xlu0 %424 }
  0xa8   : > { %13881 = vst [vmem:[#allocation28_spill] sm:$0xff] %v9153_v61  ;;  %13882 = vst [vmem:[#allocation29_spill] sm:$0xff] %v9155_v60  ;;  %619 = vperm.xlu1 %8032, %v9148_v59   ;;  %616 = vperm.xlu0 %8031, %v9151_v62   ;;  %v9172_v60 = vld [vmem:[%s8865_s19 + $0x248] sm:$0xff]  ;;  %v9175_v61 = vld [vmem:[%s8865_s19 + $0x240] sm:$0xff] }
  0xa9   : > { %13887 = vst [vmem:[#allocation34_spill] sm:$0xff] %v9172_v60  ;;  %13888 = vst [vmem:[#allocation35_spill] sm:$0xff] %v9175_v61 }
  0xab   : > { %v9165_v63 = vpop.permute.xlu1 %433  ;;  %v9167_v58 = vpop.permute.xlu0 %430 }
  0xac   : > { %13885 = vst [vmem:[#allocation32_spill] sm:$0xff] %v9165_v63  ;;  %13886 = vst [vmem:[#allocation33_spill] sm:$0xff] %v9167_v58  ;;  %625 = vperm.xlu1 %8032, %v9160_v0   ;;  %622 = vperm.xlu0 %8031, %v9163_v1   ;;  %v9184_v58 = vld [vmem:[%s8865_s19 + $0x258] sm:$0xff]  ;;  %v9187_v63 = vld [vmem:[%s8865_s19 + $0x250] sm:$0xff] }
  0xad   : > { %13891 = vst [vmem:[#allocation38_spill] sm:$0xff] %v9184_v58  ;;  %13892 = vst [vmem:[#allocation39_spill] sm:$0xff] %v9187_v63 }
  0xaf   : > { %v9177_v59 = vpop.permute.xlu1 %439  ;;  %v9179_v62 = vpop.permute.xlu0 %436 }
  0xb0   : > { %13889 = vst [vmem:[#allocation36_spill] sm:$0xff] %v9177_v59  ;;  %13890 = vst [vmem:[#allocation37_spill] sm:$0xff] %v9179_v62  ;;  %631 = vperm.xlu1 %8032, %v9172_v60   ;;  %628 = vperm.xlu0 %8031, %v9175_v61   ;;  %v9196_v62 = vld [vmem:[%s8865_s19 + $0x268] sm:$0xff]  ;;  %v9199_v59 = vld [vmem:[%s8865_s19 + $0x260] sm:$0xff] }
  0xb1   : > { %13895 = vst [vmem:[#allocation42_spill] sm:$0xff] %v9196_v62  ;;  %13896 = vst [vmem:[#allocation43_spill] sm:$0xff] %v9199_v59 }
  0xb3   : > { %v9189_v0 = vpop.permute.xlu1 %445  ;;  %v9191_v1 = vpop.permute.xlu0 %442 }
  0xb4   : > { %13893 = vst [vmem:[#allocation40_spill] sm:$0xff] %v9189_v0  ;;  %13894 = vst [vmem:[#allocation41_spill] sm:$0xff] %v9191_v1  ;;  %637 = vperm.xlu1 %8032, %v9184_v58   ;;  %634 = vperm.xlu0 %8031, %v9187_v63   ;;  %v9208_v1 = vld [vmem:[%s8865_s19 + $0x278] sm:$0xff]  ;;  %v9211_v0 = vld [vmem:[%s8865_s19 + $0x270] sm:$0xff] }
  0xb5   : > { %13899 = vst [vmem:[#allocation46_spill] sm:$0xff] %v9208_v1  ;;  %13900 = vst [vmem:[#allocation47_spill] sm:$0xff] %v9211_v0 }
  0xb7   : > { %v9201_v60 = vpop.permute.xlu1 %451  ;;  %v9203_v61 = vpop.permute.xlu0 %448 }
  0xb8   : > { %13897 = vst [vmem:[#allocation44_spill] sm:$0xff] %v9201_v60  ;;  %13898 = vst [vmem:[#allocation45_spill] sm:$0xff] %v9203_v61  ;;  %643 = vperm.xlu1 %8032, %v9196_v62   ;;  %640 = vperm.xlu0 %8031, %v9199_v59   ;;  %v9220_v61 = vld [vmem:[%s8865_s19 + $0x288] sm:$0xff]  ;;  %v9223_v60 = vld [vmem:[%s8865_s19 + $0x280] sm:$0xff] }
  0xb9   : > { %13903 = vst [vmem:[#allocation50_spill] sm:$0xff] %v9220_v61  ;;  %13904 = vst [vmem:[#allocation51_spill] sm:$0xff] %v9223_v60 }
  0xbb   : > { %v9213_v58 = vpop.permute.xlu1 %457  ;;  %v9215_v63 = vpop.permute.xlu0 %454 }
  0xbc   : > { %13901 = vst [vmem:[#allocation48_spill] sm:$0xff] %v9213_v58  ;;  %13902 = vst [vmem:[#allocation49_spill] sm:$0xff] %v9215_v63  ;;  %649 = vperm.xlu1 %8032, %v9208_v1   ;;  %646 = vperm.xlu0 %8031, %v9211_v0   ;;  %v9232_v63 = vld [vmem:[%s8865_s19 + $0x298] sm:$0xff]  ;;  %v9235_v58 = vld [vmem:[%s8865_s19 + $0x290] sm:$0xff] }
  0xbd   : > { %13907 = vst [vmem:[#allocation54_spill] sm:$0xff] %v9232_v63  ;;  %13908 = vst [vmem:[#allocation55_spill] sm:$0xff] %v9235_v58 }
  0xbf   : > { %v9225_v62 = vpop.permute.xlu1 %463  ;;  %v9227_v59 = vpop.permute.xlu0 %460 }
  0xc0   : > { %13905 = vst [vmem:[#allocation52_spill] sm:$0xff] %v9225_v62  ;;  %13906 = vst [vmem:[#allocation53_spill] sm:$0xff] %v9227_v59  ;;  %655 = vperm.xlu1 %8032, %v9220_v61   ;;  %652 = vperm.xlu0 %8031, %v9223_v60   ;;  %v9244_v59 = vld [vmem:[%s8865_s19 + $0x2a8] sm:$0xff]  ;;  %v9247_v62 = vld [vmem:[%s8865_s19 + $0x2a0] sm:$0xff] }
  0xc1   : > { %13911 = vst [vmem:[#allocation58_spill] sm:$0xff] %v9244_v59  ;;  %13912 = vst [vmem:[#allocation59_spill] sm:$0xff] %v9247_v62 }
  0xc3   : > { %v9237_v1 = vpop.permute.xlu1 %469  ;;  %v9239_v0 = vpop.permute.xlu0 %466 }
  0xc4   : > { %13909 = vst [vmem:[#allocation56_spill] sm:$0xff] %v9237_v1  ;;  %13910 = vst [vmem:[#allocation57_spill] sm:$0xff] %v9239_v0  ;;  %661 = vperm.xlu1 %8032, %v9232_v63   ;;  %658 = vperm.xlu0 %8031, %v9235_v58   ;;  %v9256_v0 = vld [vmem:[%s8865_s19 + $0x2b8] sm:$0xff]  ;;  %v9259_v1 = vld [vmem:[%s8865_s19 + $0x2b0] sm:$0xff] }
  0xc5   : > { %13915 = vst [vmem:[#allocation62_spill] sm:$0xff] %v9256_v0  ;;  %13916 = vst [vmem:[#allocation63_spill] sm:$0xff] %v9259_v1 }
  0xc7   : > { %v9249_v61 = vpop.permute.xlu1 %475  ;;  %v9251_v60 = vpop.permute.xlu0 %472 }
  0xc8   : > { %13913 = vst [vmem:[#allocation60_spill] sm:$0xff] %v9249_v61  ;;  %13914 = vst [vmem:[#allocation61_spill] sm:$0xff] %v9251_v60  ;;  %667 = vperm.xlu1 %8032, %v9244_v59   ;;  %664 = vperm.xlu0 %8031, %v9247_v62   ;;  %v9268_v60 = vld [vmem:[%s8865_s19 + $0x2c8] sm:$0xff]  ;;  %v9271_v61 = vld [vmem:[%s8865_s19 + $0x2c0] sm:$0xff] }
  0xc9   : > { %13919 = vst [vmem:[#allocation66_spill] sm:$0xff] %v9268_v60  ;;  %13920 = vst [vmem:[#allocation67_spill] sm:$0xff] %v9271_v61 }
  0xcb   : > { %v9261_v63 = vpop.permute.xlu1 %481  ;;  %v9263_v58 = vpop.permute.xlu0 %478 }
  0xcc   : > { %13917 = vst [vmem:[#allocation64_spill] sm:$0xff] %v9261_v63  ;;  %13918 = vst [vmem:[#allocation65_spill] sm:$0xff] %v9263_v58  ;;  %673 = vperm.xlu1 %8032, %v9256_v0   ;;  %670 = vperm.xlu0 %8031, %v9259_v1   ;;  %v9280_v58 = vld [vmem:[%s8865_s19 + $0x2d8] sm:$0xff]  ;;  %v9283_v63 = vld [vmem:[%s8865_s19 + $0x2d0] sm:$0xff] }
  0xcd   : > { %13923 = vst [vmem:[#allocation70_spill] sm:$0xff] %v9280_v58  ;;  %13924 = vst [vmem:[#allocation71_spill] sm:$0xff] %v9283_v63 }
  0xcf   : > { %v9273_v59 = vpop.permute.xlu1 %487  ;;  %v9275_v62 = vpop.permute.xlu0 %484 }
  0xd0   : > { %13921 = vst [vmem:[#allocation68_spill] sm:$0xff] %v9273_v59  ;;  %13922 = vst [vmem:[#allocation69_spill] sm:$0xff] %v9275_v62  ;;  %679 = vperm.xlu1 %8032, %v9268_v60   ;;  %676 = vperm.xlu0 %8031, %v9271_v61   ;;  %v9292_v62 = vld [vmem:[%s8865_s19 + $0x2e8] sm:$0xff]  ;;  %v9295_v59 = vld [vmem:[%s8865_s19 + $0x2e0] sm:$0xff] }
  0xd1   : > { %13927 = vst [vmem:[#allocation74_spill] sm:$0xff] %v9292_v62  ;;  %13928 = vst [vmem:[#allocation75_spill] sm:$0xff] %v9295_v59 }
  0xd3   : > { %v9285_v0 = vpop.permute.xlu1 %493  ;;  %v9287_v1 = vpop.permute.xlu0 %490 }
  0xd4   : > { %13925 = vst [vmem:[#allocation72_spill] sm:$0xff] %v9285_v0  ;;  %13926 = vst [vmem:[#allocation73_spill] sm:$0xff] %v9287_v1  ;;  %685 = vperm.xlu1 %8032, %v9280_v58   ;;  %682 = vperm.xlu0 %8031, %v9283_v63   ;;  %v9304_v1 = vld [vmem:[%s8865_s19 + $0x2f8] sm:$0xff]  ;;  %v9307_v0 = vld [vmem:[%s8865_s19 + $0x2f0] sm:$0xff] }
  0xd5   : > { %13931 = vst [vmem:[#allocation78_spill] sm:$0xff] %v9304_v1  ;;  %13932 = vst [vmem:[#allocation79_spill] sm:$0xff] %v9307_v0 }
  0xd7   : > { %v9297_v60 = vpop.permute.xlu1 %499  ;;  %v9299_v61 = vpop.permute.xlu0 %496 }
  0xd8   : > { %13929 = vst [vmem:[#allocation76_spill] sm:$0xff] %v9297_v60  ;;  %13930 = vst [vmem:[#allocation77_spill] sm:$0xff] %v9299_v61  ;;  %691 = vperm.xlu1 %8032, %v9292_v62   ;;  %688 = vperm.xlu0 %8031, %v9295_v59   ;;  %v9316_v61 = vld [vmem:[%s8865_s19 + $0x308] sm:$0xff]  ;;  %v9319_v60 = vld [vmem:[%s8865_s19 + $0x300] sm:$0xff] }
  0xd9   : > { %13935 = vst [vmem:[#allocation82_spill] sm:$0xff] %v9316_v61  ;;  %13936 = vst [vmem:[#allocation83_spill] sm:$0xff] %v9319_v60 }
  0xdb   : > { %v9309_v58 = vpop.permute.xlu1 %505  ;;  %v9311_v63 = vpop.permute.xlu0 %502 }
  0xdc   : > { %13933 = vst [vmem:[#allocation80_spill] sm:$0xff] %v9309_v58  ;;  %13934 = vst [vmem:[#allocation81_spill] sm:$0xff] %v9311_v63  ;;  %697 = vperm.xlu1 %8032, %v9304_v1   ;;  %694 = vperm.xlu0 %8031, %v9307_v0   ;;  %v9328_v63 = vld [vmem:[%s8865_s19 + $0x318] sm:$0xff]  ;;  %v9331_v58 = vld [vmem:[%s8865_s19 + $0x310] sm:$0xff] }
  0xdd   : > { %13939 = vst [vmem:[#allocation86_spill] sm:$0xff] %v9328_v63  ;;  %13940 = vst [vmem:[#allocation87_spill] sm:$0xff] %v9331_v58 }
  0xdf   : > { %v9321_v62 = vpop.permute.xlu1 %511  ;;  %v9323_v59 = vpop.permute.xlu0 %508 }
  0xe0   : > { %13937 = vst [vmem:[#allocation84_spill] sm:$0xff] %v9321_v62  ;;  %13938 = vst [vmem:[#allocation85_spill] sm:$0xff] %v9323_v59  ;;  %703 = vperm.xlu1 %8032, %v9316_v61   ;;  %700 = vperm.xlu0 %8031, %v9319_v60   ;;  %v9340_v59 = vld [vmem:[%s8865_s19 + $0x328] sm:$0xff]  ;;  %v9343_v62 = vld [vmem:[%s8865_s19 + $0x320] sm:$0xff] }
  0xe1   : > { %13943 = vst [vmem:[#allocation90_spill] sm:$0xff] %v9340_v59  ;;  %13944 = vst [vmem:[#allocation91_spill] sm:$0xff] %v9343_v62 }
  0xe3   : > { %v9333_v1 = vpop.permute.xlu1 %517  ;;  %v9335_v0 = vpop.permute.xlu0 %514 }
  0xe4   : > { %13941 = vst [vmem:[#allocation88_spill] sm:$0xff] %v9333_v1  ;;  %13942 = vst [vmem:[#allocation89_spill] sm:$0xff] %v9335_v0  ;;  %709 = vperm.xlu1 %8032, %v9328_v63   ;;  %706 = vperm.xlu0 %8031, %v9331_v58   ;;  %v9352_v0 = vld [vmem:[%s8865_s19 + $0x338] sm:$0xff]  ;;  %v9355_v1 = vld [vmem:[%s8865_s19 + $0x330] sm:$0xff] }
  0xe5   : > { %13947 = vst [vmem:[#allocation94_spill] sm:$0xff] %v9352_v0  ;;  %13948 = vst [vmem:[#allocation95_spill] sm:$0xff] %v9355_v1 }
  0xe7   : > { %v9345_v61 = vpop.permute.xlu1 %523  ;;  %v9347_v60 = vpop.permute.xlu0 %520 }
  0xe8   : > { %13945 = vst [vmem:[#allocation92_spill] sm:$0xff] %v9345_v61  ;;  %13946 = vst [vmem:[#allocation93_spill] sm:$0xff] %v9347_v60  ;;  %715 = vperm.xlu1 %8032, %v9340_v59   ;;  %712 = vperm.xlu0 %8031, %v9343_v62   ;;  %v9364_v60 = vld [vmem:[%s8865_s19 + $0x348] sm:$0xff]  ;;  %v9367_v61 = vld [vmem:[%s8865_s19 + $0x340] sm:$0xff] }
  0xe9   : > { %13951 = vst [vmem:[#allocation98_spill] sm:$0xff] %v9364_v60  ;;  %13952 = vst [vmem:[#allocation99_spill] sm:$0xff] %v9367_v61 }
  0xeb   : > { %v9357_v63 = vpop.permute.xlu1 %529  ;;  %v9359_v58 = vpop.permute.xlu0 %526 }
  0xec   : > { %13949 = vst [vmem:[#allocation96_spill] sm:$0xff] %v9357_v63  ;;  %13950 = vst [vmem:[#allocation97_spill] sm:$0xff] %v9359_v58  ;;  %721 = vperm.xlu1 %8032, %v9352_v0   ;;  %718 = vperm.xlu0 %8031, %v9355_v1   ;;  %v9376_v58 = vld [vmem:[%s8865_s19 + $0x358] sm:$0xff]  ;;  %v9379_v63 = vld [vmem:[%s8865_s19 + $0x350] sm:$0xff] }
  0xed   : > { %13955 = vst [vmem:[#allocation102_spill] sm:$0xff] %v9376_v58  ;;  %13956 = vst [vmem:[#allocation103_spill] sm:$0xff] %v9379_v63 }
  0xef   : > { %v9369_v59 = vpop.permute.xlu1 %535  ;;  %v9371_v62 = vpop.permute.xlu0 %532 }
  0xf0   : > { %13953 = vst [vmem:[#allocation100_spill] sm:$0xff] %v9369_v59  ;;  %13954 = vst [vmem:[#allocation101_spill] sm:$0xff] %v9371_v62  ;;  %727 = vperm.xlu1 %8032, %v9364_v60   ;;  %724 = vperm.xlu0 %8031, %v9367_v61   ;;  %v9388_v62 = vld [vmem:[%s8865_s19 + $0x368] sm:$0xff]  ;;  %v9391_v59 = vld [vmem:[%s8865_s19 + $0x360] sm:$0xff] }
  0xf1   : > { %13959 = vst [vmem:[#allocation106_spill] sm:$0xff] %v9388_v62  ;;  %13960 = vst [vmem:[#allocation107_spill] sm:$0xff] %v9391_v59 }
  0xf3   : > { %v9381_v0 = vpop.permute.xlu1 %541  ;;  %v9383_v1 = vpop.permute.xlu0 %538 }
  0xf4   : > { %13957 = vst [vmem:[#allocation104_spill] sm:$0xff] %v9381_v0  ;;  %13958 = vst [vmem:[#allocation105_spill] sm:$0xff] %v9383_v1  ;;  %733 = vperm.xlu1 %8032, %v9376_v58   ;;  %730 = vperm.xlu0 %8031, %v9379_v63   ;;  %v9400_v1 = vld [vmem:[%s8865_s19 + $0x378] sm:$0xff]  ;;  %v9403_v0 = vld [vmem:[%s8865_s19 + $0x370] sm:$0xff] }
  0xf5   : > { %13963 = vst [vmem:[#allocation110_spill] sm:$0xff] %v9400_v1  ;;  %13964 = vst [vmem:[#allocation111_spill] sm:$0xff] %v9403_v0 }
  0xf7   : > { %v9393_v60 = vpop.permute.xlu1 %547  ;;  %v9395_v61 = vpop.permute.xlu0 %544 }
  0xf8   : > { %13961 = vst [vmem:[#allocation108_spill] sm:$0xff] %v9393_v60  ;;  %13962 = vst [vmem:[#allocation109_spill] sm:$0xff] %v9395_v61  ;;  %739 = vperm.xlu1 %8032, %v9388_v62   ;;  %736 = vperm.xlu0 %8031, %v9391_v59   ;;  %v396_v61 = vld [vmem:[%s8865_s19 + $0x388] sm:$0xff]  ;;  %v9413_v60 = vld [vmem:[%s8865_s19 + $0x380] sm:$0xff] }
  0xf9   : > { %13967 = vst [vmem:[#allocation114_spill] sm:$0xff] %v9413_v60 }
  0xfb   : > { %v9405_v58 = vpop.permute.xlu1 %553  ;;  %v9407_v63 = vpop.permute.xlu0 %550 }
  0xfc   : > { %13965 = vst [vmem:[#allocation112_spill] sm:$0xff] %v9405_v58  ;;  %13966 = vst [vmem:[#allocation113_spill] sm:$0xff] %v9407_v63  ;;  %745 = vperm.xlu1 %8032, %v9400_v1   ;;  %742 = vperm.xlu0 %8031, %v9403_v0   ;;  %v398_v58 = vld [vmem:[%s8865_s19 + $0x398] sm:$0xff]  ;;  %v399_v0 = vld [vmem:[%s8865_s19 + $0x3a0] sm:$0xff] }
  0xff   : > { %v9415_v62 = vpop.permute.xlu1 %559  ;;  %v9417_v59 = vpop.permute.xlu0 %556 }
 0x100   : > { %13968 = vst [vmem:[#allocation115_spill] sm:$0xff] %v9415_v62  ;;  %13969 = vst [vmem:[#allocation116_spill] sm:$0xff] %v9417_v59  ;;  %751 = vperm.xlu1 %8032, %v396_v61   ;;  %748 = vperm.xlu0 %8031, %v9413_v60   ;;  %v400_v62 = vld [vmem:[%s8865_s19 + $0x3a8] sm:$0xff]  ;;  %v402_v59 = vld [vmem:[%s8865_s19 + $0x3b8] sm:$0xff] }
 0x101   : > { %v9437_v60 = vld [vmem:[%s8865_s19 + $0x3b0] sm:$0xff] }
 0x102   : > { %13975 = vst [vmem:[#allocation122_spill] sm:$0xff] %v9437_v60 }
 0x103   : > { %v9424_v63 = vpop.permute.xlu1 %565  ;;  %v9426_v1 = vpop.permute.xlu0 %562 }
 0x104   : > { %13971 = vst [vmem:[#allocation118_spill] sm:$0xff] %v9424_v63  ;;  %13972 = vst [vmem:[#allocation119_spill] sm:$0xff] %v9426_v1  ;;  %757 = vperm.xlu1 %8032, %v398_v58   ;;  %754 = vperm.xlu0 %8031, %v9422_v57   ;;  %v404_v58 = vld [vmem:[%s8865_s19 + $0x3c8] sm:$0xff] }
 0x107   : > { %v9431_v56 = vpop.permute.xlu1 %571  ;;  %v9433_v61 = vpop.permute.xlu0 %568 }
 0x108   : > { %13973 = vst [vmem:[#allocation120_spill] sm:$0xff] %v9431_v56  ;;  %13974 = vst [vmem:[#allocation121_spill] sm:$0xff] %v9433_v61  ;;  %763 = vperm.xlu1 %8032, %v400_v62   ;;  %760 = vperm.xlu0 %8031, %v399_v0   ;;  %v403_v56 = vld [vmem:[%s8865_s19 + $0x3c0] sm:$0xff]  ;;  %v406_v62 = vld [vmem:[%s8865_s19 + $0x3d8] sm:$0xff] }
 0x109   : > { %v405_v0 = vld [vmem:[%s8865_s19 + $0x3d0] sm:$0xff] }
 0x10b   : > { %v9439_v63 = vpop.permute.xlu1 %577  ;;  %v9441_v1 = vpop.permute.xlu0 %574 }
 0x10c   : > { %13976 = vst [vmem:[#allocation123_spill] sm:$0xff] %v9439_v63  ;;  %13977 = vst [vmem:[#allocation124_spill] sm:$0xff] %v9441_v1  ;;  %769 = vperm.xlu1 %8032, %v402_v59   ;;  %766 = vperm.xlu0 %8031, %v9437_v60   ;;  %v408_v59 = vld [vmem:[%s8865_s19 + $0x3e8] sm:$0xff]  ;;  %v407_v1 = vld [vmem:[%s8865_s19 + $0x3e0] sm:$0xff] }
 0x10f   : > { %v9446_v57 = vpop.permute.xlu1 %583  ;;  %v9448_v61 = vpop.permute.xlu0 %580 }
 0x110   : > { %13978 = vst [vmem:[#allocation125_spill] sm:$0xff] %v9446_v57  ;;  %13979 = vst [vmem:[#allocation126_spill] sm:$0xff] %v9448_v61  ;;  %775 = vperm.xlu1 %8032, %v404_v58   ;;  %772 = vperm.xlu0 %8031, %v403_v56   ;;  %v410_v61 = vld [vmem:[%s8865_s19 + $0x3f8] sm:$0xff]  ;;  %v409_v57 = vld [vmem:[%s8865_s19 + $0x3f0] sm:$0xff] }
 0x113   : > { %v9452_v63 = vpop.permute.xlu1 %589  ;;  %v9454_v55 = vpop.permute.xlu0 %586 }
 0x114   : > { %13980 = vst [vmem:[#allocation127_spill] sm:$0xff] %v9452_v63  ;;  %13981 = vst [vmem:[#allocation128_spill] sm:$0xff] %v9454_v55  ;;  %781 = vperm.xlu1 %8032, %v406_v62   ;;  %778 = vperm.xlu0 %8031, %v405_v0   ;;  %v1051_v63 = vadd.s32 10, %v8871_v3  ;;  %v1052_v62 = vadd.s32 10, %v8879_v5  ;;  %v1056_v5 = vadd.s32 10, %v8884_v6  ;;  %v1060_v6 = vadd.s32 10, %v8900_v10 }
 0x115   : > { %v1064_v10 = vadd.s32 10, %v8916_v14  ;;  %v1068_v14 = vadd.s32 10, %v8932_v18  ;;  %v1072_v18 = vadd.s32 10, %v8948_v22  ;;  %v1076_v22 = vadd.s32 10, %v8964_v26 }
 0x116   : > { %v1080_v26 = vadd.s32 10, %v8980_v30  ;;  %v1084_v30 = vadd.s32 10, %v8996_v34  ;;  %v1088_v34 = vadd.s32 10, %v9012_v38  ;;  %v1092_v38 = vadd.s32 10, %v9028_v42 }
 0x117   : > { %v9458_v60 = vpop.permute.xlu1 %595  ;;  %v9460_v54 = vpop.permute.xlu0 %592  ;;  %v1096_v42 = vadd.s32 10, %v9044_v46  ;;  %v1100_v46 = vadd.s32 10, %v9060_v50 }
 0x118   : > { %13982 = vst [vmem:[#allocation129_spill] sm:$0xff] %v9458_v60  ;;  %13983 = vst [vmem:[#allocation130_spill] sm:$0xff] %v9460_v54  ;;  %787 = vperm.xlu1 %8032, %v408_v59   ;;  %784 = vperm.xlu0 %8031, %v407_v1   ;;  %v13764_v60 = vmov 2   ;;  %v1053_v1 = vadd.s32 10, %v8868_v2  ;;  %v1054_v59 = vadd.s32 10, %v8876_v4  ;;  %v1058_v2 = vadd.s32 10, %v8892_v8 }
 0x119   : > { %v1057_v4 = vadd.s32 10, %v8895_v9  ;;  %v1062_v8 = vadd.s32 10, %v8908_v12  ;;  %v1061_v9 = vadd.s32 10, %v8911_v13  ;;  %v1066_v12 = vadd.s32 10, %v8924_v16  ;;  %v8572_v54 = vld [vmem:[%s8865_s19 + $0x20] sm:$0xff] }
 0x11a   : > { %v1065_v13 = vadd.s32 10, %v8927_v17  ;;  %v1070_v16 = vadd.s32 10, %v8940_v20  ;;  %v1069_v17 = vadd.s32 10, %v8943_v21  ;;  %v1074_v20 = vadd.s32 10, %v8956_v24 }
 0x11b   : > { %v9464_v58 = vpop.permute.xlu1 %601  ;;  %v9466_v56 = vpop.permute.xlu0 %598  ;;  %v1073_v21 = vadd.s32 10, %v8959_v25  ;;  %v1078_v24 = vadd.s32 10, %v8972_v28  ;;  %v1077_v25 = vadd.s32 10, %v8975_v29  ;;  %v1082_v28 = vadd.s32 10, %v8988_v32 }
 0x11c   : > { %13984 = vst [vmem:[#allocation131_spill] sm:$0xff] %v9464_v58  ;;  %13985 = vst [vmem:[#allocation132_spill] sm:$0xff] %v9466_v56  ;;  %793 = vperm.xlu1 %8032, %v410_v61   ;;  %790 = vperm.xlu0 %8031, %v409_v57   ;;  %v1055_v61 = vadd.s32 10, %v8887_v7  ;;  %v1059_v7 = vadd.s32 10, %v8903_v11  ;;  %v1063_v11 = vadd.s32 10, %v8919_v15  ;;  %v1067_v15 = vadd.s32 10, %v8935_v19 }
 0x11d   : > { %v1071_v19 = vadd.s32 10, %v8951_v23  ;;  %v1075_v23 = vadd.s32 10, %v8967_v27  ;;  %v1079_v27 = vadd.s32 10, %v8983_v31  ;;  %v1081_v29 = vadd.s32 10, %v8991_v33 }
 0x11e   : > { %v1083_v31 = vadd.s32 10, %v8999_v35  ;;  %v1086_v32 = vadd.s32 10, %v9004_v36  ;;  %v1085_v33 = vadd.s32 10, %v9007_v37  ;;  %v1087_v35 = vadd.s32 10, %v9015_v39 }
 0x11f   : > { %v9470_v0 = vpop.permute.xlu1 %607  ;;  %v9472_v55 = vpop.permute.xlu0 %604  ;;  %v1090_v36 = vadd.s32 10, %v9020_v40  ;;  %v1089_v37 = vadd.s32 10, %v9023_v41  ;;  %v1091_v39 = vadd.s32 10, %v9031_v43  ;;  %v1094_v40 = vadd.s32 10, %v9036_v44 }
 0x120   : > { %13986 = vst [vmem:[#allocation133_spill] sm:$0xff] %v9470_v0  ;;  %13987 = vst [vmem:[#allocation134_spill] sm:$0xff] %v9472_v55  ;;  %8034 = vset.pattern.permute.xlu1 %v13764_v60  ;;  %8033 = vset.pattern.permute.xlu0 %v13764_v60  ;;  %v1093_v41 = vadd.s32 10, %v9039_v45  ;;  %v1095_v43 = vadd.s32 10, %v9047_v47  ;;  %v1098_v44 = vadd.s32 10, %v9052_v48  ;;  %v1097_v45 = vadd.s32 10, %v9055_v49 }
 0x121   : > { %1183 = vperm.xlu1 %8034, %v1052_v62   ;;  %1180 = vperm.xlu0 %8033, %v1051_v63   ;;  %v1099_v47 = vadd.s32 10, %v9063_v51  ;;  %v1102_v48 = vadd.s32 10, %v9068_v52  ;;  %v1101_v49 = vadd.s32 10, %v9071_v53  ;;  %v14038_v60 = vld [vmem:[#allocation6_spill] sm:$0xff] }
 0x122   : > { %v1104_v50 = vadd.s32 10, %v14038_v60 }
 0x123   : > { %v9478_v57 = vpop.permute.xlu1 %613  ;;  %v9480_v3 = vpop.permute.xlu0 %610 }
 0x124   : > { %13988 = vst [vmem:[#allocation135_spill] sm:$0xff] %v9478_v57  ;;  %13989 = vst [vmem:[#allocation136_spill] sm:$0xff] %v9480_v3  ;;  %v2599_v3 = vld [vmem:[%s13635_s1 + $0x60] sm:$0xff] }
 0x125   : > { %1186 = vperm.xlu1 %8034, %v1053_v1   ;;  %1189 = vperm.xlu0 %8033, %v1054_v59  }
 0x127   : > { %v9484_v0 = vpop.permute.xlu1 %619  ;;  %v9486_v55 = vpop.permute.xlu0 %616 }
 0x128   : > { %13990 = vst [vmem:[#allocation137_spill] sm:$0xff] %v9484_v0  ;;  %13991 = vst [vmem:[#allocation138_spill] sm:$0xff] %v9486_v55  ;;  %v2597_v55 = vld [vmem:[%s13635_s1 + $0x50] sm:$0xff] }
 0x129   : > { %1192 = vperm.xlu1 %8034, %v1055_v61   ;;  %1195 = vperm.xlu0 %8033, %v1056_v5  }
 0x12b   : > { %v9490_v63 = vpop.permute.xlu1 %625  ;;  %v9492_v62 = vpop.permute.xlu0 %622 }
 0x12c   : > { %13992 = vst [vmem:[#allocation139_spill] sm:$0xff] %v9490_v63  ;;  %13993 = vst [vmem:[#allocation140_spill] sm:$0xff] %v9492_v62 }
 0x12d   : > { %1198 = vperm.xlu1 %8034, %v1057_v4   ;;  %1201 = vperm.xlu0 %8033, %v1058_v2  }
 0x12f   : > { %v9496_v1 = vpop.permute.xlu1 %631  ;;  %v9498_v59 = vpop.permute.xlu0 %628 }
 0x130   : > { %13994 = vst [vmem:[#allocation141_spill] sm:$0xff] %v9496_v1  ;;  %13995 = vst [vmem:[#allocation142_spill] sm:$0xff] %v9498_v59 }
 0x131   : > { %1204 = vperm.xlu1 %8034, %v1059_v7   ;;  %1207 = vperm.xlu0 %8033, %v1060_v6  }
 0x133   : > { %v9502_v5 = vpop.permute.xlu1 %637  ;;  %v9504_v61 = vpop.permute.xlu0 %634 }
 0x134   : > { %13996 = vst [vmem:[#allocation143_spill] sm:$0xff] %v9502_v5  ;;  %13997 = vst [vmem:[#allocation144_spill] sm:$0xff] %v9504_v61 }
 0x135   : > { %1210 = vperm.xlu1 %8034, %v1061_v9   ;;  %1213 = vperm.xlu0 %8033, %v1062_v8  }
 0x137   : > { %v9508_v2 = vpop.permute.xlu1 %643  ;;  %v9510_v4 = vpop.permute.xlu0 %640 }
 0x138   : > { %13998 = vst [vmem:[#allocation145_spill] sm:$0xff] %v9508_v2  ;;  %13999 = vst [vmem:[#allocation146_spill] sm:$0xff] %v9510_v4  ;;  %v14101_v2 = vld [vmem:[#allocation95_spill] sm:$0xff] }
 0x139   : > { %1216 = vperm.xlu1 %8034, %v1063_v11   ;;  %1219 = vperm.xlu0 %8033, %v1064_v10  }
 0x13b   : > { %v9514_v6 = vpop.permute.xlu1 %649  ;;  %v9516_v7 = vpop.permute.xlu0 %646 }
 0x13c   : > { %14000 = vst [vmem:[#allocation147_spill] sm:$0xff] %v9514_v6  ;;  %14001 = vst [vmem:[#allocation148_spill] sm:$0xff] %v9516_v7  ;;  %v14099_v6 = vld [vmem:[#allocation91_spill] sm:$0xff]  ;;  %v14100_v7 = vld [vmem:[#allocation94_spill] sm:$0xff] }
 0x13d   : > { %1222 = vperm.xlu1 %8034, %v1065_v13   ;;  %1225 = vperm.xlu0 %8033, %v1066_v12  }
 0x13f   : > { %v9520_v8 = vpop.permute.xlu1 %655  ;;  %v9522_v9 = vpop.permute.xlu0 %652 }
 0x140   : > { %14002 = vst [vmem:[#allocation149_spill] sm:$0xff] %v9520_v8  ;;  %14003 = vst [vmem:[#allocation150_spill] sm:$0xff] %v9522_v9  ;;  %v14097_v8 = vld [vmem:[#allocation87_spill] sm:$0xff]  ;;  %v14098_v9 = vld [vmem:[#allocation90_spill] sm:$0xff] }
 0x141   : > { %1228 = vperm.xlu1 %8034, %v1067_v15   ;;  %1231 = vperm.xlu0 %8033, %v1068_v14  }
 0x143   : > { %v9526_v10 = vpop.permute.xlu1 %661  ;;  %v9528_v11 = vpop.permute.xlu0 %658 }
 0x144   : > { %14004 = vst [vmem:[#allocation151_spill] sm:$0xff] %v9526_v10  ;;  %14005 = vst [vmem:[#allocation152_spill] sm:$0xff] %v9528_v11  ;;  %v14095_v10 = vld [vmem:[#allocation83_spill] sm:$0xff]  ;;  %v14096_v11 = vld [vmem:[#allocation86_spill] sm:$0xff] }
 0x145   : > { %1234 = vperm.xlu1 %8034, %v1069_v17   ;;  %1237 = vperm.xlu0 %8033, %v1070_v16  }
 0x147   : > { %v9532_v12 = vpop.permute.xlu1 %667  ;;  %v9534_v13 = vpop.permute.xlu0 %664 }
 0x148   : > { %14006 = vst [vmem:[#allocation153_spill] sm:$0xff] %v9532_v12  ;;  %14007 = vst [vmem:[#allocation154_spill] sm:$0xff] %v9534_v13  ;;  %v14093_v12 = vld [vmem:[#allocation79_spill] sm:$0xff]  ;;  %v14094_v13 = vld [vmem:[#allocation82_spill] sm:$0xff] }
 0x149   : > { %1240 = vperm.xlu1 %8034, %v1071_v19   ;;  %1243 = vperm.xlu0 %8033, %v1072_v18  }
 0x14b   : > { %v9538_v14 = vpop.permute.xlu1 %673  ;;  %v9540_v15 = vpop.permute.xlu0 %670 }
 0x14c   : > { %14008 = vst [vmem:[#allocation155_spill] sm:$0xff] %v9538_v14  ;;  %14009 = vst [vmem:[#allocation156_spill] sm:$0xff] %v9540_v15  ;;  %v14091_v14 = vld [vmem:[#allocation75_spill] sm:$0xff]  ;;  %v14092_v15 = vld [vmem:[#allocation78_spill] sm:$0xff] }
 0x14d   : > { %1246 = vperm.xlu1 %8034, %v1073_v21   ;;  %1249 = vperm.xlu0 %8033, %v1074_v20  }
 0x14f   : > { %v9544_v16 = vpop.permute.xlu1 %679  ;;  %v9546_v17 = vpop.permute.xlu0 %676 }
 0x150   : > { %14010 = vst [vmem:[#allocation157_spill] sm:$0xff] %v9544_v16  ;;  %14011 = vst [vmem:[#allocation158_spill] sm:$0xff] %v9546_v17  ;;  %v14089_v16 = vld [vmem:[#allocation71_spill] sm:$0xff]  ;;  %v14090_v17 = vld [vmem:[#allocation74_spill] sm:$0xff] }
 0x151   : > { %1252 = vperm.xlu1 %8034, %v1075_v23   ;;  %1255 = vperm.xlu0 %8033, %v1076_v22  }
 0x153   : > { %v9550_v18 = vpop.permute.xlu1 %685  ;;  %v9552_v19 = vpop.permute.xlu0 %682 }
 0x154   : > { %14012 = vst [vmem:[#allocation159_spill] sm:$0xff] %v9550_v18  ;;  %14013 = vst [vmem:[#allocation160_spill] sm:$0xff] %v9552_v19  ;;  %v14087_v18 = vld [vmem:[#allocation67_spill] sm:$0xff]  ;;  %v14088_v19 = vld [vmem:[#allocation70_spill] sm:$0xff] }
 0x155   : > { %1258 = vperm.xlu1 %8034, %v1077_v25   ;;  %1261 = vperm.xlu0 %8033, %v1078_v24  }
 0x157   : > { %v9556_v20 = vpop.permute.xlu1 %691  ;;  %v9558_v21 = vpop.permute.xlu0 %688 }
 0x158   : > { %14014 = vst [vmem:[#allocation161_spill] sm:$0xff] %v9556_v20  ;;  %14015 = vst [vmem:[#allocation162_spill] sm:$0xff] %v9558_v21  ;;  %v14085_v20 = vld [vmem:[#allocation63_spill] sm:$0xff]  ;;  %v14086_v21 = vld [vmem:[#allocation66_spill] sm:$0xff] }
 0x159   : > { %1264 = vperm.xlu1 %8034, %v1079_v27   ;;  %1267 = vperm.xlu0 %8033, %v1080_v26  }
 0x15b   : > { %v9562_v22 = vpop.permute.xlu1 %697  ;;  %v9564_v23 = vpop.permute.xlu0 %694 }
 0x15c   : > { %14016 = vst [vmem:[#allocation163_spill] sm:$0xff] %v9562_v22  ;;  %14017 = vst [vmem:[#allocation164_spill] sm:$0xff] %v9564_v23  ;;  %v14083_v22 = vld [vmem:[#allocation59_spill] sm:$0xff]  ;;  %v14084_v23 = vld [vmem:[#allocation62_spill] sm:$0xff] }
 0x15d   : > { %1270 = vperm.xlu1 %8034, %v1081_v29   ;;  %1273 = vperm.xlu0 %8033, %v1082_v28  }
 0x15f   : > { %v9568_v24 = vpop.permute.xlu1 %703  ;;  %v9570_v25 = vpop.permute.xlu0 %700 }
 0x160   : > { %14018 = vst [vmem:[#allocation165_spill] sm:$0xff] %v9568_v24  ;;  %14019 = vst [vmem:[#allocation166_spill] sm:$0xff] %v9570_v25  ;;  %v14081_v24 = vld [vmem:[#allocation55_spill] sm:$0xff]  ;;  %v14082_v25 = vld [vmem:[#allocation58_spill] sm:$0xff] }
 0x161   : > { %1276 = vperm.xlu1 %8034, %v1083_v31   ;;  %1279 = vperm.xlu0 %8033, %v1084_v30  }
 0x163   : > { %v9574_v26 = vpop.permute.xlu1 %709  ;;  %v9576_v27 = vpop.permute.xlu0 %706 }
 0x164   : > { %14020 = vst [vmem:[#allocation167_spill] sm:$0xff] %v9574_v26  ;;  %14021 = vst [vmem:[#allocation168_spill] sm:$0xff] %v9576_v27  ;;  %v14079_v26 = vld [vmem:[#allocation51_spill] sm:$0xff]  ;;  %v14080_v27 = vld [vmem:[#allocation54_spill] sm:$0xff] }
 0x165   : > { %1282 = vperm.xlu1 %8034, %v1085_v33   ;;  %1285 = vperm.xlu0 %8033, %v1086_v32  }
 0x167   : > { %v9580_v28 = vpop.permute.xlu1 %715  ;;  %v9582_v29 = vpop.permute.xlu0 %712 }
 0x168   : > { %14022 = vst [vmem:[#allocation169_spill] sm:$0xff] %v9580_v28  ;;  %14023 = vst [vmem:[#allocation170_spill] sm:$0xff] %v9582_v29  ;;  %v14077_v28 = vld [vmem:[#allocation47_spill] sm:$0xff]  ;;  %v14078_v29 = vld [vmem:[#allocation50_spill] sm:$0xff] }
 0x169   : > { %1288 = vperm.xlu1 %8034, %v1087_v35   ;;  %1291 = vperm.xlu0 %8033, %v1088_v34  }
 0x16b   : > { %v9586_v30 = vpop.permute.xlu1 %721  ;;  %v9588_v31 = vpop.permute.xlu0 %718 }
 0x16c   : > { %14024 = vst [vmem:[#allocation171_spill] sm:$0xff] %v9586_v30  ;;  %14025 = vst [vmem:[#allocation172_spill] sm:$0xff] %v9588_v31  ;;  %v14075_v30 = vld [vmem:[#allocation43_spill] sm:$0xff]  ;;  %v14076_v31 = vld [vmem:[#allocation46_spill] sm:$0xff] }
 0x16d   : > { %1294 = vperm.xlu1 %8034, %v1089_v37   ;;  %1297 = vperm.xlu0 %8033, %v1090_v36  }
 0x16f   : > { %v9592_v32 = vpop.permute.xlu1 %727  ;;  %v9594_v33 = vpop.permute.xlu0 %724 }
 0x170   : > { %14026 = vst [vmem:[#allocation173_spill] sm:$0xff] %v9592_v32  ;;  %14027 = vst [vmem:[#allocation174_spill] sm:$0xff] %v9594_v33  ;;  %v14073_v32 = vld [vmem:[#allocation39_spill] sm:$0xff]  ;;  %v14074_v33 = vld [vmem:[#allocation42_spill] sm:$0xff] }
 0x171   : > { %1300 = vperm.xlu1 %8034, %v1091_v39   ;;  %1303 = vperm.xlu0 %8033, %v1092_v38  }
 0x173   : > { %v9598_v34 = vpop.permute.xlu1 %733  ;;  %v9600_v35 = vpop.permute.xlu0 %730 }
 0x174   : > { %14028 = vst [vmem:[#allocation175_spill] sm:$0xff] %v9598_v34  ;;  %14029 = vst [vmem:[#allocation176_spill] sm:$0xff] %v9600_v35  ;;  %v14071_v34 = vld [vmem:[#allocation35_spill] sm:$0xff]  ;;  %v14072_v35 = vld [vmem:[#allocation38_spill] sm:$0xff] }
 0x175   : > { %1306 = vperm.xlu1 %8034, %v1093_v41   ;;  %1309 = vperm.xlu0 %8033, %v1094_v40  }
 0x177   : > { %v9604_v36 = vpop.permute.xlu1 %739  ;;  %v9606_v37 = vpop.permute.xlu0 %736 }
 0x178   : > { %14030 = vst [vmem:[#allocation177_spill] sm:$0xff] %v9604_v36  ;;  %14031 = vst [vmem:[#allocation178_spill] sm:$0xff] %v9606_v37  ;;  %v14069_v36 = vld [vmem:[#allocation31_spill] sm:$0xff]  ;;  %v14070_v37 = vld [vmem:[#allocation34_spill] sm:$0xff] }
 0x179   : > { %1312 = vperm.xlu1 %8034, %v1095_v43   ;;  %1315 = vperm.xlu0 %8033, %v1096_v42  }
 0x17b   : > { %v9610_v38 = vpop.permute.xlu1 %745  ;;  %v9612_v39 = vpop.permute.xlu0 %742 }
 0x17c   : > { %14032 = vst [vmem:[#allocation179_spill] sm:$0xff] %v9610_v38  ;;  %14033 = vst [vmem:[#allocation180_spill] sm:$0xff] %v9612_v39  ;;  %v14039_v38 = vld [vmem:[#allocation7_spill] sm:$0xff]  ;;  %v14068_v39 = vld [vmem:[#allocation30_spill] sm:$0xff] }
 0x17d   : > { %1318 = vperm.xlu1 %8034, %v1097_v45   ;;  %1321 = vperm.xlu0 %8033, %v1098_v44   ;;  %v1103_v51 = vadd.s32 10, %v14039_v38 }
 0x17f   : > { %v9616_v40 = vpop.permute.xlu1 %751  ;;  %v9618_v41 = vpop.permute.xlu0 %748 }
 0x180   : > { %14034 = vst [vmem:[#allocation181_spill] sm:$0xff] %v9616_v40  ;;  %14035 = vst [vmem:[#allocation182_spill] sm:$0xff] %v9618_v41  ;;  %v14042_v40 = vld [vmem:[#allocation8_spill] sm:$0xff]  ;;  %v14043_v41 = vld [vmem:[#allocation9_spill] sm:$0xff] }
 0x181   : > { %1324 = vperm.xlu1 %8034, %v1099_v47   ;;  %1327 = vperm.xlu0 %8033, %v1100_v46   ;;  %v1106_v52 = vadd.s32 10, %v14042_v40  ;;  %v1105_v53 = vadd.s32 10, %v14043_v41 }
 0x183   : > { %v9622_v42 = vpop.permute.xlu1 %757  ;;  %v9624_v43 = vpop.permute.xlu0 %754 }
 0x184   : > { %14036 = vst [vmem:[#allocation183_spill] sm:$0xff] %v9622_v42  ;;  %14037 = vst [vmem:[#allocation184_spill] sm:$0xff] %v9624_v43  ;;  %v14046_v43 = vld [vmem:[#allocation10_spill] sm:$0xff]  ;;  %v14047_v42 = vld [vmem:[#allocation11_spill] sm:$0xff] }
 0x185   : > { %1330 = vperm.xlu1 %8034, %v1101_v49   ;;  %1333 = vperm.xlu0 %8033, %v1102_v48   ;;  %v1108_v60 = vadd.s32 10, %v14046_v43  ;;  %v1107_v38 = vadd.s32 10, %v14047_v42 }
 0x187   : > { %v9628_v44 = vpop.permute.xlu1 %763  ;;  %v9630_v45 = vpop.permute.xlu0 %760 }
 0x188   : > { %14040 = vst [vmem:[#allocation6_spill] sm:$0xff] %v9628_v44  ;;  %14041 = vst [vmem:[#allocation7_spill] sm:$0xff] %v9630_v45  ;;  %v14050_v44 = vld [vmem:[#allocation12_spill] sm:$0xff]  ;;  %v14051_v45 = vld [vmem:[#allocation13_spill] sm:$0xff] }
 0x189   : > { %1336 = vperm.xlu1 %8034, %v1103_v51   ;;  %1339 = vperm.xlu0 %8033, %v1104_v50   ;;  %v1110_v40 = vadd.s32 10, %v14050_v44  ;;  %v1109_v41 = vadd.s32 10, %v14051_v45 }
 0x18b   : > { %v9634_v46 = vpop.permute.xlu1 %769  ;;  %v9636_v47 = vpop.permute.xlu0 %766 }
 0x18c   : > { %14044 = vst [vmem:[#allocation8_spill] sm:$0xff] %v9634_v46  ;;  %14045 = vst [vmem:[#allocation9_spill] sm:$0xff] %v9636_v47  ;;  %v14054_v47 = vld [vmem:[#allocation14_spill] sm:$0xff]  ;;  %v14055_v46 = vld [vmem:[#allocation15_spill] sm:$0xff] }
 0x18d   : > { %1342 = vperm.xlu1 %8034, %v1105_v53   ;;  %1345 = vperm.xlu0 %8033, %v1106_v52   ;;  %v1112_v43 = vadd.s32 10, %v14054_v47  ;;  %v1111_v42 = vadd.s32 10, %v14055_v46 }
 0x18f   : > { %v9640_v48 = vpop.permute.xlu1 %775  ;;  %v9642_v49 = vpop.permute.xlu0 %772 }
 0x190   : > { %14048 = vst [vmem:[#allocation10_spill] sm:$0xff] %v9640_v48  ;;  %14049 = vst [vmem:[#allocation11_spill] sm:$0xff] %v9642_v49  ;;  %v14058_v48 = vld [vmem:[#allocation16_spill] sm:$0xff]  ;;  %v14059_v49 = vld [vmem:[#allocation17_spill] sm:$0xff] }
 0x191   : > { %1348 = vperm.xlu1 %8034, %v1107_v38   ;;  %1351 = vperm.xlu0 %8033, %v1108_v60   ;;  %v1114_v44 = vadd.s32 10, %v14058_v48  ;;  %v1113_v45 = vadd.s32 10, %v14059_v49 }
 0x193   : > { %v9646_v50 = vpop.permute.xlu1 %781  ;;  %v9648_v51 = vpop.permute.xlu0 %778 }
 0x194   : > { %14052 = vst [vmem:[#allocation12_spill] sm:$0xff] %v9646_v50  ;;  %14053 = vst [vmem:[#allocation13_spill] sm:$0xff] %v9648_v51  ;;  %v14062_v51 = vld [vmem:[#allocation18_spill] sm:$0xff]  ;;  %v14063_v50 = vld [vmem:[#allocation19_spill] sm:$0xff] }
 0x195   : > { %1354 = vperm.xlu1 %8034, %v1109_v41   ;;  %1357 = vperm.xlu0 %8033, %v1110_v40   ;;  %v1116_v47 = vadd.s32 10, %v14062_v51  ;;  %v1115_v46 = vadd.s32 10, %v14063_v50 }
 0x197   : > { %v9652_v52 = vpop.permute.xlu1 %787  ;;  %v9654_v53 = vpop.permute.xlu0 %784 }
 0x198   : > { %14056 = vst [vmem:[#allocation14_spill] sm:$0xff] %v9652_v52  ;;  %14057 = vst [vmem:[#allocation15_spill] sm:$0xff] %v9654_v53  ;;  %v14064_v52 = vld [vmem:[#allocation22_spill] sm:$0xff]  ;;  %v14065_v53 = vld [vmem:[#allocation23_spill] sm:$0xff] }
 0x199   : > { %1360 = vperm.xlu1 %8034, %v1111_v42   ;;  %1363 = vperm.xlu0 %8033, %v1112_v43   ;;  %v1118_v48 = vadd.s32 10, %v14064_v52  ;;  %v1117_v49 = vadd.s32 10, %v14065_v53  ;;  %v1122_v52 = vadd.s32 10, %v14068_v39  ;;  %v1121_v53 = vadd.s32 10, %v14069_v36 }
 0x19a   : > { %v1126_v39 = vadd.s32 10, %v14072_v35  ;;  %v1125_v36 = vadd.s32 10, %v14073_v32  ;;  %v1130_v35 = vadd.s32 10, %v14076_v31  ;;  %v1129_v32 = vadd.s32 10, %v14077_v28 }
 0x19b   : > { %v9658_v60 = vpop.permute.xlu1 %793  ;;  %v9660_v38 = vpop.permute.xlu0 %790  ;;  %v1134_v31 = vadd.s32 10, %v14080_v27  ;;  %v1133_v28 = vadd.s32 10, %v14081_v24  ;;  %v1138_v27 = vadd.s32 10, %v14084_v23  ;;  %v1137_v24 = vadd.s32 10, %v14085_v20 }
 0x19c   : > { %14060 = vst [vmem:[#allocation16_spill] sm:$0xff] %v9658_v60  ;;  %14061 = vst [vmem:[#allocation17_spill] sm:$0xff] %v9660_v38  ;;  %v14066_v38 = vld [vmem:[#allocation26_spill] sm:$0xff]  ;;  %v14067_v60 = vld [vmem:[#allocation27_spill] sm:$0xff]  ;;  %v1142_v23 = vadd.s32 10, %v14088_v19  ;;  %v1141_v20 = vadd.s32 10, %v14089_v16 }
 0x19d   : > { %1366 = vperm.xlu1 %8034, %v1113_v45   ;;  %1369 = vperm.xlu0 %8033, %v1114_v44   ;;  %v1120_v51 = vadd.s32 10, %v14066_v38  ;;  %v1119_v50 = vadd.s32 10, %v14067_v60  ;;  %v1124_v38 = vadd.s32 10, %v14070_v37  ;;  %v1123_v60 = vadd.s32 10, %v14071_v34 }
 0x19e   : > { %v1128_v37 = vadd.s32 10, %v14074_v33  ;;  %v1127_v34 = vadd.s32 10, %v14075_v30  ;;  %v1132_v33 = vadd.s32 10, %v14078_v29  ;;  %v1131_v30 = vadd.s32 10, %v14079_v26 }
 0x19f   : > { %v1136_v29 = vadd.s32 10, %v14082_v25  ;;  %v1135_v26 = vadd.s32 10, %v14083_v22  ;;  %v1140_v25 = vadd.s32 10, %v14086_v21  ;;  %v1139_v22 = vadd.s32 10, %v14087_v18 }
 0x1a0   : > { %v9664_v40 = vpop.permute.xlu1 %1183  ;;  %v9666_v41 = vpop.permute.xlu0 %1180  ;;  %v1144_v21 = vadd.s32 10, %v14090_v17  ;;  %v1143_v18 = vadd.s32 10, %v14091_v14  ;;  %v1146_v19 = vadd.s32 10, %v14092_v15  ;;  %v1145_v16 = vadd.s32 10, %v14093_v12 }
 0x1a1   : > { %1372 = vperm.xlu1 %8034, %v1115_v46   ;;  %1375 = vperm.xlu0 %8033, %v1116_v47   ;;  %v1148_v17 = vadd.s32 10, %v14094_v13  ;;  %v1147_v14 = vadd.s32 10, %v14095_v10  ;;  %v1150_v15 = vadd.s32 10, %v14096_v11  ;;  %v1149_v12 = vadd.s32 10, %v14097_v8 }
 0x1a2   : > { %v1152_v13 = vadd.s32 10, %v14098_v9  ;;  %v1151_v10 = vadd.s32 10, %v14099_v6  ;;  %v1154_v11 = vadd.s32 10, %v14100_v7  ;;  %v1153_v8 = vadd.s32 10, %v14101_v2  ;;  %v2588_v6 = vld [vmem:[%s13635_s1 + $0x8] sm:$0xff]  ;;  %v14103_v7 = vld [vmem:[#allocation99_spill] sm:$0xff] }
 0x1a3   : > { %v1155_v5 = vadd.s32 10, %v14103_v7  ;;  %v2589_v2 = vld [vmem:[%s13635_s1 + $0x10] sm:$0xff]  ;;  %v14105_v7 = vld [vmem:[#allocation103_spill] sm:$0xff] }
 0x1a4   : > { %v9670_v43 = vpop.permute.xlu1 %1186  ;;  %v9672_v42 = vpop.permute.xlu0 %1189 }
 0x1a5   : > { %1378 = vperm.xlu1 %8034, %v1117_v49   ;;  %1381 = vperm.xlu0 %8033, %v1118_v48  }
 0x1a8   : > { %v9676_v44 = vpop.permute.xlu1 %1192  ;;  %v9678_v45 = vpop.permute.xlu0 %1195 }
 0x1a9   : > { %1384 = vperm.xlu1 %8034, %v1119_v50   ;;  %1387 = vperm.xlu0 %8033, %v1120_v51  }
 0x1ac   : > { %v9682_v47 = vpop.permute.xlu1 %1198  ;;  %v9684_v46 = vpop.permute.xlu0 %1201 }
 0x1ad   : > { %1390 = vperm.xlu1 %8034, %v1121_v53   ;;  %1393 = vperm.xlu0 %8033, %v1122_v52  }
 0x1b0   : > { %v9688_v48 = vpop.permute.xlu1 %1204  ;;  %v9690_v49 = vpop.permute.xlu0 %1207 }
 0x1b1   : > { %1396 = vperm.xlu1 %8034, %v1123_v60   ;;  %1399 = vperm.xlu0 %8033, %v1124_v38  }
 0x1b4   : > { %v9694_v51 = vpop.permute.xlu1 %1210  ;;  %v9696_v50 = vpop.permute.xlu0 %1213 }
 0x1b5   : > { %1402 = vperm.xlu1 %8034, %v1125_v36   ;;  %1405 = vperm.xlu0 %8033, %v1126_v39  }
 0x1b8   : > { %v9700_v52 = vpop.permute.xlu1 %1216  ;;  %v9702_v53 = vpop.permute.xlu0 %1219 }
 0x1b9   : > { %1408 = vperm.xlu1 %8034, %v1127_v34   ;;  %1411 = vperm.xlu0 %8033, %v1128_v37  }
 0x1bc   : > { %v9706_v38 = vpop.permute.xlu1 %1222  ;;  %v9708_v60 = vpop.permute.xlu0 %1225 }
 0x1bd   : > { %1414 = vperm.xlu1 %8034, %v1129_v32   ;;  %1417 = vperm.xlu0 %8033, %v1130_v35  }
 0x1c0   : > { %v9712_v39 = vpop.permute.xlu1 %1228  ;;  %v9714_v36 = vpop.permute.xlu0 %1231 }
 0x1c1   : > { %1420 = vperm.xlu1 %8034, %v1131_v30   ;;  %1423 = vperm.xlu0 %8033, %v1132_v33  }
 0x1c4   : > { %v9718_v37 = vpop.permute.xlu1 %1234  ;;  %v9720_v34 = vpop.permute.xlu0 %1237 }
 0x1c5   : > { %1426 = vperm.xlu1 %8034, %v1133_v28   ;;  %1429 = vperm.xlu0 %8033, %v1134_v31  }
 0x1c8   : > { %v9724_v35 = vpop.permute.xlu1 %1240  ;;  %v9726_v32 = vpop.permute.xlu0 %1243 }
 0x1c9   : > { %1432 = vperm.xlu1 %8034, %v1135_v26   ;;  %1435 = vperm.xlu0 %8033, %v1136_v29  }
 0x1cc   : > { %v9730_v33 = vpop.permute.xlu1 %1246  ;;  %v9732_v30 = vpop.permute.xlu0 %1249 }
 0x1cd   : > { %1438 = vperm.xlu1 %8034, %v1137_v24   ;;  %1441 = vperm.xlu0 %8033, %v1138_v27  }
 0x1d0   : > { %v9736_v31 = vpop.permute.xlu1 %1252  ;;  %v9738_v28 = vpop.permute.xlu0 %1255 }
 0x1d1   : > { %1444 = vperm.xlu1 %8034, %v1139_v22   ;;  %1447 = vperm.xlu0 %8033, %v1140_v25  }
 0x1d4   : > { %v9742_v29 = vpop.permute.xlu1 %1258  ;;  %v9744_v26 = vpop.permute.xlu0 %1261 }
 0x1d5   : > { %1450 = vperm.xlu1 %8034, %v1141_v20   ;;  %1453 = vperm.xlu0 %8033, %v1142_v23  }
 0x1d8   : > { %v9748_v27 = vpop.permute.xlu1 %1264  ;;  %v9750_v24 = vpop.permute.xlu0 %1267 }
 0x1d9   : > { %1456 = vperm.xlu1 %8034, %v1143_v18   ;;  %1459 = vperm.xlu0 %8033, %v1144_v21  }
 0x1dc   : > { %v9754_v25 = vpop.permute.xlu1 %1270  ;;  %v9756_v22 = vpop.permute.xlu0 %1273 }
 0x1dd   : > { %1462 = vperm.xlu1 %8034, %v1145_v16   ;;  %1465 = vperm.xlu0 %8033, %v1146_v19  }
 0x1e0   : > { %v9760_v23 = vpop.permute.xlu1 %1276  ;;  %v9762_v20 = vpop.permute.xlu0 %1279 }
 0x1e1   : > { %1468 = vperm.xlu1 %8034, %v1147_v14   ;;  %1471 = vperm.xlu0 %8033, %v1148_v17   ;;  %v2587_v17 = vld [vmem:[%s13635_s1] sm:$0xff] }
 0x1e2   : > { %v7948_v9 = vpack.c.bf16 %v2588_v6, %v2587_v17 }
 0x1e4   : > { %v9766_v21 = vpop.permute.xlu1 %1282  ;;  %v9768_v18 = vpop.permute.xlu0 %1285  ;;  %7949 = vmatprep.subr.bf16.mxu0 %v7948_v9 }
 0x1e5   : > { %1474 = vperm.xlu1 %8034, %v1149_v12   ;;  %1477 = vperm.xlu0 %8033, %v1150_v15   ;;  %v14102_v12 = vld [vmem:[#allocation98_spill] sm:$0xff] }
 0x1e6   : > { %v1156_v4 = vadd.s32 10, %v14102_v12  ;;  %7951 = vmatpush3.bf16.msra.mxu0 %v7948_v9  ;;  %v14104_v12 = vld [vmem:[#allocation102_spill] sm:$0xff]  ;;  %v2592_v9 = vld [vmem:[%s13635_s1 + $0x28] sm:$0xff] }
 0x1e7   : > { %v1158_v61 = vadd.s32 10, %v14104_v12  ;;  %v14106_v12 = vld [vmem:[#allocation106_spill] sm:$0xff] }
 0x1e8   : > { %v9772_v19 = vpop.permute.xlu1 %1288  ;;  %v9774_v16 = vpop.permute.xlu0 %1291  ;;  %v1160_v59 = vadd.s32 10, %v14106_v12  ;;  %v14108_v12 = vld [vmem:[#allocation110_spill] sm:$0xff] }
 0x1e9   : > { %1480 = vperm.xlu1 %8034, %v1151_v10   ;;  %1483 = vperm.xlu0 %8033, %v1152_v13   ;;  %v2590_v13 = vld [vmem:[%s13635_s1 + $0x18] sm:$0xff]  ;;  %v1162_v62 = vadd.s32 10, %v14108_v12 }
 0x1ea   : > { %v7952_v10 = vpack.c.bf16 %v2590_v13, %v2589_v2  ;;  %v14112_v12 = vld [vmem:[#allocation114_spill] sm:$0xff] }
 0x1ec   : > { %v9784_v14 = vpop.permute.xlu1 %1294  ;;  %v9786_v15 = vpop.permute.xlu0 %1297  ;;  %7953 = vmatprep.subr.bf16.mxu0 %v7952_v10 }
 0x1ed   : > { %1486 = vperm.xlu1 %8034, %v1153_v8   ;;  %1489 = vperm.xlu0 %8033, %v1154_v11   ;;  %v1157_v8 = vadd.s32 10, %v14105_v7  ;;  %v2591_v11 = vld [vmem:[%s13635_s1 + $0x20] sm:$0xff] }
 0x1ee   : > { %7955 = vmatpush3.bf16.msra.mxu0 %v7952_v10  ;;  %v7956_v2 = vpack.c.bf16 %v2592_v9, %v2591_v11  ;;  %v14107_v7 = vld [vmem:[#allocation107_spill] sm:$0xff] }
 0x1ef   : > { %v2594_v10 = vld [vmem:[%s13635_s1 + $0x38] sm:$0xff] }
 0x1f0   : > { %v9796_v17 = vpop.permute.xlu1 %1300  ;;  %v9798_v6 = vpop.permute.xlu0 %1303  ;;  %7957 = vmatprep.subr.bf16.mxu0 %v7956_v2 }
 0x1f1   : > { %1492 = vperm.xlu1 %8034, %v1155_v5   ;;  %1495 = vperm.xlu0 %8033, %v1156_v4   ;;  %v1159_v5 = vadd.s32 10, %v14107_v7  ;;  %v2593_v4 = vld [vmem:[%s13635_s1 + $0x30] sm:$0xff]  ;;  %v14109_v7 = vld [vmem:[#allocation111_spill] sm:$0xff] }
 0x1f2   : > { %7959 = vmatpush3.bf16.msra.mxu0 %v7956_v2  ;;  %v7960_v11 = vpack.c.bf16 %v2594_v10, %v2593_v4  ;;  %v2596_v2 = vld [vmem:[%s13635_s1 + $0x48] sm:$0xff] }
 0x1f4   : > { %v9808_v13 = vpop.permute.xlu1 %1306  ;;  %v9810_v1 = vpop.permute.xlu0 %1309  ;;  %7961 = vmatprep.subr.bf16.mxu0 %v7960_v11 }
 0x1f5   : > { %1498 = vperm.xlu1 %8034, %v1157_v8   ;;  %1501 = vperm.xlu0 %8033, %v1158_v61   ;;  %v1161_v8 = vadd.s32 10, %v14109_v7  ;;  %v2595_v61 = vld [vmem:[%s13635_s1 + $0x40] sm:$0xff]  ;;  %v1163_v7 = vadd.s32 10, %v14112_v12  ;;  %v14116_v12 = vld [vmem:[#allocation122_spill] sm:$0xff] }
 0x1f6   : > { %7963 = vmatpush3.bf16.msra.mxu0 %v7960_v11  ;;  %v7964_v4 = vpack.c.bf16 %v2596_v2, %v2595_v61  ;;  %v2598_v11 = vld [vmem:[%s13635_s1 + $0x58] sm:$0xff] }
 0x1f7   : > { %v7968_v61 = vpack.c.bf16 %v2598_v11, %v2597_v55  ;;  %v2600_v55 = vld [vmem:[%s13635_s1 + $0x68] sm:$0xff] }
 0x1f8   : > { %v9820_v9 = vpop.permute.xlu1 %1312  ;;  %v9822_v63 = vpop.permute.xlu0 %1315  ;;  %7965 = vmatprep.subr.bf16.mxu0 %v7964_v4 }
 0x1f9   : > { %1504 = vperm.xlu1 %8034, %v1159_v5   ;;  %1507 = vperm.xlu0 %8033, %v1160_v59   ;;  %v14113_v5 = vld [vmem:[#allocation117_spill] sm:$0xff] }
 0x1fa   : > { %v1165_v59 = vadd.s32 10, %v14113_v5  ;;  %7967 = vmatpush3.bf16.msra.mxu0 %v7964_v4  ;;  %v1169_v5 = vadd.s32 10, %v14116_v12  ;;  %v7972_v4 = vpack.c.bf16 %v2600_v55, %v2599_v3  ;;  %v2601_v3 = vld [vmem:[%s13635_s1 + $0x70] sm:$0xff] }
 0x1fb   : > { %7969 = vmatprep.subr.bf16.mxu0 %v7968_v61 }
 0x1fc   : > { %v9832_v10 = vpop.permute.xlu1 %1318  ;;  %v9834_v0 = vpop.permute.xlu0 %1321 }
 0x1fd   : > { %14110 = vst [vmem:[#allocation18_spill] sm:$0xff] %v9832_v10  ;;  %14111 = vst [vmem:[#allocation19_spill] sm:$0xff] %v9834_v0  ;;  %1510 = vperm.xlu1 %8034, %v1161_v8   ;;  %1513 = vperm.xlu0 %8033, %v1162_v62   ;;  %v8568_v62 = vld [vmem:[%s8865_s19 + $0x8] sm:$0xff]  ;;  %v14187_v10 = vmov 0.0  }
 0x1fe   : > { %v1820_v8 = vadd.s32 22, %v8568_v62  ;;  %7971 = vmatpush3.bf16.msra.mxu0 %v7968_v61  ;;  %v8570_v62 = vld [vmem:[%s8865_s19] sm:$0xff]  ;;  %v2602_v61 = vld [vmem:[%s13635_s1 + $0x78] sm:$0xff] }
 0x1ff   : > { %v1819_v56 = vadd.s32 22, %v8570_v62  ;;  %7973 = vmatprep.subr.bf16.mxu0 %v7972_v4  ;;  %v7976_v55 = vpack.c.bf16 %v2602_v61, %v2601_v3  ;;  %v8573_v3 = vld [vmem:[%s8865_s19 + $0x28] sm:$0xff] }
 0x200   : > { %v9844_v2 = vpop.permute.xlu1 %1324  ;;  %v9846_v57 = vpop.permute.xlu0 %1327  ;;  %v1824_v61 = vadd.s32 22, %v8573_v3 }
 0x201   : > { %14114 = vst [vmem:[#allocation22_spill] sm:$0xff] %v9844_v2  ;;  %14115 = vst [vmem:[#allocation23_spill] sm:$0xff] %v9846_v57  ;;  %1516 = vperm.xlu1 %8034, %v1163_v7   ;;  %1522 = vperm.xlu0 %8033, %v1165_v59   ;;  %v13777_v7 = vmov 3   ;;  %v8569_v59 = vld [vmem:[%s8865_s19 + $0x10] sm:$0xff]  ;;  %v8637_v2 = vld [vmem:[%s8865_s19 + $0x228] sm:$0xff] }
 0x202   : > { %v1821_v12 = vadd.s32 22, %v8569_v59  ;;  %7975 = vmatpush3.bf16.msra.mxu0 %v7972_v4  ;;  %v14121_v59 = vmov 3   ;;  %v1888_v0 = vadd.s32 22, %v8637_v2 }
 0x203   : > { %7977 = vmatprep.subr.bf16.mxu0 %v7976_v55 }
 0x204   : > { %v9856_v11 = vpop.permute.xlu1 %1330  ;;  %v9858_v58 = vpop.permute.xlu0 %1333 }
 0x205   : > { %14117 = vst [vmem:[#allocation26_spill] sm:$0xff] %v9856_v11  ;;  %14118 = vst [vmem:[#allocation27_spill] sm:$0xff] %v9858_v58  ;;  %8035 = vset.pattern.permute.xlu1 %v13777_v7  ;;  %1534 = vperm.xlu0 %8033, %v1169_v5   ;;  %v1823_v58 = vadd.s32 22, %v8572_v54  ;;  %v8575_v54 = vld [vmem:[%s8865_s19 + $0x38] sm:$0xff] }
 0x206   : > { %1951 = vperm.xlu1 %8035, %v1820_v8   ;;  %v8571_v8 = vld [vmem:[%s8865_s19 + $0x18] sm:$0xff]  ;;  %7979 = vmatpush3.bf16.msra.mxu0 %v7976_v55 }
 0x207   : > { %v1822_v62 = vadd.s32 22, %v8571_v8 }
 0x208   : > { %v9869_v5 = vpop.permute.xlu1 %1336  ;;  %v9871_v7 = vpop.permute.xlu0 %1339 }
 0x209   : > { %14119 = vst [vmem:[#allocation30_spill] sm:$0xff] %v9869_v5  ;;  %14120 = vst [vmem:[#allocation31_spill] sm:$0xff] %v9871_v7  ;;  %8042 = vset.pattern.permute.xlu0 %v14121_v59  ;;  %v8574_v7 = vld [vmem:[%s8865_s19 + $0x30] sm:$0xff] }
 0x20a   : > { %1954 = vperm.xlu1 %8035, %v1821_v12   ;;  %1948 = vperm.xlu0 %8042, %v1819_v56   ;;  %v1825_v5 = vadd.s32 22, %v8574_v7  ;;  %v1826_v56 = vadd.s32 22, %v8575_v54  ;;  %v8576_v12 = vld [vmem:[%s8865_s19 + $0x40] sm:$0xff]  ;;  %v8578_v7 = vld [vmem:[%s8865_s19 + $0x50] sm:$0xff] }
 0x20b   : > { %v1827_v55 = vadd.s32 22, %v8576_v12 }
 0x20c   : > { %v9876_v11 = vpop.permute.xlu1 %1342  ;;  %v9878_v4 = vpop.permute.xlu0 %1345 }
 0x20d   : > { %14122 = vst [vmem:[#allocation34_spill] sm:$0xff] %v9876_v11  ;;  %14123 = vst [vmem:[#allocation35_spill] sm:$0xff] %v9878_v4  ;;  %v8577_v11 = vld [vmem:[%s8865_s19 + $0x48] sm:$0xff] }
 0x20e   : > { %1960 = vperm.xlu1 %8035, %v1823_v58   ;;  %1957 = vperm.xlu0 %8042, %v1822_v62   ;;  %v1828_v58 = vadd.s32 22, %v8577_v11  ;;  %v1829_v62 = vadd.s32 22, %v8578_v7 }
 0x210   : > { %v9882_v8 = vpop.permute.xlu1 %1348  ;;  %v9884_v59 = vpop.permute.xlu0 %1351 }
 0x211   : > { %14124 = vst [vmem:[#allocation38_spill] sm:$0xff] %v9882_v8  ;;  %14125 = vst [vmem:[#allocation39_spill] sm:$0xff] %v9884_v59  ;;  %v8579_v8 = vld [vmem:[%s8865_s19 + $0x58] sm:$0xff] }
 0x212   : > { %1966 = vperm.xlu1 %8035, %v1825_v5   ;;  %1963 = vperm.xlu0 %8042, %v1824_v61   ;;  %v1830_v5 = vadd.s32 22, %v8579_v8  ;;  %v8580_v61 = vld [vmem:[%s8865_s19 + $0x60] sm:$0xff] }
 0x213   : > { %v1831_v12 = vadd.s32 22, %v8580_v61 }
 0x214   : > { %v9888_v4 = vpop.permute.xlu1 %1354  ;;  %v9890_v3 = vpop.permute.xlu0 %1357 }
 0x215   : > { %14126 = vst [vmem:[#allocation42_spill] sm:$0xff] %v9888_v4  ;;  %14127 = vst [vmem:[#allocation43_spill] sm:$0xff] %v9890_v3  ;;  %v8581_v4 = vld [vmem:[%s8865_s19 + $0x68] sm:$0xff] }
 0x216   : > { %1972 = vperm.xlu1 %8035, %v1827_v55   ;;  %1969 = vperm.xlu0 %8042, %v1826_v56   ;;  %v1832_v55 = vadd.s32 22, %v8581_v4  ;;  %v8582_v56 = vld [vmem:[%s8865_s19 + $0x70] sm:$0xff] }
 0x217   : > { %v1833_v7 = vadd.s32 22, %v8582_v56 }
 0x218   : > { %v9894_v59 = vpop.permute.xlu1 %1360  ;;  %v9896_v54 = vpop.permute.xlu0 %1363 }
 0x219   : > { %14128 = vst [vmem:[#allocation46_spill] sm:$0xff] %v9894_v59  ;;  %14129 = vst [vmem:[#allocation47_spill] sm:$0xff] %v9896_v54  ;;  %v8583_v59 = vld [vmem:[%s8865_s19 + $0x78] sm:$0xff] }
 0x21a   : > { %1978 = vperm.xlu1 %8035, %v1829_v62   ;;  %1975 = vperm.xlu0 %8042, %v1828_v58   ;;  %v1834_v62 = vadd.s32 22, %v8583_v59  ;;  %v8584_v58 = vld [vmem:[%s8865_s19 + $0x80] sm:$0xff] }
 0x21b   : > { %v1835_v61 = vadd.s32 22, %v8584_v58 }
 0x21c   : > { %v9900_v3 = vpop.permute.xlu1 %1366  ;;  %v9902_v11 = vpop.permute.xlu0 %1369 }
 0x21d   : > { %14130 = vst [vmem:[#allocation50_spill] sm:$0xff] %v9900_v3  ;;  %14131 = vst [vmem:[#allocation51_spill] sm:$0xff] %v9902_v11  ;;  %v8585_v3 = vld [vmem:[%s8865_s19 + $0x88] sm:$0xff] }
 0x21e   : > { %1984 = vperm.xlu1 %8035, %v1831_v12   ;;  %1981 = vperm.xlu0 %8042, %v1830_v5   ;;  %v1836_v12 = vadd.s32 22, %v8585_v3  ;;  %v8586_v5 = vld [vmem:[%s8865_s19 + $0x90] sm:$0xff] }
 0x21f   : > { %v1837_v56 = vadd.s32 22, %v8586_v5 }
 0x220   : > { %v9906_v54 = vpop.permute.xlu1 %1372  ;;  %v9908_v8 = vpop.permute.xlu0 %1375 }
 0x221   : > { %14132 = vst [vmem:[#allocation54_spill] sm:$0xff] %v9906_v54  ;;  %14133 = vst [vmem:[#allocation55_spill] sm:$0xff] %v9908_v8  ;;  %v8587_v54 = vld [vmem:[%s8865_s19 + $0x98] sm:$0xff] }
 0x222   : > { %1990 = vperm.xlu1 %8035, %v1833_v7   ;;  %1987 = vperm.xlu0 %8042, %v1832_v55   ;;  %v1838_v7 = vadd.s32 22, %v8587_v54  ;;  %v8588_v55 = vld [vmem:[%s8865_s19 + $0xa0] sm:$0xff] }
 0x223   : > { %v1839_v58 = vadd.s32 22, %v8588_v55 }
 0x224   : > { %v9912_v11 = vpop.permute.xlu1 %1378  ;;  %v9914_v4 = vpop.permute.xlu0 %1381 }
 0x225   : > { %14134 = vst [vmem:[#allocation58_spill] sm:$0xff] %v9912_v11  ;;  %14135 = vst [vmem:[#allocation59_spill] sm:$0xff] %v9914_v4  ;;  %v8589_v11 = vld [vmem:[%s8865_s19 + $0xa8] sm:$0xff] }
 0x226   : > { %1996 = vperm.xlu1 %8035, %v1835_v61   ;;  %1993 = vperm.xlu0 %8042, %v1834_v62   ;;  %v1840_v61 = vadd.s32 22, %v8589_v11  ;;  %v8590_v62 = vld [vmem:[%s8865_s19 + $0xb0] sm:$0xff] }
 0x227   : > { %v1841_v5 = vadd.s32 22, %v8590_v62 }
 0x228   : > { %v9918_v8 = vpop.permute.xlu1 %1384  ;;  %v9920_v59 = vpop.permute.xlu0 %1387 }
 0x229   : > { %14136 = vst [vmem:[#allocation62_spill] sm:$0xff] %v9918_v8  ;;  %14137 = vst [vmem:[#allocation63_spill] sm:$0xff] %v9920_v59  ;;  %v8591_v8 = vld [vmem:[%s8865_s19 + $0xb8] sm:$0xff] }
 0x22a   : > { %2002 = vperm.xlu1 %8035, %v1837_v56   ;;  %1999 = vperm.xlu0 %8042, %v1836_v12   ;;  %v1842_v56 = vadd.s32 22, %v8591_v8  ;;  %v8592_v12 = vld [vmem:[%s8865_s19 + $0xc0] sm:$0xff] }
 0x22b   : > { %v1843_v55 = vadd.s32 22, %v8592_v12 }
 0x22c   : > { %v9924_v4 = vpop.permute.xlu1 %1390  ;;  %v9926_v3 = vpop.permute.xlu0 %1393 }
 0x22d   : > { %14138 = vst [vmem:[#allocation66_spill] sm:$0xff] %v9924_v4  ;;  %14139 = vst [vmem:[#allocation67_spill] sm:$0xff] %v9926_v3  ;;  %v8593_v4 = vld [vmem:[%s8865_s19 + $0xc8] sm:$0xff] }
 0x22e   : > { %2008 = vperm.xlu1 %8035, %v1839_v58   ;;  %2005 = vperm.xlu0 %8042, %v1838_v7   ;;  %v1844_v58 = vadd.s32 22, %v8593_v4  ;;  %v8594_v7 = vld [vmem:[%s8865_s19 + $0xd0] sm:$0xff] }
 0x22f   : > { %v1845_v62 = vadd.s32 22, %v8594_v7 }
 0x230   : > { %v9930_v59 = vpop.permute.xlu1 %1396  ;;  %v9932_v54 = vpop.permute.xlu0 %1399 }
 0x231   : > { %14140 = vst [vmem:[#allocation70_spill] sm:$0xff] %v9930_v59  ;;  %14141 = vst [vmem:[#allocation71_spill] sm:$0xff] %v9932_v54  ;;  %v8595_v59 = vld [vmem:[%s8865_s19 + $0xd8] sm:$0xff] }
 0x232   : > { %2014 = vperm.xlu1 %8035, %v1841_v5   ;;  %2011 = vperm.xlu0 %8042, %v1840_v61   ;;  %v1846_v5 = vadd.s32 22, %v8595_v59  ;;  %v8596_v61 = vld [vmem:[%s8865_s19 + $0xe0] sm:$0xff] }
 0x233   : > { %v1847_v12 = vadd.s32 22, %v8596_v61 }
 0x234   : > { %v9936_v3 = vpop.permute.xlu1 %1402  ;;  %v9938_v11 = vpop.permute.xlu0 %1405 }
 0x235   : > { %14142 = vst [vmem:[#allocation74_spill] sm:$0xff] %v9936_v3  ;;  %14143 = vst [vmem:[#allocation75_spill] sm:$0xff] %v9938_v11  ;;  %v8597_v3 = vld [vmem:[%s8865_s19 + $0xe8] sm:$0xff] }
 0x236   : > { %2020 = vperm.xlu1 %8035, %v1843_v55   ;;  %2017 = vperm.xlu0 %8042, %v1842_v56   ;;  %v1848_v55 = vadd.s32 22, %v8597_v3  ;;  %v8598_v56 = vld [vmem:[%s8865_s19 + $0xf0] sm:$0xff] }
 0x237   : > { %v1849_v7 = vadd.s32 22, %v8598_v56 }
 0x238   : > { %v9942_v54 = vpop.permute.xlu1 %1408  ;;  %v9944_v8 = vpop.permute.xlu0 %1411 }
 0x239   : > { %14144 = vst [vmem:[#allocation78_spill] sm:$0xff] %v9942_v54  ;;  %14145 = vst [vmem:[#allocation79_spill] sm:$0xff] %v9944_v8  ;;  %v8599_v54 = vld [vmem:[%s8865_s19 + $0xf8] sm:$0xff] }
 0x23a   : > { %2026 = vperm.xlu1 %8035, %v1845_v62   ;;  %2023 = vperm.xlu0 %8042, %v1844_v58   ;;  %v1850_v62 = vadd.s32 22, %v8599_v54  ;;  %v8600_v58 = vld [vmem:[%s8865_s19 + $0x100] sm:$0xff] }
 0x23b   : > { %v1851_v61 = vadd.s32 22, %v8600_v58 }
 0x23c   : > { %v9948_v11 = vpop.permute.xlu1 %1414  ;;  %v9950_v4 = vpop.permute.xlu0 %1417 }
 0x23d   : > { %14146 = vst [vmem:[#allocation82_spill] sm:$0xff] %v9948_v11  ;;  %14147 = vst [vmem:[#allocation83_spill] sm:$0xff] %v9950_v4  ;;  %v8601_v11 = vld [vmem:[%s8865_s19 + $0x108] sm:$0xff] }
 0x23e   : > { %2032 = vperm.xlu1 %8035, %v1847_v12   ;;  %2029 = vperm.xlu0 %8042, %v1846_v5   ;;  %v1852_v12 = vadd.s32 22, %v8601_v11  ;;  %v8602_v5 = vld [vmem:[%s8865_s19 + $0x110] sm:$0xff] }
 0x23f   : > { %v1853_v56 = vadd.s32 22, %v8602_v5 }
 0x240   : > { %v9954_v8 = vpop.permute.xlu1 %1420  ;;  %v9956_v59 = vpop.permute.xlu0 %1423 }
 0x241   : > { %14148 = vst [vmem:[#allocation86_spill] sm:$0xff] %v9954_v8  ;;  %14149 = vst [vmem:[#allocation87_spill] sm:$0xff] %v9956_v59  ;;  %v8603_v8 = vld [vmem:[%s8865_s19 + $0x118] sm:$0xff] }
 0x242   : > { %2038 = vperm.xlu1 %8035, %v1849_v7   ;;  %2035 = vperm.xlu0 %8042, %v1848_v55   ;;  %v1854_v7 = vadd.s32 22, %v8603_v8  ;;  %v8604_v55 = vld [vmem:[%s8865_s19 + $0x120] sm:$0xff] }
 0x243   : > { %v1855_v58 = vadd.s32 22, %v8604_v55 }
 0x244   : > { %v9960_v4 = vpop.permute.xlu1 %1426  ;;  %v9962_v3 = vpop.permute.xlu0 %1429 }
 0x245   : > { %14150 = vst [vmem:[#allocation90_spill] sm:$0xff] %v9960_v4  ;;  %14151 = vst [vmem:[#allocation91_spill] sm:$0xff] %v9962_v3  ;;  %v8605_v4 = vld [vmem:[%s8865_s19 + $0x128] sm:$0xff] }
 0x246   : > { %2044 = vperm.xlu1 %8035, %v1851_v61   ;;  %2041 = vperm.xlu0 %8042, %v1850_v62   ;;  %v1856_v61 = vadd.s32 22, %v8605_v4  ;;  %v8606_v62 = vld [vmem:[%s8865_s19 + $0x130] sm:$0xff] }
 0x247   : > { %v1857_v5 = vadd.s32 22, %v8606_v62 }
 0x248   : > { %v9966_v59 = vpop.permute.xlu1 %1432  ;;  %v9968_v54 = vpop.permute.xlu0 %1435 }
 0x249   : > { %14152 = vst [vmem:[#allocation94_spill] sm:$0xff] %v9966_v59  ;;  %14153 = vst [vmem:[#allocation95_spill] sm:$0xff] %v9968_v54  ;;  %v8607_v59 = vld [vmem:[%s8865_s19 + $0x138] sm:$0xff] }
 0x24a   : > { %2050 = vperm.xlu1 %8035, %v1853_v56   ;;  %2047 = vperm.xlu0 %8042, %v1852_v12   ;;  %v1858_v56 = vadd.s32 22, %v8607_v59  ;;  %v8608_v12 = vld [vmem:[%s8865_s19 + $0x140] sm:$0xff] }
 0x24b   : > { %v1859_v55 = vadd.s32 22, %v8608_v12 }
 0x24c   : > { %v9972_v3 = vpop.permute.xlu1 %1438  ;;  %v9974_v11 = vpop.permute.xlu0 %1441 }
 0x24d   : > { %14154 = vst [vmem:[#allocation98_spill] sm:$0xff] %v9972_v3  ;;  %14155 = vst [vmem:[#allocation99_spill] sm:$0xff] %v9974_v11  ;;  %v8609_v3 = vld [vmem:[%s8865_s19 + $0x148] sm:$0xff] }
 0x24e   : > { %2056 = vperm.xlu1 %8035, %v1855_v58   ;;  %2053 = vperm.xlu0 %8042, %v1854_v7   ;;  %v1860_v58 = vadd.s32 22, %v8609_v3  ;;  %v8610_v7 = vld [vmem:[%s8865_s19 + $0x150] sm:$0xff] }
 0x24f   : > { %v1861_v62 = vadd.s32 22, %v8610_v7 }
 0x250   : > { %v9978_v54 = vpop.permute.xlu1 %1444  ;;  %v9980_v8 = vpop.permute.xlu0 %1447 }
 0x251   : > { %14156 = vst [vmem:[#allocation102_spill] sm:$0xff] %v9978_v54  ;;  %14157 = vst [vmem:[#allocation103_spill] sm:$0xff] %v9980_v8  ;;  %v8611_v54 = vld [vmem:[%s8865_s19 + $0x158] sm:$0xff] }
 0x252   : > { %2062 = vperm.xlu1 %8035, %v1857_v5   ;;  %2059 = vperm.xlu0 %8042, %v1856_v61   ;;  %v1862_v5 = vadd.s32 22, %v8611_v54  ;;  %v8612_v61 = vld [vmem:[%s8865_s19 + $0x160] sm:$0xff] }
 0x253   : > { %v1863_v12 = vadd.s32 22, %v8612_v61 }
 0x254   : > { %v9984_v11 = vpop.permute.xlu1 %1450  ;;  %v9986_v4 = vpop.permute.xlu0 %1453 }
 0x255   : > { %14158 = vst [vmem:[#allocation106_spill] sm:$0xff] %v9984_v11  ;;  %14159 = vst [vmem:[#allocation107_spill] sm:$0xff] %v9986_v4  ;;  %v8613_v11 = vld [vmem:[%s8865_s19 + $0x168] sm:$0xff] }
 0x256   : > { %2068 = vperm.xlu1 %8035, %v1859_v55   ;;  %2065 = vperm.xlu0 %8042, %v1858_v56   ;;  %v1864_v55 = vadd.s32 22, %v8613_v11  ;;  %v8614_v56 = vld [vmem:[%s8865_s19 + $0x170] sm:$0xff] }
 0x257   : > { %v1865_v7 = vadd.s32 22, %v8614_v56 }
 0x258   : > { %v9990_v8 = vpop.permute.xlu1 %1456  ;;  %v9992_v59 = vpop.permute.xlu0 %1459 }
 0x259   : > { %14160 = vst [vmem:[#allocation110_spill] sm:$0xff] %v9990_v8  ;;  %14161 = vst [vmem:[#allocation111_spill] sm:$0xff] %v9992_v59  ;;  %v8615_v8 = vld [vmem:[%s8865_s19 + $0x178] sm:$0xff] }
 0x25a   : > { %2074 = vperm.xlu1 %8035, %v1861_v62   ;;  %2071 = vperm.xlu0 %8042, %v1860_v58   ;;  %v1866_v62 = vadd.s32 22, %v8615_v8  ;;  %v8616_v58 = vld [vmem:[%s8865_s19 + $0x180] sm:$0xff] }
 0x25b   : > { %v1867_v61 = vadd.s32 22, %v8616_v58 }
 0x25c   : > { %v9996_v4 = vpop.permute.xlu1 %1462  ;;  %v9998_v3 = vpop.permute.xlu0 %1465 }
 0x25d   : > { %14162 = vst [vmem:[#allocation114_spill] sm:$0xff] %v9996_v4  ;;  %14163 = vst [vmem:[#allocation117_spill] sm:$0xff] %v9998_v3  ;;  %v8617_v4 = vld [vmem:[%s8865_s19 + $0x188] sm:$0xff] }
 0x25e   : > { %2080 = vperm.xlu1 %8035, %v1863_v12   ;;  %2077 = vperm.xlu0 %8042, %v1862_v5   ;;  %v1868_v12 = vadd.s32 22, %v8617_v4  ;;  %v8618_v5 = vld [vmem:[%s8865_s19 + $0x190] sm:$0xff] }
 0x25f   : > { %v1869_v56 = vadd.s32 22, %v8618_v5 }
 0x260   : > { %v10002_v59 = vpop.permute.xlu1 %1468  ;;  %v10004_v54 = vpop.permute.xlu0 %1471 }
 0x261   : > { %14164 = vst [vmem:[#allocation122_spill] sm:$0xff] %v10002_v59  ;;  %14165 = vst [vmem:[#allocation185_spill] sm:$0xff] %v10004_v54  ;;  %v8619_v59 = vld [vmem:[%s8865_s19 + $0x198] sm:$0xff] }
 0x262   : > { %2086 = vperm.xlu1 %8035, %v1865_v7   ;;  %2083 = vperm.xlu0 %8042, %v1864_v55   ;;  %v1870_v7 = vadd.s32 22, %v8619_v59  ;;  %v8620_v55 = vld [vmem:[%s8865_s19 + $0x1a0] sm:$0xff] }
 0x263   : > { %v1871_v58 = vadd.s32 22, %v8620_v55 }
 0x264   : > { %v10008_v3 = vpop.permute.xlu1 %1474  ;;  %v10010_v11 = vpop.permute.xlu0 %1477 }
 0x265   : > { %14166 = vst [vmem:[#allocation186_spill] sm:$0xff] %v10008_v3  ;;  %14167 = vst [vmem:[#allocation187_spill] sm:$0xff] %v10010_v11  ;;  %v8621_v3 = vld [vmem:[%s8865_s19 + $0x1a8] sm:$0xff] }
 0x266   : > { %2092 = vperm.xlu1 %8035, %v1867_v61   ;;  %2089 = vperm.xlu0 %8042, %v1866_v62   ;;  %v1872_v61 = vadd.s32 22, %v8621_v3  ;;  %v8622_v62 = vld [vmem:[%s8865_s19 + $0x1b0] sm:$0xff] }
 0x267   : > { %v1873_v5 = vadd.s32 22, %v8622_v62 }
 0x268   : > { %v10014_v54 = vpop.permute.xlu1 %1480  ;;  %v10016_v8 = vpop.permute.xlu0 %1483 }
 0x269   : > { %14168 = vst [vmem:[#allocation188_spill] sm:$0xff] %v10014_v54  ;;  %14169 = vst [vmem:[#allocation189_spill] sm:$0xff] %v10016_v8  ;;  %v8623_v54 = vld [vmem:[%s8865_s19 + $0x1b8] sm:$0xff] }
 0x26a   : > { %2098 = vperm.xlu1 %8035, %v1869_v56   ;;  %2095 = vperm.xlu0 %8042, %v1868_v12   ;;  %v1874_v56 = vadd.s32 22, %v8623_v54  ;;  %v8624_v12 = vld [vmem:[%s8865_s19 + $0x1c0] sm:$0xff] }
 0x26b   : > { %v1875_v55 = vadd.s32 22, %v8624_v12 }
 0x26c   : > { %v10020_v11 = vpop.permute.xlu1 %1486  ;;  %v10022_v4 = vpop.permute.xlu0 %1489 }
 0x26d   : > { %14170 = vst [vmem:[#allocation190_spill] sm:$0xff] %v10020_v11  ;;  %14171 = vst [vmem:[#allocation191_spill] sm:$0xff] %v10022_v4  ;;  %v8625_v11 = vld [vmem:[%s8865_s19 + $0x1c8] sm:$0xff] }
 0x26e   : > { %2104 = vperm.xlu1 %8035, %v1871_v58   ;;  %2101 = vperm.xlu0 %8042, %v1870_v7   ;;  %v1876_v58 = vadd.s32 22, %v8625_v11  ;;  %v8626_v7 = vld [vmem:[%s8865_s19 + $0x1d0] sm:$0xff] }
 0x26f   : > { %v1877_v62 = vadd.s32 22, %v8626_v7 }
 0x270   : > { %v10026_v8 = vpop.permute.xlu1 %1492  ;;  %v10028_v59 = vpop.permute.xlu0 %1495 }
 0x271   : > { %14172 = vst [vmem:[#allocation192_spill] sm:$0xff] %v10026_v8  ;;  %14173 = vst [vmem:[#allocation193_spill] sm:$0xff] %v10028_v59  ;;  %v8627_v8 = vld [vmem:[%s8865_s19 + $0x1d8] sm:$0xff] }
 0x272   : > { %2110 = vperm.xlu1 %8035, %v1873_v5   ;;  %2107 = vperm.xlu0 %8042, %v1872_v61   ;;  %v1878_v12 = vadd.s32 22, %v8627_v8  ;;  %v8628_v61 = vld [vmem:[%s8865_s19 + $0x1e0] sm:$0xff] }
 0x273   : > { %v1879_v5 = vadd.s32 22, %v8628_v61  ;;  %v8631_v61 = vld [vmem:[%s8865_s19 + $0x1f8] sm:$0xff] }
 0x274   : > { %v10032_v4 = vpop.permute.xlu1 %1498  ;;  %v10034_v3 = vpop.permute.xlu0 %1501 }
 0x275   : > { %14174 = vst [vmem:[#allocation194_spill] sm:$0xff] %v10032_v4  ;;  %14175 = vst [vmem:[#allocation195_spill] sm:$0xff] %v10034_v3  ;;  %v8629_v4 = vld [vmem:[%s8865_s19 + $0x1e8] sm:$0xff] }
 0x276   : > { %2116 = vperm.xlu1 %8035, %v1875_v55   ;;  %2113 = vperm.xlu0 %8042, %v1874_v56   ;;  %v1880_v7 = vadd.s32 22, %v8629_v4  ;;  %v8630_v55 = vld [vmem:[%s8865_s19 + $0x1f0] sm:$0xff] }
 0x277   : > { %v1881_v56 = vadd.s32 22, %v8630_v55 }
 0x278   : > { %v10038_v59 = vpop.permute.xlu1 %1504  ;;  %v10040_v54 = vpop.permute.xlu0 %1507 }
 0x279   : > { %14176 = vst [vmem:[#allocation196_spill] sm:$0xff] %v10038_v59  ;;  %14177 = vst [vmem:[#allocation197_spill] sm:$0xff] %v10040_v54  ;;  %v13822_v54 = vlaneseq }
 0x27a   : > { %2122 = vperm.xlu1 %8035, %v1877_v62   ;;  %2119 = vperm.xlu0 %8042, %v1876_v58   ;;  %v1882_v62 = vadd.s32 22, %v8631_v61  ;;  %v8632_v58 = vld [vmem:[%s8865_s19 + $0x200] sm:$0xff]  ;;  %v8634_v61 = vld [vmem:[%s8865_s19 + $0x210] sm:$0xff] }
 0x27b   : > { %v1883_v57 = vadd.s32 22, %v8632_v58  ;;  %v10057_v4 = vand.u32 127, %v13822_v54  ;;  %v1885_v58 = vadd.s32 22, %v8634_v61 }
 0x27c   : > { %v10044_v3 = vpop.permute.xlu1 %1510  ;;  %v10046_v11 = vpop.permute.xlu0 %1513 }
 0x27d   : > { %14178 = vst [vmem:[#allocation198_spill] sm:$0xff] %v10044_v3  ;;  %14179 = vst [vmem:[#allocation199_spill] sm:$0xff] %v10046_v11  ;;  %vm1563_vm2 = vcmp.eq.s32.totalorder %v10057_v4, %v9666_v41  ;;  %vm1564_vm4 = vcmp.eq.s32.totalorder %v10057_v4, %v9664_v40  ;;  %vm1565_vm7 = vcmp.eq.s32.totalorder %v10057_v4, %v9670_v43  ;;  %v14189_v40 = vld [vmem:[#allocation29_spill] sm:$0xff] }
 0x27e   : > { %2128 = vperm.xlu1 %8035, %v1879_v5   ;;  %2125 = vperm.xlu0 %8042, %v1878_v12   ;;  %v14183_v5 = vld [vmem:[#allocation21_spill] sm:$0xff]  ;;  %vm1566_vm8 = vcmp.eq.s32.totalorder %v10057_v4, %v9672_v42  ;;  %vm799_vm12 = vcmp.eq.s32.totalorder %v10057_v4, %v14189_v40  ;;  %vm1567_vm13 = vcmp.eq.s32.totalorder %v10057_v4, %v9676_v44 }
 0x27f   : > { %vm795_vm0 = vcmp.eq.s32.totalorder %v10057_v4, %v14183_v5  ;;  %vm1568_vm14 = vcmp.eq.s32.totalorder %v10057_v4, %v9678_v45 }
 0x280   : > { %v10050_v8 = vpop.permute.xlu1 %1516  ;;  %v10052_v59 = vpop.permute.xlu0 %1522 }
 0x281   : > { %14180 = vst [vmem:[#allocation200_spill] sm:$0xff] %v10050_v8  ;;  %14181 = vst [vmem:[#allocation201_spill] sm:$0xff] %v10052_v59  ;;  %v8633_v8 = vld [vmem:[%s8865_s19 + $0x208] sm:$0xff] }
 0x282   : > { %2134 = vperm.xlu1 %8035, %v1881_v56   ;;  %2131 = vperm.xlu0 %8042, %v1880_v7   ;;  %v1884_v11 = vadd.s32 22, %v8633_v8  ;;  %v14184_v59 = vld [vmem:[#allocation25_spill] sm:$0xff]  ;;  %v14185_v7 = vld [vmem:[#allocation20_spill] sm:$0xff]  ;;  %v8635_v56 = vld [vmem:[%s8865_s19 + $0x218] sm:$0xff] }
 0x283   : > { %vm796_vm1 = vcmp.eq.s32.totalorder %v10057_v4, %v14184_v59  ;;  %vm797_vm3 = vcmp.eq.s32.totalorder %v10057_v4, %v14185_v7  ;;  %v1886_v54 = vadd.s32 22, %v8635_v56  ;;  %v14186_v8 = vld [vmem:[#allocation24_spill] sm:$0xff]  ;;  %v13826_v59 = vmov 0.0  }
 0x284   : > { %v10059_v55 = vpop.permute.xlu0 %1534  ;;  %vm798_vm5 = vcmp.eq.s32.totalorder %v10057_v4, %v14186_v8  ;;  %v923_v56 = vsel %vm795_vm0, 1.0, %v13826_v59 }
 0x285   : > { %14182 = vst [vmem:[#allocation202_spill] sm:$0xff] %v10059_v55  ;;  %v1952_v12 = vpop.permute.xlu1 %1951  ;;  %v8636_v55 = vld [vmem:[%s8865_s19 + $0x220] sm:$0xff]  ;;  %v926_v41 = vsel %vm798_vm5, 1.0, %v14187_v10 }
 0x286   : > { %2140 = vperm.xlu1 %8035, %v1883_v57   ;;  %2137 = vperm.xlu0 %8042, %v1882_v62   ;;  %v1887_v3 = vadd.s32 22, %v8636_v55  ;;  %v924_v57 = vsel %vm796_vm1, 1.0, %v13826_v59  ;;  %vm2332_vm6 = vcmp.eq.s32.totalorder %v10057_v4, %v1952_v12  ;;  %v1691_v55 = vsel %vm1563_vm2, 1.0, %v923_v56  ;;  %v14188_v56 = vld [vmem:[#allocation28_spill] sm:$0xff] }
 0x287   : > { %v1692_v59 = vsel %vm1564_vm4, 1.0, %v924_v57  ;;  %vm800_vm11 = vcmp.eq.s32.totalorder %v10057_v4, %v14188_v56  ;;  %v1694_v12 = vsel %vm1566_vm8, 1.0, %v926_v41  ;;  %v14191_v41 = vld [vmem:[#allocation33_spill] sm:$0xff]  ;;  %vm1570_vm4 = vcmp.eq.s32.totalorder %v10057_v4, %v9684_v46 }
 0x288   : > { %v2460_v2 = vsel %vm2332_vm6, 1.0, %v1692_v59  ;;  %v928_v42 = vsel %vm800_vm11, 1.0, %v14187_v10  ;;  %vm801_vm2 = vcmp.eq.s32.totalorder %v10057_v4, %v14191_v41 }
 0x289   : > { %v1955_v62 = vpop.permute.xlu1 %1954  ;;  %v1949_v61 = vpop.permute.xlu0 %1948  ;;  %v1696_v40 = vsel %vm1568_vm14, 1.0, %v928_v42 }
 0x28a   : > { %2146 = vperm.xlu1 %8035, %v1885_v58   ;;  %2143 = vperm.xlu0 %8042, %v1884_v11   ;;  %vm2331_vm9 = vcmp.eq.s32.totalorder %v10057_v4, %v1949_v61  ;;  %vm2333_vm10 = vcmp.eq.s32.totalorder %v10057_v4, %v1955_v62  ;;  %v925_v11 = vsel %vm797_vm3, 1.0, %v14187_v10  ;;  %v8638_v58 = vld [vmem:[%s8865_s19 + $0x230] sm:$0xff]  ;;  %v14190_v62 = vld [vmem:[#allocation32_spill] sm:$0xff]  ;;  %vm1569_vm3 = vcmp.eq.s32.totalorder %v10057_v4, %v9682_v47 }
 0x28b   : > { %v2459_v5 = vsel %vm2331_vm9, 1.0, %v1691_v55  ;;  %v1889_v61 = vadd.s32 22, %v8638_v58  ;;  %v1693_v8 = vsel %vm1565_vm7, 1.0, %v925_v11  ;;  %v927_v55 = vsel %vm799_vm12, 1.0, %v14187_v10 }
 0x28c   : > { %7556 = vmatprep.mubr.f32.mxu0 %v2459_v5  ;;  %v2461_v59 = vsel %vm2333_vm10, 1.0, %v1693_v8  ;;  %v8639_v5 = vld [vmem:[%s8865_s19 + $0x238] sm:$0xff]  ;;  %vm802_vm1 = vcmp.eq.s32.totalorder %v10057_v4, %v14190_v62  ;;  %v1695_v56 = vsel %vm1567_vm13, 1.0, %v927_v55  ;;  %v929_v8 = vsel %vm801_vm2, 1.0, %v14187_v10 }
 0x28d   : > { %v1961_v57 = vpop.permute.xlu1 %1960  ;;  %7557 = vmatmul.mubr.f32.vlgmr.msra.gmra.mrb[0].mxu0 %v2460_v2  ;;  %v1958_v7 = vpop.permute.xlu0 %1957  ;;  %v930_v45 = vsel %vm802_vm1, 1.0, %v14187_v10  ;;  %vm1571_vm9 = vcmp.eq.s32.totalorder %v10057_v4, %v9688_v48  ;;  %vm1572_vm10 = vcmp.eq.s32.totalorder %v10057_v4, %v9690_v49 }
 0x28e   : > { %vm2334_vm15 = vcmp.eq.s32.totalorder %v10057_v4, %v1958_v7  ;;  %2152 = vperm.xlu1 %8035, %v1887_v3   ;;  %2149 = vperm.xlu0 %8042, %v1886_v54   ;;  %vm2335_vm0 = vcmp.eq.s32.totalorder %v10057_v4, %v1961_v57  ;;  %v1890_v3 = vadd.s32 22, %v8639_v5  ;;  %v8640_v54 = vld [vmem:[%s8865_s19 + $0x240] sm:$0xff]  ;;  %v1697_v5 = vsel %vm1569_vm3, 1.0, %v929_v8 }
 0x28f   : > { %7559 = vmatprep.mubr.f32.mxu0 %v2461_v59  ;;  %v2462_v43 = vsel %vm2334_vm15, 1.0, %v1694_v12  ;;  %v1891_v11 = vadd.s32 22, %v8640_v54  ;;  %v2463_v7 = vsel %vm2335_vm0, 1.0, %v1695_v56  ;;  %v8641_v12 = vld [vmem:[%s8865_s19 + $0x248] sm:$0xff]  ;;  %v1698_v54 = vsel %vm1570_vm4, 1.0, %v930_v45 }
 0x290   : > { %v14192_v57 = vld [vmem:[#allocation36_spill] sm:$0xff]  ;;  %vm1573_vm15 = vcmp.eq.s32.totalorder %v10057_v4, %v9694_v51  ;;  %vm1574_vm0 = vcmp.eq.s32.totalorder %v10057_v4, %v9696_v50 }
 0x291   : > { %v1967_v58 = vpop.permute.xlu1 %1966  ;;  %7560 = vmatmul.mubr.f32.gmra.mrb[2].mxu0 %v2462_v43  ;;  %v1964_v2 = vpop.permute.xlu0 %1963  ;;  %vm804_vm7 = vcmp.eq.s32.totalorder %v10057_v4, %v14192_v57  ;;  %v14193_v43 = vld [vmem:[#allocation37_spill] sm:$0xff] }
 0x292   : > { %vm2336_vm5 = vcmp.eq.s32.totalorder %v10057_v4, %v1964_v2  ;;  %2158 = vperm.xlu1 %8035, %v1889_v61   ;;  %2155 = vperm.xlu0 %8042, %v1888_v0   ;;  %vm2337_vm6 = vcmp.eq.s32.totalorder %v10057_v4, %v1967_v58  ;;  %v1892_v61 = vadd.s32 22, %v8641_v12  ;;  %v8642_v0 = vld [vmem:[%s8865_s19 + $0x250] sm:$0xff]  ;;  %vm803_vm8 = vcmp.eq.s32.totalorder %v10057_v4, %v14193_v43  ;;  %v8643_v2 = vld [vmem:[%s8865_s19 + $0x258] sm:$0xff]  ;;  %v14194_v58 = vld [vmem:[#allocation40_spill] sm:$0xff] }
 0x293   : > { %7562 = vmatprep.mubr.f32.mxu0 %v2463_v7  ;;  %v2464_v44 = vsel %vm2336_vm5, 1.0, %v1696_v40  ;;  %v1893_v59 = vadd.s32 22, %v8642_v0  ;;  %v2465_v62 = vsel %vm2337_vm6, 1.0, %v1697_v5  ;;  %v932_v46 = vsel %vm804_vm7, 1.0, %v14187_v10  ;;  %v14195_v40 = vld [vmem:[#allocation41_spill] sm:$0xff] }
 0x294   : > { %v931_v41 = vsel %vm803_vm8, 1.0, %v14187_v10  ;;  %vm806_vm13 = vcmp.eq.s32.totalorder %v10057_v4, %v14194_v58  ;;  %vm805_vm14 = vcmp.eq.s32.totalorder %v10057_v4, %v14195_v40  ;;  %v1700_v8 = vsel %vm1572_vm10, 1.0, %v932_v46  ;;  %v8645_v57 = vld [vmem:[%s8865_s19 + $0x268] sm:$0xff] }
 0x295   : > { %v1973_v42 = vpop.permute.xlu1 %1972  ;;  %7563 = vmatmul.mubr.f32.gmra.mrb[4].mxu0 %v2464_v44  ;;  %v1970_v55 = vpop.permute.xlu0 %1969  ;;  %v1699_v45 = vsel %vm1571_vm9, 1.0, %v931_v41  ;;  %v934_v49 = vsel %vm806_vm13, 1.0, %v14187_v10  ;;  %v933_v0 = vsel %vm805_vm14, 1.0, %v14187_v10  ;;  %vm1575_vm5 = vcmp.eq.s32.totalorder %v10057_v4, %v9700_v52  ;;  %v14198_v58 = vld [vmem:[#allocation48_spill] sm:$0xff]  ;;  %v14199_v40 = vld [vmem:[#allocation49_spill] sm:$0xff] }
 0x296   : > { %vm2338_vm11 = vcmp.eq.s32.totalorder %v10057_v4, %v1970_v55  ;;  %2164 = vperm.xlu1 %8035, %v1891_v11   ;;  %2161 = vperm.xlu0 %8042, %v1890_v3   ;;  %vm2339_vm12 = vcmp.eq.s32.totalorder %v10057_v4, %v1973_v42  ;;  %v1894_v11 = vadd.s32 22, %v8643_v2  ;;  %v8644_v3 = vld [vmem:[%s8865_s19 + $0x260] sm:$0xff]  ;;  %v14197_v55 = vld [vmem:[#allocation45_spill] sm:$0xff]  ;;  %vm1576_vm6 = vcmp.eq.s32.totalorder %v10057_v4, %v9702_v53  ;;  %v8647_v2 = vld [vmem:[%s8865_s19 + $0x278] sm:$0xff] }
 0x297   : > { %7565 = vmatprep.mubr.f32.mxu0 %v2465_v62  ;;  %v2466_v47 = vsel %vm2338_vm11, 1.0, %v1698_v54  ;;  %v1895_v56 = vadd.s32 22, %v8644_v3  ;;  %v2467_v12 = vsel %vm2339_vm12, 1.0, %v1699_v45  ;;  %v14196_v42 = vld [vmem:[#allocation44_spill] sm:$0xff]  ;;  %vm807_vm4 = vcmp.eq.s32.totalorder %v10057_v4, %v14197_v55 }
 0x298   : > { %vm808_vm3 = vcmp.eq.s32.totalorder %v10057_v4, %v14196_v42  ;;  %v1701_v62 = vsel %vm1573_vm15, 1.0, %v933_v0  ;;  %v935_v41 = vsel %vm807_vm4, 1.0, %v14187_v10  ;;  %v1898_v3 = vadd.s32 22, %v8647_v2  ;;  %v14202_v2 = vld [vmem:[#allocation56_spill] sm:$0xff] }
 0x299   : > { %v1979_v7 = vpop.permute.xlu1 %1978  ;;  %7566 = vmatmul.mubr.f32.gmra.mrb[6].mxu0 %v2466_v47  ;;  %v1976_v44 = vpop.permute.xlu0 %1975  ;;  %v1702_v47 = vsel %vm1574_vm0, 1.0, %v934_v49  ;;  %v936_v50 = vsel %vm808_vm3, 1.0, %v14187_v10  ;;  %vm810_vm9 = vcmp.eq.s32.totalorder %v10057_v4, %v14198_v58  ;;  %vm809_vm10 = vcmp.eq.s32.totalorder %v10057_v4, %v14199_v40  ;;  %v8649_v49 = vld [vmem:[%s8865_s19 + $0x288] sm:$0xff] }
 0x29a   : > { %vm2340_vm1 = vcmp.eq.s32.totalorder %v10057_v4, %v1976_v44  ;;  %2170 = vperm.xlu1 %8035, %v1893_v59   ;;  %2167 = vperm.xlu0 %8042, %v1892_v61   ;;  %vm2341_vm2 = vcmp.eq.s32.totalorder %v10057_v4, %v1979_v7  ;;  %v1896_v59 = vadd.s32 22, %v8645_v57  ;;  %v8646_v61 = vld [vmem:[%s8865_s19 + $0x270] sm:$0xff]  ;;  %v1703_v45 = vsel %vm1575_vm5, 1.0, %v935_v41 }
 0x29b   : > { %7568 = vmatprep.mubr.f32.mxu0 %v2467_v12  ;;  %v2468_v48 = vsel %vm2340_vm1, 1.0, %v1700_v8  ;;  %v1897_v43 = vadd.s32 22, %v8646_v61  ;;  %v2469_v46 = vsel %vm2341_vm2, 1.0, %v1701_v62  ;;  %v1704_v8 = vsel %vm1576_vm6, 1.0, %v936_v50  ;;  %v8650_v57 = vld [vmem:[%s8865_s19 + $0x290] sm:$0xff]  ;;  %v14200_v61 = vld [vmem:[#allocation52_spill] sm:$0xff] }
 0x29c   : > { %vm1577_vm11 = vcmp.eq.s32.totalorder %v10057_v4, %v9706_v38  ;;  %vm1578_vm12 = vcmp.eq.s32.totalorder %v10057_v4, %v9708_v60  ;;  %v938_v53 = vsel %vm810_vm9, 1.0, %v14187_v10  ;;  %v1900_v0 = vadd.s32 22, %v8649_v49  ;;  %v8652_v50 = vld [vmem:[%s8865_s19 + $0x2a0] sm:$0xff] }
 0x29d   : > { %v1985_v5 = vpop.permute.xlu1 %1984  ;;  %7569 = vmatmul.mubr.f32.gmra.mrb[8].mxu0 %v2468_v48  ;;  %v1982_v54 = vpop.permute.xlu0 %1981  ;;  %v937_v48 = vsel %vm809_vm10, 1.0, %v14187_v10  ;;  %vm812_vm15 = vcmp.eq.s32.totalorder %v10057_v4, %v14200_v61  ;;  %vm1579_vm1 = vcmp.eq.s32.totalorder %v10057_v4, %v9712_v39  ;;  %vm1580_vm2 = vcmp.eq.s32.totalorder %v10057_v4, %v9714_v36 }
 0x29e   : > { %vm2342_vm7 = vcmp.eq.s32.totalorder %v10057_v4, %v1982_v54  ;;  %2176 = vperm.xlu1 %8035, %v1895_v56   ;;  %2173 = vperm.xlu0 %8042, %v1894_v11   ;;  %vm2343_vm8 = vcmp.eq.s32.totalorder %v10057_v4, %v1985_v5  ;;  %v8648_v11 = vld [vmem:[%s8865_s19 + $0x280] sm:$0xff]  ;;  %v1705_v5 = vsel %vm1577_vm11, 1.0, %v937_v48  ;;  %v1706_v54 = vsel %vm1578_vm12, 1.0, %v938_v53  ;;  %v14205_v48 = vld [vmem:[#allocation61_spill] sm:$0xff] }
 0x29f   : > { %7571 = vmatprep.mubr.f32.mxu0 %v2469_v46  ;;  %v2470_v51 = vsel %vm2342_vm7, 1.0, %v1702_v47  ;;  %v1899_v56 = vadd.s32 22, %v8648_v11  ;;  %v2471_v12 = vsel %vm2343_vm8, 1.0, %v1703_v45  ;;  %v940_v60 = vsel %vm812_vm15, 1.0, %v14187_v10  ;;  %v8651_v46 = vld [vmem:[%s8865_s19 + $0x298] sm:$0xff]  ;;  %v8653_v45 = vld [vmem:[%s8865_s19 + $0x2a8] sm:$0xff] }
 0x2a0   : > { %v1903_v41 = vadd.s32 22, %v8652_v50  ;;  %vm814_vm5 = vcmp.eq.s32.totalorder %v10057_v4, %v14202_v2  ;;  %v1708_v40 = vsel %vm1580_vm2, 1.0, %v940_v60  ;;  %vm1581_vm7 = vcmp.eq.s32.totalorder %v10057_v4, %v9718_v37  ;;  %v14204_v53 = vld [vmem:[#allocation60_spill] sm:$0xff] }
 0x2a1   : > { %v1991_v7 = vpop.permute.xlu1 %1990  ;;  %7572 = vmatmul.mubr.f32.gmra.mrb[10].mxu0 %v2470_v51  ;;  %v1988_v44 = vpop.permute.xlu0 %1987  ;;  %v1902_v51 = vadd.s32 22, %v8651_v46  ;;  %vm1582_vm8 = vcmp.eq.s32.totalorder %v10057_v4, %v9720_v34  ;;  %v942_v36 = vsel %vm814_vm5, 1.0, %v14187_v10  ;;  %vm816_vm11 = vcmp.eq.s32.totalorder %v10057_v4, %v14204_v53  ;;  %v8657_v2 = vld [vmem:[%s8865_s19 + $0x2c8] sm:$0xff]  ;;  %v8660_v53 = vld [vmem:[%s8865_s19 + $0x2e0] sm:$0xff] }
 0x2a2   : > { %vm2344_vm13 = vcmp.eq.s32.totalorder %v10057_v4, %v1988_v44  ;;  %2182 = vperm.xlu1 %8035, %v1897_v43   ;;  %2179 = vperm.xlu0 %8042, %v1896_v59   ;;  %vm2345_vm14 = vcmp.eq.s32.totalorder %v10057_v4, %v1991_v7  ;;  %v1901_v59 = vadd.s32 22, %v8650_v57  ;;  %v14201_v43 = vld [vmem:[#allocation53_spill] sm:$0xff]  ;;  %vm815_vm12 = vcmp.eq.s32.totalorder %v10057_v4, %v14205_v48 }
 0x2a3   : > { %7574 = vmatprep.mubr.f32.mxu0 %v2471_v12  ;;  %v2472_v52 = vsel %vm2344_vm13, 1.0, %v1704_v8  ;;  %vm811_vm0 = vcmp.eq.s32.totalorder %v10057_v4, %v14201_v43  ;;  %v2473_v62 = vsel %vm2345_vm14, 1.0, %v1705_v5  ;;  %v1904_v8 = vadd.s32 22, %v8653_v45  ;;  %v8654_v12 = vld [vmem:[%s8865_s19 + $0x2b0] sm:$0xff]  ;;  %v8656_v5 = vld [vmem:[%s8865_s19 + $0x2c0] sm:$0xff] }
 0x2a4   : > { %v939_v47 = vsel %vm811_vm0, 1.0, %v14187_v10  ;;  %vm1583_vm13 = vcmp.eq.s32.totalorder %v10057_v4, %v9724_v35  ;;  %vm1584_vm14 = vcmp.eq.s32.totalorder %v10057_v4, %v9726_v32  ;;  %v944_v34 = vsel %vm816_vm11, 1.0, %v14187_v10 }
 0x2a5   : > { %v1997_v42 = vpop.permute.xlu1 %1996  ;;  %7575 = vmatmul.mubr.f32.gmra.mrb[12].mxu0 %v2472_v52  ;;  %v1994_v55 = vpop.permute.xlu0 %1993  ;;  %v1707_v58 = vsel %vm1579_vm1, 1.0, %v939_v47  ;;  %v1905_v52 = vadd.s32 22, %v8654_v12  ;;  %v943_v43 = vsel %vm815_vm12, 1.0, %v14187_v10  ;;  %v8659_v12 = vld [vmem:[%s8865_s19 + $0x2d8] sm:$0xff]  ;;  %v1911_v48 = vadd.s32 22, %v8660_v53 }
 0x2a6   : > { %vm2346_vm3 = vcmp.eq.s32.totalorder %v10057_v4, %v1994_v55  ;;  %2188 = vperm.xlu1 %8035, %v1899_v56   ;;  %2185 = vperm.xlu0 %8042, %v1898_v3   ;;  %vm2347_vm4 = vcmp.eq.s32.totalorder %v10057_v4, %v1997_v42  ;;  %v14203_v3 = vld [vmem:[#allocation57_spill] sm:$0xff]  ;;  %v8655_v42 = vld [vmem:[%s8865_s19 + $0x2b8] sm:$0xff]  ;;  %v1711_v46 = vsel %vm1583_vm13, 1.0, %v943_v43 }
 0x2a7   : > { %7577 = vmatprep.mubr.f32.mxu0 %v2473_v62  ;;  %v2474_v38 = vsel %vm2346_vm3, 1.0, %v1706_v54  ;;  %vm813_vm6 = vcmp.eq.s32.totalorder %v10057_v4, %v14203_v3  ;;  %v2475_v7 = vsel %vm2347_vm4, 1.0, %v1707_v58  ;;  %v1906_v55 = vadd.s32 22, %v8655_v42  ;;  %v14206_v62 = vld [vmem:[#allocation64_spill] sm:$0xff] }
 0x2a8   : > { %v941_v44 = vsel %vm813_vm6, 1.0, %v14187_v10  ;;  %v1907_v54 = vadd.s32 22, %v8656_v5  ;;  %vm818_vm1 = vcmp.eq.s32.totalorder %v10057_v4, %v14206_v62  ;;  %vm1585_vm3 = vcmp.eq.s32.totalorder %v10057_v4, %v9730_v33  ;;  %v14208_v58 = vld [vmem:[#allocation68_spill] sm:$0xff]  ;;  %v8662_v5 = vld [vmem:[%s8865_s19 + $0x2f0] sm:$0xff] }
 0x2a9   : > { %v2003_v11 = vpop.permute.xlu1 %2002  ;;  %7578 = vmatmul.mubr.f32.gmra.mrb[14].mxu0 %v2474_v38  ;;  %v2000_v56 = vpop.permute.xlu0 %1999  ;;  %v1709_v57 = vsel %vm1581_vm7, 1.0, %v941_v44  ;;  %v14207_v38 = vld [vmem:[#allocation65_spill] sm:$0xff]  ;;  %vm1586_vm4 = vcmp.eq.s32.totalorder %v10057_v4, %v9732_v30  ;;  %v946_v32 = vsel %vm818_vm1, 1.0, %v14187_v10  ;;  %v1908_v3 = vadd.s32 22, %v8657_v2  ;;  %v14212_v62 = vld [vmem:[#allocation76_spill] sm:$0xff] }
 0x2aa   : > { %vm2348_vm9 = vcmp.eq.s32.totalorder %v10057_v4, %v2000_v56  ;;  %2194 = vperm.xlu1 %8035, %v1901_v59   ;;  %2191 = vperm.xlu0 %8042, %v1900_v0   ;;  %vm2349_vm10 = vcmp.eq.s32.totalorder %v10057_v4, %v2003_v11  ;;  %v1710_v59 = vsel %vm1582_vm8, 1.0, %v942_v36  ;;  %vm817_vm2 = vcmp.eq.s32.totalorder %v10057_v4, %v14207_v38  ;;  %v8658_v11 = vld [vmem:[%s8865_s19 + $0x2d0] sm:$0xff]  ;;  %v8661_v42 = vld [vmem:[%s8865_s19 + $0x2e8] sm:$0xff]  ;;  %v8664_v2 = vld [vmem:[%s8865_s19 + $0x300] sm:$0xff] }
 0x2ab   : > { %7580 = vmatprep.mubr.f32.mxu0 %v2475_v7  ;;  %v2476_v39 = vsel %vm2348_vm9, 1.0, %v1708_v40  ;;  %v2477_v61 = vsel %vm2349_vm10, 1.0, %v1709_v57  ;;  %v1909_v56 = vadd.s32 22, %v8658_v11  ;;  %vm820_vm7 = vcmp.eq.s32.totalorder %v10057_v4, %v14208_v58  ;;  %v14209_v40 = vld [vmem:[#allocation69_spill] sm:$0xff]  ;;  %v14214_v11 = vld [vmem:[#allocation80_spill] sm:$0xff] }
 0x2ac   : > { %vm819_vm8 = vcmp.eq.s32.totalorder %v10057_v4, %v14209_v40  ;;  %v1714_v44 = vsel %vm1586_vm4, 1.0, %v946_v32  ;;  %vm1587_vm9 = vcmp.eq.s32.totalorder %v10057_v4, %v9736_v31  ;;  %vm1588_vm10 = vcmp.eq.s32.totalorder %v10057_v4, %v9738_v28  ;;  %v14213_v38 = vld [vmem:[#allocation77_spill] sm:$0xff]  ;;  %v8663_v32 = vld [vmem:[%s8865_s19 + $0x2f8] sm:$0xff] }
 0x2ad   : > { %v2009_v49 = vpop.permute.xlu1 %2008  ;;  %7581 = vmatmul.mubr.f32.gmra.mrb[16].mxu0 %v2476_v39  ;;  %v2006_v0 = vpop.permute.xlu0 %2005  ;;  %v948_v30 = vsel %vm820_vm7, 1.0, %v14187_v10  ;;  %vm823_vm4 = vcmp.eq.s32.totalorder %v10057_v4, %v14213_v38 }
 0x2ae   : > { %vm2350_vm15 = vcmp.eq.s32.totalorder %v10057_v4, %v2006_v0  ;;  %2200 = vperm.xlu1 %8035, %v1903_v41   ;;  %2197 = vperm.xlu0 %8042, %v1902_v51   ;;  %vm2351_vm0 = vcmp.eq.s32.totalorder %v10057_v4, %v2009_v49  ;;  %v1712_v51 = vsel %vm1584_vm14, 1.0, %v944_v34  ;;  %v945_v41 = vsel %vm817_vm2, 1.0, %v14187_v10  ;;  %v14210_v49 = vld [vmem:[#allocation72_spill] sm:$0xff]  ;;  %v14211_v0 = vld [vmem:[#allocation73_spill] sm:$0xff] }
 0x2af   : > { %7583 = vmatprep.mubr.f32.mxu0 %v2477_v61  ;;  %v2478_v37 = vsel %vm2350_vm15, 1.0, %v1710_v59  ;;  %v2479_v50 = vsel %vm2351_vm0, 1.0, %v1711_v46  ;;  %v1713_v36 = vsel %vm1585_vm3, 1.0, %v945_v41  ;;  %vm822_vm13 = vcmp.eq.s32.totalorder %v10057_v4, %v14210_v49 }
 0x2b0   : > { %vm821_vm14 = vcmp.eq.s32.totalorder %v10057_v4, %v14211_v0  ;;  %vm1589_vm15 = vcmp.eq.s32.totalorder %v10057_v4, %v9742_v29  ;;  %vm1590_vm0 = vcmp.eq.s32.totalorder %v10057_v4, %v9744_v26  ;;  %v950_v28 = vsel %vm822_vm13, 1.0, %v14187_v10 }
 0x2b1   : > { %v2015_v60 = vpop.permute.xlu1 %2014  ;;  %7584 = vmatmul.mubr.f32.gmra.mrb[18].mxu0 %v2478_v37  ;;  %v2012_v47 = vpop.permute.xlu0 %2011  ;;  %v1716_v37 = vsel %vm1588_vm10, 1.0, %v948_v30  ;;  %v949_v43 = vsel %vm821_vm14, 1.0, %v14187_v10  ;;  %vm824_vm3 = vcmp.eq.s32.totalorder %v10057_v4, %v14212_v62  ;;  %v1914_v41 = vadd.s32 22, %v8663_v32  ;;  %v8666_v30 = vld [vmem:[%s8865_s19 + $0x310] sm:$0xff] }
 0x2b2   : > { %vm2352_vm5 = vcmp.eq.s32.totalorder %v10057_v4, %v2012_v47  ;;  %2206 = vperm.xlu1 %8035, %v1905_v52   ;;  %2203 = vperm.xlu0 %8042, %v1904_v8   ;;  %vm2353_vm6 = vcmp.eq.s32.totalorder %v10057_v4, %v2015_v60  ;;  %v947_v8 = vsel %vm819_vm8, 1.0, %v14187_v10  ;;  %v1910_v52 = vadd.s32 22, %v8659_v12  ;;  %v14216_v12 = vld [vmem:[#allocation84_spill] sm:$0xff] }
 0x2b3   : > { %7586 = vmatprep.mubr.f32.mxu0 %v2479_v50  ;;  %v2480_v35 = vsel %vm2352_vm5, 1.0, %v1712_v51  ;;  %v2481_v45 = vsel %vm2353_vm6, 1.0, %v1713_v36  ;;  %v1715_v61 = vsel %vm1587_vm9, 1.0, %v947_v8  ;;  %v1717_v46 = vsel %vm1589_vm15, 1.0, %v949_v43  ;;  %v14219_v43 = vld [vmem:[#allocation89_spill] sm:$0xff] }
 0x2b4   : > { %v1718_v51 = vsel %vm1590_vm0, 1.0, %v950_v28  ;;  %vm1591_vm5 = vcmp.eq.s32.totalorder %v10057_v4, %v9748_v27  ;;  %vm1592_vm6 = vcmp.eq.s32.totalorder %v10057_v4, %v9750_v24  ;;  %v952_v26 = vsel %vm824_vm3, 1.0, %v14187_v10  ;;  %v14218_v28 = vld [vmem:[#allocation88_spill] sm:$0xff] }
 0x2b5   : > { %v2021_v7 = vpop.permute.xlu1 %2020  ;;  %7587 = vmatmul.mubr.f32.gmra.mrb[20].mxu0 %v2480_v35  ;;  %v2018_v39 = vpop.permute.xlu0 %2017  ;;  %v951_v35 = vsel %vm823_vm4, 1.0, %v14187_v10  ;;  %vm826_vm9 = vcmp.eq.s32.totalorder %v10057_v4, %v14214_v11  ;;  %v1917_v8 = vadd.s32 22, %v8666_v30  ;;  %vm828_vm15 = vcmp.eq.s32.totalorder %v10057_v4, %v14216_v12  ;;  %v8671_v11 = vld [vmem:[%s8865_s19 + $0x338] sm:$0xff]  ;;  %v8673_v30 = vld [vmem:[%s8865_s19 + $0x348] sm:$0xff]  ;;  %v8674_v12 = vld [vmem:[%s8865_s19 + $0x350] sm:$0xff] }
 0x2b6   : > { %vm2354_vm11 = vcmp.eq.s32.totalorder %v10057_v4, %v2018_v39  ;;  %2212 = vperm.xlu1 %8035, %v1907_v54   ;;  %2209 = vperm.xlu0 %8042, %v1906_v55   ;;  %vm2355_vm12 = vcmp.eq.s32.totalorder %v10057_v4, %v2021_v7  ;;  %v1912_v55 = vadd.s32 22, %v8661_v42  ;;  %v1913_v54 = vadd.s32 22, %v8662_v5 }
 0x2b7   : > { %7589 = vmatprep.mubr.f32.mxu0 %v2481_v45  ;;  %v2482_v33 = vsel %vm2354_vm11, 1.0, %v1714_v44  ;;  %v2483_v34 = vsel %vm2355_vm12, 1.0, %v1715_v61  ;;  %v1719_v7 = vsel %vm1591_vm5, 1.0, %v951_v35  ;;  %v1720_v39 = vsel %vm1592_vm6, 1.0, %v952_v26  ;;  %v8665_v45 = vld [vmem:[%s8865_s19 + $0x308] sm:$0xff]  ;;  %v8667_v61 = vld [vmem:[%s8865_s19 + $0x318] sm:$0xff] }
 0x2b8   : > { %vm1593_vm11 = vcmp.eq.s32.totalorder %v10057_v4, %v9754_v25  ;;  %vm1594_vm12 = vcmp.eq.s32.totalorder %v10057_v4, %v9756_v22  ;;  %v954_v24 = vsel %vm826_vm9, 1.0, %v14187_v10  ;;  %v956_v22 = vsel %vm828_vm15, 1.0, %v14187_v10 }
 0x2b9   : > { %v2027_v57 = vpop.permute.xlu1 %2026  ;;  %7590 = vmatmul.mubr.f32.gmra.mrb[22].mxu0 %v2482_v33  ;;  %v2024_v59 = vpop.permute.xlu0 %2023  ;;  %v1916_v33 = vadd.s32 22, %v8665_v45  ;;  %v1722_v0 = vsel %vm1594_vm12, 1.0, %v954_v24  ;;  %vm830_vm5 = vcmp.eq.s32.totalorder %v10057_v4, %v14218_v28  ;;  %vm829_vm6 = vcmp.eq.s32.totalorder %v10057_v4, %v14219_v43  ;;  %v14226_v28 = vld [vmem:[#allocation104_spill] sm:$0xff]  ;;  %v14227_v43 = vld [vmem:[#allocation105_spill] sm:$0xff] }
 0x2ba   : > { %vm2356_vm1 = vcmp.eq.s32.totalorder %v10057_v4, %v2024_v59  ;;  %2218 = vperm.xlu1 %8035, %v1909_v56   ;;  %2215 = vperm.xlu0 %8042, %v1908_v3   ;;  %vm2357_vm2 = vcmp.eq.s32.totalorder %v10057_v4, %v2027_v57  ;;  %v1915_v3 = vadd.s32 22, %v8664_v2  ;;  %v14215_v56 = vld [vmem:[#allocation81_spill] sm:$0xff]  ;;  %v957_v38 = vsel %vm829_vm6, 1.0, %v14187_v10 }
 0x2bb   : > { %7592 = vmatprep.mubr.f32.mxu0 %v2483_v34  ;;  %v2484_v31 = vsel %vm2356_vm1, 1.0, %v1716_v37  ;;  %v2485_v50 = vsel %vm2357_vm2, 1.0, %v1717_v46  ;;  %vm825_vm10 = vcmp.eq.s32.totalorder %v10057_v4, %v14215_v56  ;;  %vm1595_vm1 = vcmp.eq.s32.totalorder %v10057_v4, %v9760_v23  ;;  %v8668_v34 = vld [vmem:[%s8865_s19 + $0x320] sm:$0xff]  ;;  %v8670_v46 = vld [vmem:[%s8865_s19 + $0x330] sm:$0xff] }
 0x2bc   : > { %v953_v44 = vsel %vm825_vm10, 1.0, %v14187_v10  ;;  %vm1596_vm2 = vcmp.eq.s32.totalorder %v10057_v4, %v9762_v20  ;;  %v1918_v37 = vadd.s32 22, %v8667_v61  ;;  %v958_v20 = vsel %vm830_vm5, 1.0, %v14187_v10  ;;  %v8675_v61 = vld [vmem:[%s8865_s19 + $0x358] sm:$0xff] }
 0x2bd   : > { %v2033_v60 = vpop.permute.xlu1 %2032  ;;  %7593 = vmatmul.mubr.f32.gmra.mrb[24].mxu0 %v2484_v31  ;;  %v2030_v47 = vpop.permute.xlu0 %2029  ;;  %v1721_v49 = vsel %vm1593_vm11, 1.0, %v953_v44  ;;  %v1919_v31 = vadd.s32 22, %v8668_v34  ;;  %v1922_v56 = vadd.s32 22, %v8671_v11  ;;  %v8676_v34 = vld [vmem:[%s8865_s19 + $0x360] sm:$0xff] }
 0x2be   : > { %vm2358_vm7 = vcmp.eq.s32.totalorder %v10057_v4, %v2030_v47  ;;  %2224 = vperm.xlu1 %8035, %v1911_v48   ;;  %2221 = vperm.xlu0 %8042, %v1910_v52   ;;  %vm2359_vm8 = vcmp.eq.s32.totalorder %v10057_v4, %v2033_v60  ;;  %v14217_v52 = vld [vmem:[#allocation85_spill] sm:$0xff] }
 0x2bf   : > { %7595 = vmatprep.mubr.f32.mxu0 %v2485_v50  ;;  %v2486_v29 = vsel %vm2358_vm7, 1.0, %v1718_v51  ;;  %v2487_v36 = vsel %vm2359_vm8, 1.0, %v1719_v7  ;;  %vm827_vm0 = vcmp.eq.s32.totalorder %v10057_v4, %v14217_v52  ;;  %vm1597_vm7 = vcmp.eq.s32.totalorder %v10057_v4, %v9766_v21  ;;  %v8669_v60 = vld [vmem:[%s8865_s19 + $0x328] sm:$0xff] }
 0x2c0   : > { %v955_v59 = vsel %vm827_vm0, 1.0, %v14187_v10  ;;  %vm1598_vm8 = vcmp.eq.s32.totalorder %v10057_v4, %v9768_v18  ;;  %v1920_v47 = vadd.s32 22, %v8669_v60  ;;  %v1921_v51 = vadd.s32 22, %v8670_v46  ;;  %v14220_v50 = vld [vmem:[#allocation92_spill] sm:$0xff] }
 0x2c1   : > { %v2039_v58 = vpop.permute.xlu1 %2038  ;;  %7596 = vmatmul.mubr.f32.gmra.mrb[26].mxu0 %v2486_v29  ;;  %v2036_v40 = vpop.permute.xlu0 %2035  ;;  %v1723_v5 = vsel %vm1595_vm1, 1.0, %v955_v59  ;;  %vm832_vm11 = vcmp.eq.s32.totalorder %v10057_v4, %v14220_v50  ;;  %v14221_v29 = vld [vmem:[#allocation93_spill] sm:$0xff]  ;;  %v1725_v32 = vsel %vm1597_vm7, 1.0, %v957_v38  ;;  %v14222_v7 = vld [vmem:[#allocation96_spill] sm:$0xff]  ;;  %v1925_v52 = vadd.s32 22, %v8674_v12 }
 0x2c2   : > { %vm2360_vm13 = vcmp.eq.s32.totalorder %v10057_v4, %v2036_v40  ;;  %2230 = vperm.xlu1 %8035, %v1913_v54   ;;  %2227 = vperm.xlu0 %8042, %v1912_v55   ;;  %vm2361_vm14 = vcmp.eq.s32.totalorder %v10057_v4, %v2039_v58  ;;  %v1724_v54 = vsel %vm1596_vm2, 1.0, %v956_v22  ;;  %vm831_vm12 = vcmp.eq.s32.totalorder %v10057_v4, %v14221_v29  ;;  %v8672_v58 = vld [vmem:[%s8865_s19 + $0x340] sm:$0xff] }
 0x2c3   : > { %7598 = vmatprep.mubr.f32.mxu0 %v2487_v36  ;;  %v2488_v27 = vsel %vm2360_vm13, 1.0, %v1720_v39  ;;  %v2489_v57 = vsel %vm2361_vm14, 1.0, %v1721_v49  ;;  %vm1599_vm13 = vcmp.eq.s32.totalorder %v10057_v4, %v9772_v19  ;;  %vm1600_vm14 = vcmp.eq.s32.totalorder %v10057_v4, %v9774_v16  ;;  %v14223_v39 = vld [vmem:[#allocation97_spill] sm:$0xff]  ;;  %v14228_v60 = vld [vmem:[#allocation108_spill] sm:$0xff] }
 0x2c4   : > { %v960_v18 = vsel %vm832_vm11, 1.0, %v14187_v10  ;;  %v1923_v40 = vadd.s32 22, %v8672_v58  ;;  %vm834_vm1 = vcmp.eq.s32.totalorder %v10057_v4, %v14222_v7  ;;  %vm833_vm2 = vcmp.eq.s32.totalorder %v10057_v4, %v14223_v39  ;;  %v14231_v58 = vld [vmem:[#allocation113_spill] sm:$0xff]  ;;  %v8681_v12 = vld [vmem:[%s8865_s19 + $0x380] sm:$0xff] }
 0x2c5   : > { %v2045_v53 = vpop.permute.xlu1 %2044  ;;  %7599 = vmatmul.mubr.f32.gmra.mrb[28].mxu0 %v2488_v27  ;;  %v2042_v48 = vpop.permute.xlu0 %2041  ;;  %v1728_v44 = vsel %vm1600_vm14, 1.0, %v960_v18  ;;  %v962_v16 = vsel %vm834_vm1, 1.0, %v14187_v10  ;;  %vm837_vm14 = vcmp.eq.s32.totalorder %v10057_v4, %v14227_v43 }
 0x2c6   : > { %vm2362_vm3 = vcmp.eq.s32.totalorder %v10057_v4, %v2042_v48  ;;  %2236 = vperm.xlu1 %8035, %v1915_v3   ;;  %2233 = vperm.xlu0 %8042, %v1914_v41   ;;  %vm2363_vm4 = vcmp.eq.s32.totalorder %v10057_v4, %v2045_v53  ;;  %v1726_v41 = vsel %vm1598_vm8, 1.0, %v958_v20  ;;  %v959_v3 = vsel %vm831_vm12, 1.0, %v14187_v10  ;;  %v14224_v53 = vld [vmem:[#allocation100_spill] sm:$0xff]  ;;  %v14225_v48 = vld [vmem:[#allocation101_spill] sm:$0xff] }
 0x2c7   : > { %7601 = vmatprep.mubr.f32.mxu0 %v2489_v57  ;;  %v2490_v25 = vsel %vm2362_vm3, 1.0, %v1722_v0  ;;  %v2491_v62 = vsel %vm2363_vm4, 1.0, %v1723_v5  ;;  %v1727_v24 = vsel %vm1599_vm13, 1.0, %v959_v3  ;;  %vm1601_vm3 = vcmp.eq.s32.totalorder %v10057_v4, %v9784_v14  ;;  %v8679_v3 = vld [vmem:[%s8865_s19 + $0x378] sm:$0xff] }
 0x2c8   : > { %vm1602_vm4 = vcmp.eq.s32.totalorder %v10057_v4, %v9786_v15  ;;  %vm836_vm7 = vcmp.eq.s32.totalorder %v10057_v4, %v14224_v53  ;;  %vm835_vm8 = vcmp.eq.s32.totalorder %v10057_v4, %v14225_v48  ;;  %vm838_vm13 = vcmp.eq.s32.totalorder %v10057_v4, %v14226_v28  ;;  %v14235_v48 = vld [vmem:[#allocation115_spill] sm:$0xff] }
 0x2c9   : > { %v2051_v42 = vpop.permute.xlu1 %2050  ;;  %7602 = vmatmul.mubr.f32.gmra.mrb[30].mxu0 %v2490_v25  ;;  %v2048_v55 = vpop.permute.xlu0 %2047  ;;  %v1730_v25 = vsel %vm1602_vm4, 1.0, %v962_v16  ;;  %v964_v15 = vsel %vm836_vm7, 1.0, %v14187_v10  ;;  %v963_v59 = vsel %vm835_vm8, 1.0, %v14187_v10  ;;  %v966_v20 = vsel %vm838_vm13, 1.0, %v14187_v10  ;;  %v14233_v16 = vld [vmem:[#allocation19_spill] sm:$0xff] }
 0x2ca   : > { %vm2364_vm9 = vcmp.eq.s32.totalorder %v10057_v4, %v2048_v55  ;;  %2242 = vperm.xlu1 %8035, %v1917_v8   ;;  %2239 = vperm.xlu0 %8042, %v1916_v33   ;;  %vm2365_vm10 = vcmp.eq.s32.totalorder %v10057_v4, %v2051_v42  ;;  %v961_v33 = vsel %vm833_vm2, 1.0, %v14187_v10  ;;  %v1924_v8 = vadd.s32 22, %v8673_v30 }
 0x2cb   : > { %7604 = vmatprep.mubr.f32.mxu0 %v2491_v62  ;;  %v2492_v23 = vsel %vm2364_vm9, 1.0, %v1724_v54  ;;  %v2493_v2 = vsel %vm2365_vm10, 1.0, %v1725_v32  ;;  %v1729_v57 = vsel %vm1601_vm3, 1.0, %v961_v33  ;;  %vm1603_vm9 = vcmp.eq.s32.totalorder %v10057_v4, %v9796_v17  ;;  %v8677_v17 = vld [vmem:[%s8865_s19 + $0x368] sm:$0xff]  ;;  %v3443_v32 = vld [vmem:[%s13637_s3] sm:$0xff] }
 0x2cc   : > { %vm1604_vm10 = vcmp.eq.s32.totalorder %v10057_v4, %v9798_v6  ;;  %v1731_v5 = vsel %vm1603_vm9, 1.0, %v963_v59  ;;  %v965_v38 = vsel %vm837_vm14, 1.0, %v14187_v10  ;;  %vm840_vm3 = vcmp.eq.s32.totalorder %v10057_v4, %v14228_v60 }
 0x2cd   : > { %v2057_v26 = vpop.permute.xlu1 %2056  ;;  %7605 = vmatmul.mubr.f32.gmra.mrb[32].mxu0 %v2492_v23  ;;  %v2054_v35 = vpop.permute.xlu0 %2053  ;;  %v1732_v54 = vsel %vm1604_vm10, 1.0, %v964_v15  ;;  %v1928_v23 = vadd.s32 22, %v8677_v17  ;;  %v1930_v11 = vadd.s32 22, %v8679_v3  ;;  %vm841_vm10 = vcmp.eq.s32.totalorder %v10057_v4, %v14231_v58  ;;  %v14247_v3 = vld [vmem:[#allocation31_spill] sm:$0xff] }
 0x2ce   : > { %vm2366_vm15 = vcmp.eq.s32.totalorder %v10057_v4, %v2054_v35  ;;  %2248 = vperm.xlu1 %8035, %v1919_v31   ;;  %2245 = vperm.xlu0 %8042, %v1918_v37   ;;  %vm2367_vm0 = vcmp.eq.s32.totalorder %v10057_v4, %v2057_v26  ;;  %v1926_v37 = vadd.s32 22, %v8675_v61  ;;  %v1927_v31 = vadd.s32 22, %v8676_v34  ;;  %v14238_v61 = vld [vmem:[#allocation23_spill] sm:$0xff] }
 0x2cf   : > { %7607 = vmatprep.mubr.f32.mxu0 %v2493_v2  ;;  %v2494_v21 = vsel %vm2366_vm15, 1.0, %v1726_v41  ;;  %v2495_v45 = vsel %vm2367_vm0, 1.0, %v1727_v24  ;;  %vm1605_vm15 = vcmp.eq.s32.totalorder %v10057_v4, %v9808_v13  ;;  %vm1606_vm0 = vcmp.eq.s32.totalorder %v10057_v4, %v9810_v1  ;;  %v3444_v41 = vld [vmem:[%s13637_s3 + $0x8] sm:$0xff]  ;;  %v3446_v24 = vld [vmem:[%s13637_s3 + $0x18] sm:$0xff] }
 0x2d0   : > { %v1733_v26 = vsel %vm1605_vm15, 1.0, %v965_v38  ;;  %v1734_v35 = vsel %vm1606_vm0, 1.0, %v966_v20  ;;  %v7980_v1 = vpack.c.bf16 %v3444_v41, %v3443_v32  ;;  %vm1610_vm13 = vcmp.eq.s32.totalorder %v10057_v4, %v14233_v16  ;;  %v14242_v38 = vld [vmem:[#allocation27_spill] sm:$0xff]  ;;  %v14245_v32 = vld [vmem:[#allocation30_spill] sm:$0xff] }
 0x2d1   : > { %v2063_v36 = vpop.permute.xlu1 %2062  ;;  %7608 = vmatmul.mubr.f32.gmra.mrb[34].mxu0 %v2494_v21  ;;  %v2060_v27 = vpop.permute.xlu0 %2059  ;;  %v968_v21 = vsel %vm840_vm3, 1.0, %v14187_v10  ;;  %v969_v30 = vsel %vm841_vm10, 1.0, %v14187_v10  ;;  %vm844_vm0 = vcmp.eq.s32.totalorder %v10057_v4, %v14235_v48  ;;  %vm1614_vm10 = vcmp.eq.s32.totalorder %v10057_v4, %v14242_v38  ;;  %v14251_v16 = vld [vmem:[#allocation35_spill] sm:$0xff]  ;;  %v14253_v48 = vld [vmem:[#allocation126_spill] sm:$0xff] }
 0x2d2   : > { %vm2368_vm5 = vcmp.eq.s32.totalorder %v10057_v4, %v2060_v27  ;;  %2254 = vperm.xlu1 %8035, %v1921_v51   ;;  %2251 = vperm.xlu0 %8042, %v1920_v47   ;;  %vm2369_vm6 = vcmp.eq.s32.totalorder %v10057_v4, %v2063_v36  ;;  %v8678_v47 = vld [vmem:[%s8865_s19 + $0x370] sm:$0xff]  ;;  %v972_v43 = vsel %vm844_vm0, 1.0, %v14187_v10  ;;  %v14243_v60 = vmov 3  }
 0x2d3   : > { %7610 = vmatprep.mubr.f32.mxu0 %v2495_v45  ;;  %v2496_v19 = vsel %vm2368_vm5, 1.0, %v1728_v44  ;;  %v2497_v22 = vsel %vm2369_vm6, 1.0, %v1729_v57  ;;  %v1929_v46 = vadd.s32 22, %v8678_v47  ;;  %v14229_v51 = vld [vmem:[#allocation109_spill] sm:$0xff]  ;;  %vm1607_vm5 = vcmp.eq.s32.totalorder %v10057_v4, %v9820_v9  ;;  %7981 = vmatprep.subr.bf16.mxu1 %v7980_v1  ;;  %v14232_v44 = vld [vmem:[#allocation18_spill] sm:$0xff] }
 0x2d4   : > { %vm839_vm4 = vcmp.eq.s32.totalorder %v10057_v4, %v14229_v51  ;;  %vm1608_vm6 = vcmp.eq.s32.totalorder %v10057_v4, %v9822_v63  ;;  %7983 = vmatpush3.bf16.msra.mxu1 %v7980_v1  ;;  %v3445_v27 = vld [vmem:[%s13637_s3 + $0x10] sm:$0xff]  ;;  %v8680_v45 = vld [vmem:[%s8865_s19 + $0x388] sm:$0xff]  ;;  %vm1616_vm0 = vcmp.eq.s32.totalorder %v10057_v4, %v14247_v3 }
 0x2d5   : > { %v2069_v49 = vpop.permute.xlu1 %2068  ;;  %7611 = vmatmul.mubr.f32.gmra.mrb[36].mxu0 %v2496_v19  ;;  %v2066_v0 = vpop.permute.xlu0 %2065  ;;  %v967_v18 = vsel %vm839_vm4, 1.0, %v14187_v10  ;;  %v1736_v36 = vsel %vm1608_vm6, 1.0, %v968_v21  ;;  %v7984_v9 = vpack.c.bf16 %v3446_v24, %v3445_v27  ;;  %v1164_v19 = vadd.s32 10, %v8680_v45  ;;  %v14244_v51 = vld [vmem:[#allocation121_spill] sm:$0xff] }
 0x2d6   : > { %vm2370_vm11 = vcmp.eq.s32.totalorder %v10057_v4, %v2066_v0  ;;  %2260 = vperm.xlu1 %8035, %v1923_v40   ;;  %2257 = vperm.xlu0 %8042, %v1922_v56   ;;  %vm2371_vm12 = vcmp.eq.s32.totalorder %v10057_v4, %v2069_v49  ;;  %v14230_v56 = vld [vmem:[#allocation112_spill] sm:$0xff]  ;;  %v1735_v39 = vsel %vm1607_vm5, 1.0, %v967_v18  ;;  %v14236_v49 = vld [vmem:[#allocation22_spill] sm:$0xff]  ;;  %vm1612_vm4 = vcmp.eq.s32.totalorder %v10057_v4, %v14238_v61  ;;  %v14255_v61 = vld [vmem:[#allocation39_spill] sm:$0xff] }
 0x2d7   : > { %7613 = vmatprep.mubr.f32.mxu0 %v2497_v22  ;;  %v2498_v14 = vsel %vm2370_vm11, 1.0, %v1730_v25  ;;  %v2499_v62 = vsel %vm2371_vm12, 1.0, %v1731_v5  ;;  %vm842_vm9 = vcmp.eq.s32.totalorder %v10057_v4, %v14230_v56  ;;  %vm1609_vm11 = vcmp.eq.s32.totalorder %v10057_v4, %v14232_v44  ;;  %7985 = vmatprep.subr.bf16.mxu1 %v7984_v9  ;;  %v14240_v5 = vld [vmem:[#allocation26_spill] sm:$0xff] }
 0x2d8   : > { %v970_v53 = vsel %vm842_vm9, 1.0, %v14187_v10  ;;  %v1737_v25 = vsel %vm1609_vm11, 1.0, %v969_v30  ;;  %7987 = vmatpush3.bf16.msra.mxu1 %v7984_v9  ;;  %v14237_v22 = vmov 2   ;;  %v1932_v34 = vadd.s32 22, %v8680_v45  ;;  %v8684_v56 = vld [vmem:[%s8865_s19 + $0x390] sm:$0xff]  ;;  %v14249_v9 = vld [vmem:[#allocation123_spill] sm:$0xff] }
 0x2d9   : > { %v2075_v42 = vpop.permute.xlu1 %2074  ;;  %7614 = vmatmul.mubr.f32.gmra.mrb[38].mxu0 %v2498_v14  ;;  %v2072_v55 = vpop.permute.xlu0 %2071  ;;  %v1738_v15 = vsel %vm1610_vm13, 1.0, %v970_v53  ;;  %vm1613_vm6 = vcmp.eq.s32.totalorder %v10057_v4, %v14240_v5  ;;  %vm847_vm11 = vcmp.eq.s32.totalorder %v10057_v4, %v14244_v51  ;;  %v1933_v58 = vadd.s32 22, %v8684_v56  ;;  %v14250_v45 = vld [vmem:[#allocation34_spill] sm:$0xff]  ;;  %v14252_v53 = vld [vmem:[#allocation125_spill] sm:$0xff] }
 0x2da   : > { %vm2372_vm1 = vcmp.eq.s32.totalorder %v10057_v4, %v2072_v55  ;;  %2266 = vperm.xlu1 %8035, %v1925_v52   ;;  %2263 = vperm.xlu0 %8042, %v1924_v8   ;;  %vm2373_vm2 = vcmp.eq.s32.totalorder %v10057_v4, %v2075_v42  ;;  %v14234_v8 = vld [vmem:[#allocation116_spill] sm:$0xff]  ;;  %v1931_v52 = vadd.s32 22, %v8681_v12  ;;  %v8682_v42 = vld [vmem:[%s8865_s19 + $0x398] sm:$0xff]  ;;  %v975_v18 = vsel %vm847_vm11, 1.0, %v14187_v10 }
 0x2db   : > { %7616 = vmatprep.mubr.f32.mxu0 %v2499_v62  ;;  %v2500_v6 = vsel %vm2372_vm1, 1.0, %v1732_v54  ;;  %v2501_v13 = vsel %vm2373_vm2, 1.0, %v1733_v26  ;;  %vm843_vm15 = vcmp.eq.s32.totalorder %v10057_v4, %v14234_v8  ;;  %vm1611_vm1 = vcmp.eq.s32.totalorder %v10057_v4, %v14236_v49  ;;  %v8683_v26 = vld [vmem:[%s8865_s19 + $0x3a0] sm:$0xff]  ;;  %v14258_v5 = vld [vmem:[#allocation42_spill] sm:$0xff] }
 0x2dc   : > { %v971_v59 = vsel %vm843_vm15, 1.0, %v14187_v10  ;;  %v1934_v55 = vadd.s32 22, %v8682_v42  ;;  %v10839_v8 = vld [vmem:[%s8865_s19 + $0x3c0] sm:$0xff]  ;;  %vm1620_vm11 = vcmp.eq.s32.totalorder %v10057_v4, %v14255_v61 }
 0x2dd   : > { %v2081_v50 = vpop.permute.xlu1 %2080  ;;  %7617 = vmatmul.mubr.f32.gmra.mrb[40].mxu0 %v2500_v6  ;;  %v2078_v29 = vpop.permute.xlu0 %2077  ;;  %v1739_v28 = vsel %vm1611_vm1, 1.0, %v971_v59  ;;  %v1740_v6 = vsel %vm1612_vm4, 1.0, %v972_v43  ;;  %v1939_v12 = vadd.s32 22, %v10839_v8  ;;  %v1167_v59 = vadd.s32 10, %v8683_v26 }
 0x2de   : > { %vm2374_vm7 = vcmp.eq.s32.totalorder %v10057_v4, %v2078_v29  ;;  %2272 = vperm.xlu1 %8035, %v1927_v31   ;;  %2269 = vperm.xlu0 %8042, %v1926_v37   ;;  %vm2375_vm8 = vcmp.eq.s32.totalorder %v10057_v4, %v2081_v50  ;;  %v14239_v31 = vld [vmem:[#allocation119_spill] sm:$0xff] }
 0x2df   : > { %7619 = vmatprep.mubr.f32.mxu0 %v2501_v13  ;;  %v2502_v2 = vsel %vm2374_vm7, 1.0, %v1734_v35  ;;  %v2503_v63 = vsel %vm2375_vm8, 1.0, %v1735_v39  ;;  %vm845_vm5 = vcmp.eq.s32.totalorder %v10057_v4, %v14239_v31  ;;  %v1935_v35 = vadd.s32 22, %v8683_v26  ;;  %v14248_v39 = vld [vmem:[#allocation124_spill] sm:$0xff] }
 0x2e0   : > { %v973_v20 = vsel %vm845_vm5, 1.0, %v14187_v10  ;;  %vm849_vm1 = vcmp.eq.s32.totalorder %v10057_v4, %v14248_v39  ;;  %vm1618_vm5 = vcmp.eq.s32.totalorder %v10057_v4, %v14251_v16  ;;  %v14256_v31 = vld [vmem:[#allocation128_spill] sm:$0xff] }
 0x2e1   : > { %v2087_v40 = vpop.permute.xlu1 %2086  ;;  %7620 = vmatmul.mubr.f32.gmra.mrb[42].mxu0 %v2502_v2  ;;  %v2084_v7 = vpop.permute.xlu0 %2083  ;;  %v1741_v50 = vsel %vm1613_vm6, 1.0, %v973_v20  ;;  %v14246_v2 = vld [vmem:[#allocation120_spill] sm:$0xff]  ;;  %v977_v30 = vsel %vm849_vm1, 1.0, %v14187_v10 }
 0x2e2   : > { %vm2376_vm12 = vcmp.eq.s32.totalorder %v10057_v4, %v2084_v7  ;;  %2278 = vperm.xlu1 %8035, %v1929_v46   ;;  %2275 = vperm.xlu0 %8042, %v1928_v23   ;;  %vm2377_vm14 = vcmp.eq.s32.totalorder %v10057_v4, %v2087_v40  ;;  %v14241_v23 = vld [vmem:[#allocation118_spill] sm:$0xff]  ;;  %v1166_v46 = vadd.s32 10, %v8682_v42  ;;  %vm848_vm13 = vcmp.eq.s32.totalorder %v10057_v4, %v14246_v2  ;;  %v8688_v20 = vld [vmem:[%s8865_s19 + $0x3a8] sm:$0xff] }
 0x2e3   : > { %7622 = vmatprep.mubr.f32.mxu0 %v2503_v63  ;;  %v2504_v33 = vsel %vm2376_vm12, 1.0, %v1736_v36  ;;  %v2505_v14 = vsel %vm2377_vm14, 1.0, %v1737_v25  ;;  %vm846_vm7 = vcmp.eq.s32.totalorder %v10057_v4, %v14241_v23  ;;  %vm1615_vm12 = vcmp.eq.s32.totalorder %v10057_v4, %v14245_v32  ;;  %v10818_v36 = vld [vmem:[%s8865_s19 + $0x3b8] sm:$0xff] }
 0x2e4   : > { %v974_v29 = vsel %vm846_vm7, 1.0, %v14187_v10  ;;  %v1743_v40 = vsel %vm1615_vm12, 1.0, %v975_v18  ;;  %v976_v7 = vsel %vm848_vm13, 1.0, %v14187_v10  ;;  %v1938_v27 = vadd.s32 22, %v10818_v36  ;;  %v14254_v25 = vld [vmem:[#allocation38_spill] sm:$0xff] }
 0x2e5   : > { %v2093_v0 = vpop.permute.xlu1 %2092  ;;  %7623 = vmatmul.mubr.f32.gmra.mrb[44].mxu0 %v2504_v33  ;;  %v2090_v57 = vpop.permute.xlu0 %2089  ;;  %v1742_v21 = vsel %vm1614_vm10, 1.0, %v974_v29  ;;  %vm852_vm7 = vcmp.eq.s32.totalorder %v10057_v4, %v14252_v53  ;;  %vm853_vm13 = vcmp.eq.s32.totalorder %v10057_v4, %v14256_v31  ;;  %v1168_v38 = vadd.s32 10, %v8688_v20 }
 0x2e6   : > { %vm2379_vm2 = vcmp.eq.s32.totalorder %v10057_v4, %v2093_v0  ;;  %vm2378_vm3 = vcmp.eq.s32.totalorder %v10057_v4, %v2090_v57  ;;  %8036 = vset.pattern.permute.xlu1 %v14237_v22  ;;  %2281 = vperm.xlu0 %8042, %v1930_v11   ;;  %v980_v42 = vsel %vm852_vm7, 1.0, %v14187_v10 }
 0x2e7   : > { %7625 = vmatprep.mubr.f32.mxu0 %v2505_v14  ;;  %1519 = vperm.xlu1 %8036, %v1164_v19   ;;  %v2506_v37 = vsel %vm2378_vm3, 1.0, %v1738_v15  ;;  %v2507_v17 = vsel %vm2379_vm2, 1.0, %v1739_v28  ;;  %vm850_vm2 = vcmp.eq.s32.totalorder %v10057_v4, %v14249_v9  ;;  %vm1617_vm3 = vcmp.eq.s32.totalorder %v10057_v4, %v14250_v45  ;;  %v10869_v28 = vld [vmem:[%s8865_s19 + $0x3d8] sm:$0xff] }
 0x2e8   : > { %v1744_v19 = vsel %vm1616_vm0, 1.0, %v976_v7  ;;  %v1745_v57 = vsel %vm1617_vm3, 1.0, %v977_v30  ;;  %v1942_v43 = vadd.s32 22, %v10869_v28  ;;  %v14266_v9 = vld [vmem:[#allocation131_spill] sm:$0xff] }
 0x2e9   : > { %v2099_v54 = vpop.permute.xlu1 %2098  ;;  %7626 = vmatmul.mubr.f32.gmra.mrb[46].mxu0 %v2506_v37  ;;  %v2096_v62 = vpop.permute.xlu0 %2095  ;;  %v14267_v30 = vld [vmem:[#allocation51_spill] sm:$0xff] }
 0x2ea   : > { %vm2381_vm8 = vcmp.eq.s32.totalorder %v10057_v4, %v2099_v54  ;;  %vm2380_vm9 = vcmp.eq.s32.totalorder %v10057_v4, %v2096_v62  ;;  %2284 = vperm.xlu0 %8042, %v1931_v52   ;;  %7628 = vmatprep.mubr.f32.mxu0 %v2507_v17  ;;  %v978_v52 = vsel %vm850_vm2, 1.0, %v14187_v10 }
 0x2eb   : > { %8037 = vset.pattern.permute.xlu1 %v14243_v60  ;;  %v2508_v47 = vsel %vm2380_vm9, 1.0, %v1740_v6  ;;  %v2509_v1 = vsel %vm2381_vm8, 1.0, %v1741_v50  ;;  %vm851_vm8 = vcmp.eq.s32.totalorder %v10057_v4, %v14253_v48  ;;  %vm1619_vm9 = vcmp.eq.s32.totalorder %v10057_v4, %v14254_v25  ;;  %v14260_v50 = vld [vmem:[#allocation130_spill] sm:$0xff] }
 0x2ec   : > { %2287 = vperm.xlu1 %8037, %v1932_v34   ;;  %v1746_v15 = vsel %vm1618_vm5, 1.0, %v978_v52  ;;  %v979_v34 = vsel %vm851_vm8, 1.0, %v14187_v10  ;;  %v1748_v6 = vsel %vm1620_vm11, 1.0, %v980_v42  ;;  %vm855_vm3 = vcmp.eq.s32.totalorder %v10057_v4, %v14260_v50  ;;  %v14268_v52 = vld [vmem:[#allocation134_spill] sm:$0xff] }
 0x2ed   : > { %v2105_v41 = vpop.permute.xlu1 %2104  ;;  %7629 = vmatmul.mubr.f32.gmra.mrb[48].mxu0 %v2508_v47  ;;  %v2102_v13 = vpop.permute.xlu0 %2101  ;;  %v1747_v17 = vsel %vm1619_vm9, 1.0, %v979_v34  ;;  %v981_v47 = vsel %vm853_vm13, 1.0, %v14187_v10  ;;  %v983_v3 = vsel %vm855_vm3, 1.0, %v14187_v10  ;;  %vm858_vm11 = vcmp.eq.s32.totalorder %v10057_v4, %v14266_v9  ;;  %v14271_v34 = vld [vmem:[#allocation55_spill] sm:$0xff] }
 0x2ee   : > { %vm2383_vm14 = vcmp.eq.s32.totalorder %v10057_v4, %v2105_v41  ;;  %vm2382_vm15 = vcmp.eq.s32.totalorder %v10057_v4, %v2102_v13  ;;  %2293 = vperm.xlu0 %8042, %v1934_v55   ;;  %7631 = vmatprep.mubr.f32.mxu0 %v2509_v1  ;;  %v14257_v55 = vld [vmem:[#allocation127_spill] sm:$0xff]  ;;  %v14261_v41 = vld [vmem:[#allocation46_spill] sm:$0xff]  ;;  %v1170_v48 = vadd.s32 10, %v10818_v36 }
 0x2ef   : > { %v2510_v11 = vsel %vm2382_vm15, 1.0, %v1742_v21  ;;  %v2511_v63 = vsel %vm2383_vm14, 1.0, %v1743_v40  ;;  %vm854_vm14 = vcmp.eq.s32.totalorder %v10057_v4, %v14257_v55  ;;  %vm1621_vm15 = vcmp.eq.s32.totalorder %v10057_v4, %v14258_v5  ;;  %v14262_v21 = vld [vmem:[#allocation129_spill] sm:$0xff]  ;;  %v14264_v40 = vld [vmem:[#allocation132_spill] sm:$0xff]  ;;  %v11017_v50 = vld [vmem:[%s8865_s19 + $0x3f8] sm:$0xff] }
 0x2f0   : > { %8038 = vset.pattern.permute.xlu1 %v14237_v22  ;;  %v1749_v29 = vsel %vm1621_vm15, 1.0, %v981_v47  ;;  %v982_v26 = vsel %vm854_vm14, 1.0, %v14187_v10  ;;  %vm856_vm5 = vcmp.eq.s32.totalorder %v10057_v4, %v14262_v21  ;;  %vm857_vm9 = vcmp.eq.s32.totalorder %v10057_v4, %v14264_v40  ;;  %v8692_v55 = vld [vmem:[%s8865_s19 + $0x3b0] sm:$0xff]  ;;  %v14282_v9 = vld [vmem:[#allocation139_spill] sm:$0xff] }
 0x2f1   : > { %1525 = vperm.xlu1 %8038, %v1166_v46   ;;  %v2111_v24 = vpop.permute.xlu1 %2110  ;;  %7632 = vmatmul.mubr.f32.gmra.mrb[50].mxu0 %v2510_v11  ;;  %v2108_v44 = vpop.permute.xlu0 %2107  ;;  %v14259_v46 = vld [vmem:[#allocation43_spill] sm:$0xff]  ;;  %v984_v39 = vsel %vm856_vm5, 1.0, %v14187_v10  ;;  %vm1626_vm14 = vcmp.eq.s32.totalorder %v10057_v4, %v14267_v30  ;;  %vm859_vm15 = vcmp.eq.s32.totalorder %v10057_v4, %v14268_v52  ;;  %v1937_v5 = vadd.s32 22, %v8692_v55 }
 0x2f2   : > { %vm2384_vm4 = vcmp.eq.s32.totalorder %v10057_v4, %v2108_v44  ;;  %2296 = vperm.xlu0 %8042, %v1935_v35   ;;  %7634 = vmatprep.mubr.f32.mxu0 %v2511_v63  ;;  %vm2385_vm6 = vcmp.eq.s32.totalorder %v10057_v4, %v2111_v24  ;;  %vm1622_vm2 = vcmp.eq.s32.totalorder %v10057_v4, %v14259_v46  ;;  %v10908_v35 = vld [vmem:[%s8865_s19 + $0x3e0] sm:$0xff] }
 0x2f3   : > { %v2512_v33 = vsel %vm2384_vm4, 1.0, %v1744_v19  ;;  %v2513_v14 = vsel %vm2385_vm6, 1.0, %v1745_v57  ;;  %v1943_v32 = vadd.s32 22, %v10908_v35  ;;  %vm1623_vm4 = vcmp.eq.s32.totalorder %v10057_v4, %v14261_v41  ;;  %v14263_v11 = vld [vmem:[#allocation47_spill] sm:$0xff]  ;;  %v10946_v19 = vld [vmem:[%s8865_s19 + $0x3d0] sm:$0xff] }
 0x2f4   : > { %v1750_v18 = vsel %vm1622_vm2, 1.0, %v982_v26  ;;  %vm1624_vm8 = vcmp.eq.s32.totalorder %v10057_v4, %v14263_v11  ;;  %v1751_v7 = vsel %vm1623_vm4, 1.0, %v983_v3  ;;  %v1173_v16 = vadd.s32 10, %v10946_v19  ;;  %v14275_v46 = vld [vmem:[#allocation59_spill] sm:$0xff]  ;;  %v14276_v26 = vld [vmem:[#allocation138_spill] sm:$0xff] }
 0x2f5   : > { %8039 = vset.pattern.permute.xlu1 %v14243_v60  ;;  %v2117_v49 = vpop.permute.xlu1 %2116  ;;  %7635 = vmatmul.mubr.f32.gmra.mrb[52].mxu0 %v2512_v33  ;;  %v2114_v0 = vpop.permute.xlu0 %2113  ;;  %v1752_v45 = vsel %vm1624_vm8, 1.0, %v984_v39  ;;  %v985_v33 = vsel %vm857_vm9, 1.0, %v14187_v10  ;;  %vm1628_vm4 = vcmp.eq.s32.totalorder %v10057_v4, %v14271_v34  ;;  %v1171_v11 = vadd.s32 10, %v10839_v8  ;;  %v14288_v34 = vld [vmem:[#allocation71_spill] sm:$0xff] }
 0x2f6   : > { %vm2386_vm10 = vcmp.eq.s32.totalorder %v10057_v4, %v2114_v0  ;;  %2290 = vperm.xlu1 %8039, %v1933_v58   ;;  %2305 = vperm.xlu0 %8042, %v1938_v27   ;;  %vm2387_vm12 = vcmp.eq.s32.totalorder %v10057_v4, %v2117_v49  ;;  %v1936_v58 = vadd.s32 22, %v8688_v20  ;;  %v14265_v27 = vld [vmem:[#allocation50_spill] sm:$0xff]  ;;  %v986_v49 = vsel %vm858_vm11, 1.0, %v14187_v10  ;;  %v14274_v20 = vld [vmem:[#allocation135_spill] sm:$0xff] }
 0x2f7   : > { %7637 = vmatprep.mubr.f32.mxu0 %v2513_v14  ;;  %v2514_v37 = vsel %vm2386_vm10, 1.0, %v1746_v15  ;;  %v2515_v23 = vsel %vm2387_vm12, 1.0, %v1747_v17  ;;  %vm1625_vm10 = vcmp.eq.s32.totalorder %v10057_v4, %v14265_v27  ;;  %v14269_v0 = vld [vmem:[#allocation54_spill] sm:$0xff]  ;;  %v14270_v15 = vld [vmem:[#allocation133_spill] sm:$0xff]  ;;  %v1754_v36 = vsel %vm1626_vm14, 1.0, %v986_v49 }
 0x2f8   : > { %v1753_v53 = vsel %vm1625_vm10, 1.0, %v985_v33  ;;  %vm1630_vm10 = vcmp.eq.s32.totalorder %v10057_v4, %v14275_v46  ;;  %vm863_vm11 = vcmp.eq.s32.totalorder %v10057_v4, %v14276_v26  ;;  %v14281_v27 = vld [vmem:[#allocation66_spill] sm:$0xff]  ;;  %v14285_v49 = vmov 0  }
 0x2f9   : > { %v2123_v54 = vpop.permute.xlu1 %2122  ;;  %7638 = vmatmul.mubr.f32.gmra.mrb[54].mxu0 %v2514_v37  ;;  %v2120_v62 = vpop.permute.xlu0 %2119  ;;  %v987_v37 = vsel %vm859_vm15, 1.0, %v14187_v10  ;;  %v1174_v26 = vadd.s32 10, %v10869_v28 }
 0x2fa   : > { %vm2389_vm0 = vcmp.eq.s32.totalorder %v10057_v4, %v2123_v54  ;;  %vm2388_vm1 = vcmp.eq.s32.totalorder %v10057_v4, %v2120_v62  ;;  %8040 = vset.pattern.permute.xlu1 %v14237_v22  ;;  %2308 = vperm.xlu0 %8042, %v1939_v12   ;;  %v14273_v62 = vld [vmem:[#allocation58_spill] sm:$0xff] }
 0x2fb   : > { %7640 = vmatprep.mubr.f32.mxu0 %v2515_v23  ;;  %1528 = vperm.xlu1 %8040, %v1167_v59   ;;  %v2516_v51 = vsel %vm2388_vm1, 1.0, %v1748_v6  ;;  %v2517_v2 = vsel %vm2389_vm0, 1.0, %v1749_v29  ;;  %vm1627_vm0 = vcmp.eq.s32.totalorder %v10057_v4, %v14269_v0  ;;  %vm860_vm1 = vcmp.eq.s32.totalorder %v10057_v4, %v14270_v15  ;;  %v10979_v59 = vld [vmem:[%s8865_s19 + $0x3f0] sm:$0xff] }
 0x2fc   : > { %v1177_v61 = vadd.s32 10, %v10979_v59  ;;  %v1755_v42 = vsel %vm1627_vm0, 1.0, %v987_v37  ;;  %v988_v54 = vsel %vm860_vm1, 1.0, %v14187_v10  ;;  %v1946_v29 = vadd.s32 22, %v11017_v50 }
 0x2fd   : > { %v2129_v13 = vpop.permute.xlu1 %2128  ;;  %7641 = vmatmul.mubr.f32.gmra.mrb[56].mxu0 %v2516_v51  ;;  %v2126_v1 = vpop.permute.xlu0 %2125 }
 0x2fe   : > { %vm2391_vm6 = vcmp.eq.s32.totalorder %v10057_v4, %v2129_v13  ;;  %vm2390_vm7 = vcmp.eq.s32.totalorder %v10057_v4, %v2126_v1  ;;  %2317 = vperm.xlu0 %8042, %v1942_v43   ;;  %7643 = vmatprep.mubr.f32.mxu0 %v2517_v2  ;;  %v14272_v43 = vld [vmem:[#allocation136_spill] sm:$0xff]  ;;  %v14277_v13 = vld [vmem:[#allocation62_spill] sm:$0xff] }
 0x2ff   : > { %1531 = vperm.xlu1 %8040, %v1168_v38   ;;  %v2518_v56 = vsel %vm2390_vm7, 1.0, %v1750_v18  ;;  %v2519_v63 = vsel %vm2391_vm6, 1.0, %v1751_v7  ;;  %vm861_vm5 = vcmp.eq.s32.totalorder %v10057_v4, %v14272_v43  ;;  %vm1629_vm6 = vcmp.eq.s32.totalorder %v10057_v4, %v14273_v62  ;;  %v14278_v18 = vld [vmem:[#allocation137_spill] sm:$0xff]  ;;  %v14280_v7 = vld [vmem:[#allocation140_spill] sm:$0xff] }
 0x300   : > { %vm862_vm7 = vcmp.eq.s32.totalorder %v10057_v4, %v14274_v20  ;;  %v1756_v38 = vsel %vm1628_vm4, 1.0, %v988_v54  ;;  %v989_v47 = vsel %vm861_vm5, 1.0, %v14187_v10  ;;  %vm865_vm1 = vcmp.eq.s32.totalorder %v10057_v4, %v14280_v7  ;;  %v14290_v54 = vld [vmem:[#allocation74_spill] sm:$0xff] }
 0x301   : > { %v2135_v24 = vpop.permute.xlu1 %2134  ;;  %7644 = vmatmul.mubr.f32.gmra.mrb[58].mxu0 %v2518_v56  ;;  %v2132_v44 = vpop.permute.xlu0 %2131  ;;  %v990_v41 = vsel %vm862_vm7, 1.0, %v14187_v10  ;;  %v991_v56 = vsel %vm863_vm11, 1.0, %v14187_v10  ;;  %v993_v30 = vsel %vm865_vm1, 1.0, %v14187_v10 }
 0x302   : > { %vm2393_vm12 = vcmp.eq.s32.totalorder %v10057_v4, %v2135_v24  ;;  %vm2392_vm13 = vcmp.eq.s32.totalorder %v10057_v4, %v2132_v44  ;;  %2320 = vperm.xlu0 %8042, %v1943_v32   ;;  %7646 = vmatprep.mubr.f32.mxu0 %v2519_v63  ;;  %v1757_v32 = vsel %vm1629_vm6, 1.0, %v989_v47  ;;  %v1758_v3 = vsel %vm1630_vm10, 1.0, %v990_v41  ;;  %v14292_v47 = vld [vmem:[#allocation75_spill] sm:$0xff]  ;;  %v14294_v41 = vld [vmem:[#allocation78_spill] sm:$0xff] }
 0x303   : > { %8041 = vset.pattern.permute.xlu1 %v14243_v60  ;;  %v2520_v12 = vsel %vm2392_vm13, 1.0, %v1752_v45  ;;  %v2521_v14 = vsel %vm2393_vm12, 1.0, %v1753_v53  ;;  %vm1631_vm12 = vcmp.eq.s32.totalorder %v10057_v4, %v14277_v13  ;;  %vm864_vm13 = vcmp.eq.s32.totalorder %v10057_v4, %v14278_v18  ;;  %v14284_v53 = vld [vmem:[#allocation142_spill] sm:$0xff] }
 0x304   : > { %2299 = vperm.xlu1 %8041, %v1936_v58   ;;  %v14279_v58 = vld [vmem:[#allocation63_spill] sm:$0xff]  ;;  %v1759_v39 = vsel %vm1631_vm12, 1.0, %v991_v56  ;;  %v992_v8 = vsel %vm864_vm13, 1.0, %v14187_v10  ;;  %vm867_vm7 = vcmp.eq.s32.totalorder %v10057_v4, %v14284_v53  ;;  %vm1636_vm12 = vcmp.eq.s32.totalorder %v10057_v4, %v14288_v34  ;;  %v14297_v56 = vld [vmem:[#allocation148_spill] sm:$0xff] }
 0x305   : > { %v2141_v57 = vpop.permute.xlu1 %2140  ;;  %7647 = vmatmul.mubr.f32.gmra.mrb[60].mxu0 %v2520_v12  ;;  %v2138_v25 = vpop.permute.xlu0 %2137  ;;  %vm1632_vm0 = vcmp.eq.s32.totalorder %v10057_v4, %v14279_v58  ;;  %v14283_v12 = vld [vmem:[#allocation67_spill] sm:$0xff]  ;;  %v995_v37 = vsel %vm867_vm7, 1.0, %v14187_v10 }
 0x306   : > { %vm2395_vm2 = vcmp.eq.s32.totalorder %v10057_v4, %v2141_v57  ;;  %vm2394_vm3 = vcmp.eq.s32.totalorder %v10057_v4, %v2138_v25  ;;  %8050 = vset.pattern.permute.xlu0 %v14237_v22  ;;  %7649 = vmatprep.mubr.f32.mxu0 %v2521_v14  ;;  %v1760_v45 = vsel %vm1632_vm0, 1.0, %v992_v8  ;;  %vm1634_vm6 = vcmp.eq.s32.totalorder %v10057_v4, %v14283_v12  ;;  %v14286_v57 = vld [vmem:[#allocation70_spill] sm:$0xff] }
 0x307   : > { %1546 = vperm.xlu0 %8050, %v1173_v16   ;;  %v2522_v31 = vsel %vm2394_vm3, 1.0, %v1754_v36  ;;  %v2523_v6 = vsel %vm2395_vm2, 1.0, %v1755_v42  ;;  %vm1633_vm2 = vcmp.eq.s32.totalorder %v10057_v4, %v14281_v27  ;;  %vm866_vm3 = vcmp.eq.s32.totalorder %v10057_v4, %v14282_v9  ;;  %v8694_v16 = vld [vmem:[%s8865_s19 + $0x3c8] sm:$0xff]  ;;  %v14300_v9 = vld [vmem:[#allocation83_spill] sm:$0xff]  ;;  %v14302_v12 = vld [vmem:[#allocation86_spill] sm:$0xff] }
 0x308   : > { %8043 = vset.pattern.permute.xlu1 %v14237_v22  ;;  %v1172_v33 = vadd.s32 10, %v8694_v16  ;;  %v994_v0 = vsel %vm866_vm3, 1.0, %v14187_v10  ;;  %v14287_v36 = vld [vmem:[#allocation141_spill] sm:$0xff]  ;;  %v1940_v43 = vadd.s32 22, %v8694_v16  ;;  %v14289_v42 = vld [vmem:[#allocation144_spill] sm:$0xff]  ;;  %v14301_v16 = vld [vmem:[#allocation150_spill] sm:$0xff] }
 0x309   : > { %1537 = vperm.xlu1 %8043, %v1170_v48   ;;  %v2147_v17 = vpop.permute.xlu1 %2146  ;;  %7650 = vmatmul.mubr.f32.gmra.mrb[62].mxu0 %v2522_v31  ;;  %v2144_v23 = vpop.permute.xlu0 %2143  ;;  %v1761_v48 = vsel %vm1633_vm2, 1.0, %v993_v30  ;;  %vm869_vm13 = vcmp.eq.s32.totalorder %v10057_v4, %v14289_v42  ;;  %vm1638_vm2 = vcmp.eq.s32.totalorder %v10057_v4, %v14292_v47  ;;  %v14307_v42 = vld [vmem:[#allocation151_spill] sm:$0xff]  ;;  %v14310_v47 = vld [vmem:[#allocation94_spill] sm:$0xff] }
 0x30a   : > { %vm2397_vm8 = vcmp.eq.s32.totalorder %v10057_v4, %v2147_v17  ;;  %vm2396_vm9 = vcmp.eq.s32.totalorder %v10057_v4, %v2144_v23  ;;  %7652 = vmatprep.mubr.f32.mxu0 %v2523_v6  ;;  %v14291_v6 = vld [vmem:[#allocation143_spill] sm:$0xff] }
 0x30b   : > { %1558 = vperm.xlu0 %8050, %v1177_v61   ;;  %v2524_v51 = vsel %vm2396_vm9, 1.0, %v1756_v38  ;;  %v2525_v21 = vsel %vm2397_vm8, 1.0, %v1757_v32  ;;  %vm1635_vm8 = vcmp.eq.s32.totalorder %v10057_v4, %v14286_v57  ;;  %vm868_vm9 = vcmp.eq.s32.totalorder %v10057_v4, %v14287_v36  ;;  %v14305_v36 = vld [vmem:[#allocation152_spill] sm:$0xff] }
 0x30c   : > { %v1762_v61 = vsel %vm1634_vm6, 1.0, %v994_v0  ;;  %v1763_v55 = vsel %vm1635_vm8, 1.0, %v995_v37  ;;  %v997_v38 = vsel %vm869_vm13, 1.0, %v14187_v10  ;;  %v1175_v57 = vadd.s32 10, %v10908_v35  ;;  %v14306_v35 = vld [vmem:[#allocation90_spill] sm:$0xff] }
 0x30d   : > { %8044 = vset.pattern.permute.xlu1 %v14243_v60  ;;  %v2153_v1 = vpop.permute.xlu1 %2152  ;;  %7653 = vmatmul.mubr.f32.gmra.mrb[64].mxu0 %v2524_v51  ;;  %v2150_v2 = vpop.permute.xlu0 %2149  ;;  %v14293_v51 = vld [vmem:[#allocation146_spill] sm:$0xff] }
 0x30e   : > { %vm2399_vm14 = vcmp.eq.s32.totalorder %v10057_v4, %v2153_v1  ;;  %vm2398_vm15 = vcmp.eq.s32.totalorder %v10057_v4, %v2150_v2  ;;  %2302 = vperm.xlu1 %8044, %v1937_v5   ;;  %7655 = vmatprep.mubr.f32.mxu0 %v2525_v21  ;;  %v996_v5 = vsel %vm868_vm9, 1.0, %v14187_v10  ;;  %vm871_vm3 = vcmp.eq.s32.totalorder %v10057_v4, %v14293_v51  ;;  %v14295_v21 = vld [vmem:[#allocation145_spill] sm:$0xff] }
 0x30f   : > { %v2526_v40 = vsel %vm2398_vm15, 1.0, %v1758_v3  ;;  %8054 = vset.pattern.permute.xlu0 %v14243_v60  ;;  %v2527_v63 = vsel %vm2399_vm14, 1.0, %v1759_v39  ;;  %vm1637_vm14 = vcmp.eq.s32.totalorder %v10057_v4, %v14290_v54  ;;  %vm870_vm15 = vcmp.eq.s32.totalorder %v10057_v4, %v14291_v6  ;;  %v14296_v3 = vld [vmem:[#allocation79_spill] sm:$0xff]  ;;  %v14298_v39 = vld [vmem:[#allocation82_spill] sm:$0xff] }
 0x310   : > { %2329 = vperm.xlu0 %8054, %v1946_v29   ;;  %v1764_v20 = vsel %vm1636_vm12, 1.0, %v996_v5  ;;  %v1765_v29 = vsel %vm1637_vm14, 1.0, %v997_v38  ;;  %v998_v32 = vsel %vm870_vm15, 1.0, %v14187_v10  ;;  %v999_v18 = vsel %vm871_vm3, 1.0, %v14187_v10  ;;  %v8695_v5 = vld [vmem:[%s8865_s19 + $0x3e8] sm:$0xff]  ;;  %v14309_v6 = vld [vmem:[#allocation154_spill] sm:$0xff] }
 0x311   : > { %v2159_v24 = vpop.permute.xlu1 %2158  ;;  %7656 = vmatmul.mubr.f32.gmra.mrb[66].mxu0 %v2526_v40  ;;  %v2156_v44 = vpop.permute.xlu0 %2155  ;;  %v1766_v28 = vsel %vm1638_vm2, 1.0, %v998_v32  ;;  %vm1640_vm8 = vcmp.eq.s32.totalorder %v10057_v4, %v14296_v3  ;;  %vm873_vm9 = vcmp.eq.s32.totalorder %v10057_v4, %v14297_v56  ;;  %v1941_v40 = vadd.s32 22, %v10946_v19  ;;  %v14314_v3 = vld [vmem:[#allocation98_spill] sm:$0xff]  ;;  %s6918_s19 = sshll.u32 %s274_s16, 4  ;;  %s13592_s19 = int_to_ptr.vmem [resolvable:$true] %s6918_s19 }
 0x312   : > { %vm2401_vm4 = vcmp.eq.s32.totalorder %v10057_v4, %v2159_v24  ;;  %vm2400_vm5 = vcmp.eq.s32.totalorder %v10057_v4, %v2156_v44  ;;  %8045 = vset.pattern.permute.xlu1 %v14237_v22  ;;  %7658 = vmatprep.mubr.f32.mxu0 %v2527_v63  ;;  %v14299_v44 = vld [vmem:[#allocation147_spill] sm:$0xff]  ;;  %v1001_v63 = vsel %vm873_vm9, 1.0, %v14187_v10  ;;  %vm1642_vm14 = vcmp.eq.s32.totalorder %v10057_v4, %v14300_v9  ;;  %v14318_v9 = vld [vmem:[#allocation102_spill] sm:$0xff]  ;;  %s8699_s22 = scalar_lea.vmem %s13592_s19, 128  ;;  %p8706_p0 = scmp.lt.s32.totalorder %s13592_s19, %s8704_s24 }
 0x313   : > { %1540 = vperm.xlu1 %8045, %v1171_v11   ;;  %v2528_v52 = vsel %vm2400_vm5, 1.0, %v1760_v45  ;;  %v2529_v15 = vsel %vm2401_vm4, 1.0, %v1761_v48  ;;  %vm1639_vm4 = vcmp.eq.s32.totalorder %v10057_v4, %v14294_v41  ;;  %vm872_vm5 = vcmp.eq.s32.totalorder %v10057_v4, %v14295_v21  ;;  %v14313_v21 = vld [vmem:[#allocation156_spill] sm:$0xff]  ;;  %p8700_p11 = scmp.ne.s32.totalorder %s13592_s19, %s8699_s22  ;;  %p8707_p1 = scmp.lt.s32.totalorder %s8705_s25, %s8699_s22 }
 0x314   : > { %8055 = vset.pattern.permute.xlu0 %v14285_v49  ;;  %v1767_v58 = vsel %vm1639_vm4, 1.0, %v999_v18  ;;  %v1000_v7 = vsel %vm872_vm5, 1.0, %v14187_v10  ;;  %vm875_vm15 = vcmp.eq.s32.totalorder %v10057_v4, %v14301_v16  ;;  %v14303_v49 = vld [vmem:[#allocation149_spill] sm:$0xff]  ;;  %vm877_vm5 = vcmp.eq.s32.totalorder %v10057_v4, %v14305_v36 }
 0x315   : > { %v2165_v25 = vpop.permute.xlu1 %2164  ;;  %7659 = vmatmul.mubr.f32.gmra.mrb[68].mxu0 %v2528_v52  ;;  %v2162_v14 = vpop.permute.xlu0 %2161  ;;  %v1768_v19 = vsel %vm1640_vm8, 1.0, %v1000_v7  ;;  %v1176_v54 = vadd.s32 10, %v8695_v5  ;;  %p8701_p12 = pnand %p8700_p11, %p8846_p5  ;;  %p8708_p2 = por %p8707_p1, %p8706_p0 }
 0x316   : > { %vm2403_vm10 = vcmp.eq.s32.totalorder %v10057_v4, %v2165_v25  ;;  %vm2402_vm11 = vcmp.eq.s32.totalorder %v10057_v4, %v2162_v14  ;;  %7661 = vmatprep.mubr.f32.mxu0 %v2529_v15  ;;  %v1003_v25 = vsel %vm875_vm15, 1.0, %v14187_v10  ;;  %v14304_v14 = vld [vmem:[#allocation87_spill] sm:$0xff] }
 0x317   : > { %1543 = vperm.xlu1 %8045, %v1172_v33   ;;  %v2530_v31 = vsel %vm2402_vm11, 1.0, %v1762_v61  ;;  %v2531_v23 = vsel %vm2403_vm10, 1.0, %v1763_v55  ;;  %vm1641_vm10 = vcmp.eq.s32.totalorder %v10057_v4, %v14298_v39  ;;  %vm874_vm11 = vcmp.eq.s32.totalorder %v10057_v4, %v14299_v44  ;;  %p8702_p13 = pneg %p8701_p12 }
 0x318   : > { %v1769_v33 = vsel %vm1641_vm10, 1.0, %v1001_v63  ;;  %v1002_v30 = vsel %vm874_vm11, 1.0, %v14187_v10  ;;  %vm1644_vm4 = vcmp.eq.s32.totalorder %v10057_v4, %v14304_v14  ;;  %vm879_vm11 = vcmp.eq.s32.totalorder %v10057_v4, %v14309_v6 }
 0x319   : > { %v2171_v62 = vpop.permute.xlu1 %2170  ;;  %7662 = vmatmul.mubr.f32.gmra.mrb[70].mxu0 %v2530_v31  ;;  %v2168_v17 = vpop.permute.xlu0 %2167  ;;  %v1770_v0 = vsel %vm1642_vm14, 1.0, %v1002_v30  ;;  %v1007_v41 = vsel %vm879_vm11, 1.0, %v14187_v10  ;;  %v14319_v30 = vld [vmem:[#allocation157_spill] sm:$0xff]  ;;  %p8709_p3 = pnand %p8708_p2, %p8702_p13 }
 0x31a   : > { %vm2405_vm0 = vcmp.eq.s32.totalorder %v10057_v4, %v2171_v62  ;;  %vm2404_vm1 = vcmp.eq.s32.totalorder %v10057_v4, %v2168_v17  ;;  %7664 = vmatprep.mubr.f32.mxu0 %v2531_v23  ;;  %v1005_v62 = vsel %vm877_vm5, 1.0, %v14187_v10  ;;  %v14308_v17 = vld [vmem:[#allocation91_spill] sm:$0xff] }
 0x31b   : > { %8046 = vset.pattern.permute.xlu1 %v14243_v60  ;;  %v2532_v46 = vsel %vm2404_vm1, 1.0, %v1764_v20  ;;  %v2533_v2 = vsel %vm2405_vm0, 1.0, %v1765_v29  ;;  %vm1643_vm0 = vcmp.eq.s32.totalorder %v10057_v4, %v14302_v12  ;;  %vm876_vm1 = vcmp.eq.s32.totalorder %v10057_v4, %v14303_v49 }
 0x31c   : > { %2311 = vperm.xlu1 %8046, %v1940_v43   ;;  %v1771_v61 = vsel %vm1643_vm0, 1.0, %v1003_v25  ;;  %v1004_v37 = vsel %vm876_vm1, 1.0, %v14187_v10  ;;  %vm1646_vm10 = vcmp.eq.s32.totalorder %v10057_v4, %v14308_v17  ;;  %vm881_vm1 = vcmp.eq.s32.totalorder %v10057_v4, %v14313_v21  ;;  %v14322_v25 = vld [vmem:[#allocation106_spill] sm:$0xff] }
 0x31d   : > { %v2177_v13 = vpop.permute.xlu1 %2176  ;;  %7665 = vmatmul.mubr.f32.gmra.mrb[72].mxu0 %v2532_v46  ;;  %v2174_v1 = vpop.permute.xlu0 %2173  ;;  %v1772_v55 = vsel %vm1644_vm4, 1.0, %v1004_v37  ;;  %v1009_v39 = vsel %vm881_vm1, 1.0, %v14187_v10  ;;  %v14324_v37 = vld [vmem:[#allocation107_spill] sm:$0xff]  ;;  %v14333_v21 = vld [vmem:[#allocation166_spill] sm:$0xff] }
 0x31e   : > { %vm2407_vm6 = vcmp.eq.s32.totalorder %v10057_v4, %v2177_v13  ;;  %vm2406_vm7 = vcmp.eq.s32.totalorder %v10057_v4, %v2174_v1  ;;  %7667 = vmatprep.mubr.f32.mxu0 %v2533_v2  ;;  %v14312_v13 = vld [vmem:[#allocation95_spill] sm:$0xff]  ;;  %v1944_v2 = vadd.s32 22, %v8695_v5 }
 0x31f   : > { %v2534_v11 = vsel %vm2406_vm7, 1.0, %v1766_v28  ;;  %v2535_v24 = vsel %vm2407_vm6, 1.0, %v1767_v58  ;;  %vm1645_vm6 = vcmp.eq.s32.totalorder %v10057_v4, %v14306_v35  ;;  %vm878_vm7 = vcmp.eq.s32.totalorder %v10057_v4, %v14307_v42  ;;  %v14326_v42 = vld [vmem:[#allocation110_spill] sm:$0xff] }
 0x320   : > { %8047 = vset.pattern.permute.xlu1 %v14237_v22  ;;  %v1773_v20 = vsel %vm1645_vm6, 1.0, %v1005_v62  ;;  %v1006_v38 = vsel %vm878_vm7, 1.0, %v14187_v10  ;;  %vm1648_vm0 = vcmp.eq.s32.totalorder %v10057_v4, %v14312_v13  ;;  %v14327_v62 = vld [vmem:[#allocation161_spill] sm:$0xff] }
 0x321   : > { %1549 = vperm.xlu1 %8047, %v1174_v26   ;;  %v2183_v8 = vpop.permute.xlu1 %2182  ;;  %7668 = vmatmul.mubr.f32.gmra.mrb[74].mxu0 %v2534_v11  ;;  %v2180_v27 = vpop.permute.xlu0 %2179  ;;  %v14311_v26 = vld [vmem:[#allocation153_spill] sm:$0xff]  ;;  %v1774_v32 = vsel %vm1646_vm10, 1.0, %v1006_v38 }
 0x322   : > { %vm2409_vm12 = vcmp.eq.s32.totalorder %v10057_v4, %v2183_v8  ;;  %vm2408_vm13 = vcmp.eq.s32.totalorder %v10057_v4, %v2180_v27  ;;  %7670 = vmatprep.mubr.f32.mxu0 %v2535_v24  ;;  %v14316_v8 = vld [vmem:[#allocation99_spill] sm:$0xff]  ;;  %v14317_v24 = vld [vmem:[#allocation158_spill] sm:$0xff] }
 0x323   : > { %v2536_v45 = vsel %vm2408_vm13, 1.0, %v1768_v19  ;;  %v2537_v48 = vsel %vm2409_vm12, 1.0, %v1769_v33  ;;  %vm1647_vm12 = vcmp.eq.s32.totalorder %v10057_v4, %v14310_v47  ;;  %vm880_vm13 = vcmp.eq.s32.totalorder %v10057_v4, %v14311_v26 }
 0x324   : > { %v1775_v28 = vsel %vm1647_vm12, 1.0, %v1007_v41  ;;  %v1008_v18 = vsel %vm880_vm13, 1.0, %v14187_v10  ;;  %vm1650_vm6 = vcmp.eq.s32.totalorder %v10057_v4, %v14316_v8  ;;  %vm883_vm7 = vcmp.eq.s32.totalorder %v10057_v4, %v14317_v24  ;;  %v14336_v8 = vld [vmem:[#allocation185_spill] sm:$0xff]  ;;  %v14337_v24 = vld [vmem:[#allocation168_spill] sm:$0xff] }
 0x325   : > { %8048 = vset.pattern.permute.xlu1 %v14243_v60  ;;  %v2189_v52 = vpop.permute.xlu1 %2188  ;;  %7671 = vmatmul.mubr.f32.gmra.mrb[76].mxu0 %v2536_v45  ;;  %v2186_v53 = vpop.permute.xlu0 %2185  ;;  %v1776_v7 = vsel %vm1648_vm0, 1.0, %v1008_v18  ;;  %v1178_v19 = vadd.s32 10, %v11017_v50  ;;  %v1011_v12 = vsel %vm883_vm7, 1.0, %v14187_v10 }
 0x326   : > { %vm2411_vm2 = vcmp.eq.s32.totalorder %v10057_v4, %v2189_v52  ;;  %vm2410_vm3 = vcmp.eq.s32.totalorder %v10057_v4, %v2186_v53  ;;  %2314 = vperm.xlu1 %8048, %v1941_v40   ;;  %7673 = vmatprep.mubr.f32.mxu0 %v2537_v48  ;;  %v14315_v40 = vld [vmem:[#allocation155_spill] sm:$0xff]  ;;  %v14321_v48 = vld [vmem:[#allocation160_spill] sm:$0xff] }
 0x327   : > { %v2538_v15 = vsel %vm2410_vm3, 1.0, %v1770_v0  ;;  %v2539_v43 = vsel %vm2411_vm2, 1.0, %v1771_v61  ;;  %vm1649_vm2 = vcmp.eq.s32.totalorder %v10057_v4, %v14314_v3  ;;  %vm882_vm3 = vcmp.eq.s32.totalorder %v10057_v4, %v14315_v40  ;;  %v14320_v52 = vld [vmem:[#allocation103_spill] sm:$0xff]  ;;  %v14334_v3 = vld [vmem:[#allocation122_spill] sm:$0xff]  ;;  %v14335_v40 = vld [vmem:[#allocation165_spill] sm:$0xff] }
 0x328   : > { %v1777_v44 = vsel %vm1649_vm2, 1.0, %v1009_v39  ;;  %v1010_v63 = vsel %vm882_vm3, 1.0, %v14187_v10  ;;  %vm1652_vm12 = vcmp.eq.s32.totalorder %v10057_v4, %v14320_v52  ;;  %vm885_vm13 = vcmp.eq.s32.totalorder %v10057_v4, %v14321_v48  ;;  %v14323_v61 = vld [vmem:[#allocation159_spill] sm:$0xff] }
 0x329   : > { %v2195_v34 = vpop.permute.xlu1 %2194  ;;  %7674 = vmatmul.mubr.f32.gmra.mrb[78].mxu0 %v2538_v15  ;;  %v2192_v31 = vpop.permute.xlu0 %2191  ;;  %v1778_v50 = vsel %vm1650_vm6, 1.0, %v1010_v63  ;;  %v1945_v0 = vadd.s32 22, %v10979_v59  ;;  %v1013_v59 = vsel %vm885_vm13, 1.0, %v14187_v10  ;;  %vm1654_vm2 = vcmp.eq.s32.totalorder %v10057_v4, %v14324_v37  ;;  %v14338_v63 = vld [vmem:[#allocation186_spill] sm:$0xff]  ;;  %v14345_v37 = vld [vmem:[#allocation172_spill] sm:$0xff] }
 0x32a   : > { %vm2413_vm8 = vcmp.eq.s32.totalorder %v10057_v4, %v2195_v34  ;;  %vm2412_vm9 = vcmp.eq.s32.totalorder %v10057_v4, %v2192_v31  ;;  %8049 = vset.pattern.permute.xlu1 %v14237_v22  ;;  %7676 = vmatprep.mubr.f32.mxu0 %v2539_v43  ;;  %v14325_v34 = vld [vmem:[#allocation162_spill] sm:$0xff] }
 0x32b   : > { %1552 = vperm.xlu1 %8049, %v1175_v57   ;;  %v2540_v23 = vsel %vm2412_vm9, 1.0, %v1772_v55  ;;  %v2541_v29 = vsel %vm2413_vm8, 1.0, %v1773_v20  ;;  %vm1651_vm8 = vcmp.eq.s32.totalorder %v10057_v4, %v14318_v9  ;;  %vm884_vm9 = vcmp.eq.s32.totalorder %v10057_v4, %v14319_v30  ;;  %v14329_v20 = vld [vmem:[#allocation164_spill] sm:$0xff] }
 0x32c   : > { %v1779_v49 = vsel %vm1651_vm8, 1.0, %v1011_v12  ;;  %v1012_v57 = vsel %vm884_vm9, 1.0, %v14187_v10  ;;  %vm887_vm3 = vcmp.eq.s32.totalorder %v10057_v4, %v14325_v34  ;;  %vm889_vm9 = vcmp.eq.s32.totalorder %v10057_v4, %v14329_v20  ;;  %v14340_v12 = vld [vmem:[#allocation187_spill] sm:$0xff] }
 0x32d   : > { %v2201_v46 = vpop.permute.xlu1 %2200  ;;  %7677 = vmatmul.mubr.f32.gmra.mrb[80].mxu0 %v2540_v23  ;;  %v2198_v51 = vpop.permute.xlu0 %2197  ;;  %v1015_v23 = vsel %vm887_vm3, 1.0, %v14187_v10  ;;  %v1017_v13 = vsel %vm889_vm9, 1.0, %v14187_v10 }
 0x32e   : > { %vm2415_vm14 = vcmp.eq.s32.totalorder %v10057_v4, %v2201_v46  ;;  %vm2414_vm15 = vcmp.eq.s32.totalorder %v10057_v4, %v2198_v51  ;;  %7679 = vmatprep.mubr.f32.mxu0 %v2541_v29  ;;  %v14330_v46 = vld [vmem:[#allocation114_spill] sm:$0xff] }
 0x32f   : > { %1555 = vperm.xlu1 %8049, %v1176_v54   ;;  %v2542_v1 = vsel %vm2414_vm15, 1.0, %v1774_v32  ;;  %v2543_v58 = vsel %vm2415_vm14, 1.0, %v1775_v28  ;;  %vm1653_vm14 = vcmp.eq.s32.totalorder %v10057_v4, %v14322_v25  ;;  %vm886_vm15 = vcmp.eq.s32.totalorder %v10057_v4, %v14323_v61  ;;  %v14331_v32 = vld [vmem:[#allocation163_spill] sm:$0xff] }
 0x330   : > { %v1781_v31 = vsel %vm1653_vm14, 1.0, %v1013_v59  ;;  %v1014_v43 = vsel %vm886_vm15, 1.0, %v14187_v10  ;;  %vm891_vm15 = vcmp.eq.s32.totalorder %v10057_v4, %v14333_v21 }
 0x331   : > { %v2207_v11 = vpop.permute.xlu1 %2206  ;;  %7680 = vmatmul.mubr.f32.gmra.mrb[82].mxu0 %v2542_v1  ;;  %v2204_v56 = vpop.permute.xlu0 %2203  ;;  %v1782_v17 = vsel %vm1654_vm2, 1.0, %v1014_v43  ;;  %v14332_v1 = vld [vmem:[#allocation117_spill] sm:$0xff]  ;;  %v1019_v39 = vsel %vm891_vm15, 1.0, %v14187_v10 }
 0x332   : > { %vm2417_vm4 = vcmp.eq.s32.totalorder %v10057_v4, %v2207_v11  ;;  %vm2416_vm5 = vcmp.eq.s32.totalorder %v10057_v4, %v2204_v56  ;;  %7682 = vmatprep.mubr.f32.mxu0 %v2543_v58  ;;  %vm1658_vm14 = vcmp.eq.s32.totalorder %v10057_v4, %v14332_v1  ;;  %v14353_v1 = vld [vmem:[#allocation176_spill] sm:$0xff] }
 0x333   : > { %8051 = vset.pattern.permute.xlu1 %v14243_v60  ;;  %v2544_v27 = vsel %vm2416_vm5, 1.0, %v1776_v7  ;;  %v2545_v33 = vsel %vm2417_vm4, 1.0, %v1777_v44  ;;  %vm1655_vm4 = vcmp.eq.s32.totalorder %v10057_v4, %v14326_v42  ;;  %vm888_vm5 = vcmp.eq.s32.totalorder %v10057_v4, %v14327_v62 }
 0x334   : > { %2323 = vperm.xlu1 %8051, %v1944_v2   ;;  %v1783_v38 = vsel %vm1655_vm4, 1.0, %v1015_v23  ;;  %v1016_v47 = vsel %vm888_vm5, 1.0, %v14187_v10  ;;  %vm1660_vm4 = vcmp.eq.s32.totalorder %v10057_v4, %v14336_v8  ;;  %vm893_vm5 = vcmp.eq.s32.totalorder %v10057_v4, %v14337_v24  ;;  %v14357_v8 = vld [vmem:[#allocation178_spill] sm:$0xff] }
 0x335   : > { %v2213_v45 = vpop.permute.xlu1 %2212  ;;  %7683 = vmatmul.mubr.f32.gmra.mrb[84].mxu0 %v2544_v27  ;;  %v2210_v16 = vpop.permute.xlu0 %2209 }
 0x336   : > { %vm2419_vm10 = vcmp.eq.s32.totalorder %v10057_v4, %v2213_v45  ;;  %vm2418_vm11 = vcmp.eq.s32.totalorder %v10057_v4, %v2210_v16  ;;  %7685 = vmatprep.mubr.f32.mxu0 %v2545_v33  ;;  %v14339_v33 = vld [vmem:[#allocation167_spill] sm:$0xff] }
 0x337   : > { %v2546_v53 = vsel %vm2418_vm11, 1.0, %v1778_v50  ;;  %v2547_v36 = vsel %vm2419_vm10, 1.0, %v1779_v49  ;;  %vm1657_vm10 = vcmp.eq.s32.totalorder %v10057_v4, %v14330_v46  ;;  %vm890_vm11 = vcmp.eq.s32.totalorder %v10057_v4, %v14331_v32 }
 0x338   : > { %8052 = vset.pattern.permute.xlu1 %v14237_v22  ;;  %v1780_v22 = vsel %vm1652_vm12, 1.0, %v1012_v57  ;;  %v1785_v28 = vsel %vm1657_vm10, 1.0, %v1017_v13  ;;  %v1018_v18 = vsel %vm890_vm11, 1.0, %v14187_v10  ;;  %v1021_v50 = vsel %vm893_vm5, 1.0, %v14187_v10 }
 0x339   : > { %1561 = vperm.xlu1 %8052, %v1178_v19   ;;  %v2219_v14 = vpop.permute.xlu1 %2218  ;;  %7686 = vmatmul.mubr.f32.gmra.mrb[86].mxu0 %v2546_v53  ;;  %v2216_v15 = vpop.permute.xlu0 %2215  ;;  %v1786_v7 = vsel %vm1658_vm14, 1.0, %v1018_v18  ;;  %vm1662_vm10 = vcmp.eq.s32.totalorder %v10057_v4, %v14340_v12  ;;  %v14341_v53 = vld [vmem:[#allocation170_spill] sm:$0xff]  ;;  %v14360_v12 = vld [vmem:[#allocation180_spill] sm:$0xff] }
 0x33a   : > { %vm2421_vm0 = vcmp.eq.s32.totalorder %v10057_v4, %v2219_v14  ;;  %vm2420_vm1 = vcmp.eq.s32.totalorder %v10057_v4, %v2216_v15  ;;  %7688 = vmatprep.mubr.f32.mxu0 %v2547_v36  ;;  %vm895_vm11 = vcmp.eq.s32.totalorder %v10057_v4, %v14341_v53  ;;  %v14343_v15 = vld [vmem:[#allocation169_spill] sm:$0xff] }
 0x33b   : > { %v2548_v35 = vsel %vm2420_vm1, 1.0, %v1780_v22  ;;  %v2549_v54 = vsel %vm2421_vm0, 1.0, %v1781_v31  ;;  %vm1659_vm0 = vcmp.eq.s32.totalorder %v10057_v4, %v14334_v3  ;;  %vm892_vm1 = vcmp.eq.s32.totalorder %v10057_v4, %v14335_v40  ;;  %v14344_v22 = vld [vmem:[#allocation189_spill] sm:$0xff]  ;;  %v14346_v31 = vld [vmem:[#allocation190_spill] sm:$0xff] }
 0x33c   : > { %v1787_v44 = vsel %vm1659_vm0, 1.0, %v1019_v39  ;;  %v1020_v19 = vsel %vm892_vm1, 1.0, %v14187_v10  ;;  %v1023_v61 = vsel %vm895_vm11, 1.0, %v14187_v10  ;;  %vm1664_vm0 = vcmp.eq.s32.totalorder %v10057_v4, %v14344_v22 }
 0x33d   : > { %8053 = vset.pattern.permute.xlu1 %v14243_v60  ;;  %v2225_v55 = vpop.permute.xlu1 %2224  ;;  %7689 = vmatmul.mubr.f32.gmra.mrb[88].mxu0 %v2548_v35  ;;  %v2222_v5 = vpop.permute.xlu0 %2221  ;;  %v14328_v60 = vld [vmem:[#allocation111_spill] sm:$0xff]  ;;  %v1788_v30 = vsel %vm1660_vm4, 1.0, %v1020_v19  ;;  %vm897_vm1 = vcmp.eq.s32.totalorder %v10057_v4, %v14345_v37 }
 0x33e   : > { %vm2423_vm6 = vcmp.eq.s32.totalorder %v10057_v4, %v2225_v55  ;;  %vm2422_vm7 = vcmp.eq.s32.totalorder %v10057_v4, %v2222_v5  ;;  %2326 = vperm.xlu1 %8053, %v1945_v0   ;;  %7691 = vmatprep.mubr.f32.mxu0 %v2549_v54  ;;  %vm1656_vm8 = vcmp.eq.s32.totalorder %v10057_v4, %v14328_v60  ;;  %v14342_v0 = vld [vmem:[#allocation188_spill] sm:$0xff]  ;;  %v14347_v5 = vld [vmem:[#allocation171_spill] sm:$0xff]  ;;  %v1025_v62 = vsel %vm897_vm1, 1.0, %v14187_v10  ;;  %v14349_v60 = vld [vmem:[#allocation174_spill] sm:$0xff] }
 0x33f   : > { %v2550_v6 = vsel %vm2422_vm7, 1.0, %v1782_v17  ;;  %v2551_v26 = vsel %vm2423_vm6, 1.0, %v1783_v38  ;;  %v1784_v41 = vsel %vm1656_vm8, 1.0, %v1016_v47  ;;  %vm1661_vm6 = vcmp.eq.s32.totalorder %v10057_v4, %v14338_v63  ;;  %v14348_v17 = vld [vmem:[#allocation191_spill] sm:$0xff]  ;;  %v14350_v38 = vld [vmem:[#allocation192_spill] sm:$0xff] }
 0x340   : > { %vm894_vm7 = vcmp.eq.s32.totalorder %v10057_v4, %v14339_v33  ;;  %v1789_v48 = vsel %vm1661_vm6, 1.0, %v1021_v50  ;;  %vm1666_vm6 = vcmp.eq.s32.totalorder %v10057_v4, %v14348_v17  ;;  %v14359_v33 = vld [vmem:[#allocation177_spill] sm:$0xff] }
 0x341   : > { %v2231_v51 = vpop.permute.xlu1 %2230  ;;  %7692 = vmatmul.mubr.f32.gmra.mrb[90].mxu0 %v2550_v6  ;;  %v2228_v29 = vpop.permute.xlu0 %2227  ;;  %v1022_v49 = vsel %vm894_vm7, 1.0, %v14187_v10  ;;  %vm899_vm7 = vcmp.eq.s32.totalorder %v10057_v4, %v14349_v60 }
 0x342   : > { %vm2425_vm12 = vcmp.eq.s32.totalorder %v10057_v4, %v2231_v51  ;;  %vm2424_vm13 = vcmp.eq.s32.totalorder %v10057_v4, %v2228_v29  ;;  %7694 = vmatprep.mubr.f32.mxu0 %v2551_v26  ;;  %v1790_v36 = vsel %vm1662_vm10, 1.0, %v1022_v49  ;;  %v14351_v29 = vld [vmem:[#allocation173_spill] sm:$0xff]  ;;  %v1027_v32 = vsel %vm899_vm7, 1.0, %v14187_v10  ;;  %v14362_v49 = vld [vmem:[#allocation198_spill] sm:$0xff] }
 0x343   : > { %v2552_v2 = vsel %vm2424_vm13, 1.0, %v1784_v41  ;;  %v2553_v58 = vsel %vm2425_vm12, 1.0, %v1785_v28  ;;  %vm1663_vm12 = vcmp.eq.s32.totalorder %v10057_v4, %v14342_v0  ;;  %vm896_vm13 = vcmp.eq.s32.totalorder %v10057_v4, %v14343_v15  ;;  %v14352_v41 = vld [vmem:[#allocation193_spill] sm:$0xff]  ;;  %v14354_v28 = vld [vmem:[#allocation194_spill] sm:$0xff] }
 0x344   : > { %v1791_v35 = vsel %vm1663_vm12, 1.0, %v1023_v61  ;;  %v1024_v34 = vsel %vm896_vm13, 1.0, %v14187_v10  ;;  %vm1668_vm12 = vcmp.eq.s32.totalorder %v10057_v4, %v14352_v41  ;;  %vm901_vm13 = vcmp.eq.s32.totalorder %v10057_v4, %v14353_v1 }
 0x345   : > { %v2237_v11 = vpop.permute.xlu1 %2236  ;;  %7695 = vmatmul.mubr.f32.gmra.mrb[92].mxu0 %v2552_v2  ;;  %v2234_v56 = vpop.permute.xlu0 %2233  ;;  %v1792_v54 = vsel %vm1664_vm0, 1.0, %v1024_v34  ;;  %v1029_v40 = vsel %vm901_vm13, 1.0, %v14187_v10  ;;  %vm904_vm7 = vcmp.eq.s32.totalorder %v10057_v4, %v14359_v33 }
 0x346   : > { %vm2427_vm2 = vcmp.eq.s32.totalorder %v10057_v4, %v2237_v11  ;;  %vm2426_vm3 = vcmp.eq.s32.totalorder %v10057_v4, %v2234_v56  ;;  %7697 = vmatprep.mubr.f32.mxu0 %v2553_v58  ;;  %v14355_v56 = vld [vmem:[#allocation175_spill] sm:$0xff]  ;;  %v1032_v15 = vsel %vm904_vm7, 1.0, %v14187_v10 }
 0x347   : > { %v2554_v27 = vsel %vm2426_vm3, 1.0, %v1786_v7  ;;  %v2555_v16 = vsel %vm2427_vm2, 1.0, %v1787_v44  ;;  %vm1665_vm2 = vcmp.eq.s32.totalorder %v10057_v4, %v14346_v31  ;;  %vm898_vm3 = vcmp.eq.s32.totalorder %v10057_v4, %v14347_v5  ;;  %v14356_v7 = vld [vmem:[#allocation195_spill] sm:$0xff]  ;;  %v14358_v44 = vld [vmem:[#allocation196_spill] sm:$0xff] }
 0x348   : > { %v1793_v6 = vsel %vm1665_vm2, 1.0, %v1025_v62  ;;  %v1026_v20 = vsel %vm898_vm3, 1.0, %v14187_v10  ;;  %vm1670_vm2 = vcmp.eq.s32.totalorder %v10057_v4, %v14356_v7  ;;  %vm903_vm3 = vcmp.eq.s32.totalorder %v10057_v4, %v14357_v8 }
 0x349   : > { %v2243_v9 = vpop.permute.xlu1 %2242  ;;  %7698 = vmatmul.mubr.f32.gmra.mrb[94].mxu0 %v2554_v27  ;;  %v2240_v45 = vpop.permute.xlu0 %2239  ;;  %v1794_v26 = vsel %vm1666_vm6, 1.0, %v1026_v20  ;;  %v14365_v20 = vld [vmem:[#allocation182_spill] sm:$0xff] }
 0x34a   : > { %vm2429_vm8 = vcmp.eq.s32.totalorder %v10057_v4, %v2243_v9  ;;  %vm2428_vm9 = vcmp.eq.s32.totalorder %v10057_v4, %v2240_v45  ;;  %7700 = vmatprep.mubr.f32.mxu0 %v2555_v16  ;;  %v11392_v45 = vld [vmem:[%s13636_s2] ss:$0 sm:$0xff] }
 0x34b   : > { %v2556_v52 = vsel %vm2428_vm9, 1.0, %v1788_v30  ;;  %v2557_v14 = vsel %vm2429_vm8, 1.0, %v1789_v48  ;;  %vm1667_vm8 = vcmp.eq.s32.totalorder %v10057_v4, %v14350_v38  ;;  %vm900_vm9 = vcmp.eq.s32.totalorder %v10057_v4, %v14351_v29 }
 0x34c   : > { %v1795_v2 = vsel %vm1667_vm8, 1.0, %v1027_v32  ;;  %v1028_v21 = vsel %vm900_vm9, 1.0, %v14187_v10  ;;  %v1031_v30 = vsel %vm903_vm3, 1.0, %v14187_v10  ;;  %vm905_vm8 = vcmp.eq.s32.totalorder %v10057_v4, %v14360_v12 }
 0x34d   : > { %v2249_v57 = vpop.permute.xlu1 %2248  ;;  %7701 = vmatmul.mubr.f32.gmra.mrb[96].mxu0 %v2556_v52  ;;  %v2246_v25 = vpop.permute.xlu0 %2245  ;;  %v1796_v58 = vsel %vm1668_vm12, 1.0, %v1028_v21  ;;  %v14361_v52 = vld [vmem:[#allocation197_spill] sm:$0xff] }
 0x34e   : > { %vm2431_vm14 = vcmp.eq.s32.totalorder %v10057_v4, %v2249_v57  ;;  %vm2430_vm15 = vcmp.eq.s32.totalorder %v10057_v4, %v2246_v25  ;;  %7703 = vmatprep.mubr.f32.mxu0 %v2557_v14  ;;  %vm1672_vm9 = vcmp.eq.s32.totalorder %v10057_v4, %v14361_v52  ;;  %v14370_v52 = vld [vmem:[#allocation201_spill] sm:$0xff] }
 0x34f   : > { %v2558_v59 = vsel %vm2430_vm15, 1.0, %v1790_v36  ;;  %v2559_v55 = vsel %vm2431_vm14, 1.0, %v1791_v35  ;;  %vm1669_vm14 = vcmp.eq.s32.totalorder %v10057_v4, %v14354_v28  ;;  %vm902_vm15 = vcmp.eq.s32.totalorder %v10057_v4, %v14355_v56  ;;  %v14363_v36 = vld [vmem:[#allocation179_spill] sm:$0xff] }
 0x350   : > { %v1797_v27 = vsel %vm1669_vm14, 1.0, %v1029_v40  ;;  %v1030_v24 = vsel %vm902_vm15, 1.0, %v14187_v10  ;;  %v1800_v37 = vsel %vm1672_vm9, 1.0, %v1032_v15  ;;  %vm3454_vm14 = vcmask 261120   ;;  %v14364_v35 = vld [vmem:[#allocation199_spill] sm:$0xff] }
 0x351   : > { %v2255_v43 = vpop.permute.xlu1 %2254  ;;  %7704 = vmatmul.mubr.f32.gmra.mrb[98].mxu0 %v2558_v59  ;;  %v2252_v42 = vpop.permute.xlu0 %2251  ;;  %v1798_v16 = vsel %vm1670_vm2, 1.0, %v1030_v24  ;;  %v1033_v59 = vsel %vm905_vm8, 1.0, %v14187_v10  ;;  %vm1674_vm15 = vcmp.eq.s32.totalorder %v10057_v4, %v14364_v35  ;;  %v14371_v35 = vld [vmem:[#allocation7_spill] sm:$0xff] }
 0x352   : > { %vm2433_vm4 = vcmp.eq.s32.totalorder %v10057_v4, %v2255_v43  ;;  %vm2432_vm5 = vcmp.eq.s32.totalorder %v10057_v4, %v2252_v42  ;;  %7706 = vmatprep.mubr.f32.mxu0 %v2559_v55 }
 0x353   : > { %v2560_v23 = vsel %vm2432_vm5, 1.0, %v1792_v54  ;;  %v2561_v51 = vsel %vm2433_vm4, 1.0, %v1793_v6  ;;  %vm1671_vm4 = vcmp.eq.s32.totalorder %v10057_v4, %v14358_v44 }
 0x354   : > { %v1799_v48 = vsel %vm1671_vm4, 1.0, %v1031_v30 }
 0x355   : > { %v2261_v47 = vpop.permute.xlu1 %2260  ;;  %7707 = vmatmul.mubr.f32.gmra.mrb[100].mxu0 %v2560_v23  ;;  %v2258_v46 = vpop.permute.xlu0 %2257 }
 0x356   : > { %vm2435_vm10 = vcmp.eq.s32.totalorder %v10057_v4, %v2261_v47  ;;  %vm2434_vm11 = vcmp.eq.s32.totalorder %v10057_v4, %v2258_v46  ;;  %7709 = vmatprep.mubr.f32.mxu0 %v2561_v51  ;;  %v14366_v47 = vld [vmem:[#allocation181_spill] sm:$0xff]  ;;  %v14367_v46 = vld [vmem:[#allocation200_spill] sm:$0xff] }
 0x357   : > { %v2562_v13 = vsel %vm2434_vm11, 1.0, %v1794_v26  ;;  %v2563_v11 = vsel %vm2435_vm10, 1.0, %v1795_v2  ;;  %vm1673_vm10 = vcmp.eq.s32.totalorder %v10057_v4, %v14362_v49  ;;  %vm906_vm11 = vcmp.eq.s32.totalorder %v10057_v4, %v14363_v36 }
 0x358   : > { %v1801_v42 = vsel %vm1673_vm10, 1.0, %v1033_v59  ;;  %v1034_v17 = vsel %vm906_vm11, 1.0, %v14187_v10  ;;  %vm908_vm2 = vcmp.eq.s32.totalorder %v10057_v4, %v14366_v47  ;;  %vm1675_vm3 = vcmp.eq.s32.totalorder %v10057_v4, %v14367_v46 }
 0x359   : > { %v2267_v18 = vpop.permute.xlu1 %2266  ;;  %7710 = vmatmul.mubr.f32.gmra.mrb[102].mxu0 %v2562_v13  ;;  %v2264_v3 = vpop.permute.xlu0 %2263  ;;  %v1802_v38 = vsel %vm1674_vm15, 1.0, %v1034_v17  ;;  %v1036_v28 = vsel %vm908_vm2, 1.0, %v14187_v10  ;;  %vm1677_vm10 = vcmp.eq.s32.totalorder %v10057_v4, %v14370_v52  ;;  %v14375_v52 = vld [vmem:[#allocation202_spill] sm:$0xff] }
 0x35a   : > { %vm2437_vm0 = vcmp.eq.s32.totalorder %v10057_v4, %v2267_v18  ;;  %vm2436_vm1 = vcmp.eq.s32.totalorder %v10057_v4, %v2264_v3  ;;  %7712 = vmatprep.mubr.f32.mxu0 %v2563_v11 }
 0x35b   : > { %v2564_v39 = vsel %vm2436_vm1, 1.0, %v1796_v58  ;;  %v2565_v9 = vsel %vm2437_vm0, 1.0, %v1797_v27  ;;  %vm907_vm0 = vcmp.eq.s32.totalorder %v10057_v4, %v14365_v20 }
 0x35c   : > { %v1035_v1 = vsel %vm907_vm0, 1.0, %v14187_v10 }
 0x35d   : > { %v2273_v19 = vpop.permute.xlu1 %2272  ;;  %7713 = vmatmul.mubr.f32.gmra.mrb[104].mxu0 %v2564_v39  ;;  %v2270_v63 = vpop.permute.xlu0 %2269  ;;  %v1803_v3 = vsel %vm1675_vm3, 1.0, %v1035_v1 }
 0x35e   : > { %vm2439_vm5 = vcmp.eq.s32.totalorder %v10057_v4, %v2273_v19  ;;  %vm2438_vm6 = vcmp.eq.s32.totalorder %v10057_v4, %v2270_v63  ;;  %7715 = vmatprep.mubr.f32.mxu0 %v2565_v9  ;;  %v14368_v9 = vld [vmem:[#allocation183_spill] sm:$0xff] }
 0x35f   : > { %v2566_v50 = vsel %vm2438_vm6, 1.0, %v1798_v16  ;;  %v2567_v14 = vsel %vm2439_vm5, 1.0, %v1799_v48  ;;  %vm910_vm7 = vcmp.eq.s32.totalorder %v10057_v4, %v14368_v9  ;;  %v14373_v9 = vld [vmem:[#allocation8_spill] sm:$0xff] }
 0x360   : > { %v7558_v53 = vpop.f32.mrb[0].mxu0  ;;  %v1038_v48 = vsel %vm910_vm7, 1.0, %v14187_v10  ;;  %vm1681_vm7 = vcmp.eq.s32.totalorder %v10057_v4, %v14375_v52 }
 0x361   : > { %v2682_v0 = vadd.f32 %v7558_v53, %v11392_v45  ;;  %v2279_v57 = vpop.permute.xlu1 %2278  ;;  %v2676_v25 = vpop.f32.mrb[1].mxu0  ;;  %7716 = vmatmul.mubr.f32.gmra.mrb[106].mxu0 %v2566_v50  ;;  %v14369_v50 = vld [vmem:[#allocation184_spill] sm:$0xff] }
 0x362   : > { %vm2441_vm12 = vcmp.eq.s32.totalorder %v10057_v4, %v2279_v57  ;;  %v2677_v61 = vadd.f32 %v11392_v45, %v2676_v25  ;;  %v2276_v22 = vpop.permute.xlu0 %2275  ;;  %7718 = vmatprep.mubr.f32.mxu0 %v2567_v14  ;;  %vm909_vm8 = vcmp.eq.s32.totalorder %v10057_v4, %v14369_v50  ;;  %v14374_v50 = vld [vmem:[#allocation9_spill] sm:$0xff] }
 0x363   : > { %vm2440_vm13 = vcmp.eq.s32.totalorder %v10057_v4, %v2276_v22  ;;  %v3316_v55 = vmax.f32 %v2682_v0, 0.0  ;;  %v2569_v62 = vsel %vm2441_vm12, 1.0, %v1801_v42  ;;  %v1037_v57 = vsel %vm909_vm8, 1.0, %v14187_v10 }
 0x364   : > { %v3315_v34 = vmax.f32 %v2677_v61, 0.0  ;;  %v7561_v31 = vpop.f32.mrb[2].mxu0  ;;  %v2568_v43 = vsel %vm2440_vm13, 1.0, %v1800_v37  ;;  %v1805_v59 = vsel %vm1677_vm10, 1.0, %v1037_v57  ;;  %vm911_vm13 = vcmp.eq.s32.totalorder %v10057_v4, %v14371_v35  ;;  %v14376_v35 = vld [vmem:[#allocation11_spill] sm:$0xff] }
 0x365   : > { %v2692_v5 = vadd.f32 %v7561_v31, %v11392_v45  ;;  %v2686_v54 = vpop.f32.mrb[3].mxu0  ;;  %7719 = vmatmul.mubr.f32.gmra.mrb[108].mxu0 %v2568_v43  ;;  %vm915_vm10 = vcmp.eq.s32.totalorder %v10057_v4, %v14376_v35 }
 0x366   : > { %v2687_v23 = vadd.f32 %v11392_v45, %v2686_v54  ;;  %v2282_v60 = vpop.permute.xlu0 %2281  ;;  %v1520_v6 = vpop.permute.xlu1 %1519  ;;  %7721 = vmatprep.mubr.f32.mxu0 %v2569_v62  ;;  %7756 = vmatprep.mubr.msk.f32.mxu1 %vm3454_vm14, %v3315_v34 }
 0x367   : > { %vm2442_vm1 = vcmp.eq.s32.totalorder %v10057_v4, %v2282_v60  ;;  %7757 = vmatmul.mubr.msk.f32.vlgmr.msra.gmra.mrb[0].mxu1 %vm3454_vm14, %v3316_v55  ;;  %v3318_v32 = vmax.f32 %v2692_v5, 0.0  ;;  %vm1676_vm4 = vcmp.eq.s32.totalorder %v10057_v4, %v1520_v6 }
 0x368   : > { %v3317_v51 = vmax.f32 %v2687_v23, 0.0  ;;  %v7564_v29 = vpop.f32.mrb[4].mxu0  ;;  %v2570_v26 = vsel %vm2442_vm1, 1.0, %v1802_v38  ;;  %v1804_v40 = vsel %vm1676_vm4, 1.0, %v1036_v28  ;;  %v1039_v23 = vsel %vm911_vm13, 1.0, %v14187_v10 }
 0x369   : > { %v2702_v41 = vadd.f32 %v7564_v29, %v11392_v45  ;;  %v2696_v13 = vpop.f32.mrb[5].mxu0  ;;  %7722 = vmatmul.mubr.f32.gmra.mrb[110].mxu0 %v2570_v26  ;;  %vm914_vm4 = vcmp.eq.s32.totalorder %v10057_v4, %v14373_v9 }
 0x36a   : > { %v2697_v2 = vadd.f32 %v11392_v45, %v2696_v13  ;;  %v2285_v21 = vpop.permute.xlu0 %2284  ;;  %7759 = vmatprep.mubr.msk.f32.mxu1 %vm3454_vm14, %v3317_v51 }
 0x36b   : > { %vm2443_vm5 = vcmp.eq.s32.totalorder %v10057_v4, %v2285_v21  ;;  %v2288_v18 = vpop.permute.xlu1 %2287  ;;  %7760 = vmatmul.mubr.msk.f32.gmra.mrb[2].mxu1 %vm3454_vm14, %v3318_v32  ;;  %v3320_v7 = vmax.f32 %v2702_v41, 0.0  ;;  %v14372_v32 = vld [vmem:[#allocation6_spill] sm:$0xff] }
 0x36c   : > { %v3319_v11 = vmax.f32 %v2697_v2, 0.0  ;;  %vm2444_vm6 = vcmp.eq.s32.totalorder %v10057_v4, %v2288_v18  ;;  %v7567_v56 = vpop.f32.mrb[6].mxu0  ;;  %v2571_v58 = vsel %vm2443_vm5, 1.0, %v1803_v3  ;;  %vm912_vm1 = vcmp.eq.s32.totalorder %v10057_v4, %v14372_v32  ;;  %v14377_v32 = vld [vmem:[#allocation10_spill] sm:$0xff] }
 0x36d   : > { %v2712_v39 = vadd.f32 %v7567_v56, %v11392_v45  ;;  %7724 = vmatprep.mubr.f32.mxu0 %v2571_v58  ;;  %v2706_v8 = vpop.f32.mrb[7].mxu0  ;;  %v2572_v27 = vsel %vm2444_vm6, 1.0, %v1804_v40  ;;  %v1040_v18 = vsel %vm912_vm1, 1.0, %v14187_v10  ;;  %vm913_vm5 = vcmp.eq.s32.totalorder %v10057_v4, %v14374_v50 }
 0x36e   : > { %v2707_v24 = vadd.f32 %v11392_v45, %v2706_v8  ;;  %7725 = vmatmul.mubr.f32.gmra.mrb[112].mxu0 %v2572_v27  ;;  %7762 = vmatprep.mubr.msk.f32.mxu1 %vm3454_vm14, %v3319_v11  ;;  %v2294_v53 = vpop.permute.xlu0 %2293  ;;  %v1041_v57 = vsel %vm913_vm5, 1.0, %v14187_v10  ;;  %vm916_vm13 = vcmp.eq.s32.totalorder %v10057_v4, %v14377_v32 }
 0x36f   : > { %7763 = vmatmul.mubr.msk.f32.gmra.mrb[4].mxu1 %vm3454_vm14, %v3320_v7  ;;  %v3322_v16 = vmax.f32 %v2712_v39, 0.0  ;;  %vm2446_vm12 = vcmp.eq.s32.totalorder %v10057_v4, %v2294_v53  ;;  %v1042_v53 = vsel %vm914_vm4, 1.0, %v14187_v10 }
 0x370   : > { %v3321_v44 = vmax.f32 %v2707_v24, 0.0  ;;  %v1526_v19 = vpop.permute.xlu1 %1525  ;;  %v7570_v63 = vpop.f32.mrb[8].mxu0 }
 0x371   : > { %v2722_v33 = vadd.f32 %v7570_v63, %v11392_v45  ;;  %v2716_v30 = vpop.f32.mrb[9].mxu0  ;;  %vm1678_vm9 = vcmp.eq.s32.totalorder %v10057_v4, %v1526_v19 }
 0x372   : > { %v2717_v12 = vadd.f32 %v11392_v45, %v2716_v30  ;;  %7765 = vmatprep.mubr.msk.f32.mxu1 %vm3454_vm14, %v3321_v44  ;;  %v1806_v61 = vsel %vm1678_vm9, 1.0, %v1038_v48  ;;  %v2297_v42 = vpop.permute.xlu0 %2296 }
 0x373   : > { %7766 = vmatmul.mubr.msk.f32.gmra.mrb[6].mxu1 %vm3454_vm14, %v3322_v16  ;;  %v3324_v25 = vmax.f32 %v2722_v33, 0.0  ;;  %v2574_v43 = vsel %vm2446_vm12, 1.0, %v1806_v61  ;;  %vm2447_vm0 = vcmp.eq.s32.totalorder %v10057_v4, %v2297_v42 }
 0x374   : > { %v3323_v49 = vmax.f32 %v2717_v12, 0.0  ;;  %v7573_v0 = vpop.f32.mrb[10].mxu0 }
 0x375   : > { %v2732_v14 = vadd.f32 %v7573_v0, %v11392_v45  ;;  %v2291_v15 = vpop.permute.xlu1 %2290  ;;  %v2726_v36 = vpop.f32.mrb[11].mxu0 }
 0x376   : > { %vm2445_vm11 = vcmp.eq.s32.totalorder %v10057_v4, %v2291_v15  ;;  %v2727_v22 = vadd.f32 %v11392_v45, %v2726_v36  ;;  %7768 = vmatprep.mubr.msk.f32.mxu1 %vm3454_vm14, %v3323_v49  ;;  %v2306_v27 = vpop.permute.xlu0 %2305 }
 0x377   : > { %7769 = vmatmul.mubr.msk.f32.gmra.mrb[8].mxu1 %vm3454_vm14, %v3324_v25  ;;  %v2573_v37 = vsel %vm2445_vm11, 1.0, %v1805_v59  ;;  %v3326_v55 = vmax.f32 %v2732_v14, 0.0  ;;  %v1809_v59 = vsel %vm1681_vm7, 1.0, %v1041_v57  ;;  %vm2450_vm9 = vcmp.eq.s32.totalorder %v10057_v4, %v2306_v27 }
 0x378   : > { %v3325_v34 = vmax.f32 %v2727_v22, 0.0  ;;  %v7576_v31 = vpop.f32.mrb[12].mxu0  ;;  %7727 = vmatprep.mubr.f32.mxu0 %v2573_v37 }
 0x379   : > { %v2742_v5 = vadd.f32 %v7576_v31, %v11392_v45  ;;  %v2736_v54 = vpop.f32.mrb[13].mxu0  ;;  %7728 = vmatmul.mubr.f32.gmra.mrb[114].mxu0 %v2574_v43 }
 0x37a   : > { %v2737_v62 = vadd.f32 %v11392_v45, %v2736_v54  ;;  %v1529_v17 = vpop.permute.xlu1 %1528  ;;  %7771 = vmatprep.mubr.msk.f32.mxu1 %vm3454_vm14, %v3325_v34  ;;  %v2309_v48 = vpop.permute.xlu0 %2308 }
 0x37b   : > { %vm1679_vm15 = vcmp.eq.s32.totalorder %v10057_v4, %v1529_v17  ;;  %7772 = vmatmul.mubr.msk.f32.gmra.mrb[10].mxu1 %vm3454_vm14, %v3326_v55  ;;  %v3328_v38 = vmax.f32 %v2742_v5, 0.0  ;;  %v1043_v17 = vsel %vm915_vm10, 1.0, %v14187_v10  ;;  %vm2451_vm12 = vcmp.eq.s32.totalorder %v10057_v4, %v2309_v48 }
 0x37c   : > { %v3327_v60 = vmax.f32 %v2737_v62, 0.0  ;;  %v7579_v6 = vpop.f32.mrb[14].mxu0  ;;  %v1807_v20 = vsel %vm1679_vm15, 1.0, %v1039_v23 }
 0x37d   : > { %v2752_v47 = vadd.f32 %v7579_v6, %v11392_v45  ;;  %v2746_v46 = vpop.f32.mrb[15].mxu0  ;;  %v2575_v51 = vsel %vm2447_vm0, 1.0, %v1807_v20 }
 0x37e   : > { %v2747_v29 = vadd.f32 %v11392_v45, %v2746_v46  ;;  %v1532_v26 = vpop.permute.xlu1 %1531  ;;  %7730 = vmatprep.mubr.f32.mxu0 %v2575_v51  ;;  %7774 = vmatprep.mubr.msk.f32.mxu1 %vm3454_vm14, %v3327_v60  ;;  %v11535_v23 = vpop.permute.xlu0 %2317 }
 0x37f   : > { %7775 = vmatmul.mubr.msk.f32.gmra.mrb[12].mxu1 %vm3454_vm14, %v3328_v38  ;;  %v3330_v1 = vmax.f32 %v2752_v47, 0.0  ;;  %vm1680_vm2 = vcmp.eq.s32.totalorder %v10057_v4, %v1532_v26 }
 0x380   : > { %v3329_v41 = vmax.f32 %v2747_v29, 0.0  ;;  %v7582_v13 = vpop.f32.mrb[16].mxu0  ;;  %v1808_v58 = vsel %vm1680_vm2, 1.0, %v1040_v18 }
 0x381   : > { %v2762_v2 = vadd.f32 %v7582_v13, %v11392_v45  ;;  %v2756_v21 = vpop.f32.mrb[17].mxu0 }
 0x382   : > { %v2757_v28 = vadd.f32 %v11392_v45, %v2756_v21  ;;  %7777 = vmatprep.mubr.msk.f32.mxu1 %vm3454_vm14, %v3329_v41 }
 0x383   : > { %v2300_v3 = vpop.permute.xlu1 %2299  ;;  %7778 = vmatmul.mubr.msk.f32.gmra.mrb[14].mxu1 %vm3454_vm14, %v3330_v1  ;;  %v3332_v40 = vmax.f32 %v2762_v2, 0.0  ;;  %v11546_v1 = vpop.permute.xlu0 %2320 }
 0x384   : > { %v3331_v11 = vmax.f32 %v2757_v28, 0.0  ;;  %vm2448_vm3 = vcmp.eq.s32.totalorder %v10057_v4, %v2300_v3  ;;  %v7585_v56 = vpop.f32.mrb[18].mxu0  ;;  %v1044_v3 = vsel %vm916_vm13, 1.0, %v14187_v10 }
 0x385   : > { %v2772_v7 = vadd.f32 %v7585_v56, %v11392_v45  ;;  %v2766_v39 = vpop.f32.mrb[19].mxu0  ;;  %v2576_v8 = vsel %vm2448_vm3, 1.0, %v1808_v58 }
 0x386   : > { %v2767_v24 = vadd.f32 %v11392_v45, %v2766_v39  ;;  %7731 = vmatmul.mubr.f32.gmra.mrb[116].mxu0 %v2576_v8  ;;  %7780 = vmatprep.mubr.msk.f32.mxu1 %vm3454_vm14, %v3331_v11 }
 0x387   : > { %7781 = vmatmul.mubr.msk.f32.gmra.mrb[16].mxu1 %vm3454_vm14, %v3332_v40  ;;  %v3334_v16 = vmax.f32 %v2772_v7, 0.0 }
 0x388   : > { %v3333_v44 = vmax.f32 %v2767_v24, 0.0  ;;  %v1538_v19 = vpop.permute.xlu1 %1537  ;;  %v7588_v63 = vpop.f32.mrb[20].mxu0 }
 0x389   : > { %v2782_v33 = vadd.f32 %v7588_v63, %v11392_v45  ;;  %v2776_v30 = vpop.f32.mrb[21].mxu0  ;;  %vm1682_vm6 = vcmp.eq.s32.totalorder %v10057_v4, %v1538_v19 }
 0x38a   : > { %v2777_v12 = vadd.f32 %v11392_v45, %v2776_v30  ;;  %7783 = vmatprep.mubr.msk.f32.mxu1 %vm3454_vm14, %v3333_v44  ;;  %v1810_v61 = vsel %vm1682_vm6, 1.0, %v1042_v53  ;;  %v1547_v44 = vpop.permute.xlu0 %1546  ;;  %vm2454_vm6 = vcmp.eq.s32.totalorder %v10057_v4, %v11535_v23 }
 0x38b   : > { %7784 = vmatmul.mubr.msk.f32.gmra.mrb[18].mxu1 %vm3454_vm14, %v3334_v16  ;;  %v3336_v25 = vmax.f32 %v2782_v33, 0.0  ;;  %v2578_v43 = vsel %vm2450_vm9, 1.0, %v1810_v61  ;;  %v14378_v16 = vld [vmem:[#allocation12_spill] sm:$0xff]  ;;  %vm1685_vm4 = vcmp.eq.s32.totalorder %v10057_v4, %v1547_v44  ;;  %vm2455_vm9 = vcmp.eq.s32.totalorder %v10057_v4, %v11546_v1 }
 0x38c   : > { %v3335_v49 = vmax.f32 %v2777_v12, 0.0  ;;  %v7591_v0 = vpop.f32.mrb[22].mxu0  ;;  %vm918_vm1 = vcmp.eq.s32.totalorder %v10057_v4, %v14378_v16  ;;  %v14379_v12 = vld [vmem:[#allocation13_spill] sm:$0xff] }
 0x38d   : > { %v2792_v14 = vadd.f32 %v7591_v0, %v11392_v45  ;;  %v2303_v15 = vpop.permute.xlu1 %2302  ;;  %v2786_v36 = vpop.f32.mrb[23].mxu0  ;;  %vm917_vm2 = vcmp.eq.s32.totalorder %v10057_v4, %v14379_v12  ;;  %v1046_v53 = vsel %vm918_vm1, 1.0, %v14187_v10 }
 0x38e   : > { %vm2449_vm8 = vcmp.eq.s32.totalorder %v10057_v4, %v2303_v15  ;;  %v2787_v22 = vadd.f32 %v11392_v45, %v2786_v36  ;;  %7786 = vmatprep.mubr.msk.f32.mxu1 %vm3454_vm14, %v3335_v49  ;;  %v1045_v0 = vsel %vm917_vm2, 1.0, %v14187_v10 }
 0x38f   : > { %7787 = vmatmul.mubr.msk.f32.gmra.mrb[20].mxu1 %vm3454_vm14, %v3336_v25  ;;  %v2577_v37 = vsel %vm2449_vm8, 1.0, %v1809_v59  ;;  %v3338_v42 = vmax.f32 %v2792_v14, 0.0 }
 0x390   : > { %v3337_v34 = vmax.f32 %v2787_v22, 0.0  ;;  %v7594_v31 = vpop.f32.mrb[24].mxu0  ;;  %7733 = vmatprep.mubr.f32.mxu0 %v2577_v37  ;;  %v1813_v22 = vsel %vm1685_vm4, 1.0, %v1045_v0  ;;  %v14380_v37 = vld [vmem:[#allocation15_spill] sm:$0xff]  ;;  %vm4807_vm4 = vcmask 130048  }
 0x391   : > { %v2802_v55 = vadd.f32 %v7594_v31, %v11392_v45  ;;  %v2796_v5 = vpop.f32.mrb[25].mxu0  ;;  %7734 = vmatmul.mubr.f32.gmra.mrb[118].mxu0 %v2578_v43  ;;  %vm919_vm7 = vcmp.eq.s32.totalorder %v10057_v4, %v14380_v37 }
 0x392   : > { %v2797_v54 = vadd.f32 %v11392_v45, %v2796_v5  ;;  %v1541_v62 = vpop.permute.xlu1 %1540  ;;  %7789 = vmatprep.mubr.msk.f32.mxu1 %vm3454_vm14, %v3337_v34 }
 0x393   : > { %vm1683_vm11 = vcmp.eq.s32.totalorder %v10057_v4, %v1541_v62  ;;  %7790 = vmatmul.mubr.msk.f32.gmra.mrb[22].mxu1 %vm3454_vm14, %v3338_v42  ;;  %v3340_v38 = vmax.f32 %v2802_v55, 0.0  ;;  %v1047_v62 = vsel %vm919_vm7, 1.0, %v14187_v10  ;;  %vm6256_vm7 = vcmask 326912  }
 0x394   : > { %v3339_v60 = vmax.f32 %v2797_v54, 0.0  ;;  %v7597_v6 = vpop.f32.mrb[26].mxu0  ;;  %v1811_v20 = vsel %vm1683_vm11, 1.0, %v1043_v17 }
 0x395   : > { %v2812_v47 = vadd.f32 %v7597_v6, %v11392_v45  ;;  %v2806_v46 = vpop.f32.mrb[27].mxu0  ;;  %v2579_v51 = vsel %vm2451_vm12, 1.0, %v1811_v20 }
 0x396   : > { %v2807_v29 = vadd.f32 %v11392_v45, %v2806_v46  ;;  %v1544_v26 = vpop.permute.xlu1 %1543  ;;  %7736 = vmatprep.mubr.f32.mxu0 %v2579_v51  ;;  %7792 = vmatprep.mubr.msk.f32.mxu1 %vm3454_vm14, %v3339_v60 }
 0x397   : > { %7793 = vmatmul.mubr.msk.f32.gmra.mrb[24].mxu1 %vm3454_vm14, %v3340_v38  ;;  %v3342_v2 = vmax.f32 %v2812_v47, 0.0  ;;  %vm1684_vm15 = vcmp.eq.s32.totalorder %v10057_v4, %v1544_v26 }
 0x398   : > { %v3341_v41 = vmax.f32 %v2807_v29, 0.0  ;;  %v7600_v13 = vpop.f32.mrb[28].mxu0  ;;  %v1812_v40 = vsel %vm1684_vm15, 1.0, %v1044_v3  ;;  %v14381_v29 = vld [vmem:[#allocation14_spill] sm:$0xff] }
 0x399   : > { %v2822_v21 = vadd.f32 %v7600_v13, %v11392_v45  ;;  %v2816_v28 = vpop.f32.mrb[29].mxu0  ;;  %vm920_vm10 = vcmp.eq.s32.totalorder %v10057_v4, %v14381_v29 }
 0x39a   : > { %v2817_v18 = vadd.f32 %v11392_v45, %v2816_v28  ;;  %7795 = vmatprep.mubr.msk.f32.mxu1 %vm3454_vm14, %v3341_v41 }
 0x39b   : > { %v2312_v11 = vpop.permute.xlu1 %2311  ;;  %7796 = vmatmul.mubr.msk.f32.gmra.mrb[26].mxu1 %vm3454_vm14, %v3342_v2  ;;  %v3344_v7 = vmax.f32 %v2822_v21, 0.0  ;;  %v1048_v21 = vsel %vm920_vm10, 1.0, %v14187_v10  ;;  %vm6277_vm10 = vcmask 523712  }
 0x39c   : > { %v3343_v56 = vmax.f32 %v2817_v18, 0.0  ;;  %vm2452_vm0 = vcmp.eq.s32.totalorder %v10057_v4, %v2312_v11  ;;  %v7603_v58 = vpop.f32.mrb[30].mxu0 }
 0x39d   : > { %v2832_v39 = vadd.f32 %v7603_v58, %v11392_v45  ;;  %v2826_v8 = vpop.f32.mrb[31].mxu0  ;;  %v2580_v27 = vsel %vm2452_vm0, 1.0, %v1812_v40 }
 0x39e   : > { %v2827_v24 = vadd.f32 %v11392_v45, %v2826_v8  ;;  %7737 = vmatmul.mubr.f32.gmra.mrb[120].mxu0 %v2580_v27  ;;  %7798 = vmatprep.mubr.msk.f32.mxu1 %vm3454_vm14, %v3343_v56 }
 0x39f   : > { %7799 = vmatmul.mubr.msk.f32.gmra.mrb[28].mxu1 %vm3454_vm14, %v3344_v7  ;;  %v3346_v33 = vmax.f32 %v2832_v39, 0.0  ;;  %v1559_v39 = vpop.permute.xlu0 %1558 }
 0x3a0   : > { %v3345_v19 = vmax.f32 %v2827_v24, 0.0  ;;  %v1550_v63 = vpop.permute.xlu1 %1549  ;;  %v7606_v9 = vpop.f32.mrb[32].mxu0  ;;  %vm1689_vm1 = vcmp.eq.s32.totalorder %v10057_v4, %v1559_v39 }
 0x3a1   : > { %v2842_v30 = vadd.f32 %v7606_v9, %v11392_v45  ;;  %v2836_v50 = vpop.f32.mrb[33].mxu0  ;;  %vm1686_vm3 = vcmp.eq.s32.totalorder %v10057_v4, %v1550_v63  ;;  %v14383_v63 = vld [vmem:[#allocation17_spill] sm:$0xff] }
 0x3a2   : > { %v2837_v52 = vadd.f32 %v11392_v45, %v2836_v50  ;;  %7801 = vmatprep.mubr.msk.f32.mxu1 %vm3454_vm14, %v3345_v19  ;;  %v1814_v36 = vsel %vm1686_vm3, 1.0, %v1046_v53  ;;  %v14382_v19 = vld [vmem:[#allocation16_spill] sm:$0xff]  ;;  %vm921_vm15 = vcmp.eq.s32.totalorder %v10057_v4, %v14383_v63 }
 0x3a3   : > { %7802 = vmatmul.mubr.msk.f32.gmra.mrb[30].mxu1 %vm3454_vm14, %v3346_v33  ;;  %v3348_v57 = vmax.f32 %v2842_v30, 0.0  ;;  %v2582_v31 = vsel %vm2454_vm6, 1.0, %v1814_v36  ;;  %vm922_vm13 = vcmp.eq.s32.totalorder %v10057_v4, %v14382_v19  ;;  %v2330_v50 = vpop.permute.xlu0 %2329  ;;  %vm6249_vm6 = vcmask 261312  }
 0x3a4   : > { %v3347_v48 = vmax.f32 %v2837_v52, 0.0  ;;  %v7609_v49 = vpop.f32.mrb[34].mxu0  ;;  %v1050_v12 = vsel %vm922_vm13, 1.0, %v14187_v10  ;;  %v1049_v52 = vsel %vm921_vm15, 1.0, %v14187_v10  ;;  %vm2458_vm2 = vcmp.eq.s32.totalorder %v10057_v4, %v2330_v50 }
 0x3a5   : > { %v2852_v25 = vadd.f32 %v7609_v49, %v11392_v45  ;;  %v2315_v14 = vpop.permute.xlu1 %2314  ;;  %v2846_v15 = vpop.f32.mrb[35].mxu0  ;;  %v1817_v36 = vsel %vm1689_vm1, 1.0, %v1049_v52  ;;  %vm6298_vm13 = vcmask 720512   ;;  %vm6305_vm15 = vcmask 786112  }
 0x3a6   : > { %vm2453_vm5 = vcmp.eq.s32.totalorder %v10057_v4, %v2315_v14  ;;  %v2847_v61 = vadd.f32 %v11392_v45, %v2846_v15  ;;  %7804 = vmatprep.mubr.msk.f32.mxu1 %vm3454_vm14, %v3347_v48  ;;  %vm6319_vm1 = vcmask 917312  }
 0x3a7   : > { %7805 = vmatmul.mubr.msk.f32.gmra.mrb[32].mxu1 %vm3454_vm14, %v3348_v57  ;;  %v2581_v59 = vsel %vm2453_vm5, 1.0, %v1813_v22  ;;  %v3350_v43 = vmax.f32 %v2852_v25, 0.0  ;;  %vm6242_vm5 = vcmask 195712  }
 0x3a8   : > { %v3349_v35 = vmax.f32 %v2847_v61, 0.0  ;;  %v7612_v34 = vpop.f32.mrb[36].mxu0  ;;  %7739 = vmatprep.mubr.f32.mxu0 %v2581_v59 }
 0x3a9   : > { %v2862_v42 = vadd.f32 %v7612_v34, %v11392_v45  ;;  %v2856_v55 = vpop.f32.mrb[37].mxu0  ;;  %7740 = vmatmul.mubr.f32.gmra.mrb[122].mxu0 %v2582_v31 }
 0x3aa   : > { %v2857_v5 = vadd.f32 %v11392_v45, %v2856_v55  ;;  %v1553_v54 = vpop.permute.xlu1 %1552  ;;  %7807 = vmatprep.mubr.msk.f32.mxu1 %vm3454_vm14, %v3349_v35 }
 0x3ab   : > { %vm1687_vm8 = vcmp.eq.s32.totalorder %v10057_v4, %v1553_v54  ;;  %7808 = vmatmul.mubr.msk.f32.gmra.mrb[34].mxu1 %vm3454_vm14, %v3350_v43  ;;  %v3352_v6 = vmax.f32 %v2862_v42, 0.0 }
 0x3ac   : > { %v3351_v17 = vmax.f32 %v2857_v5, 0.0  ;;  %v7615_v23 = vpop.f32.mrb[38].mxu0  ;;  %v1815_v60 = vsel %vm1687_vm8, 1.0, %v1047_v62  ;;  %vm6263_vm8 = vcmask 392512  }
 0x3ad   : > { %v2872_v20 = vadd.f32 %v7615_v23, %v11392_v45  ;;  %v2866_v38 = vpop.f32.mrb[39].mxu0  ;;  %v2583_v47 = vsel %vm2455_vm9, 1.0, %v1815_v60  ;;  %vm6270_vm9 = vcmask 458112  }
 0x3ae   : > { %v2867_v46 = vadd.f32 %v11392_v45, %v2866_v38  ;;  %v1556_v51 = vpop.permute.xlu1 %1555  ;;  %7742 = vmatprep.mubr.f32.mxu0 %v2583_v47  ;;  %7810 = vmatprep.mubr.msk.f32.mxu1 %vm3454_vm14, %v3351_v17 }
 0x3af   : > { %7811 = vmatmul.mubr.msk.f32.gmra.mrb[36].mxu1 %vm3454_vm14, %v3352_v6  ;;  %v3354_v41 = vmax.f32 %v2872_v20, 0.0  ;;  %vm1688_vm11 = vcmp.eq.s32.totalorder %v10057_v4, %v1556_v51 }
 0x3b0   : > { %v3353_v26 = vmax.f32 %v2867_v46, 0.0  ;;  %v7618_v32 = vpop.f32.mrb[40].mxu0  ;;  %v1816_v11 = vsel %vm1688_vm11, 1.0, %v1048_v21  ;;  %vm6284_vm11 = vcmask 589312  }
 0x3b1   : > { %v2882_v13 = vadd.f32 %v7618_v32, %v11392_v45  ;;  %v2876_v1 = vpop.f32.mrb[41].mxu0 }
 0x3b2   : > { %v2877_v2 = vadd.f32 %v11392_v45, %v2876_v1  ;;  %7813 = vmatprep.mubr.msk.f32.mxu1 %vm3454_vm14, %v3353_v26 }
 0x3b3   : > { %v2324_v28 = vpop.permute.xlu1 %2323  ;;  %7814 = vmatmul.mubr.msk.f32.gmra.mrb[38].mxu1 %vm3454_vm14, %v3354_v41  ;;  %v3356_v56 = vmax.f32 %v2882_v13, 0.0 }
 0x3b4   : > { %v3355_v18 = vmax.f32 %v2877_v2, 0.0  ;;  %vm2456_vm12 = vcmp.eq.s32.totalorder %v10057_v4, %v2324_v28  ;;  %v7621_v3 = vpop.f32.mrb[42].mxu0 }
 0x3b5   : > { %v2892_v58 = vadd.f32 %v7621_v3, %v11392_v45  ;;  %v2886_v40 = vpop.f32.mrb[43].mxu0  ;;  %v2584_v7 = vsel %vm2456_vm12, 1.0, %v1816_v11  ;;  %vm6291_vm12 = vcmask 654912  }
 0x3b6   : > { %v2887_v8 = vadd.f32 %v11392_v45, %v2886_v40  ;;  %7743 = vmatmul.mubr.f32.gmra.mrb[124].mxu0 %v2584_v7  ;;  %7816 = vmatprep.mubr.msk.f32.mxu1 %vm3454_vm14, %v3355_v18 }
 0x3b7   : > { %7817 = vmatmul.mubr.msk.f32.gmra.mrb[40].mxu1 %vm3454_vm14, %v3356_v56  ;;  %v3358_v9 = vmax.f32 %v2892_v58, 0.0 }
 0x3b8   : > { %v3357_v27 = vmax.f32 %v2887_v8, 0.0  ;;  %v1562_v24 = vpop.permute.xlu1 %1561  ;;  %v7624_v44 = vpop.f32.mrb[44].mxu0 }
 0x3b9   : > { %v2902_v16 = vadd.f32 %v7624_v44, %v11392_v45  ;;  %v2896_v33 = vpop.f32.mrb[45].mxu0  ;;  %vm1690_vm0 = vcmp.eq.s32.totalorder %v10057_v4, %v1562_v24 }
 0x3ba   : > { %v2897_v30 = vadd.f32 %v11392_v45, %v2896_v33  ;;  %7819 = vmatprep.mubr.msk.f32.mxu1 %vm3454_vm14, %v3357_v27  ;;  %v1818_v14 = vsel %vm1690_vm0, 1.0, %v1050_v12  ;;  %vm6312_vm0 = vcmask 851712  }
 0x3bb   : > { %7820 = vmatmul.mubr.msk.f32.gmra.mrb[42].mxu1 %vm3454_vm14, %v3358_v9  ;;  %v3360_v49 = vmax.f32 %v2902_v16, 0.0  ;;  %v2586_v59 = vsel %vm2458_vm2, 1.0, %v1818_v14  ;;  %vm6326_vm2 = vcmask 982912  }
 0x3bc   : > { %v3359_v53 = vmax.f32 %v2897_v30, 0.0  ;;  %v7627_v48 = vpop.f32.mrb[46].mxu0 }
 0x3bd   : > { %v2912_v0 = vadd.f32 %v7627_v48, %v11392_v45  ;;  %v2327_v57 = vpop.permute.xlu1 %2326  ;;  %v2906_v25 = vpop.f32.mrb[47].mxu0 }
 0x3be   : > { %vm2457_vm3 = vcmp.eq.s32.totalorder %v10057_v4, %v2327_v57  ;;  %v2907_v15 = vadd.f32 %v11392_v45, %v2906_v25  ;;  %7822 = vmatprep.mubr.msk.f32.mxu1 %vm3454_vm14, %v3359_v53 }
 0x3bf   : > { %7823 = vmatmul.mubr.msk.f32.gmra.mrb[44].mxu1 %vm3454_vm14, %v3360_v49  ;;  %v2585_v10 = vsel %vm2457_vm3, 1.0, %v1817_v36  ;;  %v3362_v37 = vmax.f32 %v2912_v0, 0.0  ;;  %vm6333_vm3 = vcmask 1048512  }
 0x3c0   : > { %v3361_v61 = vmax.f32 %v2907_v15, 0.0  ;;  %v7630_v22 = vpop.f32.mrb[48].mxu0  ;;  %7745 = vmatprep.mubr.f32.mxu0 %v2585_v10 }
 0x3c1   : > { %v2922_v35 = vadd.f32 %v7630_v22, %v11392_v45  ;;  %v2916_v34 = vpop.f32.mrb[49].mxu0  ;;  %7746 = vmatmul.mubr.f32.gmra.mrb[126].mxu0 %v2586_v59 }
 0x3c2   : > { %v2917_v31 = vadd.f32 %v11392_v45, %v2916_v34  ;;  %7825 = vmatprep.mubr.msk.f32.mxu1 %vm3454_vm14, %v3361_v61 }
 0x3c3   : > { %7826 = vmatmul.mubr.msk.f32.gmra.mrb[46].mxu1 %vm3454_vm14, %v3362_v37  ;;  %v3364_v55 = vmax.f32 %v2922_v35, 0.0 }
 0x3c4   : > { %v3363_v43 = vmax.f32 %v2917_v31, 0.0  ;;  %v7633_v42 = vpop.f32.mrb[50].mxu0 }
 0x3c5   : > { %v2932_v5 = vadd.f32 %v7633_v42, %v11392_v45  ;;  %v2926_v54 = vpop.f32.mrb[51].mxu0 }
 0x3c6   : > { %v2927_v62 = vadd.f32 %v11392_v45, %v2926_v54  ;;  %7828 = vmatprep.mubr.msk.f32.mxu1 %vm3454_vm14, %v3363_v43 }
 0x3c7   : > { %7829 = vmatmul.mubr.msk.f32.gmra.mrb[48].mxu1 %vm3454_vm14, %v3364_v55  ;;  %v3366_v60 = vmax.f32 %v2932_v5, 0.0 }
 0x3c8   : > { %v3365_v17 = vmax.f32 %v2927_v62, 0.0  ;;  %v7636_v23 = vpop.f32.mrb[52].mxu0 }
 0x3c9   : > { %v2942_v6 = vadd.f32 %v7636_v23, %v11392_v45  ;;  %v2936_v20 = vpop.f32.mrb[53].mxu0 }
 0x3ca   : > { %v2937_v38 = vadd.f32 %v11392_v45, %v2936_v20  ;;  %7831 = vmatprep.mubr.msk.f32.mxu1 %vm3454_vm14, %v3365_v17 }
 0x3cb   : > { %7832 = vmatmul.mubr.msk.f32.gmra.mrb[50].mxu1 %vm3454_vm14, %v3366_v60  ;;  %v3368_v51 = vmax.f32 %v2942_v6, 0.0 }
 0x3cc   : > { %v3367_v47 = vmax.f32 %v2937_v38, 0.0  ;;  %v7639_v46 = vpop.f32.mrb[54].mxu0 }
 0x3cd   : > { %v2952_v29 = vadd.f32 %v7639_v46, %v11392_v45  ;;  %v2946_v26 = vpop.f32.mrb[55].mxu0 }
 0x3ce   : > { %v2947_v32 = vadd.f32 %v11392_v45, %v2946_v26  ;;  %7834 = vmatprep.mubr.msk.f32.mxu1 %vm3454_vm14, %v3367_v47 }
 0x3cf   : > { %7835 = vmatmul.mubr.msk.f32.gmra.mrb[52].mxu1 %vm3454_vm14, %v3368_v51  ;;  %v3370_v1 = vmax.f32 %v2952_v29, 0.0 }
 0x3d0   : > { %v3369_v41 = vmax.f32 %v2947_v32, 0.0  ;;  %v7642_v13 = vpop.f32.mrb[56].mxu0 }
 0x3d1   : > { %v2962_v2 = vadd.f32 %v7642_v13, %v11392_v45  ;;  %v2956_v21 = vpop.f32.mrb[57].mxu0 }
 0x3d2   : > { %v2957_v28 = vadd.f32 %v11392_v45, %v2956_v21  ;;  %7837 = vmatprep.mubr.msk.f32.mxu1 %vm3454_vm14, %v3369_v41 }
 0x3d3   : > { %7838 = vmatmul.mubr.msk.f32.gmra.mrb[54].mxu1 %vm3454_vm14, %v3370_v1  ;;  %v3372_v11 = vmax.f32 %v2962_v2, 0.0 }
 0x3d4   : > { %v3371_v18 = vmax.f32 %v2957_v28, 0.0  ;;  %v7645_v3 = vpop.f32.mrb[58].mxu0 }
 0x3d5   : > { %v2972_v56 = vadd.f32 %v7645_v3, %v11392_v45  ;;  %v2966_v58 = vpop.f32.mrb[59].mxu0 }
 0x3d6   : > { %v2967_v40 = vadd.f32 %v11392_v45, %v2966_v58  ;;  %7840 = vmatprep.mubr.msk.f32.mxu1 %vm3454_vm14, %v3371_v18 }
 0x3d7   : > { %7841 = vmatmul.mubr.msk.f32.gmra.mrb[56].mxu1 %vm3454_vm14, %v3372_v11  ;;  %v3374_v8 = vmax.f32 %v2972_v56, 0.0 }
 0x3d8   : > { %v3373_v7 = vmax.f32 %v2967_v40, 0.0  ;;  %v7648_v39 = vpop.f32.mrb[60].mxu0 }
 0x3d9   : > { %v2982_v27 = vadd.f32 %v7648_v39, %v11392_v45  ;;  %v2976_v24 = vpop.f32.mrb[61].mxu0 }
 0x3da   : > { %v2977_v44 = vadd.f32 %v11392_v45, %v2976_v24  ;;  %7843 = vmatprep.mubr.msk.f32.mxu1 %vm3454_vm14, %v3373_v7 }
 0x3db   : > { %7844 = vmatmul.mubr.msk.f32.gmra.mrb[58].mxu1 %vm3454_vm14, %v3374_v8  ;;  %v3376_v9 = vmax.f32 %v2982_v27, 0.0 }
 0x3dc   : > { %v3375_v19 = vmax.f32 %v2977_v44, 0.0  ;;  %v7651_v63 = vpop.f32.mrb[62].mxu0 }
 0x3dd   : > { %v2992_v16 = vadd.f32 %v7651_v63, %v11392_v45  ;;  %v2986_v33 = vpop.f32.mrb[63].mxu0 }
 0x3de   : > { %v2987_v30 = vadd.f32 %v11392_v45, %v2986_v33  ;;  %7846 = vmatprep.mubr.msk.f32.mxu1 %vm3454_vm14, %v3375_v19 }
 0x3df   : > { %7847 = vmatmul.mubr.msk.f32.gmra.mrb[60].mxu1 %vm3454_vm14, %v3376_v9  ;;  %v3378_v52 = vmax.f32 %v2992_v16, 0.0 }
 0x3e0   : > { %v3377_v50 = vmax.f32 %v2987_v30, 0.0  ;;  %v7654_v12 = vpop.f32.mrb[64].mxu0 }
 0x3e1   : > { %v3002_v53 = vadd.f32 %v7654_v12, %v11392_v45  ;;  %v2996_v48 = vpop.f32.mrb[65].mxu0 }
 0x3e2   : > { %v2997_v49 = vadd.f32 %v11392_v45, %v2996_v48  ;;  %7849 = vmatprep.mubr.msk.f32.mxu1 %vm3454_vm14, %v3377_v50 }
 0x3e3   : > { %7850 = vmatmul.mubr.msk.f32.gmra.mrb[62].mxu1 %vm3454_vm14, %v3378_v52  ;;  %v3380_v25 = vmax.f32 %v3002_v53, 0.0 }
 0x3e4   : > { %v3379_v0 = vmax.f32 %v2997_v49, 0.0  ;;  %v7657_v57 = vpop.f32.mrb[66].mxu0 }
 0x3e5   : > { %v3012_v14 = vadd.f32 %v7657_v57, %v11392_v45  ;;  %v3006_v15 = vpop.f32.mrb[67].mxu0  ;;  %v11702_v57 = vld [vmem:[%s13636_s2] ss:$0 sm:$0xff] }
 0x3e6   : > { %v3007_v36 = vadd.f32 %v11392_v45, %v3006_v15  ;;  %7852 = vmatprep.mubr.msk.f32.mxu1 %vm3454_vm14, %v3379_v0 }
 0x3e7   : > { %7853 = vmatmul.mubr.msk.f32.gmra.mrb[64].mxu1 %vm3454_vm14, %v3380_v25  ;;  %v3382_v22 = vmax.f32 %v3012_v14, 0.0 }
 0x3e8   : > { %v3381_v10 = vmax.f32 %v3007_v36, 0.0  ;;  %v7660_v61 = vpop.f32.mrb[68].mxu0 }
 0x3e9   : > { %v3022_v59 = vadd.f32 %v7660_v61, %v11392_v45  ;;  %v3016_v37 = vpop.f32.mrb[69].mxu0 }
 0x3ea   : > { %v3017_v35 = vadd.f32 %v11392_v45, %v3016_v37  ;;  %7855 = vmatprep.mubr.msk.f32.mxu1 %vm3454_vm14, %v3381_v10 }
 0x3eb   : > { %7856 = vmatmul.mubr.msk.f32.gmra.mrb[66].mxu1 %vm3454_vm14, %v3382_v22  ;;  %v3384_v43 = vmax.f32 %v3022_v59, 0.0 }
 0x3ec   : > { %v3383_v34 = vmax.f32 %v3017_v35, 0.0  ;;  %v7663_v31 = vpop.f32.mrb[70].mxu0 }
 0x3ed   : > { %v3032_v42 = vadd.f32 %v7663_v31, %v11392_v45  ;;  %v3026_v55 = vpop.f32.mrb[71].mxu0 }
 0x3ee   : > { %v3027_v5 = vadd.f32 %v11392_v45, %v3026_v55  ;;  %7858 = vmatprep.mubr.msk.f32.mxu1 %vm3454_vm14, %v3383_v34 }
 0x3ef   : > { %7859 = vmatmul.mubr.msk.f32.gmra.mrb[68].mxu1 %vm3454_vm14, %v3384_v43  ;;  %v3386_v17 = vmax.f32 %v3032_v42, 0.0 }
 0x3f0   : > { %v3385_v54 = vmax.f32 %v3027_v5, 0.0  ;;  %v7666_v62 = vpop.f32.mrb[72].mxu0 }
 0x3f1   : > { %v3042_v23 = vadd.f32 %v7666_v62, %v11392_v45  ;;  %v3036_v60 = vpop.f32.mrb[73].mxu0 }
 0x3f2   : > { %v3037_v6 = vadd.f32 %v11392_v45, %v3036_v60  ;;  %7861 = vmatprep.mubr.msk.f32.mxu1 %vm3454_vm14, %v3385_v54 }
 0x3f3   : > { %7862 = vmatmul.mubr.msk.f32.gmra.mrb[70].mxu1 %vm3454_vm14, %v3386_v17  ;;  %v3388_v47 = vmax.f32 %v3042_v23, 0.0 }
 0x3f4   : > { %v3387_v20 = vmax.f32 %v3037_v6, 0.0  ;;  %v7669_v38 = vpop.f32.mrb[74].mxu0 }
 0x3f5   : > { %v3052_v46 = vadd.f32 %v7669_v38, %v11392_v45  ;;  %v3046_v51 = vpop.f32.mrb[75].mxu0 }
 0x3f6   : > { %v3047_v29 = vadd.f32 %v11392_v45, %v3046_v51  ;;  %7864 = vmatprep.mubr.msk.f32.mxu1 %vm3454_vm14, %v3387_v20 }
 0x3f7   : > { %7865 = vmatmul.mubr.msk.f32.gmra.mrb[72].mxu1 %vm3454_vm14, %v3388_v47  ;;  %v3390_v41 = vmax.f32 %v3052_v46, 0.0 }
 0x3f8   : > { %v3389_v26 = vmax.f32 %v3047_v29, 0.0  ;;  %v7672_v32 = vpop.f32.mrb[76].mxu0 }
 0x3f9   : > { %v3062_v13 = vadd.f32 %v7672_v32, %v11392_v45  ;;  %v3056_v1 = vpop.f32.mrb[77].mxu0 }
 0x3fa   : > { %v3057_v2 = vadd.f32 %v11392_v45, %v3056_v1  ;;  %7867 = vmatprep.mubr.msk.f32.mxu1 %vm3454_vm14, %v3389_v26 }
 0x3fb   : > { %7868 = vmatmul.mubr.msk.f32.gmra.mrb[74].mxu1 %vm3454_vm14, %v3390_v41  ;;  %v3392_v18 = vmax.f32 %v3062_v13, 0.0 }
 0x3fc   : > { %v3391_v21 = vmax.f32 %v3057_v2, 0.0  ;;  %v7675_v28 = vpop.f32.mrb[78].mxu0 }
 0x3fd   : > { %v3072_v3 = vadd.f32 %v7675_v28, %v11392_v45  ;;  %v3066_v11 = vpop.f32.mrb[79].mxu0 }
 0x3fe   : > { %v3067_v56 = vadd.f32 %v11392_v45, %v3066_v11  ;;  %7870 = vmatprep.mubr.msk.f32.mxu1 %vm3454_vm14, %v3391_v21 }
 0x3ff   : > { %7871 = vmatmul.mubr.msk.f32.gmra.mrb[76].mxu1 %vm3454_vm14, %v3392_v18  ;;  %v3394_v7 = vmax.f32 %v3072_v3, 0.0 }
 0x400   : > { %v3393_v58 = vmax.f32 %v3067_v56, 0.0  ;;  %v7678_v40 = vpop.f32.mrb[80].mxu0 }
 0x401   : > { %v3082_v39 = vadd.f32 %v7678_v40, %v11392_v45  ;;  %v3076_v8 = vpop.f32.mrb[81].mxu0 }
 0x402   : > { %v3077_v27 = vadd.f32 %v11392_v45, %v3076_v8  ;;  %7873 = vmatprep.mubr.msk.f32.mxu1 %vm3454_vm14, %v3393_v58 }
 0x403   : > { %7874 = vmatmul.mubr.msk.f32.gmra.mrb[78].mxu1 %vm3454_vm14, %v3394_v7  ;;  %v3396_v19 = vmax.f32 %v3082_v39, 0.0 }
 0x404   : > { %v3395_v24 = vmax.f32 %v3077_v27, 0.0  ;;  %v7681_v44 = vpop.f32.mrb[82].mxu0 }
 0x405   : > { %v3092_v63 = vadd.f32 %v7681_v44, %v11392_v45  ;;  %v3086_v9 = vpop.f32.mrb[83].mxu0 }
 0x406   : > { %v3087_v16 = vadd.f32 %v11392_v45, %v3086_v9  ;;  %7876 = vmatprep.mubr.msk.f32.mxu1 %vm3454_vm14, %v3395_v24 }
 0x407   : > { %7877 = vmatmul.mubr.msk.f32.gmra.mrb[80].mxu1 %vm3454_vm14, %v3396_v19  ;;  %v3398_v50 = vmax.f32 %v3092_v63, 0.0 }
 0x408   : > { %v3397_v33 = vmax.f32 %v3087_v16, 0.0  ;;  %v7684_v30 = vpop.f32.mrb[84].mxu0 }
 0x409   : > { %v3102_v12 = vadd.f32 %v7684_v30, %v11392_v45  ;;  %v3096_v52 = vpop.f32.mrb[85].mxu0 }
 0x40a   : > { %v3097_v53 = vadd.f32 %v11392_v45, %v3096_v52  ;;  %7879 = vmatprep.mubr.msk.f32.mxu1 %vm3454_vm14, %v3397_v33 }
 0x40b   : > { %7880 = vmatmul.mubr.msk.f32.gmra.mrb[82].mxu1 %vm3454_vm14, %v3398_v50  ;;  %v3400_v0 = vmax.f32 %v3102_v12, 0.0 }
 0x40c   : > { %v3399_v48 = vmax.f32 %v3097_v53, 0.0  ;;  %v7687_v49 = vpop.f32.mrb[86].mxu0 }
 0x40d   : > { %v3112_v25 = vadd.f32 %v11702_v57, %v7687_v49  ;;  %v3106_v14 = vpop.f32.mrb[87].mxu0 }
 0x40e   : > { %v3107_v15 = vadd.f32 %v11702_v57, %v3106_v14  ;;  %7882 = vmatprep.mubr.msk.f32.mxu1 %vm3454_vm14, %v3399_v48 }
 0x40f   : > { %7883 = vmatmul.mubr.msk.f32.gmra.mrb[84].mxu1 %vm3454_vm14, %v3400_v0  ;;  %v3402_v10 = vmax.f32 %v3112_v25, 0.0 }
 0x410   : > { %v3401_v45 = vmax.f32 %v3107_v15, 0.0  ;;  %v7690_v36 = vpop.f32.mrb[88].mxu0 }
 0x411   : > { %v3122_v61 = vadd.f32 %v11702_v57, %v7690_v36  ;;  %v3116_v22 = vpop.f32.mrb[89].mxu0 }
 0x412   : > { %v3117_v59 = vadd.f32 %v11702_v57, %v3116_v22  ;;  %7885 = vmatprep.mubr.msk.f32.mxu1 %vm3454_vm14, %v3401_v45  ;;  %v11751_v45 = vld [vmem:[%s13638_s4] ss:$0 sm:$0xff] }
 0x413   : > { %7886 = vmatmul.mubr.msk.f32.gmra.mrb[86].mxu1 %vm3454_vm14, %v3402_v10  ;;  %v3404_v34 = vmax.f32 %v3122_v61, 0.0 }
 0x414   : > { %v3403_v37 = vmax.f32 %v3117_v59, 0.0  ;;  %v7693_v35 = vpop.f32.mrb[90].mxu0 }
 0x415   : > { %v3132_v31 = vadd.f32 %v11702_v57, %v7693_v35  ;;  %v3126_v43 = vpop.f32.mrb[91].mxu0 }
 0x416   : > { %v3127_v42 = vadd.f32 %v11702_v57, %v3126_v43  ;;  %7888 = vmatprep.mubr.msk.f32.mxu1 %vm3454_vm14, %v3403_v37 }
 0x417   : > { %7889 = vmatmul.mubr.msk.f32.gmra.mrb[88].mxu1 %vm3454_vm14, %v3404_v34  ;;  %v3406_v54 = vmax.f32 %v3132_v31, 0.0  ;;  %v11761_v31 = vld [vmem:[%s13639_s5] ss:$0 sm:$0xff] }
 0x418   : > { %v3405_v55 = vmax.f32 %v3127_v42, 0.0  ;;  %v7696_v5 = vpop.f32.mrb[92].mxu0 }
 0x419   : > { %v3142_v62 = vadd.f32 %v11702_v57, %v7696_v5  ;;  %v3136_v17 = vpop.f32.mrb[93].mxu0 }
 0x41a   : > { %v3137_v23 = vadd.f32 %v11702_v57, %v3136_v17  ;;  %7891 = vmatprep.mubr.msk.f32.mxu1 %vm3454_vm14, %v3405_v55 }
 0x41b   : > { %7892 = vmatmul.mubr.msk.f32.gmra.mrb[90].mxu1 %vm3454_vm14, %v3406_v54  ;;  %v3408_v20 = vmax.f32 %v3142_v62, 0.0 }
 0x41c   : > { %v3407_v60 = vmax.f32 %v3137_v23, 0.0  ;;  %v7699_v6 = vpop.f32.mrb[94].mxu0 }
 0x41d   : > { %v3152_v38 = vadd.f32 %v11702_v57, %v7699_v6  ;;  %v3146_v47 = vpop.f32.mrb[95].mxu0 }
 0x41e   : > { %v3147_v46 = vadd.f32 %v11702_v57, %v3146_v47  ;;  %7894 = vmatprep.mubr.msk.f32.mxu1 %vm3454_vm14, %v3407_v60 }
 0x41f   : > { %7895 = vmatmul.mubr.msk.f32.gmra.mrb[92].mxu1 %vm3454_vm14, %v3408_v20  ;;  %v3410_v26 = vmax.f32 %v3152_v38, 0.0 }
 0x420   : > { %v3409_v51 = vmax.f32 %v3147_v46, 0.0  ;;  %v7702_v29 = vpop.f32.mrb[96].mxu0 }
 0x421   : > { %v3162_v32 = vadd.f32 %v11702_v57, %v7702_v29  ;;  %v3156_v41 = vpop.f32.mrb[97].mxu0 }
 0x422   : > { %v3157_v13 = vadd.f32 %v11702_v57, %v3156_v41  ;;  %7897 = vmatprep.mubr.msk.f32.mxu1 %vm3454_vm14, %v3409_v51 }
 0x423   : > { %7898 = vmatmul.mubr.msk.f32.gmra.mrb[94].mxu1 %vm3454_vm14, %v3410_v26  ;;  %v3412_v21 = vmax.f32 %v3162_v32, 0.0 }
 0x424   : > { %v3411_v1 = vmax.f32 %v3157_v13, 0.0  ;;  %v7705_v2 = vpop.f32.mrb[98].mxu0 }
 0x425   : > { %v3172_v28 = vadd.f32 %v11702_v57, %v7705_v2  ;;  %v3166_v18 = vpop.f32.mrb[99].mxu0 }
 0x426   : > { %v3167_v3 = vadd.f32 %v11702_v57, %v3166_v18  ;;  %7900 = vmatprep.mubr.msk.f32.mxu1 %vm3454_vm14, %v3411_v1 }
 0x427   : > { %7901 = vmatmul.mubr.msk.f32.gmra.mrb[96].mxu1 %vm3454_vm14, %v3412_v21  ;;  %v3414_v58 = vmax.f32 %v3172_v28, 0.0 }
 0x428   : > { %v3413_v11 = vmax.f32 %v3167_v3, 0.0  ;;  %v7708_v56 = vpop.f32.mrb[100].mxu0 }
 0x429   : > { %v3182_v40 = vadd.f32 %v11702_v57, %v7708_v56  ;;  %v3176_v7 = vpop.f32.mrb[101].mxu0 }
 0x42a   : > { %v3177_v39 = vadd.f32 %v11702_v57, %v3176_v7  ;;  %7903 = vmatprep.mubr.msk.f32.mxu1 %vm3454_vm14, %v3413_v11 }
 0x42b   : > { %7904 = vmatmul.mubr.msk.f32.gmra.mrb[98].mxu1 %vm3454_vm14, %v3414_v58  ;;  %v3416_v24 = vmax.f32 %v3182_v40, 0.0 }
 0x42c   : > { %v3415_v8 = vmax.f32 %v3177_v39, 0.0  ;;  %v7711_v27 = vpop.f32.mrb[102].mxu0 }
 0x42d   : > { %v3192_v44 = vadd.f32 %v11702_v57, %v7711_v27  ;;  %v3186_v19 = vpop.f32.mrb[103].mxu0 }
 0x42e   : > { %v3187_v63 = vadd.f32 %v11702_v57, %v3186_v19  ;;  %7906 = vmatprep.mubr.msk.f32.mxu1 %vm3454_vm14, %v3415_v8 }
 0x42f   : > { %7907 = vmatmul.mubr.msk.f32.gmra.mrb[100].mxu1 %vm3454_vm14, %v3416_v24  ;;  %v3418_v33 = vmax.f32 %v3192_v44, 0.0 }
 0x430   : > { %v3417_v9 = vmax.f32 %v3187_v63, 0.0  ;;  %v7714_v16 = vpop.f32.mrb[104].mxu0 }
 0x431   : > { %v3202_v30 = vadd.f32 %v11702_v57, %v7714_v16  ;;  %v3196_v50 = vpop.f32.mrb[105].mxu0 }
 0x432   : > { %v3197_v12 = vadd.f32 %v11702_v57, %v3196_v50  ;;  %7909 = vmatprep.mubr.msk.f32.mxu1 %vm3454_vm14, %v3417_v9 }
 0x433   : > { %7910 = vmatmul.mubr.msk.f32.gmra.mrb[102].mxu1 %vm3454_vm14, %v3418_v33  ;;  %v3420_v48 = vmax.f32 %v3202_v30, 0.0 }
 0x434   : > { %v3419_v52 = vmax.f32 %v3197_v12, 0.0  ;;  %v7717_v53 = vpop.f32.mrb[106].mxu0 }
 0x435   : > { %v3212_v49 = vadd.f32 %v11702_v57, %v7717_v53  ;;  %v3206_v0 = vpop.f32.mrb[107].mxu0 }
 0x436   : > { %v3207_v25 = vadd.f32 %v11702_v57, %v3206_v0  ;;  %7912 = vmatprep.mubr.msk.f32.mxu1 %vm3454_vm14, %v3419_v52 }
 0x437   : > { %7913 = vmatmul.mubr.msk.f32.gmra.mrb[104].mxu1 %vm3454_vm14, %v3420_v48  ;;  %v3422_v36 = vmax.f32 %v3212_v49, 0.0 }
 0x438   : > { %v3421_v14 = vmax.f32 %v3207_v25, 0.0  ;;  %v7720_v15 = vpop.f32.mrb[108].mxu0 }
 0x439   : > { %v3222_v10 = vadd.f32 %v11702_v57, %v7720_v15  ;;  %v3216_v61 = vpop.f32.mrb[109].mxu0 }
 0x43a   : > { %v3217_v22 = vadd.f32 %v11702_v57, %v3216_v61  ;;  %v7758_v59 = vpop.f32.mrb[0].mxu1  ;;  %7915 = vmatprep.mubr.msk.f32.mxu1 %vm3454_vm14, %v3421_v14 }
 0x43b   : > { %v3911_v37 = vadd.f32 %v7758_v59, %v11751_v45  ;;  %v3905_v35 = vpop.f32.mrb[1].mxu1  ;;  %7916 = vmatmul.mubr.msk.f32.gmra.mrb[106].mxu1 %vm3454_vm14, %v3422_v36  ;;  %v3424_v55 = vmax.f32 %v3222_v10, 0.0 }
 0x43c   : > { %v3423_v34 = vmax.f32 %v3217_v22, 0.0  ;;  %v3906_v43 = vadd.f32 %v11751_v45, %v3905_v35  ;;  %v7723_v42 = vpop.f32.mrb[110].mxu0 }
 0x43d   : > { %v4545_v5 = vmax.f32 %v3911_v37, 0.0  ;;  %v3232_v54 = vadd.f32 %v11702_v57, %v7723_v42  ;;  %v3226_v62 = vpop.f32.mrb[111].mxu0 }
 0x43e   : > { %v4544_v17 = vmax.f32 %v3906_v43, 0.0  ;;  %v3227_v23 = vadd.f32 %v11702_v57, %v3226_v62  ;;  %v7761_v60 = vpop.f32.mrb[2].mxu1  ;;  %7918 = vmatprep.mubr.msk.f32.mxu1 %vm3454_vm14, %v3423_v34 }
 0x43f   : > { %v4680_v6 = vmul.f32 %v11761_v31, %v4545_v5  ;;  %v3921_v20 = vadd.f32 %v7761_v60, %v11751_v45  ;;  %v3915_v38 = vpop.f32.mrb[3].mxu1  ;;  %7919 = vmatmul.mubr.msk.f32.gmra.mrb[108].mxu1 %vm3454_vm14, %v3424_v55  ;;  %v3426_v29 = vmax.f32 %v3232_v54, 0.0 }
 0x440   : > { %v4679_v47 = vmul.f32 %v11761_v31, %v4544_v17  ;;  %v3425_v46 = vmax.f32 %v3227_v23, 0.0  ;;  %v3916_v51 = vadd.f32 %v11751_v45, %v3915_v38 }
 0x441   : > { %v4547_v26 = vmax.f32 %v3921_v20, 0.0  ;;  %v7726_v32 = vpop.f32.mrb[112].mxu0  ;;  %v4811_v41 = vsel %vm4807_vm4, %v4680_v6, 0.0 }
 0x442   : > { %v4546_v13 = vmax.f32 %v3916_v51, 0.0  ;;  %v3242_v1 = vadd.f32 %v11702_v57, %v7726_v32  ;;  %v7764_v2 = vpop.f32.mrb[4].mxu1  ;;  %4812 = vadd.xlane.f32.xlu0 %v4811_v41  ;;  %v3236_v21 = vpop.f32.mrb[113].mxu0  ;;  %7921 = vmatprep.mubr.msk.f32.mxu1 %vm3454_vm14, %v3425_v46  ;;  %v4808_v28 = vsel %vm4807_vm4, %v4679_v47, 0.0 }
 0x443   : > { %v4682_v18 = vmul.f32 %v11761_v31, %v4547_v26  ;;  %v3931_v3 = vadd.f32 %v7764_v2, %v11751_v45  ;;  %v3237_v11 = vadd.f32 %v11702_v57, %v3236_v21  ;;  %4809 = vadd.xlane.f32.xlu1 %v4808_v28  ;;  %v3925_v56 = vpop.f32.mrb[5].mxu1  ;;  %7922 = vmatmul.mubr.msk.f32.gmra.mrb[110].mxu1 %vm3454_vm14, %v3426_v29 }
 0x444   : > { %v4681_v58 = vmul.f32 %v11761_v31, %v4546_v13  ;;  %v3926_v40 = vadd.f32 %v11751_v45, %v3925_v56  ;;  %v3428_v27 = vmax.f32 %v3242_v1, 0.0 }
 0x445   : > { %v4549_v7 = vmax.f32 %v3931_v3, 0.0  ;;  %v3427_v39 = vmax.f32 %v3237_v11, 0.0  ;;  %v4817_v8 = vsel %vm4807_vm4, %v4682_v18, 0.0 }
 0x446   : > { %v4548_v24 = vmax.f32 %v3926_v40, 0.0  ;;  %v7767_v44 = vpop.f32.mrb[6].mxu1  ;;  %4818 = vadd.xlane.f32.xlu0 %v4817_v8  ;;  %v4814_v19 = vsel %vm4807_vm4, %v4681_v58, 0.0 }
 0x447   : > { %v4684_v63 = vmul.f32 %v11761_v31, %v4549_v7  ;;  %v3941_v9 = vadd.f32 %v7767_v44, %v11751_v45  ;;  %4815 = vadd.xlane.f32.xlu1 %v4814_v19  ;;  %v3935_v16 = vpop.f32.mrb[7].mxu1  ;;  %7924 = vmatprep.mubr.msk.f32.mxu1 %vm3454_vm14, %v3427_v39 }
 0x448   : > { %v4683_v33 = vmul.f32 %v11761_v31, %v4548_v24  ;;  %v3936_v30 = vadd.f32 %v11751_v45, %v3935_v16  ;;  %7925 = vmatmul.mubr.msk.f32.gmra.mrb[112].mxu1 %vm3454_vm14, %v3428_v27 }
 0x449   : > { %v4551_v50 = vmax.f32 %v3941_v9, 0.0  ;;  %v4823_v12 = vsel %vm4807_vm4, %v4684_v63, 0.0 }
 0x44a   : > { %v4550_v52 = vmax.f32 %v3936_v30, 0.0  ;;  %v7770_v53 = vpop.f32.mrb[8].mxu1  ;;  %4824 = vadd.xlane.f32.xlu0 %v4823_v12  ;;  %v4820_v48 = vsel %vm4807_vm4, %v4683_v33, 0.0 }
 0x44b   : > { %v4686_v49 = vmul.f32 %v11761_v31, %v4551_v50  ;;  %v3951_v0 = vadd.f32 %v7770_v53, %v11751_v45  ;;  %4821 = vadd.xlane.f32.xlu1 %v4820_v48  ;;  %v3945_v25 = vpop.f32.mrb[9].mxu1 }
 0x44c   : > { %v4685_v14 = vmul.f32 %v11761_v31, %v4550_v52  ;;  %v3946_v15 = vadd.f32 %v11751_v45, %v3945_v25  ;;  %v7729_v36 = vpop.f32.mrb[114].mxu0 }
 0x44d   : > { %v4553_v10 = vmax.f32 %v3951_v0, 0.0  ;;  %v3252_v61 = vadd.f32 %v11702_v57, %v7729_v36  ;;  %v3246_v22 = vpop.f32.mrb[115].mxu0  ;;  %v4829_v59 = vsel %vm4807_vm4, %v4686_v49, 0.0 }
 0x44e   : > { %v4552_v37 = vmax.f32 %v3946_v15, 0.0  ;;  %v3247_v35 = vadd.f32 %v11702_v57, %v3246_v22  ;;  %v7773_v34 = vpop.f32.mrb[10].mxu1  ;;  %4830 = vadd.xlane.f32.xlu0 %v4829_v59  ;;  %v4826_v43 = vsel %vm4807_vm4, %v4685_v14, 0.0 }
 0x44f   : > { %v4688_v42 = vmul.f32 %v11761_v31, %v4553_v10  ;;  %v3961_v55 = vadd.f32 %v7773_v34, %v11751_v45  ;;  %4827 = vadd.xlane.f32.xlu1 %v4826_v43  ;;  %v3955_v5 = vpop.f32.mrb[11].mxu1  ;;  %v3430_v23 = vmax.f32 %v3252_v61, 0.0 }
 0x450   : > { %v4687_v54 = vmul.f32 %v11761_v31, %v4552_v37  ;;  %v3429_v62 = vmax.f32 %v3247_v35, 0.0  ;;  %v3956_v17 = vadd.f32 %v11751_v45, %v3955_v5 }
 0x451   : > { %v4555_v60 = vmax.f32 %v3961_v55, 0.0  ;;  %v4835_v6 = vsel %vm4807_vm4, %v4688_v42, 0.0 }
 0x452   : > { %v4554_v20 = vmax.f32 %v3956_v17, 0.0  ;;  %v7776_v38 = vpop.f32.mrb[12].mxu1  ;;  %4836 = vadd.xlane.f32.xlu0 %v4835_v6  ;;  %7927 = vmatprep.mubr.msk.f32.mxu1 %vm3454_vm14, %v3429_v62  ;;  %v4832_v47 = vsel %vm4807_vm4, %v4687_v54, 0.0 }
 0x453   : > { %v4690_v46 = vmul.f32 %v11761_v31, %v4555_v60  ;;  %v3971_v51 = vadd.f32 %v7776_v38, %v11751_v45  ;;  %4833 = vadd.xlane.f32.xlu1 %v4832_v47  ;;  %v3965_v29 = vpop.f32.mrb[13].mxu1  ;;  %7928 = vmatmul.mubr.msk.f32.gmra.mrb[114].mxu1 %vm3454_vm14, %v3430_v23 }
 0x454   : > { %v4689_v26 = vmul.f32 %v11761_v31, %v4554_v20  ;;  %v3966_v32 = vadd.f32 %v11751_v45, %v3965_v29 }
 0x455   : > { %v4557_v41 = vmax.f32 %v3971_v51, 0.0  ;;  %v4841_v13 = vsel %vm4807_vm4, %v4690_v46, 0.0 }
 0x456   : > { %v4556_v1 = vmax.f32 %v3966_v32, 0.0  ;;  %v7779_v2 = vpop.f32.mrb[14].mxu1  ;;  %4842 = vadd.xlane.f32.xlu0 %v4841_v13  ;;  %v4838_v21 = vsel %vm4807_vm4, %v4689_v26, 0.0 }
 0x457   : > { %v4692_v28 = vmul.f32 %v11761_v31, %v4557_v41  ;;  %v3981_v18 = vadd.f32 %v7779_v2, %v11751_v45  ;;  %4839 = vadd.xlane.f32.xlu1 %v4838_v21  ;;  %v3975_v3 = vpop.f32.mrb[15].mxu1 }
 0x458   : > { %v4691_v11 = vmul.f32 %v11761_v31, %v4556_v1  ;;  %v3976_v56 = vadd.f32 %v11751_v45, %v3975_v3 }
 0x459   : > { %v4559_v58 = vmax.f32 %v3981_v18, 0.0  ;;  %v7732_v40 = vpop.f32.mrb[116].mxu0  ;;  %v4847_v7 = vsel %vm4807_vm4, %v4692_v28, 0.0 }
 0x45a   : > { %v4558_v39 = vmax.f32 %v3976_v56, 0.0  ;;  %v3262_v8 = vadd.f32 %v11702_v57, %v7732_v40  ;;  %v7782_v27 = vpop.f32.mrb[16].mxu1  ;;  %4848 = vadd.xlane.f32.xlu0 %v4847_v7  ;;  %v3256_v24 = vpop.f32.mrb[117].mxu0  ;;  %v4844_v44 = vsel %vm4807_vm4, %v4691_v11, 0.0 }
 0x45b   : > { %v4694_v19 = vmul.f32 %v11761_v31, %v4559_v58  ;;  %v3991_v63 = vadd.f32 %v7782_v27, %v11751_v45  ;;  %v3257_v9 = vadd.f32 %v11702_v57, %v3256_v24  ;;  %4845 = vadd.xlane.f32.xlu1 %v4844_v44  ;;  %v3985_v16 = vpop.f32.mrb[17].mxu1 }
 0x45c   : > { %v4693_v33 = vmul.f32 %v11761_v31, %v4558_v39  ;;  %v3986_v30 = vadd.f32 %v11751_v45, %v3985_v16  ;;  %v3432_v53 = vmax.f32 %v3262_v8, 0.0 }
 0x45d   : > { %v4561_v50 = vmax.f32 %v3991_v63, 0.0  ;;  %v3431_v12 = vmax.f32 %v3257_v9, 0.0  ;;  %v4853_v52 = vsel %vm4807_vm4, %v4694_v19, 0.0 }
 0x45e   : > { %v4560_v48 = vmax.f32 %v3986_v30, 0.0  ;;  %v7785_v49 = vpop.f32.mrb[18].mxu1  ;;  %4854 = vadd.xlane.f32.xlu0 %v4853_v52  ;;  %v4850_v0 = vsel %vm4807_vm4, %v4693_v33, 0.0 }
 0x45f   : > { %v4696_v25 = vmul.f32 %v11761_v31, %v4561_v50  ;;  %v4001_v14 = vadd.f32 %v7785_v49, %v11751_v45  ;;  %4851 = vadd.xlane.f32.xlu1 %v4850_v0  ;;  %v3995_v15 = vpop.f32.mrb[19].mxu1  ;;  %7930 = vmatprep.mubr.msk.f32.mxu1 %vm3454_vm14, %v3431_v12 }
 0x460   : > { %v4695_v36 = vmul.f32 %v11761_v31, %v4560_v48  ;;  %v3996_v10 = vadd.f32 %v11751_v45, %v3995_v15  ;;  %7931 = vmatmul.mubr.msk.f32.gmra.mrb[116].mxu1 %vm3454_vm14, %v3432_v53 }
 0x461   : > { %v4563_v61 = vmax.f32 %v4001_v14, 0.0  ;;  %v4859_v22 = vsel %vm4807_vm4, %v4696_v25, 0.0 }
 0x462   : > { %v4562_v59 = vmax.f32 %v3996_v10, 0.0  ;;  %v7788_v37 = vpop.f32.mrb[20].mxu1  ;;  %4860 = vadd.xlane.f32.xlu0 %v4859_v22  ;;  %v4856_v35 = vsel %vm4807_vm4, %v4695_v36, 0.0 }
 0x463   : > { %v4698_v34 = vmul.f32 %v11761_v31, %v4563_v61  ;;  %v4011_v43 = vadd.f32 %v7788_v37, %v11751_v45  ;;  %4857 = vadd.xlane.f32.xlu1 %v4856_v35  ;;  %v4005_v42 = vpop.f32.mrb[21].mxu1 }
 0x464   : > { %v4697_v55 = vmul.f32 %v11761_v31, %v4562_v59  ;;  %v4006_v5 = vadd.f32 %v11751_v45, %v4005_v42  ;;  %v7735_v54 = vpop.f32.mrb[118].mxu0 }
 0x465   : > { %v4565_v62 = vmax.f32 %v4011_v43, 0.0  ;;  %v3272_v17 = vadd.f32 %v11702_v57, %v7735_v54  ;;  %v3266_v23 = vpop.f32.mrb[119].mxu0  ;;  %v4865_v60 = vsel %vm4807_vm4, %v4698_v34, 0.0 }
 0x466   : > { %v4564_v6 = vmax.f32 %v4006_v5, 0.0  ;;  %v3267_v20 = vadd.f32 %v11702_v57, %v3266_v23  ;;  %v7791_v38 = vpop.f32.mrb[22].mxu1  ;;  %4866 = vadd.xlane.f32.xlu0 %v4865_v60  ;;  %v4862_v47 = vsel %vm4807_vm4, %v4697_v55, 0.0 }
 0x467   : > { %v4700_v46 = vmul.f32 %v11761_v31, %v4565_v62  ;;  %v4021_v51 = vadd.f32 %v7791_v38, %v11751_v45  ;;  %4863 = vadd.xlane.f32.xlu1 %v4862_v47  ;;  %v4015_v29 = vpop.f32.mrb[23].mxu1  ;;  %v3434_v13 = vmax.f32 %v3272_v17, 0.0 }
 0x468   : > { %v4699_v26 = vmul.f32 %v11761_v31, %v4564_v6  ;;  %v3433_v32 = vmax.f32 %v3267_v20, 0.0  ;;  %v4016_v41 = vadd.f32 %v11751_v45, %v4015_v29 }
 0x469   : > { %v4567_v1 = vmax.f32 %v4021_v51, 0.0  ;;  %v4871_v2 = vsel %vm4807_vm4, %v4700_v46, 0.0 }
 0x46a   : > { %v4566_v21 = vmax.f32 %v4016_v41, 0.0  ;;  %v7794_v28 = vpop.f32.mrb[24].mxu1  ;;  %4872 = vadd.xlane.f32.xlu0 %v4871_v2  ;;  %7933 = vmatprep.mubr.msk.f32.mxu1 %vm3454_vm14, %v3433_v32  ;;  %v4868_v18 = vsel %vm4807_vm4, %v4699_v26, 0.0 }
 0x46b   : > { %v4702_v3 = vmul.f32 %v11761_v31, %v4567_v1  ;;  %v4031_v11 = vadd.f32 %v7794_v28, %v11751_v45  ;;  %4869 = vadd.xlane.f32.xlu1 %v4868_v18  ;;  %v4025_v56 = vpop.f32.mrb[25].mxu1  ;;  %7934 = vmatmul.mubr.msk.f32.gmra.mrb[118].mxu1 %vm3454_vm14, %v3434_v13 }
 0x46c   : > { %v4701_v58 = vmul.f32 %v11761_v31, %v4566_v21  ;;  %v4026_v40 = vadd.f32 %v11751_v45, %v4025_v56 }
 0x46d   : > { %v4569_v7 = vmax.f32 %v4031_v11, 0.0  ;;  %v4877_v39 = vsel %vm4807_vm4, %v4702_v3, 0.0 }
 0x46e   : > { %v4568_v8 = vmax.f32 %v4026_v40, 0.0  ;;  %v7797_v27 = vpop.f32.mrb[26].mxu1  ;;  %4878 = vadd.xlane.f32.xlu0 %v4877_v39  ;;  %v4874_v24 = vsel %vm4807_vm4, %v4701_v58, 0.0 }
 0x46f   : > { %v4704_v44 = vmul.f32 %v11761_v31, %v4569_v7  ;;  %v4041_v19 = vadd.f32 %v7797_v27, %v11751_v45  ;;  %4875 = vadd.xlane.f32.xlu1 %v4874_v24  ;;  %v4035_v63 = vpop.f32.mrb[27].mxu1 }
 0x470   : > { %v4703_v9 = vmul.f32 %v11761_v31, %v4568_v8  ;;  %v4036_v16 = vadd.f32 %v11751_v45, %v4035_v63 }
 0x471   : > { %v4571_v33 = vmax.f32 %v4041_v19, 0.0  ;;  %v7738_v30 = vpop.f32.mrb[120].mxu0  ;;  %v4883_v50 = vsel %vm4807_vm4, %v4704_v44, 0.0 }
 0x472   : > { %v4570_v12 = vmax.f32 %v4036_v16, 0.0  ;;  %v3282_v52 = vadd.f32 %v11702_v57, %v7738_v30  ;;  %v7800_v53 = vpop.f32.mrb[28].mxu1  ;;  %4884 = vadd.xlane.f32.xlu0 %v4883_v50  ;;  %v3276_v48 = vpop.f32.mrb[121].mxu0  ;;  %v4880_v49 = vsel %vm4807_vm4, %v4703_v9, 0.0 }
 0x473   : > { %v4706_v0 = vmul.f32 %v11761_v31, %v4571_v33  ;;  %v4051_v25 = vadd.f32 %v7800_v53, %v11751_v45  ;;  %v3277_v14 = vadd.f32 %v11702_v57, %v3276_v48  ;;  %4881 = vadd.xlane.f32.xlu1 %v4880_v49  ;;  %v4045_v15 = vpop.f32.mrb[29].mxu1 }
 0x474   : > { %v4705_v36 = vmul.f32 %v11761_v31, %v4570_v12  ;;  %v4046_v10 = vadd.f32 %v11751_v45, %v4045_v15  ;;  %v3436_v37 = vmax.f32 %v3282_v52, 0.0 }
 0x475   : > { %v4573_v61 = vmax.f32 %v4051_v25, 0.0  ;;  %v3435_v22 = vmax.f32 %v3277_v14, 0.0  ;;  %v4889_v59 = vsel %vm4807_vm4, %v4706_v0, 0.0 }
 0x476   : > { %v4572_v35 = vmax.f32 %v4046_v10, 0.0  ;;  %v7803_v34 = vpop.f32.mrb[30].mxu1  ;;  %4890 = vadd.xlane.f32.xlu0 %v4889_v59  ;;  %v4886_v43 = vsel %vm4807_vm4, %v4705_v36, 0.0 }
 0x477   : > { %v4708_v42 = vmul.f32 %v11761_v31, %v4573_v61  ;;  %v4061_v55 = vadd.f32 %v7803_v34, %v11751_v45  ;;  %4887 = vadd.xlane.f32.xlu1 %v4886_v43  ;;  %v4055_v5 = vpop.f32.mrb[31].mxu1  ;;  %7936 = vmatprep.mubr.msk.f32.mxu1 %vm3454_vm14, %v3435_v22 }
 0x478   : > { %v4707_v54 = vmul.f32 %v11761_v31, %v4572_v35  ;;  %v4056_v62 = vadd.f32 %v11751_v45, %v4055_v5  ;;  %7937 = vmatmul.mubr.msk.f32.gmra.mrb[120].mxu1 %vm3454_vm14, %v3436_v37 }
 0x479   : > { %v4575_v17 = vmax.f32 %v4061_v55, 0.0  ;;  %v4895_v23 = vsel %vm4807_vm4, %v4708_v42, 0.0 }
 0x47a   : > { %v4574_v60 = vmax.f32 %v4056_v62, 0.0  ;;  %v7806_v6 = vpop.f32.mrb[32].mxu1  ;;  %4896 = vadd.xlane.f32.xlu0 %v4895_v23  ;;  %v4892_v20 = vsel %vm4807_vm4, %v4707_v54, 0.0 }
 0x47b   : > { %v4710_v38 = vmul.f32 %v11761_v31, %v4575_v17  ;;  %v4071_v47 = vadd.f32 %v7806_v6, %v11751_v45  ;;  %4893 = vadd.xlane.f32.xlu1 %v4892_v20  ;;  %v4065_v46 = vpop.f32.mrb[33].mxu1 }
 0x47c   : > { %v4709_v51 = vmul.f32 %v11761_v31, %v4574_v60  ;;  %v4066_v29 = vadd.f32 %v11751_v45, %v4065_v46  ;;  %v7741_v26 = vpop.f32.mrb[122].mxu0 }
 0x47d   : > { %v4577_v32 = vmax.f32 %v4071_v47, 0.0  ;;  %v3292_v41 = vadd.f32 %v11702_v57, %v7741_v26  ;;  %v3286_v13 = vpop.f32.mrb[123].mxu0  ;;  %v4901_v1 = vsel %vm4807_vm4, %v4710_v38, 0.0 }
 0x47e   : > { %v4576_v2 = vmax.f32 %v4066_v29, 0.0  ;;  %v3287_v21 = vadd.f32 %v11702_v57, %v3286_v13  ;;  %v7809_v28 = vpop.f32.mrb[34].mxu1  ;;  %4902 = vadd.xlane.f32.xlu0 %v4901_v1  ;;  %v4898_v18 = vsel %vm4807_vm4, %v4709_v51, 0.0 }
 0x47f   : > { %v4712_v3 = vmul.f32 %v11761_v31, %v4577_v32  ;;  %v4081_v11 = vadd.f32 %v7809_v28, %v11751_v45  ;;  %4899 = vadd.xlane.f32.xlu1 %v4898_v18  ;;  %v4075_v56 = vpop.f32.mrb[35].mxu1  ;;  %v3438_v39 = vmax.f32 %v3292_v41, 0.0 }
 0x480   : > { %v4711_v58 = vmul.f32 %v11761_v31, %v4576_v2  ;;  %v3437_v40 = vmax.f32 %v3287_v21, 0.0  ;;  %v4076_v7 = vadd.f32 %v11751_v45, %v4075_v56 }
 0x481   : > { %v4579_v8 = vmax.f32 %v4081_v11, 0.0  ;;  %v4907_v27 = vsel %vm4807_vm4, %v4712_v3, 0.0 }
 0x482   : > { %v4578_v24 = vmax.f32 %v4076_v7, 0.0  ;;  %v7812_v44 = vpop.f32.mrb[36].mxu1  ;;  %4908 = vadd.xlane.f32.xlu0 %v4907_v27  ;;  %7939 = vmatprep.mubr.msk.f32.mxu1 %vm3454_vm14, %v3437_v40  ;;  %v4904_v19 = vsel %vm4807_vm4, %v4711_v58, 0.0 }
 0x483   : > { %v4714_v63 = vmul.f32 %v11761_v31, %v4579_v8  ;;  %v4091_v9 = vadd.f32 %v7812_v44, %v11751_v45  ;;  %4905 = vadd.xlane.f32.xlu1 %v4904_v19  ;;  %v4085_v16 = vpop.f32.mrb[37].mxu1  ;;  %7940 = vmatmul.mubr.msk.f32.gmra.mrb[122].mxu1 %vm3454_vm14, %v3438_v39 }
 0x484   : > { %v4713_v33 = vmul.f32 %v11761_v31, %v4578_v24  ;;  %v4086_v30 = vadd.f32 %v11751_v45, %v4085_v16 }
 0x485   : > { %v4581_v50 = vmax.f32 %v4091_v9, 0.0  ;;  %v4913_v12 = vsel %vm4807_vm4, %v4714_v63, 0.0 }
 0x486   : > { %v4580_v52 = vmax.f32 %v4086_v30, 0.0  ;;  %v7815_v53 = vpop.f32.mrb[38].mxu1  ;;  %4914 = vadd.xlane.f32.xlu0 %v4913_v12  ;;  %v4910_v48 = vsel %vm4807_vm4, %v4713_v33, 0.0 }
 0x487   : > { %v4716_v49 = vmul.f32 %v11761_v31, %v4581_v50  ;;  %v4101_v0 = vadd.f32 %v7815_v53, %v11751_v45  ;;  %4911 = vadd.xlane.f32.xlu1 %v4910_v48  ;;  %v4095_v25 = vpop.f32.mrb[39].mxu1 }
 0x488   : > { %v4715_v14 = vmul.f32 %v11761_v31, %v4580_v52  ;;  %v4096_v15 = vadd.f32 %v11751_v45, %v4095_v25 }
 0x489   : > { %v4583_v36 = vmax.f32 %v4101_v0, 0.0  ;;  %v7744_v10 = vpop.f32.mrb[124].mxu0  ;;  %v4919_v61 = vsel %vm4807_vm4, %v4716_v49, 0.0 }
 0x48a   : > { %v4582_v22 = vmax.f32 %v4096_v15, 0.0  ;;  %v3302_v59 = vadd.f32 %v11702_v57, %v7744_v10  ;;  %v7818_v37 = vpop.f32.mrb[40].mxu1  ;;  %4920 = vadd.xlane.f32.xlu0 %v4919_v61  ;;  %v3296_v35 = vpop.f32.mrb[125].mxu0  ;;  %v4916_v34 = vsel %vm4807_vm4, %v4715_v14, 0.0 }
 0x48b   : > { %v4718_v43 = vmul.f32 %v11761_v31, %v4583_v36  ;;  %v4111_v42 = vadd.f32 %v7818_v37, %v11751_v45  ;;  %v3297_v55 = vadd.f32 %v11702_v57, %v3296_v35  ;;  %4917 = vadd.xlane.f32.xlu1 %v4916_v34  ;;  %v4105_v5 = vpop.f32.mrb[41].mxu1 }
 0x48c   : > { %v4717_v54 = vmul.f32 %v11761_v31, %v4582_v22  ;;  %v4106_v62 = vadd.f32 %v11751_v45, %v4105_v5  ;;  %v3440_v6 = vmax.f32 %v3302_v59, 0.0 }
 0x48d   : > { %v4585_v17 = vmax.f32 %v4111_v42, 0.0  ;;  %v3439_v23 = vmax.f32 %v3297_v55, 0.0  ;;  %v4925_v60 = vsel %vm4807_vm4, %v4718_v43, 0.0 }
 0x48e   : > { %v4584_v20 = vmax.f32 %v4106_v62, 0.0  ;;  %v7821_v38 = vpop.f32.mrb[42].mxu1  ;;  %4926 = vadd.xlane.f32.xlu0 %v4925_v60  ;;  %v4922_v47 = vsel %vm4807_vm4, %v4717_v54, 0.0 }
 0x48f   : > { %v4720_v46 = vmul.f32 %v11761_v31, %v4585_v17  ;;  %v4121_v51 = vadd.f32 %v7821_v38, %v11751_v45  ;;  %4923 = vadd.xlane.f32.xlu1 %v4922_v47  ;;  %v4115_v29 = vpop.f32.mrb[43].mxu1  ;;  %7942 = vmatprep.mubr.msk.f32.mxu1 %vm3454_vm14, %v3439_v23 }
 0x490   : > { %v4719_v26 = vmul.f32 %v11761_v31, %v4584_v20  ;;  %v4116_v32 = vadd.f32 %v11751_v45, %v4115_v29  ;;  %7943 = vmatmul.mubr.msk.f32.gmra.mrb[124].mxu1 %vm3454_vm14, %v3440_v6 }
 0x491   : > { %v4587_v41 = vmax.f32 %v4121_v51, 0.0  ;;  %v4931_v13 = vsel %vm4807_vm4, %v4720_v46, 0.0 }
 0x492   : > { %v4586_v1 = vmax.f32 %v4116_v32, 0.0  ;;  %v7824_v2 = vpop.f32.mrb[44].mxu1  ;;  %4932 = vadd.xlane.f32.xlu0 %v4931_v13  ;;  %v4928_v21 = vsel %vm4807_vm4, %v4719_v26, 0.0 }
 0x493   : > { %v4722_v28 = vmul.f32 %v11761_v31, %v4587_v41  ;;  %v4131_v18 = vadd.f32 %v7824_v2, %v11751_v45  ;;  %4929 = vadd.xlane.f32.xlu1 %v4928_v21  ;;  %v4125_v3 = vpop.f32.mrb[45].mxu1 }
 0x494   : > { %v4721_v11 = vmul.f32 %v11761_v31, %v4586_v1  ;;  %v4126_v56 = vadd.f32 %v11751_v45, %v4125_v3  ;;  %v7747_v58 = vpop.f32.mrb[126].mxu0 }
 0x495   : > { %v4589_v40 = vmax.f32 %v4131_v18, 0.0  ;;  %v3312_v7 = vadd.f32 %v11702_v57, %v7747_v58  ;;  %v3306_v39 = vpop.f32.mrb[127].mxu0  ;;  %v4937_v8 = vsel %vm4807_vm4, %v4722_v28, 0.0 }
 0x496   : > { %v4588_v27 = vmax.f32 %v4126_v56, 0.0  ;;  %v3307_v24 = vadd.f32 %v11702_v57, %v3306_v39  ;;  %v7827_v44 = vpop.f32.mrb[46].mxu1  ;;  %4938 = vadd.xlane.f32.xlu0 %v4937_v8  ;;  %v4934_v19 = vsel %vm4807_vm4, %v4721_v11, 0.0 }
 0x497   : > { %v4724_v63 = vmul.f32 %v11761_v31, %v4589_v40  ;;  %v4141_v9 = vadd.f32 %v7827_v44, %v11751_v45  ;;  %4935 = vadd.xlane.f32.xlu1 %v4934_v19  ;;  %v4135_v16 = vpop.f32.mrb[47].mxu1  ;;  %v3442_v12 = vmax.f32 %v3312_v7, 0.0 }
 0x498   : > { %v4723_v33 = vmul.f32 %v11761_v31, %v4588_v27  ;;  %v3441_v30 = vmax.f32 %v3307_v24, 0.0  ;;  %v4136_v50 = vadd.f32 %v11751_v45, %v4135_v16 }
 0x499   : > { %v4591_v52 = vmax.f32 %v4141_v9, 0.0  ;;  %v4943_v53 = vsel %vm4807_vm4, %v4724_v63, 0.0 }
 0x49a   : > { %v4590_v57 = vmax.f32 %v4136_v50, 0.0  ;;  %v7830_v48 = vpop.f32.mrb[48].mxu1  ;;  %4944 = vadd.xlane.f32.xlu0 %v4943_v53  ;;  %7945 = vmatprep.mubr.msk.f32.mxu1 %vm3454_vm14, %v3441_v30  ;;  %v4940_v49 = vsel %vm4807_vm4, %v4723_v33, 0.0 }
 0x49b   : > { %v4726_v0 = vmul.f32 %v11761_v31, %v4591_v52  ;;  %v4151_v25 = vadd.f32 %v7830_v48, %v11751_v45  ;;  %4941 = vadd.xlane.f32.xlu1 %v4940_v49  ;;  %v4145_v14 = vpop.f32.mrb[49].mxu1  ;;  %7946 = vmatmul.mubr.msk.f32.gmra.mrb[126].mxu1 %vm3454_vm14, %v3442_v12  ;;  %vm6235_vm14 = vcmask 130112  }
 0x49c   : > { %v4725_v15 = vmul.f32 %v11761_v31, %v4590_v57  ;;  %v4146_v36 = vadd.f32 %v11751_v45, %v4145_v14 }
 0x49d   : > { %v4593_v10 = vmax.f32 %v4151_v25, 0.0  ;;  %v4949_v61 = vsel %vm4807_vm4, %v4726_v0, 0.0 }
 0x49e   : > { %v4592_v22 = vmax.f32 %v4146_v36, 0.0  ;;  %v7833_v59 = vpop.f32.mrb[50].mxu1  ;;  %4950 = vadd.xlane.f32.xlu0 %v4949_v61  ;;  %v4946_v37 = vsel %vm4807_vm4, %v4725_v15, 0.0 }
 0x49f   : > { %v4728_v35 = vmul.f32 %v11761_v31, %v4593_v10  ;;  %v4161_v34 = vadd.f32 %v7833_v59, %v11751_v45  ;;  %4947 = vadd.xlane.f32.xlu1 %v4946_v37  ;;  %v4155_v43 = vpop.f32.mrb[51].mxu1 }
 0x4a0   : > { %v4727_v42 = vmul.f32 %v11761_v31, %v4592_v22  ;;  %v4156_v55 = vadd.f32 %v11751_v45, %v4155_v43 }
 0x4a1   : > { %v4595_v5 = vmax.f32 %v4161_v34, 0.0  ;;  %v4955_v54 = vsel %vm4807_vm4, %v4728_v35, 0.0 }
 0x4a2   : > { %v4594_v62 = vmax.f32 %v4156_v55, 0.0  ;;  %v7836_v17 = vpop.f32.mrb[52].mxu1  ;;  %4956 = vadd.xlane.f32.xlu0 %v4955_v54  ;;  %v4952_v23 = vsel %vm4807_vm4, %v4727_v42, 0.0 }
 0x4a3   : > { %v4730_v60 = vmul.f32 %v11761_v31, %v4595_v5  ;;  %v4171_v6 = vadd.f32 %v7836_v17, %v11751_v45  ;;  %4953 = vadd.xlane.f32.xlu1 %v4952_v23  ;;  %v4165_v20 = vpop.f32.mrb[53].mxu1 }
 0x4a4   : > { %v4729_v38 = vmul.f32 %v11761_v31, %v4594_v62  ;;  %v4166_v47 = vadd.f32 %v11751_v45, %v4165_v20 }
 0x4a5   : > { %v4597_v46 = vmax.f32 %v4171_v6, 0.0  ;;  %v4961_v51 = vsel %vm4807_vm4, %v4730_v60, 0.0 }
 0x4a6   : > { %v4596_v29 = vmax.f32 %v4166_v47, 0.0  ;;  %v7839_v26 = vpop.f32.mrb[54].mxu1  ;;  %4962 = vadd.xlane.f32.xlu0 %v4961_v51  ;;  %v4958_v32 = vsel %vm4807_vm4, %v4729_v38, 0.0 }
 0x4a7   : > { %v4732_v41 = vmul.f32 %v11761_v31, %v4597_v46  ;;  %v4181_v13 = vadd.f32 %v7839_v26, %v11751_v45  ;;  %4959 = vadd.xlane.f32.xlu1 %v4958_v32  ;;  %v4175_v1 = vpop.f32.mrb[55].mxu1 }
 0x4a8   : > { %v4731_v2 = vmul.f32 %v11761_v31, %v4596_v29  ;;  %v4176_v21 = vadd.f32 %v11751_v45, %v4175_v1 }
 0x4a9   : > { %v4599_v28 = vmax.f32 %v4181_v13, 0.0  ;;  %v4967_v18 = vsel %vm4807_vm4, %v4732_v41, 0.0 }
 0x4aa   : > { %v4598_v3 = vmax.f32 %v4176_v21, 0.0  ;;  %v7842_v11 = vpop.f32.mrb[56].mxu1  ;;  %4968 = vadd.xlane.f32.xlu0 %v4967_v18  ;;  %v4964_v56 = vsel %vm4807_vm4, %v4731_v2, 0.0 }
 0x4ab   : > { %v4734_v58 = vmul.f32 %v11761_v31, %v4599_v28  ;;  %v4191_v40 = vadd.f32 %v7842_v11, %v11751_v45  ;;  %4965 = vadd.xlane.f32.xlu1 %v4964_v56  ;;  %v4185_v7 = vpop.f32.mrb[57].mxu1 }
 0x4ac   : > { %v4733_v39 = vmul.f32 %v11761_v31, %v4598_v3  ;;  %v4186_v8 = vadd.f32 %v11751_v45, %v4185_v7 }
 0x4ad   : > { %v4601_v27 = vmax.f32 %v4191_v40, 0.0  ;;  %v4973_v24 = vsel %vm4807_vm4, %v4734_v58, 0.0 }
 0x4ae   : > { %v4600_v44 = vmax.f32 %v4186_v8, 0.0  ;;  %v7845_v19 = vpop.f32.mrb[58].mxu1  ;;  %4974 = vadd.xlane.f32.xlu0 %v4973_v24  ;;  %v4970_v63 = vsel %vm4807_vm4, %v4733_v39, 0.0 }
 0x4af   : > { %v4736_v9 = vmul.f32 %v11761_v31, %v4601_v27  ;;  %v4201_v16 = vadd.f32 %v7845_v19, %v11751_v45  ;;  %4971 = vadd.xlane.f32.xlu1 %v4970_v63  ;;  %v4195_v33 = vpop.f32.mrb[59].mxu1 }
 0x4b0   : > { %v4735_v30 = vmul.f32 %v11761_v31, %v4600_v44  ;;  %v4196_v50 = vadd.f32 %v11751_v45, %v4195_v33 }
 0x4b1   : > { %v4603_v12 = vmax.f32 %v4201_v16, 0.0  ;;  %v4979_v52 = vsel %vm4807_vm4, %v4736_v9, 0.0 }
 0x4b2   : > { %v4602_v53 = vmax.f32 %v4196_v50, 0.0  ;;  %v7848_v57 = vpop.f32.mrb[60].mxu1  ;;  %4980 = vadd.xlane.f32.xlu0 %v4979_v52  ;;  %v4976_v48 = vsel %vm4807_vm4, %v4735_v30, 0.0 }
 0x4b3   : > { %v4738_v49 = vmul.f32 %v11761_v31, %v4603_v12  ;;  %v4211_v0 = vadd.f32 %v7848_v57, %v11751_v45  ;;  %4977 = vadd.xlane.f32.xlu1 %v4976_v48  ;;  %v4205_v25 = vpop.f32.mrb[61].mxu1 }
 0x4b4   : > { %v4737_v14 = vmul.f32 %v11761_v31, %v4602_v53  ;;  %v4206_v15 = vadd.f32 %v11751_v45, %v4205_v25 }
 0x4b5   : > { %v4605_v36 = vmax.f32 %v4211_v0, 0.0  ;;  %v4985_v10 = vsel %vm4807_vm4, %v4738_v49, 0.0  ;;  %v12016_v49 = vld [vmem:[%s13638_s4] ss:$0 sm:$0xff] }
 0x4b6   : > { %v4604_v61 = vmax.f32 %v4206_v15, 0.0  ;;  %v7851_v22 = vpop.f32.mrb[62].mxu1  ;;  %4986 = vadd.xlane.f32.xlu0 %v4985_v10  ;;  %v4982_v59 = vsel %vm4807_vm4, %v4737_v14, 0.0 }
 0x4b7   : > { %v4740_v37 = vmul.f32 %v11761_v31, %v4605_v36  ;;  %v4221_v35 = vadd.f32 %v7851_v22, %v11751_v45  ;;  %4983 = vadd.xlane.f32.xlu1 %v4982_v59  ;;  %v4215_v34 = vpop.f32.mrb[63].mxu1  ;;  %v12026_v59 = vld [vmem:[%s13639_s5] ss:$0 sm:$0xff] }
 0x4b8   : > { %v4739_v43 = vmul.f32 %v11761_v31, %v4604_v61  ;;  %v4216_v42 = vadd.f32 %v11751_v45, %v4215_v34 }
 0x4b9   : > { %v4607_v55 = vmax.f32 %v4221_v35, 0.0  ;;  %v4991_v5 = vsel %vm4807_vm4, %v4740_v37, 0.0 }
 0x4ba   : > { %v4606_v54 = vmax.f32 %v4216_v42, 0.0  ;;  %v7854_v62 = vpop.f32.mrb[64].mxu1  ;;  %4992 = vadd.xlane.f32.xlu0 %v4991_v5  ;;  %v4988_v17 = vsel %vm4807_vm4, %v4739_v43, 0.0 }
 0x4bb   : > { %v4742_v23 = vmul.f32 %v11761_v31, %v4607_v55  ;;  %v4231_v60 = vadd.f32 %v7854_v62, %v11751_v45  ;;  %4989 = vadd.xlane.f32.xlu1 %v4988_v17  ;;  %v4225_v6 = vpop.f32.mrb[65].mxu1 }
 0x4bc   : > { %v4741_v20 = vmul.f32 %v11761_v31, %v4606_v54  ;;  %v4226_v38 = vadd.f32 %v11751_v45, %v4225_v6 }
 0x4bd   : > { %v4609_v47 = vmax.f32 %v4231_v60, 0.0  ;;  %v4997_v46 = vsel %vm4807_vm4, %v4742_v23, 0.0 }
 0x4be   : > { %v4608_v51 = vmax.f32 %v4226_v38, 0.0  ;;  %v7857_v29 = vpop.f32.mrb[66].mxu1  ;;  %4998 = vadd.xlane.f32.xlu0 %v4997_v46  ;;  %v4994_v26 = vsel %vm4807_vm4, %v4741_v20, 0.0 }
 0x4bf   : > { %v4744_v32 = vmul.f32 %v11761_v31, %v4609_v47  ;;  %v4241_v41 = vadd.f32 %v7857_v29, %v11751_v45  ;;  %4995 = vadd.xlane.f32.xlu1 %v4994_v26  ;;  %v4235_v13 = vpop.f32.mrb[67].mxu1 }
 0x4c0   : > { %v4743_v1 = vmul.f32 %v11761_v31, %v4608_v51  ;;  %v4236_v2 = vadd.f32 %v11751_v45, %v4235_v13 }
 0x4c1   : > { %v4611_v21 = vmax.f32 %v4241_v41, 0.0  ;;  %v5003_v28 = vsel %vm4807_vm4, %v4744_v32, 0.0 }
 0x4c2   : > { %v4610_v18 = vmax.f32 %v4236_v2, 0.0  ;;  %v7860_v3 = vpop.f32.mrb[68].mxu1  ;;  %5004 = vadd.xlane.f32.xlu0 %v5003_v28  ;;  %v5000_v11 = vsel %vm4807_vm4, %v4743_v1, 0.0 }
 0x4c3   : > { %v4746_v56 = vmul.f32 %v11761_v31, %v4611_v21  ;;  %v4251_v58 = vadd.f32 %v7860_v3, %v11751_v45  ;;  %5001 = vadd.xlane.f32.xlu1 %v5000_v11  ;;  %v4245_v40 = vpop.f32.mrb[69].mxu1 }
 0x4c4   : > { %v4745_v7 = vmul.f32 %v11761_v31, %v4610_v18  ;;  %v4246_v39 = vadd.f32 %v11751_v45, %v4245_v40 }
 0x4c5   : > { %v4613_v8 = vmax.f32 %v4251_v58, 0.0  ;;  %v5009_v27 = vsel %vm4807_vm4, %v4746_v56, 0.0 }
 0x4c6   : > { %v4612_v24 = vmax.f32 %v4246_v39, 0.0  ;;  %v7863_v44 = vpop.f32.mrb[70].mxu1  ;;  %5010 = vadd.xlane.f32.xlu0 %v5009_v27  ;;  %v5006_v19 = vsel %vm4807_vm4, %v4745_v7, 0.0 }
 0x4c7   : > { %v4748_v63 = vmul.f32 %v11761_v31, %v4613_v8  ;;  %v4261_v9 = vadd.f32 %v7863_v44, %v11751_v45  ;;  %5007 = vadd.xlane.f32.xlu1 %v5006_v19  ;;  %v4255_v16 = vpop.f32.mrb[71].mxu1 }
 0x4c8   : > { %v4747_v33 = vmul.f32 %v11761_v31, %v4612_v24  ;;  %v4256_v30 = vadd.f32 %v11751_v45, %v4255_v16 }
 0x4c9   : > { %v4615_v50 = vmax.f32 %v4261_v9, 0.0  ;;  %v5015_v12 = vsel %vm4807_vm4, %v4748_v63, 0.0 }
 0x4ca   : > { %v4614_v52 = vmax.f32 %v4256_v30, 0.0  ;;  %v7866_v53 = vpop.f32.mrb[72].mxu1  ;;  %5016 = vadd.xlane.f32.xlu0 %v5015_v12  ;;  %v5012_v57 = vsel %vm4807_vm4, %v4747_v33, 0.0 }
 0x4cb   : > { %v4750_v48 = vmul.f32 %v11761_v31, %v4615_v50  ;;  %v4271_v0 = vadd.f32 %v12016_v49, %v7866_v53  ;;  %5013 = vadd.xlane.f32.xlu1 %v5012_v57  ;;  %v4265_v25 = vpop.f32.mrb[73].mxu1 }
 0x4cc   : > { %v4749_v45 = vmul.f32 %v11761_v31, %v4614_v52  ;;  %v4266_v14 = vadd.f32 %v12016_v49, %v4265_v25 }
 0x4cd   : > { %v4617_v15 = vmax.f32 %v4271_v0, 0.0  ;;  %v5021_v36 = vsel %vm4807_vm4, %v4750_v48, 0.0 }
 0x4ce   : > { %v4616_v10 = vmax.f32 %v4266_v14, 0.0  ;;  %v7869_v61 = vpop.f32.mrb[74].mxu1  ;;  %5022 = vadd.xlane.f32.xlu0 %v5021_v36  ;;  %v5018_v22 = vsel %vm4807_vm4, %v4749_v45, 0.0 }
 0x4cf   : > { %v4752_v37 = vmul.f32 %v12026_v59, %v4617_v15  ;;  %v4281_v35 = vadd.f32 %v12016_v49, %v7869_v61  ;;  %5019 = vadd.xlane.f32.xlu1 %v5018_v22  ;;  %v4275_v31 = vpop.f32.mrb[75].mxu1  ;;  %v12030_v34 = vpop.xlane.xlu0 %4812 }
 0x4d0   : > { %v4751_v43 = vmul.f32 %v12026_v59, %v4616_v10  ;;  %v4276_v42 = vadd.f32 %v12016_v49, %v4275_v31  ;;  %v12034_v55 = vpop.xlane.xlu1 %4809 }
 0x4d1   : > { %v4619_v5 = vmax.f32 %v4281_v35, 0.0  ;;  %v5027_v54 = vsel %vm4807_vm4, %v4752_v37, 0.0 }
 0x4d2   : > { %v4618_v62 = vmax.f32 %v4276_v42, 0.0  ;;  %v7872_v17 = vpop.f32.mrb[76].mxu1  ;;  %5028 = vadd.xlane.f32.xlu0 %v5027_v54  ;;  %v5024_v23 = vsel %vm4807_vm4, %v4751_v43, 0.0 }
 0x4d3   : > { %v4754_v60 = vmul.f32 %v12026_v59, %v4619_v5  ;;  %v4291_v6 = vadd.f32 %v12016_v49, %v7872_v17  ;;  %5025 = vadd.xlane.f32.xlu1 %v5024_v23  ;;  %v4285_v20 = vpop.f32.mrb[77].mxu1  ;;  %v12040_v38 = vpop.xlane.xlu0 %4818 }
 0x4d4   : > { %v4753_v47 = vmul.f32 %v12026_v59, %v4618_v62  ;;  %v4286_v46 = vadd.f32 %v12016_v49, %v4285_v20  ;;  %v12044_v51 = vpop.xlane.xlu1 %4815 }
 0x4d5   : > { %v4621_v29 = vmax.f32 %v4291_v6, 0.0  ;;  %v5033_v26 = vsel %vm4807_vm4, %v4754_v60, 0.0 }
 0x4d6   : > { %v4620_v32 = vmax.f32 %v4286_v46, 0.0  ;;  %v12047_v41 = vpop.f32.mrb[78].mxu1  ;;  %5034 = vadd.xlane.f32.xlu0 %v5033_v26  ;;  %v5030_v13 = vsel %vm4807_vm4, %v4753_v47, 0.0 }
 0x4d7   : > { %v4756_v1 = vmul.f32 %v12026_v59, %v4621_v29  ;;  %5031 = vadd.xlane.f32.xlu1 %v5030_v13  ;;  %v4295_v2 = vpop.f32.mrb[79].mxu1  ;;  %v12051_v21 = vpop.xlane.xlu0 %4824 }
 0x4d8   : > { %v4755_v28 = vmul.f32 %v12026_v59, %v4620_v32  ;;  %v4296_v18 = vadd.f32 %v12016_v49, %v4295_v2  ;;  %v12055_v3 = vpop.xlane.xlu1 %4821 }
 0x4d9   : > { %v5039_v11 = vsel %vm4807_vm4, %v4756_v1, 0.0 }
 0x4da   : > { %v4622_v56 = vmax.f32 %v4296_v18, 0.0  ;;  %v7878_v58 = vpop.f32.mrb[80].mxu1  ;;  %5040 = vadd.xlane.f32.xlu0 %v5039_v11  ;;  %v5036_v40 = vsel %vm4807_vm4, %v4755_v28, 0.0 }
 0x4db   : > { %v4311_v7 = vadd.f32 %v12016_v49, %v7878_v58  ;;  %5037 = vadd.xlane.f32.xlu1 %v5036_v40  ;;  %v4305_v39 = vpop.f32.mrb[81].mxu1  ;;  %v12060_v8 = vpop.xlane.xlu0 %4830 }
 0x4dc   : > { %v4757_v27 = vmul.f32 %v12026_v59, %v4622_v56  ;;  %v4306_v24 = vadd.f32 %v12016_v49, %v4305_v39  ;;  %v12064_v44 = vpop.xlane.xlu1 %4827 }
 0x4dd   : > { %v4625_v19 = vmax.f32 %v4311_v7, 0.0 }
 0x4de   : > { %v4624_v63 = vmax.f32 %v4306_v24, 0.0  ;;  %v7881_v9 = vpop.f32.mrb[82].mxu1  ;;  %v5042_v16 = vsel %vm4807_vm4, %v4757_v27, 0.0 }
 0x4df   : > { %v4760_v33 = vmul.f32 %v12026_v59, %v4625_v19  ;;  %5043 = vadd.xlane.f32.xlu1 %v5042_v16  ;;  %v4315_v30 = vpop.f32.mrb[83].mxu1  ;;  %v12068_v50 = vpop.xlane.xlu0 %4836  ;;  %v4321_v13 = vadd.f32 %v12016_v49, %v7881_v9 }
 0x4e0   : > { %v4759_v12 = vmul.f32 %v12026_v59, %v4624_v63  ;;  %v4316_v52 = vadd.f32 %v12016_v49, %v4315_v30  ;;  %v12072_v53 = vpop.xlane.xlu1 %4833 }
 0x4e1   : > { %v5051_v57 = vsel %vm4807_vm4, %v4760_v33, 0.0  ;;  %v4627_v40 = vmax.f32 %v4321_v13, 0.0 }
 0x4e2   : > { %v4626_v48 = vmax.f32 %v4316_v52, 0.0  ;;  %v12075_v0 = vpop.f32.mrb[84].mxu1  ;;  %v5048_v25 = vsel %vm4807_vm4, %v4759_v12, 0.0 }
 0x4e3   : > { %5052 = vadd.xlane.f32.xlu1 %v5051_v57  ;;  %v12078_v45 = vpop.f32.mrb[85].mxu1  ;;  %5049 = vadd.xlane.f32.xlu0 %v5048_v25  ;;  %v12080_v14 = vpop.xlane.xlu0 %4842  ;;  %v4762_v30 = vmul.f32 %v12026_v59, %v4627_v40 }
 0x4e4   : > { %v4761_v15 = vmul.f32 %v12026_v59, %v4626_v48  ;;  %v12083_v36 = vpop.xlane.xlu1 %4839 }
 0x4e6   : > { %v12085_v10 = vpop.f32.mrb[86].mxu1  ;;  %v5054_v61 = vsel %vm4807_vm4, %v4761_v15, 0.0 }
 0x4e7   : > { %v12088_v22 = vpop.f32.mrb[87].mxu1  ;;  %5055 = vadd.xlane.f32.xlu0 %v5054_v61  ;;  %v12090_v37 = vpop.xlane.xlu0 %4848 }
 0x4e8   : > { %v12092_v35 = vpop.xlane.xlu1 %4845 }
 0x4ea   : > { %v12094_v31 = vpop.f32.mrb[88].mxu1 }
 0x4eb   : > { %v12096_v43 = vpop.f32.mrb[89].mxu1  ;;  %v12098_v42 = vpop.xlane.xlu0 %4854 }
 0x4ec   : > { %v12100_v5 = vpop.xlane.xlu1 %4851 }
 0x4ee   : > { %v12102_v54 = vpop.f32.mrb[90].mxu1 }
 0x4ef   : > { %v12104_v62 = vpop.f32.mrb[91].mxu1  ;;  %v12106_v17 = vpop.xlane.xlu0 %4860 }
 0x4f0   : > { %v12108_v23 = vpop.xlane.xlu1 %4857 }
 0x4f2   : > { %v12110_v60 = vpop.f32.mrb[92].mxu1 }
 0x4f3   : > { %v12112_v6 = vpop.f32.mrb[93].mxu1  ;;  %v12114_v20 = vpop.xlane.xlu0 %4866 }
 0x4f4   : > { %v12116_v47 = vpop.xlane.xlu1 %4863 }
 0x4f6   : > { %v12118_v46 = vpop.f32.mrb[94].mxu1 }
 0x4f7   : > { %v12120_v29 = vpop.f32.mrb[95].mxu1  ;;  %v12122_v26 = vpop.xlane.xlu0 %4872 }
 0x4f8   : > { %14384 = vst [vmem:[#allocation21_spill] sm:$0xff] %v12122_v26  ;;  %v12124_v32 = vpop.xlane.xlu1 %4869 }
 0x4fa   : > { %v7902_v1 = vpop.f32.mrb[96].mxu1 }
 0x4fb   : > { %v4391_v2 = vadd.f32 %v12016_v49, %v7902_v1  ;;  %v4385_v28 = vpop.f32.mrb[97].mxu1  ;;  %v12128_v18 = vpop.xlane.xlu0 %4878  ;;  %v5057_v1 = vsel %vm4807_vm4, %v4762_v30, 0.0 }
 0x4fc   : > { %14385 = vst [vmem:[#allocation25_spill] sm:$0xff] %v12128_v18  ;;  %v4386_v11 = vadd.f32 %v12016_v49, %v4385_v28  ;;  %v12131_v56 = vpop.xlane.xlu1 %4875 }
 0x4fd   : > { %14386 = vst [vmem:[#allocation20_spill] sm:$0xff] %v12131_v56  ;;  %v4641_v58 = vmax.f32 %v4391_v2, 0.0 }
 0x4fe   : > { %v4640_v7 = vmax.f32 %v4386_v11, 0.0  ;;  %v7905_v39 = vpop.f32.mrb[98].mxu1 }
 0x4ff   : > { %v4776_v27 = vmul.f32 %v12026_v59, %v4641_v58  ;;  %v4395_v24 = vpop.f32.mrb[99].mxu1  ;;  %v12134_v19 = vpop.xlane.xlu0 %4884 }
 0x500   : > { %14387 = vst [vmem:[#allocation24_spill] sm:$0xff] %v12134_v19  ;;  %v4775_v63 = vmul.f32 %v12026_v59, %v4640_v7  ;;  %v4396_v9 = vadd.f32 %v12016_v49, %v4395_v24  ;;  %v12138_v16 = vpop.xlane.xlu1 %4881 }
 0x501   : > { %14388 = vst [vmem:[#allocation28_spill] sm:$0xff] %v12138_v16  ;;  %v5099_v33 = vsel %vm4807_vm4, %v4776_v27, 0.0 }
 0x502   : > { %v4642_v12 = vmax.f32 %v4396_v9, 0.0  ;;  %v12142_v52 = vpop.f32.mrb[100].mxu1  ;;  %5100 = vadd.xlane.f32.xlu0 %v5099_v33  ;;  %v5096_v57 = vsel %vm4807_vm4, %v4775_v63, 0.0 }
 0x503   : > { %5097 = vadd.xlane.f32.xlu1 %v5096_v57  ;;  %v4405_v48 = vpop.f32.mrb[101].mxu1  ;;  %v12146_v15 = vpop.xlane.xlu0 %4890 }
 0x504   : > { %v4777_v25 = vmul.f32 %v12026_v59, %v4642_v12  ;;  %14389 = vst [vmem:[#allocation29_spill] sm:$0xff] %v12146_v15  ;;  %v12148_v61 = vpop.xlane.xlu1 %4887 }
 0x505   : > { %14390 = vst [vmem:[#allocation32_spill] sm:$0xff] %v12148_v61 }
 0x506   : > { %v12150_v13 = vpop.f32.mrb[102].mxu1  ;;  %v5102_v2 = vsel %vm4807_vm4, %v4777_v25, 0.0 }
 0x507   : > { %5058 = vadd.xlane.f32.xlu1 %v5057_v1  ;;  %v12154_v28 = vpop.f32.mrb[103].mxu1  ;;  %5103 = vadd.xlane.f32.xlu0 %v5102_v2  ;;  %v12158_v58 = vpop.xlane.xlu0 %4896  ;;  %v4401_v2 = vadd.f32 %v12016_v49, %v7905_v39 }
 0x508   : > { %v12156_v11 = vpop.xlane.xlu1 %4893  ;;  %14392 = vst [vmem:[#allocation36_spill] sm:$0xff] %v12158_v58  ;;  %v4326_v58 = vadd.f32 %v12016_v49, %v12078_v45 }
 0x509   : > { %14391 = vst [vmem:[#allocation33_spill] sm:$0xff] %v12156_v11 }
 0x50a   : > { %v12160_v40 = vpop.f32.mrb[104].mxu1  ;;  %v4628_v16 = vmax.f32 %v4326_v58, 0.0 }
 0x50b   : > { %v12162_v7 = vpop.f32.mrb[105].mxu1  ;;  %v12170_v9 = vpop.xlane.xlu0 %4902 }
 0x50c   : > { %v12164_v27 = vpop.xlane.xlu1 %4899  ;;  %14394 = vst [vmem:[#allocation40_spill] sm:$0xff] %v12170_v9 }
 0x50d   : > { %14393 = vst [vmem:[#allocation37_spill] sm:$0xff] %v12164_v27 }
 0x50e   : > { %v12166_v24 = vpop.f32.mrb[106].mxu1 }
 0x50f   : > { %v12168_v63 = vpop.f32.mrb[107].mxu1  ;;  %v12178_v57 = vpop.xlane.xlu0 %4908 }
 0x510   : > { %v12176_v12 = vpop.xlane.xlu1 %4905  ;;  %14396 = vst [vmem:[#allocation44_spill] sm:$0xff] %v12178_v57  ;;  %v4643_v57 = vmax.f32 %v4401_v2, 0.0 }
 0x511   : > { %14395 = vst [vmem:[#allocation41_spill] sm:$0xff] %v12176_v12 }
 0x512   : > { %v12172_v33 = vpop.f32.mrb[108].mxu1  ;;  %v4778_v45 = vmul.f32 %v12026_v59, %v4643_v57 }
 0x513   : > { %v12174_v30 = vpop.f32.mrb[109].mxu1  ;;  %v12189_v11 = vpop.xlane.xlu0 %4914 }
 0x514   : > { %v12185_v27 = vpop.xlane.xlu1 %4911  ;;  %14398 = vst [vmem:[#allocation48_spill] sm:$0xff] %v12189_v11 }
 0x515   : > { %14397 = vst [vmem:[#allocation45_spill] sm:$0xff] %v12185_v27 }
 0x516   : > { %v12180_v25 = vpop.f32.mrb[110].mxu1 }
 0x517   : > { %v12182_v1 = vpop.f32.mrb[111].mxu1  ;;  %v12198_v26 = vpop.xlane.xlu0 %4920 }
 0x518   : > { %v12193_v56 = vpop.xlane.xlu1 %4917  ;;  %14399 = vst [vmem:[#allocation49_spill] sm:$0xff] %v12198_v26 }
 0x51b   : > { %v7926_v9 = vpop.f32.mrb[112].mxu1  ;;  %v12209_v2 = vpop.xlane.xlu0 %4926 }
 0x51c   : > { %v4471_v15 = vadd.f32 %v12016_v49, %v7926_v9  ;;  %v4465_v61 = vpop.f32.mrb[113].mxu1  ;;  %v4763_v9 = vmul.f32 %v12026_v59, %v4628_v16  ;;  %v12205_v58 = vpop.xlane.xlu1 %4923 }
 0x51d   : > { %v4466_v12 = vadd.f32 %v12016_v49, %v4465_v61  ;;  %14400 = vst [vmem:[#allocation52_spill] sm:$0xff] %v12205_v58 }
 0x51e   : > { %v4657_v19 = vmax.f32 %v4471_v15, 0.0  ;;  %v4331_v15 = vadd.f32 %v12016_v49, %v12075_v0  ;;  %v5060_v57 = vsel %vm4807_vm4, %v4763_v9, 0.0 }
 0x51f   : > { %v4656_v18 = vmax.f32 %v4466_v12, 0.0  ;;  %v12217_v26 = vpop.xlane.xlu0 %4932 }
 0x520   : > { %v4792_v39 = vmul.f32 %v12026_v59, %v4657_v19  ;;  %14401 = vst [vmem:[#allocation53_spill] sm:$0xff] %v12217_v26 }
 0x521   : > { %v4791_v27 = vmul.f32 %v12026_v59, %v4656_v18  ;;  %v5105_v18 = vsel %vm4807_vm4, %v4778_v45, 0.0 }
 0x522   : > { %v5147_v11 = vsel %vm4807_vm4, %v4792_v39, 0.0 }
 0x523   : > { %5148 = vadd.xlane.f32.xlu0 %v5147_v11  ;;  %v5144_v61 = vsel %vm4807_vm4, %v4791_v27, 0.0  ;;  %v4629_v11 = vmax.f32 %v4331_v15, 0.0  ;;  %v4406_v27 = vadd.f32 %v12016_v49, %v4405_v48  ;;  %v4336_v15 = vadd.f32 %v12016_v49, %v12088_v22 }
 0x524   : > { %5145 = vadd.xlane.f32.xlu1 %v5144_v61  ;;  %v12213_v61 = vpop.xlane.xlu1 %4929 }
 0x525   : > { %v4764_v58 = vmul.f32 %v12026_v59, %v4629_v11  ;;  %v4644_v45 = vmax.f32 %v4406_v27, 0.0  ;;  %v12227_v27 = vpop.xlane.xlu0 %4938  ;;  %v4630_v26 = vmax.f32 %v4336_v15, 0.0  ;;  %v7115_v15 = vld [vmem:[#allocation2] ss:$0 sm:$0xff] }
 0x526   : > { %v7929_v19 = vpop.f32.mrb[114].mxu1  ;;  %14402 = vst [vmem:[#allocation56_spill] sm:$0xff] %v12227_v27 }
 0x527   : > { %v4475_v12 = vpop.f32.mrb[115].mxu1  ;;  %5106 = vadd.xlane.f32.xlu0 %v5105_v18  ;;  %v4481_v9 = vadd.f32 %v12016_v49, %v7929_v19  ;;  %v4779_v48 = vmul.f32 %v12026_v59, %v4644_v45  ;;  %v4411_v19 = vadd.f32 %v12016_v49, %v12142_v52  ;;  %v4341_v52 = vadd.f32 %v12016_v49, %v12085_v10 }
 0x528   : > { %v4476_v16 = vadd.f32 %v12016_v49, %v4475_v12  ;;  %5061 = vadd.xlane.f32.xlu1 %v5060_v57  ;;  %v12224_v12 = vpop.xlane.xlu1 %4935 }
 0x529   : > { %v4659_v57 = vmax.f32 %v4481_v9, 0.0  ;;  %v5108_v22 = vsel %vm4807_vm4, %v4779_v48, 0.0  ;;  %v4765_v9 = vmul.f32 %v12026_v59, %v4630_v26 }
 0x52a   : > { %v4658_v39 = vmax.f32 %v4476_v16, 0.0  ;;  %v5063_v16 = vsel %vm4807_vm4, %v4764_v58, 0.0  ;;  %v12236_v58 = vpop.xlane.xlu0 %4944 }
 0x52b   : > { %14404 = vst [vmem:[#allocation60_spill] sm:$0xff] %v12236_v58  ;;  %v5066_v26 = vsel %vm4807_vm4, %v4765_v9, 0.0 }
 0x52c   : > { %v4793_v0 = vmul.f32 %v12026_v59, %v4658_v39  ;;  %v12233_v45 = vpop.xlane.xlu1 %4941 }
 0x52d   : > { %14403 = vst [vmem:[#allocation57_spill] sm:$0xff] %v12233_v45 }
 0x52e   : > { %v5150_v18 = vsel %vm4807_vm4, %v4793_v0, 0.0  ;;  %v4794_v0 = vmul.f32 %v12026_v59, %v4659_v57  ;;  %v12246_v58 = vpop.xlane.xlu0 %4950 }
 0x52f   : > { %5151 = vadd.xlane.f32.xlu1 %v5150_v18  ;;  %v4645_v18 = vmax.f32 %v4411_v19, 0.0 }
 0x530   : > { %v5153_v27 = vsel %vm4807_vm4, %v4794_v0, 0.0  ;;  %v12243_v57 = vpop.xlane.xlu1 %4947 }
 0x531   : > { %v4780_v48 = vmul.f32 %v12026_v59, %v4645_v18  ;;  %14405 = vst [vmem:[#allocation61_spill] sm:$0xff] %v12243_v57 }
 0x532   : > { %v12255_v57 = vpop.xlane.xlu0 %4956 }
 0x533   : > { %5064 = vadd.xlane.f32.xlu1 %v5063_v16  ;;  %v7932_v11 = vpop.f32.mrb[116].mxu1  ;;  %v5111_v10 = vsel %vm4807_vm4, %v4780_v48, 0.0  ;;  %14406 = vst [vmem:[#allocation64_spill] sm:$0xff] %v12255_v57 }
 0x534   : > { %v4485_v39 = vpop.f32.mrb[117].mxu1  ;;  %v12252_v18 = vpop.xlane.xlu1 %4953  ;;  %v4491_v9 = vadd.f32 %v12016_v49, %v7932_v11 }
 0x535   : > { %v4486_v16 = vadd.f32 %v12016_v49, %v4485_v39  ;;  %v4631_v39 = vmax.f32 %v4341_v52, 0.0 }
 0x537   : > { %5109 = vadd.xlane.f32.xlu1 %v5108_v22  ;;  %v4660_v22 = vmax.f32 %v4486_v16, 0.0  ;;  %v4766_v16 = vmul.f32 %v12026_v59, %v4631_v39 }
 0x538   : > { %v12262_v48 = vpop.xlane.xlu1 %4959 }
 0x539   : > { %v4795_v0 = vmul.f32 %v12026_v59, %v4660_v22  ;;  %v4661_v22 = vmax.f32 %v4491_v9, 0.0  ;;  %14407 = vst [vmem:[#allocation65_spill] sm:$0xff] %v12262_v48 }
 0x53b   : > { %5154 = vadd.xlane.f32.xlu1 %v5153_v27  ;;  %v4416_v27 = vadd.f32 %v12016_v49, %v12154_v28  ;;  %v4346_v28 = vadd.f32 %v12016_v49, %v12096_v43 }
 0x53c   : > { %v12274_v9 = vpop.xlane.xlu1 %4965 }
 0x53d   : > { %5199 = vperm.xlu0 %8055, %v7115_v15   ;;  %v4646_v15 = vmax.f32 %v4416_v27, 0.0  ;;  %v12265_v27 = vpop.xlane.xlu0 %4962  ;;  %v4632_v11 = vmax.f32 %v4346_v28, 0.0  ;;  %14409 = vst [vmem:[#allocation69_spill] sm:$0xff] %v12274_v9 }
 0x53e   : > { %v7935_v45 = vpop.f32.mrb[118].mxu1  ;;  %14408 = vst [vmem:[#allocation68_spill] sm:$0xff] %v12265_v27 }
 0x53f   : > { %5067 = vadd.xlane.f32.xlu1 %v5066_v26  ;;  %v4495_v19 = vpop.f32.mrb[119].mxu1  ;;  %v5156_v26 = vsel %vm4807_vm4, %v4795_v0, 0.0  ;;  %v4781_v52 = vmul.f32 %v12026_v59, %v4646_v15  ;;  %v4421_v0 = vadd.f32 %v12016_v49, %v12150_v13 }
 0x540   : > { %v4496_v15 = vadd.f32 %v12016_v49, %v4495_v19  ;;  %v12286_v9 = vpop.xlane.xlu1 %4971 }
 0x541   : > { %v5114_v43 = vsel %vm4807_vm4, %v4781_v52, 0.0  ;;  %v4647_v27 = vmax.f32 %v4421_v0, 0.0  ;;  %v12279_v48 = vpop.xlane.xlu0 %4968  ;;  %14411 = vst [vmem:[#allocation73_spill] sm:$0xff] %v12286_v9  ;;  %v4441_v0 = vadd.f32 %v12016_v49, %v12166_v24 }
 0x542   : > { %14410 = vst [vmem:[#allocation72_spill] sm:$0xff] %v12279_v48  ;;  %v4662_v13 = vmax.f32 %v4496_v15, 0.0 }
 0x543   : > { %5112 = vadd.xlane.f32.xlu1 %v5111_v10  ;;  %v5069_v10 = vsel %vm4807_vm4, %v4766_v16, 0.0  ;;  %v4351_v16 = vadd.f32 %v12016_v49, %v12094_v31  ;;  %v4782_v19 = vmul.f32 %v12026_v59, %v4647_v27  ;;  %v4651_v48 = vmax.f32 %v4441_v0, 0.0 }
 0x545   : > { %v4633_v52 = vmax.f32 %v4351_v16, 0.0  ;;  %v12294_v16 = vpop.xlane.xlu0 %4974  ;;  %v5117_v9 = vsel %vm4807_vm4, %v4782_v19, 0.0  ;;  %v4786_v0 = vmul.f32 %v12026_v59, %v4651_v48  ;;  %v4376_v48 = vadd.f32 %v12016_v49, %v12120_v29 }
 0x547   : > { %5157 = vadd.xlane.f32.xlu1 %v5156_v26  ;;  %v4796_v26 = vmul.f32 %v12026_v59, %v4661_v22  ;;  %v4768_v27 = vmul.f32 %v12026_v59, %v4633_v52  ;;  %v4356_v52 = vadd.f32 %v12016_v49, %v12104_v62  ;;  %v4431_v62 = vadd.f32 %v12016_v49, %v12160_v40 }
 0x549   : > { %v5159_v28 = vsel %vm4807_vm4, %v4796_v26, 0.0  ;;  %v4797_v26 = vmul.f32 %v12026_v59, %v4662_v13  ;;  %v5075_v19 = vsel %vm4807_vm4, %v4768_v27, 0.0 }
 0x54b   : > { %5070 = vadd.xlane.f32.xlu1 %v5069_v10  ;;  %v7938_v39 = vpop.f32.mrb[120].mxu1  ;;  %v4767_v10 = vmul.f32 %v12026_v59, %v4632_v11  ;;  %v5162_v13 = vsel %vm4807_vm4, %v4797_v26, 0.0 }
 0x54c   : > { %v12267_v57 = vpop.f32.mrb[121].mxu1  ;;  %v4511_v22 = vadd.f32 %v12016_v49, %v7938_v39 }
 0x54d   : > { %v5072_v11 = vsel %vm4807_vm4, %v4767_v10, 0.0  ;;  %v4371_v10 = vadd.f32 %v12016_v49, %v12110_v60 }
 0x54e   : > { %v4665_v15 = vmax.f32 %v4511_v22, 0.0  ;;  %v12303_v22 = vpop.xlane.xlu1 %4977 }
 0x54f   : > { %5115 = vadd.xlane.f32.xlu1 %v5114_v43  ;;  %v4426_v43 = vadd.f32 %v12016_v49, %v12162_v7  ;;  %v4501_v7 = vadd.f32 %v12016_v49, %v7935_v45  ;;  %v4637_v60 = vmax.f32 %v4371_v10, 0.0 }
 0x550   : > { %v4800_v24 = vmul.f32 %v12026_v59, %v4665_v15  ;;  %v4634_v15 = vmax.f32 %v4356_v52, 0.0 }
 0x551   : > { %v4663_v45 = vmax.f32 %v4501_v7, 0.0  ;;  %v4772_v27 = vmul.f32 %v12026_v59, %v4637_v60 }
 0x552   : > { %v5171_v26 = vsel %vm4807_vm4, %v4800_v24, 0.0  ;;  %v12317_v7 = vpop.xlane.xlu1 %4983  ;;  %v5129_v24 = vsel %vm4807_vm4, %v4786_v0, 0.0 }
 0x553   : > { %5160 = vadd.xlane.f32.xlu1 %v5159_v28  ;;  %v4648_v28 = vmax.f32 %v4426_v43, 0.0  ;;  %v5087_v0 = vsel %vm4807_vm4, %v4772_v27, 0.0 }
 0x555   : > { %v4783_v43 = vmul.f32 %v12026_v59, %v4648_v28  ;;  %v4798_v28 = vmul.f32 %v12026_v59, %v4663_v45  ;;  %v4769_v45 = vmul.f32 %v12026_v59, %v4634_v15  ;;  %v4361_v15 = vadd.f32 %v12016_v49, %v12102_v54 }
 0x556   : > { %v7941_v31 = vpop.f32.mrb[122].mxu1  ;;  %v4436_v54 = vadd.f32 %v12016_v49, %v12168_v63 }
 0x557   : > { %5073 = vadd.xlane.f32.xlu1 %v5072_v11  ;;  %v12292_v39 = vpop.f32.mrb[123].mxu1  ;;  %v12308_v11 = vpop.xlane.xlu0 %4980  ;;  %v5165_v60 = vsel %vm4807_vm4, %v4798_v28, 0.0  ;;  %v5078_v28 = vsel %vm4807_vm4, %v4769_v45, 0.0 }
 0x55b   : > { %5118 = vadd.xlane.f32.xlu1 %v5117_v9  ;;  %v4521_v9 = vadd.f32 %v12016_v49, %v7941_v31  ;;  %v12326_v52 = vpop.xlane.xlu0 %4986 }
 0x55c   : > { %5163 = vadd.xlane.f32.xlu0 %v5162_v13  ;;  %v5120_v13 = vsel %vm4807_vm4, %v4783_v43, 0.0  ;;  %v4506_v43 = vadd.f32 %v12016_v49, %v12267_v57 }
 0x55d   : > { %v4667_v31 = vmax.f32 %v4521_v9, 0.0 }
 0x55e   : > { %v4664_v57 = vmax.f32 %v4506_v43, 0.0 }
 0x55f   : > { %5076 = vadd.xlane.f32.xlu1 %v5075_v19  ;;  %v4649_v19 = vmax.f32 %v4431_v62, 0.0  ;;  %v4802_v29 = vmul.f32 %v12026_v59, %v4667_v31  ;;  %v4456_v31 = vadd.f32 %v12016_v49, %v12182_v1 }
 0x560   : > { %5172 = vadd.xlane.f32.xlu0 %v5171_v26  ;;  %v4638_v26 = vmax.f32 %v4376_v48, 0.0  ;;  %v4799_v43 = vmul.f32 %v12026_v59, %v4664_v57  ;;  %v4366_v57 = vadd.f32 %v12016_v49, %v12112_v6  ;;  %v4516_v6 = vadd.f32 %v12016_v49, %v12292_v39 }
 0x561   : > { %v4784_v62 = vmul.f32 %v12026_v59, %v4649_v19  ;;  %v5177_v27 = vsel %vm4807_vm4, %v4802_v29, 0.0  ;;  %v4654_v1 = vmax.f32 %v4456_v31, 0.0 }
 0x562   : > { %v4773_v48 = vmul.f32 %v12026_v59, %v4638_v26  ;;  %v4461_v26 = vadd.f32 %v12016_v49, %v12180_v25 }
 0x563   : > { %5121 = vadd.xlane.f32.xlu1 %v5120_v13  ;;  %v12323_v10 = vpop.f32.mrb[124].mxu1  ;;  %v12335_v13 = vpop.xlane.xlu1 %4989  ;;  %v5123_v45 = vsel %vm4807_vm4, %v4784_v62, 0.0  ;;  %v4650_v62 = vmax.f32 %v4436_v54, 0.0  ;;  %v4789_v31 = vmul.f32 %v12026_v59, %v4654_v1 }
 0x564   : > { %v4525_v40 = vpop.f32.mrb[125].mxu1  ;;  %5130 = vadd.xlane.f32.xlu0 %v5129_v24  ;;  %v12340_v24 = vpop.xlane.xlu0 %4992  ;;  %v4655_v25 = vmax.f32 %v4461_v26, 0.0 }
 0x565   : > { %v4526_v9 = vadd.f32 %v12016_v49, %v4525_v40  ;;  %14412 = vst [vmem:[#allocation76_spill] sm:$0xff] %v12340_v24 }
 0x567   : > { %5166 = vadd.xlane.f32.xlu1 %v5165_v60  ;;  %v4668_v40 = vmax.f32 %v4526_v9, 0.0  ;;  %v4635_v60 = vmax.f32 %v4361_v15, 0.0  ;;  %v12349_v19 = vpop.xlane.xlu1 %4995  ;;  %v5090_v15 = vsel %vm4807_vm4, %v4773_v48, 0.0 }
 0x568   : > { %5088 = vadd.xlane.f32.xlu0 %v5087_v0  ;;  %14413 = vst [vmem:[#allocation77_spill] sm:$0xff] %v12349_v19 }
 0x569   : > { %v4803_v9 = vmul.f32 %v12026_v59, %v4668_v40  ;;  %v4770_v63 = vmul.f32 %v12026_v59, %v4635_v60  ;;  %v4785_v60 = vmul.f32 %v12026_v59, %v4650_v62  ;;  %v4666_v62 = vmax.f32 %v4516_v6, 0.0 }
 0x56b   : > { %5079 = vadd.xlane.f32.xlu1 %v5078_v28  ;;  %v12359_v28 = vpop.xlane.xlu0 %4998  ;;  %v12368_v48 = vpop.xlane.xlu1 %5001  ;;  %v5081_v54 = vsel %vm4807_vm4, %v4770_v63, 0.0 }
 0x56c   : > { %5178 = vadd.xlane.f32.xlu0 %v5177_v27  ;;  %14414 = vst [vmem:[#allocation80_spill] sm:$0xff] %v12359_v28  ;;  %v5168_v27 = vsel %vm4807_vm4, %v4799_v43, 0.0  ;;  %14415 = vst [vmem:[#allocation81_spill] sm:$0xff] %v12368_v48  ;;  %v4790_v43 = vmul.f32 %v12026_v59, %v4655_v25 }
 0x56e   : > { %v7947_v0 = vpop.f32.mrb[126].mxu1  ;;  %v5141_v63 = vsel %vm4807_vm4, %v4790_v43, 0.0 }
 0x56f   : > { %5124 = vadd.xlane.f32.xlu1 %v5123_v45  ;;  %v12356_v29 = vpop.f32.mrb[127].mxu1  ;;  %v4541_v40 = vadd.f32 %v12016_v49, %v7947_v0  ;;  %v5180_v45 = vsel %vm4807_vm4, %v4803_v9, 0.0  ;;  %v12371_v28 = vpop.xlane.xlu0 %5004  ;;  %v5138_v0 = vsel %vm4807_vm4, %v4789_v31, 0.0  ;;  %v4446_v9 = vadd.f32 %v12016_v49, %v12174_v30 }
 0x570   : > { %5091 = vadd.xlane.f32.xlu0 %v5090_v15  ;;  %v4636_v15 = vmax.f32 %v4366_v57, 0.0  ;;  %14416 = vst [vmem:[#allocation84_spill] sm:$0xff] %v12371_v28  ;;  %v12381_v57 = vpop.xlane.xlu1 %5007  ;;  %v4301_v31 = vadd.f32 %v12016_v49, %v12047_v41 }
 0x571   : > { %v4671_v26 = vmax.f32 %v4541_v40, 0.0  ;;  %14417 = vst [vmem:[#allocation85_spill] sm:$0xff] %v12381_v57  ;;  %v4652_v40 = vmax.f32 %v4446_v9, 0.0 }
 0x572   : > { %v4771_v1 = vmul.f32 %v12026_v59, %v4636_v15  ;;  %v4623_v6 = vmax.f32 %v4301_v31, 0.0  ;;  %v4531_v31 = vadd.f32 %v12016_v49, %v12323_v10 }
 0x573   : > { %5169 = vadd.xlane.f32.xlu1 %v5168_v27  ;;  %v5126_v27 = vsel %vm4807_vm4, %v4785_v60, 0.0  ;;  %v4806_v39 = vmul.f32 %v12026_v59, %v4671_v26  ;;  %v12386_v25 = vpop.xlane.xlu0 %5010  ;;  %v4787_v43 = vmul.f32 %v12026_v59, %v4652_v40 }
 0x574   : > { %5181 = vadd.xlane.f32.xlu0 %v5180_v45  ;;  %14418 = vst [vmem:[#allocation88_spill] sm:$0xff] %v12386_v25  ;;  %v4801_v45 = vmul.f32 %v12026_v59, %v4666_v62  ;;  %v5084_v30 = vsel %vm4807_vm4, %v4771_v1, 0.0  ;;  %v12393_v60 = vpop.xlane.xlu1 %5013  ;;  %v4381_v1 = vadd.f32 %v12016_v49, %v12118_v46 }
 0x575   : > { %v5189_v15 = vsel %vm4807_vm4, %v4806_v39, 0.0  ;;  %14419 = vst [vmem:[#allocation89_spill] sm:$0xff] %v12393_v60 }
 0x576   : > { %v5174_v41 = vsel %vm4807_vm4, %v4801_v45, 0.0 }
 0x577   : > { %5082 = vadd.xlane.f32.xlu1 %v5081_v54  ;;  %v4451_v54 = vadd.f32 %v12016_v49, %v12172_v33  ;;  %v12398_v26 = vpop.xlane.xlu0 %5016  ;;  %v4639_v33 = vmax.f32 %v4381_v1, 0.0 }
 0x578   : > { %5139 = vadd.xlane.f32.xlu0 %v5138_v0  ;;  %14420 = vst [vmem:[#allocation92_spill] sm:$0xff] %v12398_v26  ;;  %v4758_v0 = vmul.f32 %v12026_v59, %v4623_v6  ;;  %v12404_v62 = vpop.xlane.xlu1 %5019  ;;  %v4536_v6 = vadd.f32 %v12016_v49, %v12356_v29 }
 0x579   : > { %v4653_v9 = vmax.f32 %v4451_v54, 0.0  ;;  %14421 = vst [vmem:[#allocation93_spill] sm:$0xff] %v12404_v62  ;;  %v4774_v46 = vmul.f32 %v12026_v59, %v4639_v33 }
 0x57a   : > { %v5045_v40 = vsel %vm4807_vm4, %v4758_v0, 0.0  ;;  %v4670_v10 = vmax.f32 %v4536_v6, 0.0 }
 0x57b   : > { %5127 = vadd.xlane.f32.xlu1 %v5126_v27  ;;  %v5132_v27 = vsel %vm4807_vm4, %v4787_v43, 0.0  ;;  %v12407_v39 = vpop.xlane.xlu0 %5022  ;;  %v5093_v0 = vsel %vm4807_vm4, %v4774_v46, 0.0 }
 0x57c   : > { %5142 = vadd.xlane.f32.xlu0 %v5141_v63  ;;  %14422 = vst [vmem:[#allocation96_spill] sm:$0xff] %v12407_v39  ;;  %v4788_v63 = vmul.f32 %v12026_v59, %v4653_v9  ;;  %v12413_v45 = vpop.xlane.xlu1 %5025  ;;  %v4805_v9 = vmul.f32 %v12026_v59, %v4670_v10 }
 0x57d   : > { %14423 = vst [vmem:[#allocation97_spill] sm:$0xff] %v12413_v45 }
 0x57e   : > { %v5135_v54 = vsel %vm4807_vm4, %v4788_v63, 0.0  ;;  %v5186_v29 = vsel %vm4807_vm4, %v4805_v9, 0.0 }
 0x57f   : > { %5085 = vadd.xlane.f32.xlu1 %v5084_v30  ;;  %v12416_v30 = vpop.xlane.xlu0 %5028 }
 0x580   : > { %5190 = vadd.xlane.f32.xlu0 %v5189_v15  ;;  %14424 = vst [vmem:[#allocation100_spill] sm:$0xff] %v12416_v30  ;;  %v4669_v15 = vmax.f32 %v4531_v31, 0.0 }
 0x582   : > { %v4804_v43 = vmul.f32 %v12026_v59, %v4669_v15 }
 0x583   : > { %5175 = vadd.xlane.f32.xlu1 %v5174_v41  ;;  %v12422_v41 = vpop.xlane.xlu1 %5031  ;;  %v12425_v1 = vpop.xlane.xlu0 %5034 }
 0x584   : > { %14425 = vst [vmem:[#allocation101_spill] sm:$0xff] %v12422_v41  ;;  %14426 = vst [vmem:[#allocation104_spill] sm:$0xff] %v12425_v1 }
 0x587   : > { %5133 = vadd.xlane.f32.xlu1 %v5132_v27  ;;  %v5183_v27 = vsel %vm4807_vm4, %v4804_v43, 0.0  ;;  %v12429_v33 = vpop.xlane.xlu1 %5037  ;;  %v12431_v49 = vpop.xlane.xlu0 %5040  ;;  %vm6888_vm4 = vcmask 1041409  }
 0x588   : > { %14427 = vst [vmem:[#allocation105_spill] sm:$0xff] %v12429_v33  ;;  %14428 = vst [vmem:[#allocation108_spill] sm:$0xff] %v12431_v49 }
 0x58b   : > { %5046 = vadd.xlane.f32.xlu1 %v5045_v40  ;;  %v12434_v63 = vpop.xlane.xlu1 %5043  ;;  %v5050_v31 = vpop.xlane.xlu0 %5049 }
 0x58c   : > { %14429 = vst [vmem:[#allocation109_spill] sm:$0xff] %v12434_v63 }
 0x58f   : > { %5136 = vadd.xlane.f32.xlu1 %v5135_v54  ;;  %v5053_v40 = vpop.xlane.xlu1 %5052  ;;  %v5056_v46 = vpop.xlane.xlu0 %5055 }
 0x593   : > { %5094 = vadd.xlane.f32.xlu1 %v5093_v0  ;;  %v5101_v15 = vpop.xlane.xlu0 %5100  ;;  %v5098_v6 = vpop.xlane.xlu1 %5097 }
 0x597   : > { %5184 = vadd.xlane.f32.xlu1 %v5183_v27  ;;  %v5059_v54 = vpop.xlane.xlu1 %5058  ;;  %v5104_v0 = vpop.xlane.xlu0 %5103 }
 0x59b   : > { %5187 = vadd.xlane.f32.xlu1 %v5186_v29 }
 0x5b0   : > { %v5149_v59 = vpop.xlane.xlu0 %5148 }
 0x5b1   : > { %v5146_v10 = vpop.xlane.xlu1 %5145 }
 0x5b4   : > { %v5107_v43 = vpop.xlane.xlu0 %5106 }
 0x5b5   : > { %v5062_v27 = vpop.xlane.xlu1 %5061 }
 0x5bc   : > { %v12436_v1 = vpop.xlane.xlu1 %5151  ;;  %v12438_v33 = vpop.permute.xlu0 %5199 }
 0x5bd   : > { %v5282_v9 = vadd.f32 %v12438_v33, %v5050_v31  ;;  %v5283_v29 = vadd.f32 %v12438_v33, %v5053_v40  ;;  %v5284_v63 = vadd.f32 %v12438_v33, %v5056_v46  ;;  %v5285_v49 = vadd.f32 %v12438_v33, %v5059_v54 }
 0x5be   : > { %v5286_v41 = vadd.f32 %v12438_v33, %v5062_v27  ;;  %v5298_v62 = vadd.f32 %v12438_v33, %v5098_v6  ;;  %v5299_v25 = vadd.f32 %v12438_v33, %v5101_v15  ;;  %v5300_v40 = vadd.f32 %v12438_v33, %v5104_v0 }
 0x5bf   : > { %v7196_v30 = vmul.f32 -1.442695, %v5282_v9  ;;  %v7197_v45 = vmul.f32 -1.442695, %v5283_v29  ;;  %v7198_v39 = vmul.f32 -1.442695, %v5284_v63  ;;  %v5301_v46 = vadd.f32 %v12438_v33, %v5107_v43 }
 0x5c0   : > { %v5065_v26 = vpop.xlane.xlu1 %5064  ;;  %v7199_v60 = vmul.f32 -1.442695, %v5285_v49  ;;  %v7200_v31 = vmul.f32 -1.442695, %v5286_v41  ;;  %v7212_v27 = vmul.f32 -1.442695, %v5298_v62  ;;  %v5314_v6 = vadd.f32 %v12438_v33, %v5146_v10 }
 0x5c1   : > { %v5287_v57 = vadd.f32 %v12438_v33, %v5065_v26  ;;  %8056 = vpow2.f32 %v7196_v30  ;;  %v7213_v9 = vmul.f32 -1.442695, %v5299_v25  ;;  %v7214_v15 = vmul.f32 -1.442695, %v5300_v40 }
 0x5c2   : > { %8058 = vpow2.f32 %v7197_v45  ;;  %v5315_v26 = vadd.f32 %v12438_v33, %v5149_v59  ;;  %v7215_v30 = vmul.f32 -1.442695, %v5301_v46  ;;  %v14430_v40 = vlaneseq }
 0x5c3   : > { %8060 = vpow2.f32 %v7198_v39  ;;  %v7201_v54 = vmul.f32 -1.442695, %v5287_v57  ;;  %v7228_v39 = vmul.f32 -1.442695, %v5314_v6 }
 0x5c4   : > { %8062 = vpow2.f32 %v7199_v60  ;;  %v5110_v63 = vpop.xlane.xlu1 %5109  ;;  %v7229_v57 = vmul.f32 -1.442695, %v5315_v26  ;;  %v12454_v46 = vshrl.u32 %v14430_v40, 7  ;;  %v6244_v26 = vadd.s32 4294967272, %v10057_v4 }
 0x5c5   : > { %8064 = vpow2.f32 %v7200_v31  ;;  %v5302_v49 = vadd.f32 %v12438_v33, %v5110_v63 }
 0x5c6   : > { %8066 = vpow2.f32 %v7201_v54  ;;  %v6230_v54 = vadd.s32 4294967288, %v10057_v4 }
 0x5c7   : > { %8068 = vpow2.f32 %v7212_v27  ;;  %v7216_v45 = vmul.f32 -1.442695, %v5302_v49 }
 0x5c8   : > { %8070 = vpow2.f32 %v7213_v9  ;;  %v5155_v41 = vpop.xlane.xlu1 %5154  ;;  %v6237_v9 = vadd.s32 4294967280, %v10057_v4 }
 0x5c9   : > { %8072 = vpow2.f32 %v7214_v15 }
 0x5ca   : > { %8074 = vpow2.f32 %v7215_v30 }
 0x5cb   : > { %v8057_v60 = vpop.eup %8056  ;;  %8076 = vpow2.f32 %v7216_v45  ;;  %v5316_v45 = vadd.f32 %v12438_v33, %v12436_v1 }
 0x5cc   : > { %v8059_v25 = vpop.eup %8058  ;;  %v5794_v62 = vadd.f32 1.0, %v8057_v60  ;;  %8078 = vpow2.f32 %v7228_v39  ;;  %v5068_v0 = vpop.xlane.xlu1 %5067 }
 0x5cd   : > { %v8061_v10 = vpop.eup %8060  ;;  %v5795_v43 = vadd.f32 1.0, %v8059_v25  ;;  %8080 = vpow2.f32 %v7229_v57  ;;  %v6251_v57 = vadd.s32 4294967264, %v10057_v4  ;;  %v5317_v25 = vadd.f32 %v12438_v33, %v5155_v41 }
 0x5ce   : > { %v8063_v59 = vpop.eup %8062  ;;  %v5796_v29 = vadd.f32 1.0, %v8061_v10  ;;  %8082 = vrcp.f32 %v5794_v62  ;;  %v12465_v10 = vsub.s32 %v10057_v4, %v12454_v46 }
 0x5cf   : > { %v8065_v31 = vpop.eup %8064  ;;  %v5797_v27 = vadd.f32 1.0, %v8063_v59  ;;  %8084 = vrcp.f32 %v5795_v43  ;;  %v12468_v43 = vsub.s32 %v6230_v54, %v12454_v46  ;;  %v7231_v28 = vmul.f32 -1.442695, %v5317_v25 }
 0x5d0   : > { %v8067_v63 = vpop.eup %8066  ;;  %v5798_v6 = vadd.f32 1.0, %v8065_v31  ;;  %8086 = vrcp.f32 %v5796_v29  ;;  %v5113_v49 = vpop.xlane.xlu1 %5112  ;;  %14431 = vst [vmem:[#allocation112_spill] sm:$0xff] %v12465_v10  ;;  %v12471_v29 = vsub.s32 %v6237_v9, %v12454_v46  ;;  %v6258_v9 = vadd.s32 4294967256, %v10057_v4 }
 0x5d1   : > { %v8069_v15 = vpop.eup %8068  ;;  %v5799_v30 = vadd.f32 1.0, %v8067_v63  ;;  %8088 = vrcp.f32 %v5797_v27  ;;  %14432 = vst [vmem:[#allocation113_spill] sm:$0xff] %v12468_v43  ;;  %v7230_v63 = vmul.f32 -1.442695, %v5316_v45  ;;  %v12481_v45 = vsub.s32 %v6251_v57, %v12454_v46 }
 0x5d2   : > { %v8071_v39 = vpop.eup %8070  ;;  %8090 = vrcp.f32 %v5798_v6  ;;  %v5810_v60 = vadd.f32 1.0, %v8069_v15  ;;  %14433 = vst [vmem:[#allocation18_spill] sm:$0xff] %v12471_v29  ;;  %v5288_v6 = vadd.f32 %v12438_v33, %v5068_v0  ;;  %v12487_v57 = vsub.s32 %v6258_v9, %v12454_v46 }
 0x5d3   : > { %v8073_v62 = vpop.eup %8072  ;;  %8092 = vrcp.f32 %v5799_v30  ;;  %v5811_v59 = vadd.f32 1.0, %v8071_v39  ;;  %v5303_v30 = vadd.f32 %v12438_v33, %v5113_v49  ;;  %14435 = vst [vmem:[#allocation116_spill] sm:$0xff] %v12481_v45 }
 0x5d4   : > { %v8075_v1 = vpop.eup %8074  ;;  %v5812_v31 = vadd.f32 1.0, %v8073_v62  ;;  %8094 = vrcp.f32 %v5810_v60  ;;  %v5158_v40 = vpop.xlane.xlu1 %5157 }
 0x5d5   : > { %v8077_v41 = vpop.eup %8076  ;;  %v5813_v27 = vadd.f32 1.0, %v8075_v1  ;;  %8096 = vrcp.f32 %v5811_v59  ;;  %v5318_v60 = vadd.f32 %v12438_v33, %v5158_v40  ;;  %v12478_v1 = vsub.s32 %v6244_v26, %v12454_v46 }
 0x5d6   : > { %v8079_v15 = vpop.eup %8078  ;;  %v5814_v54 = vadd.f32 1.0, %v8077_v41  ;;  %8098 = vrcp.f32 %v5812_v31  ;;  %v7202_v31 = vmul.f32 -1.442695, %v5288_v6  ;;  %v7217_v26 = vmul.f32 -1.442695, %v5303_v30 }
 0x5d7   : > { %v8081_v39 = vpop.eup %8080  ;;  %8100 = vrcp.f32 %v5813_v27  ;;  %v5826_v48 = vadd.f32 1.0, %v8079_v15  ;;  %14434 = vst [vmem:[#allocation19_spill] sm:$0xff] %v12478_v1 }
 0x5d8   : > { %v8083_v62 = vpop.eup %8082  ;;  %8102 = vrcp.f32 %v5814_v54  ;;  %v5827_v0 = vadd.f32 1.0, %v8081_v39  ;;  %v5071_v59 = vpop.xlane.xlu1 %5070  ;;  %v7232_v39 = vmul.f32 -1.442695, %v5318_v60 }
 0x5d9   : > { %v8085_v25 = vpop.eup %8084  ;;  %v6654_v49 = vrot.slane %v8083_v62, %v12465_v10  ;;  %8104 = vpow2.f32 %v7230_v63  ;;  %v5289_v41 = vadd.f32 %v12438_v33, %v5071_v59 }
 0x5da   : > { %v8087_v27 = vpop.eup %8086  ;;  %v6658_v40 = vrot.slane %v8085_v25, %v12468_v43  ;;  %8106 = vpow2.f32 %v7231_v28 }
 0x5db   : > { %v8089_v15 = vpop.eup %8088  ;;  %v6663_v54 = vrot.slane %v8087_v27, %v12471_v29  ;;  %8108 = vrcp.f32 %v5826_v48  ;;  %v7203_v62 = vmul.f32 -1.442695, %v5289_v41 }
 0x5dc   : > { %v8091_v19 = vpop.eup %8090  ;;  %v6659_v63 = vsel %vm6235_vm14, %v6658_v40, %v6654_v49  ;;  %v6668_v6 = vrot.slane %v8089_v15, %v12478_v1  ;;  %8110 = vrcp.f32 %v5827_v0  ;;  %v5116_v59 = vpop.xlane.xlu1 %5115 }
 0x5dd   : > { %v8093_v24 = vpop.eup %8092  ;;  %v6664_v28 = vsel %vm6242_vm5, %v6663_v54, %v6659_v63  ;;  %v6673_v30 = vrot.slane %v8091_v19, %v12481_v45  ;;  %8112 = vpow2.f32 %v7202_v31  ;;  %v5304_v9 = vadd.f32 %v12438_v33, %v5116_v59 }
 0x5de   : > { %v8095_v25 = vpop.eup %8094  ;;  %v6669_v48 = vsel %vm6249_vm6, %v6668_v6, %v6664_v28  ;;  %v6678_v60 = vrot.slane %v8093_v24, %v12487_v57  ;;  %8114 = vpow2.f32 %v7217_v26 }
 0x5df   : > { %v8097_v49 = vpop.eup %8096  ;;  %v6674_v27 = vsel %vm6256_vm7, %v6673_v30, %v6669_v48  ;;  %v6733_v0 = vrot.slane %v8095_v25, %v12465_v10  ;;  %8116 = vpow2.f32 %v7232_v39  ;;  %v7218_v41 = vmul.f32 -1.442695, %v5304_v9 }
 0x5e0   : > { %v8099_v40 = vpop.eup %8098  ;;  %v12500_v15 = vsel %vm6263_vm8, %v6678_v60, %v6674_v27  ;;  %v6737_v19 = vrot.slane %v8097_v49, %v12468_v43  ;;  %8118 = vpow2.f32 %v7203_v62  ;;  %v5161_v31 = vpop.xlane.xlu1 %5160 }
 0x5e1   : > { %v8101_v54 = vpop.eup %8100  ;;  %v6742_v63 = vrot.slane %v8099_v40, %v12471_v29  ;;  %8120 = vpow2.f32 %v7218_v41  ;;  %v5319_v24 = vadd.f32 %v12438_v33, %v5161_v31 }
 0x5e2   : > { %v8103_v26 = vpop.eup %8102  ;;  %v6738_v6 = vsel %vm6235_vm14, %v6737_v19, %v6733_v0  ;;  %v6747_v39 = vrot.slane %v8101_v54, %v12478_v1 }
 0x5e3   : > { %v8105_v59 = vpop.eup %8104  ;;  %v6743_v28 = vsel %vm6242_vm5, %v6742_v63, %v6738_v6  ;;  %v6752_v30 = vrot.slane %v8103_v26, %v12481_v45  ;;  %v7233_v9 = vmul.f32 -1.442695, %v5319_v24 }
 0x5e4   : > { %v8107_v25 = vpop.eup %8106  ;;  %v6748_v62 = vsel %vm6249_vm6, %v6747_v39, %v6743_v28  ;;  %v5828_v48 = vadd.f32 1.0, %v8105_v59  ;;  %v5074_v60 = vpop.xlane.xlu1 %5073 }
 0x5e5   : > { %v8109_v49 = vpop.eup %8108  ;;  %v12511_v27 = vsel %vm6256_vm7, %v6752_v30, %v6748_v62  ;;  %v5829_v41 = vadd.f32 1.0, %v8107_v25  ;;  %8122 = vpow2.f32 %v7233_v9  ;;  %v5290_v0 = vadd.f32 %v12438_v33, %v5074_v60 }
 0x5e6   : > { %v8111_v40 = vpop.eup %8110  ;;  %8124 = vrcp.f32 %v5828_v48  ;;  %v6812_v62 = vrot.slane %v8109_v49, %v12465_v10 }
 0x5e7   : > { %v8113_v19 = vpop.eup %8112  ;;  %8126 = vrcp.f32 %v5829_v41  ;;  %v7204_v31 = vmul.f32 -1.442695, %v5290_v0  ;;  %v6816_v41 = vrot.slane %v8111_v40, %v12468_v43  ;;  %v6272_v40 = vadd.s32 4294967240, %v10057_v4 }
 0x5e8   : > { %v8115_v54 = vpop.eup %8114  ;;  %v5800_v63 = vadd.f32 1.0, %v8113_v19  ;;  %v5119_v24 = vpop.xlane.xlu1 %5118 }
 0x5e9   : > { %v8117_v26 = vpop.eup %8116  ;;  %v5815_v6 = vadd.f32 1.0, %v8115_v54  ;;  %8128 = vpow2.f32 %v7204_v31  ;;  %v5305_v39 = vadd.f32 %v12438_v33, %v5119_v24  ;;  %v5164_v59 = vpop.xlane.xlu0 %5163 }
 0x5ea   : > { %v8119_v28 = vpop.eup %8118  ;;  %8130 = vrcp.f32 %v5800_v63  ;;  %v5830_v30 = vadd.f32 1.0, %v8117_v26  ;;  %v5320_v9 = vadd.f32 %v12438_v33, %v5164_v59  ;;  %v6265_v59 = vadd.s32 4294967248, %v10057_v4 }
 0x5eb   : > { %v8121_v25 = vpop.eup %8120  ;;  %8132 = vrcp.f32 %v5815_v6  ;;  %v5801_v48 = vadd.f32 1.0, %v8119_v28  ;;  %v7219_v60 = vmul.f32 -1.442695, %v5305_v39  ;;  %v6817_v39 = vsel %vm6235_vm14, %v6816_v41, %v6812_v62 }
 0x5ec   : > { %8134 = vrcp.f32 %v5830_v30  ;;  %v5816_v0 = vadd.f32 1.0, %v8121_v25  ;;  %v7234_v19 = vmul.f32 -1.442695, %v5320_v9  ;;  %v5077_v31 = vpop.xlane.xlu1 %5076  ;;  %v12529_v62 = vsub.s32 %v6265_v59, %v12454_v46 }
 0x5ed   : > { %8136 = vrcp.f32 %v5801_v48  ;;  %v5291_v54 = vadd.f32 %v12438_v33, %v5077_v31  ;;  %v5173_v24 = vpop.xlane.xlu0 %5172 }
 0x5ee   : > { %8138 = vrcp.f32 %v5816_v0  ;;  %v5323_v63 = vadd.f32 %v12438_v33, %v5173_v24 }
 0x5ef   : > { %v8123_v26 = vpop.eup %8122  ;;  %8140 = vpow2.f32 %v7219_v60  ;;  %v7205_v49 = vmul.f32 -1.442695, %v5291_v54 }
 0x5f0   : > { %v8125_v6 = vpop.eup %8124  ;;  %8142 = vpow2.f32 %v7234_v19  ;;  %v7237_v28 = vmul.f32 -1.442695, %v5323_v63  ;;  %v5122_v30 = vpop.xlane.xlu1 %5121 }
 0x5f1   : > { %v8127_v9 = vpop.eup %8126  ;;  %v6821_v25 = vrot.slane %v8125_v6, %v12471_v29  ;;  %8144 = vpow2.f32 %v7205_v49  ;;  %v5306_v48 = vadd.f32 %v12438_v33, %v5122_v30  ;;  %v5131_v0 = vpop.xlane.xlu0 %5130  ;;  %v12533_v49 = vsub.s32 %v6272_v40, %v12454_v46 }
 0x5f2   : > { %v6826_v31 = vrot.slane %v8127_v9, %v12478_v1  ;;  %v5309_v60 = vadd.f32 %v12438_v33, %v5131_v0  ;;  %8146 = vpow2.f32 %v7237_v28  ;;  %v5831_v6 = vadd.f32 1.0, %v8123_v26 }
 0x5f3   : > { %v8129_v54 = vpop.eup %8128  ;;  %v6822_v24 = vsel %vm6242_vm5, %v6821_v25, %v6817_v39  ;;  %v7220_v41 = vmul.f32 -1.442695, %v5306_v48 }
 0x5f4   : > { %v8131_v19 = vpop.eup %8130  ;;  %v6827_v63 = vsel %vm6249_vm6, %v6826_v31, %v6822_v24  ;;  %v7223_v30 = vmul.f32 -1.442695, %v5309_v60  ;;  %v5167_v29 = vpop.xlane.xlu1 %5166  ;;  %v5802_v48 = vadd.f32 1.0, %v8129_v54 }
 0x5f5   : > { %v8133_v9 = vpop.eup %8132  ;;  %v6683_v0 = vrot.slane %v8131_v19, %v12529_v62  ;;  %8148 = vpow2.f32 %v7220_v41  ;;  %v5321_v39 = vadd.f32 %v12438_v33, %v5167_v29  ;;  %v5089_v59 = vpop.xlane.xlu0 %5088 }
 0x5f6   : > { %v8135_v25 = vpop.eup %8134  ;;  %v6757_v28 = vrot.slane %v8133_v9, %v12487_v57  ;;  %v5295_v31 = vadd.f32 %v12438_v33, %v5089_v59  ;;  %8150 = vpow2.f32 %v7223_v30 }
 0x5f7   : > { %v8137_v40 = vpop.eup %8136  ;;  %v6684_v26 = vsel %vm6270_vm9, %v6683_v0, %v12500_v15  ;;  %v6831_v60 = vrot.slane %v8135_v25, %v12481_v45  ;;  %v7235_v24 = vmul.f32 -1.442695, %v5321_v39  ;;  %8152 = vrcp.f32 %v5831_v6 }
 0x5f8   : > { %v8139_v19 = vpop.eup %8138  ;;  %v6758_v29 = vsel %vm6263_vm8, %v6757_v28, %v12511_v27  ;;  %v6688_v41 = vrot.slane %v8137_v40, %v12533_v49  ;;  %v7209_v9 = vmul.f32 -1.442695, %v5295_v31  ;;  %v5080_v1 = vpop.xlane.xlu1 %5079 }
 0x5f9   : > { %v8141_v54 = vpop.eup %8140  ;;  %v12546_v59 = vsel %vm6256_vm7, %v6831_v60, %v6827_v63  ;;  %v6762_v43 = vrot.slane %v8139_v19, %v12529_v62  ;;  %8154 = vpow2.f32 %v7235_v24  ;;  %v5292_v15 = vadd.f32 %v12438_v33, %v5080_v1  ;;  %v5179_v30 = vpop.xlane.xlu0 %5178 }
 0x5fa   : > { %v8143_v0 = vpop.eup %8142  ;;  %v12551_v39 = vsel %vm6277_vm10, %v6688_v41, %v6684_v26  ;;  %v5817_v27 = vadd.f32 1.0, %v8141_v54  ;;  %8156 = vpow2.f32 %v7209_v9  ;;  %v5325_v6 = vadd.f32 %v12438_v33, %v5179_v30 }
 0x5fb   : > { %v8145_v25 = vpop.eup %8144  ;;  %v12555_v28 = vsel %vm6270_vm9, %v6762_v43, %v6758_v29  ;;  %8158 = vrcp.f32 %v5802_v48  ;;  %v5832_v63 = vadd.f32 1.0, %v8143_v0  ;;  %v7206_v31 = vmul.f32 -1.442695, %v5292_v15 }
 0x5fc   : > { %8160 = vrcp.f32 %v5817_v27  ;;  %v5803_v40 = vadd.f32 1.0, %v8145_v25  ;;  %v5125_v60 = vpop.xlane.xlu1 %5124  ;;  %v8147_v1 = vpop.eup %8146  ;;  %v7239_v24 = vmul.f32 -1.442695, %v5325_v6 }
 0x5fd   : > { %8162 = vrcp.f32 %v5832_v63  ;;  %v5307_v26 = vadd.f32 %v12438_v33, %v5125_v60  ;;  %v5092_v19 = vpop.xlane.xlu0 %5091  ;;  %v5835_v41 = vadd.f32 1.0, %v8147_v1 }
 0x5fe   : > { %8164 = vrcp.f32 %v5803_v40  ;;  %v5296_v9 = vadd.f32 %v12438_v33, %v5092_v19 }
 0x5ff   : > { %v8149_v54 = vpop.eup %8148  ;;  %8166 = vpow2.f32 %v7206_v31  ;;  %v7221_v43 = vmul.f32 -1.442695, %v5307_v26 }
 0x600   : > { %8168 = vrcp.f32 %v5835_v41  ;;  %v5818_v48 = vadd.f32 1.0, %v8149_v54  ;;  %v5170_v29 = vpop.xlane.xlu1 %5169  ;;  %v8151_v15 = vpop.eup %8150  ;;  %v7210_v30 = vmul.f32 -1.442695, %v5296_v9 }
 0x601   : > { %8170 = vpow2.f32 %v7239_v24  ;;  %v5322_v0 = vadd.f32 %v12438_v33, %v5170_v29  ;;  %v5182_v27 = vpop.xlane.xlu0 %5181  ;;  %v12560_v6 = vpop.eup %8152  ;;  %v5821_v25 = vadd.f32 1.0, %v8151_v15 }
 0x602   : > { %8172 = vrcp.f32 %v5818_v48  ;;  %v5326_v63 = vadd.f32 %v12438_v33, %v5182_v27 }
 0x603   : > { %v8155_v40 = vpop.eup %8154  ;;  %8174 = vpow2.f32 %v7221_v43  ;;  %v7236_v1 = vmul.f32 -1.442695, %v5322_v0 }
 0x604   : > { %v8157_v60 = vpop.eup %8156  ;;  %8176 = vrcp.f32 %v5821_v25  ;;  %v5833_v31 = vadd.f32 1.0, %v8155_v40  ;;  %v5083_v26 = vpop.xlane.xlu1 %5082  ;;  %v7240_v41 = vmul.f32 -1.442695, %v5326_v63 }
 0x605   : > { %v12563_v19 = vpop.eup %8158  ;;  %v5807_v24 = vadd.f32 1.0, %v8157_v60  ;;  %8178 = vpow2.f32 %v7210_v30  ;;  %v5293_v9 = vadd.f32 %v12438_v33, %v5083_v26  ;;  %v5140_v54 = vpop.xlane.xlu0 %5139 }
 0x606   : > { %v12566_v29 = vpop.eup %8160  ;;  %8180 = vrcp.f32 %v5833_v31  ;;  %v5312_v48 = vadd.f32 %v12438_v33, %v5140_v54 }
 0x607   : > { %v12569_v15 = vpop.eup %8162  ;;  %8182 = vrcp.f32 %v5807_v24  ;;  %v7207_v43 = vmul.f32 -1.442695, %v5293_v9 }
 0x608   : > { %v12571_v27 = vpop.eup %8164  ;;  %8184 = vpow2.f32 %v7236_v1  ;;  %v7226_v0 = vmul.f32 -1.442695, %v5312_v48  ;;  %v5128_v25 = vpop.xlane.xlu1 %5127 }
 0x609   : > { %v8167_v40 = vpop.eup %8166  ;;  %8186 = vpow2.f32 %v7240_v41  ;;  %v5308_v30 = vadd.f32 %v12438_v33, %v5128_v25  ;;  %v5143_v63 = vpop.xlane.xlu0 %5142  ;;  %v5202_v41 = vadd.f32 %v12438_v33, %v12034_v55 }
 0x60a   : > { %v12574_v60 = vpop.eup %8168  ;;  %v5804_v26 = vadd.f32 1.0, %v8167_v40  ;;  %8188 = vpow2.f32 %v7207_v43  ;;  %v5313_v31 = vadd.f32 %v12438_v33, %v5143_v63 }
 0x60b   : > { %14436 = vst [vmem:[#allocation115_spill] sm:$0xff] %v12574_v60  ;;  %v8171_v54 = vpop.eup %8170  ;;  %8190 = vpow2.f32 %v7226_v0  ;;  %v7222_v24 = vmul.f32 -1.442695, %v5308_v30 }
 0x60c   : > { %v12577_v9 = vpop.eup %8172  ;;  %8192 = vrcp.f32 %v5804_v26  ;;  %v5837_v1 = vadd.f32 1.0, %v8171_v54  ;;  %v7227_v48 = vmul.f32 -1.442695, %v5313_v31  ;;  %v5086_v45 = vpop.xlane.xlu1 %5085 }
 0x60d   : > { %14437 = vst [vmem:[#allocation22_spill] sm:$0xff] %v12577_v9  ;;  %v8175_v25 = vpop.eup %8174  ;;  %8194 = vpow2.f32 %v7222_v24  ;;  %v5294_v10 = vadd.f32 %v12438_v33, %v5086_v45  ;;  %v5191_v40 = vpop.xlane.xlu0 %5190  ;;  %v7116_v9 = vmul.f32 -1.442695, %v5202_v41 }
 0x60e   : > { %v12582_v43 = vpop.eup %8176  ;;  %8196 = vrcp.f32 %v5837_v1  ;;  %v5819_v63 = vadd.f32 1.0, %v8175_v25  ;;  %v5329_v0 = vadd.f32 %v12438_v33, %v5191_v40 }
 0x60f   : > { %14438 = vst [vmem:[#allocation23_spill] sm:$0xff] %v12582_v43  ;;  %v8179_v30 = vpop.eup %8178  ;;  %8198 = vpow2.f32 %v7227_v48  ;;  %v7208_v26 = vmul.f32 -1.442695, %v5294_v10 }
 0x610   : > { %v12585_v54 = vpop.eup %8180  ;;  %8200 = vrcp.f32 %v5819_v63  ;;  %v5808_v31 = vadd.f32 1.0, %v8179_v30  ;;  %v7243_v60 = vmul.f32 -1.442695, %v5329_v0  ;;  %v5176_v55 = vpop.xlane.xlu1 %5175 }
 0x611   : > { %14439 = vst [vmem:[#allocation119_spill] sm:$0xff] %v12585_v54  ;;  %v12587_v24 = vpop.eup %8182  ;;  %8202 = vpow2.f32 %v7208_v26  ;;  %v5324_v45 = vadd.f32 %v12438_v33, %v5176_v55 }
 0x612   : > { %v8185_v43 = vpop.eup %8184  ;;  %8204 = vrcp.f32 %v5808_v31 }
 0x613   : > { %v8187_v1 = vpop.eup %8186  ;;  %v5834_v25 = vadd.f32 1.0, %v8185_v43  ;;  %8206 = vpow2.f32 %v7243_v60  ;;  %v7238_v0 = vmul.f32 -1.442695, %v5324_v45  ;;  %v5203_v60 = vadd.f32 %v12438_v33, %v12030_v34 }
 0x614   : > { %v8189_v40 = vpop.eup %8188  ;;  %v5838_v48 = vadd.f32 1.0, %v8187_v1  ;;  %v5134_v10 = vpop.xlane.xlu1 %5133  ;;  %8208 = vpow2.f32 %v7116_v9  ;;  %v5205_v34 = vadd.f32 %v12438_v33, %v12040_v38 }
 0x615   : > { %v8191_v54 = vpop.eup %8190  ;;  %8210 = vrcp.f32 %v5834_v25  ;;  %v5805_v63 = vadd.f32 1.0, %v8189_v40  ;;  %v5310_v41 = vadd.f32 %v12438_v33, %v5134_v10 }
 0x616   : > { %v12591_v30 = vpop.eup %8192  ;;  %8212 = vrcp.f32 %v5838_v48  ;;  %v5824_v26 = vadd.f32 1.0, %v8191_v54  ;;  %v5204_v54 = vadd.f32 %v12438_v33, %v12044_v51 }
 0x617   : > { %v8195_v55 = vpop.eup %8194  ;;  %8214 = vrcp.f32 %v5805_v63  ;;  %v7224_v31 = vmul.f32 -1.442695, %v5310_v41  ;;  %v7117_v41 = vmul.f32 -1.442695, %v5203_v60  ;;  %v5207_v60 = vadd.f32 %v12438_v33, %v12051_v21 }
 0x618   : > { %v12595_v43 = vpop.eup %8196  ;;  %8216 = vrcp.f32 %v5824_v26  ;;  %v5820_v9 = vadd.f32 1.0, %v8195_v55  ;;  %v5047_v1 = vpop.xlane.xlu1 %5046  ;;  %v5208_v21 = vadd.f32 %v12438_v33, %v12064_v44 }
 0x619   : > { %14440 = vst [vmem:[#allocation26_spill] sm:$0xff] %v12595_v43  ;;  %v8199_v25 = vpop.eup %8198  ;;  %8218 = vpow2.f32 %v7238_v0  ;;  %v5281_v45 = vadd.f32 %v12438_v33, %v5047_v1  ;;  %v5206_v1 = vadd.f32 %v12438_v33, %v12055_v3 }
 0x61a   : > { %v12598_v40 = vpop.eup %8200  ;;  %8220 = vrcp.f32 %v5820_v9  ;;  %v5825_v48 = vadd.f32 1.0, %v8199_v25 }
 0x61b   : > { %v8203_v10 = vpop.eup %8202  ;;  %8222 = vpow2.f32 %v7224_v31  ;;  %v7195_v63 = vmul.f32 -1.442695, %v5281_v45  ;;  %v7118_v45 = vmul.f32 -1.442695, %v5204_v54 }
 0x61c   : > { %v12604_v26 = vpop.eup %8204  ;;  %8224 = vrcp.f32 %v5825_v48  ;;  %v5806_v0 = vadd.f32 1.0, %v8203_v10  ;;  %v5137_v55 = vpop.xlane.xlu1 %5136  ;;  %v7119_v48 = vmul.f32 -1.442695, %v5205_v34  ;;  %v7121_v34 = vmul.f32 -1.442695, %v5207_v60 }
 0x61d   : > { %14441 = vst [vmem:[#allocation118_spill] sm:$0xff] %v12604_v26  ;;  %v8207_v9 = vpop.eup %8206  ;;  %8226 = vpow2.f32 %v7195_v63  ;;  %v5311_v25 = vadd.f32 %v12438_v33, %v5137_v55  ;;  %v7120_v63 = vmul.f32 -1.442695, %v5206_v1  ;;  %v5209_v1 = vadd.f32 %v12438_v33, %v12060_v8 }
 0x61e   : > { %v12609_v51 = vpop.eup %8208  ;;  %8228 = vrcp.f32 %v5806_v0  ;;  %v5841_v31 = vadd.f32 1.0, %v8207_v9  ;;  %v5210_v60 = vadd.f32 %v12438_v33, %v12072_v53 }
 0x61f   : > { %v12611_v43 = vpop.eup %8210  ;;  %v7225_v38 = vmul.f32 -1.442695, %v5311_v25  ;;  %8230 = vpow2.f32 %v7117_v41 }
 0x620   : > { %v12615_v10 = vpop.eup %8212  ;;  %8232 = vrcp.f32 %v5841_v31  ;;  %v5095_v3 = vpop.xlane.xlu1 %5094 }
 0x621   : > { %14442 = vst [vmem:[#allocation27_spill] sm:$0xff] %v12615_v10  ;;  %v12617_v26 = vpop.eup %8214  ;;  %8234 = vpow2.f32 %v7225_v38  ;;  %v5297_v0 = vadd.f32 %v12438_v33, %v5095_v3  ;;  %v14467_v10 = vld [vmem:[#allocation40_spill] sm:$0xff] }
 0x622   : > { %14443 = vst [vmem:[#allocation121_spill] sm:$0xff] %v12617_v26  ;;  %v12620_v55 = vpop.eup %8216  ;;  %8236 = vpow2.f32 %v7118_v45  ;;  %v14465_v26 = vld [vmem:[#allocation37_spill] sm:$0xff] }
 0x623   : > { %14444 = vst [vmem:[#allocation30_spill] sm:$0xff] %v12620_v55  ;;  %v8219_v54 = vpop.eup %8218  ;;  %v7211_v9 = vmul.f32 -1.442695, %v5297_v0  ;;  %8238 = vpow2.f32 %v7119_v48  ;;  %v7122_v48 = vmul.f32 -1.442695, %v5208_v21 }
 0x624   : > { %v12624_v41 = vpop.eup %8220  ;;  %v5836_v25 = vadd.f32 1.0, %v8219_v54  ;;  %v5185_v31 = vpop.xlane.xlu1 %5184  ;;  %8240 = vpow2.f32 %v7120_v63 }
 0x625   : > { %14445 = vst [vmem:[#allocation120_spill] sm:$0xff] %v12624_v41  ;;  %v8223_v38 = vpop.eup %8222  ;;  %8242 = vpow2.f32 %v7211_v9  ;;  %v5327_v3 = vadd.f32 %v12438_v33, %v5185_v31  ;;  %v5211_v9 = vadd.f32 %v12438_v33, %v12068_v50  ;;  %v7123_v31 = vmul.f32 -1.442695, %v5209_v1 }
 0x626   : > { %v12629_v45 = vpop.eup %8224  ;;  %8244 = vrcp.f32 %v5836_v25  ;;  %v5822_v0 = vadd.f32 1.0, %v8223_v38  ;;  %v5212_v38 = vadd.f32 %v12438_v33, %v12083_v36  ;;  %v5215_v36 = vadd.f32 %v12438_v33, %v12090_v37 }
 0x627   : > { %14446 = vst [vmem:[#allocation31_spill] sm:$0xff] %v12629_v45  ;;  %v8227_v55 = vpop.eup %8226  ;;  %v7241_v44 = vmul.f32 -1.442695, %v5327_v3  ;;  %8246 = vpow2.f32 %v7121_v34  ;;  %v7124_v3 = vmul.f32 -1.442695, %v5210_v60  ;;  %v5216_v60 = vadd.f32 %v12438_v33, %v12100_v5  ;;  %v14454_v45 = vld [vmem:[#allocation20_spill] sm:$0xff] }
 0x628   : > { %v12633_v54 = vpop.eup %8228  ;;  %8248 = vrcp.f32 %v5822_v0  ;;  %v5793_v8 = vadd.f32 1.0, %v8227_v55  ;;  %v5188_v63 = vpop.xlane.xlu1 %5187  ;;  %v5213_v55 = vadd.f32 %v12438_v33, %v12080_v14  ;;  %v5214_v0 = vadd.f32 %v12438_v33, %v12092_v35 }
 0x629   : > { %14447 = vst [vmem:[#allocation124_spill] sm:$0xff] %v12633_v54  ;;  %v12637_v41 = vpop.eup %8230  ;;  %8250 = vpow2.f32 %v7241_v44  ;;  %v5328_v25 = vadd.f32 %v12438_v33, %v5188_v63  ;;  %v7125_v44 = vmul.f32 -1.442695, %v5211_v9  ;;  %v5217_v9 = vadd.f32 %v12438_v33, %v12098_v42  ;;  %v14461_v54 = vld [vmem:[#allocation33_spill] sm:$0xff] }
 0x62a   : > { %v12642_v53 = vpop.eup %8232  ;;  %8252 = vrcp.f32 %v5793_v8  ;;  %v7126_v8 = vmul.f32 -1.442695, %v5212_v38  ;;  %v5218_v37 = vadd.f32 %v12438_v33, %v12108_v23  ;;  %v7129_v38 = vmul.f32 -1.442695, %v5215_v36 }
 0x62b   : > { %14448 = vst [vmem:[#allocation123_spill] sm:$0xff] %v12642_v53  ;;  %v8235_v21 = vpop.eup %8234  ;;  %v7242_v34 = vmul.f32 -1.442695, %v5328_v25  ;;  %8254 = vpow2.f32 %v7122_v48  ;;  %v7127_v48 = vmul.f32 -1.442695, %v5213_v55  ;;  %v5219_v55 = vadd.f32 %v12438_v33, %v12106_v17 }
 0x62c   : > { %v12646_v50 = vpop.eup %8236  ;;  %v5823_v1 = vadd.f32 1.0, %v8235_v21  ;;  %8256 = vpow2.f32 %v7123_v31  ;;  %v7128_v31 = vmul.f32 -1.442695, %v5214_v0  ;;  %v5220_v0 = vadd.f32 %v12438_v33, %v12116_v47 }
 0x62d   : > { %v12650_v63 = vpop.eup %8238  ;;  %8258 = vpow2.f32 %v7242_v34  ;;  %v5221_v36 = vadd.f32 %v12438_v33, %v12114_v20  ;;  %v5222_v17 = vadd.f32 %v12438_v33, %v12124_v32  ;;  %v7133_v47 = vmul.f32 -1.442695, %v5219_v55 }
 0x62e   : > { %v12654_v25 = vpop.eup %8240  ;;  %8260 = vrcp.f32 %v5823_v1  ;;  %v5224_v20 = vadd.f32 %v12438_v33, %v14454_v45 }
 0x62f   : > { %v8243_v14 = vpop.eup %8242  ;;  %8262 = vpow2.f32 %v7124_v3  ;;  %v7130_v3 = vmul.f32 -1.442695, %v5216_v60  ;;  %v7135_v32 = vmul.f32 -1.442695, %v5221_v36 }
 0x630   : > { %v12658_v21 = vpop.eup %8244  ;;  %v5809_v35 = vadd.f32 1.0, %v8243_v14  ;;  %8264 = vpow2.f32 %v7125_v44  ;;  %v7131_v44 = vmul.f32 -1.442695, %v5217_v9  ;;  %v7138_v36 = vmul.f32 -1.442695, %v5224_v20 }
 0x631   : > { %14449 = vst [vmem:[#allocation34_spill] sm:$0xff] %v12658_v21  ;;  %v12662_v34 = vpop.eup %8246  ;;  %8266 = vpow2.f32 %v7126_v8  ;;  %v7132_v8 = vmul.f32 -1.442695, %v5218_v37  ;;  %v7134_v37 = vmul.f32 -1.442695, %v5220_v0 }
 0x632   : > { %v12666_v1 = vpop.eup %8248  ;;  %8268 = vrcp.f32 %v5809_v35 }
 0x633   : > { %14450 = vst [vmem:[#allocation35_spill] sm:$0xff] %v12666_v1  ;;  %v8251_v5 = vpop.eup %8250  ;;  %8270 = vpow2.f32 %v7127_v48  ;;  %v14452_v48 = vld [vmem:[#allocation21_spill] sm:$0xff]  ;;  %v14459_v1 = vld [vmem:[#allocation32_spill] sm:$0xff] }
 0x634   : > { %v12670_v14 = vpop.eup %8252  ;;  %v5839_v42 = vadd.f32 1.0, %v8251_v5  ;;  %8272 = vpow2.f32 %v7128_v31  ;;  %v5223_v5 = vadd.f32 %v12438_v33, %v14452_v48  ;;  %v7136_v48 = vmul.f32 -1.442695, %v5222_v17 }
 0x635   : > { %14451 = vst [vmem:[#allocation125_spill] sm:$0xff] %v12670_v14  ;;  %v12674_v23 = vpop.eup %8254  ;;  %8274 = vpow2.f32 %v7129_v38 }
 0x636   : > { %v12678_v35 = vpop.eup %8256  ;;  %8276 = vrcp.f32 %v5839_v42  ;;  %v14455_v42 = vld [vmem:[#allocation25_spill] sm:$0xff]  ;;  %v7137_v0 = vmul.f32 -1.442695, %v5223_v5 }
 0x637   : > { %v8259_v60 = vpop.eup %8258  ;;  %8278 = vpow2.f32 %v7130_v3  ;;  %v5225_v53 = vadd.f32 %v12438_v33, %v14455_v42  ;;  %v14456_v3 = vld [vmem:[#allocation28_spill] sm:$0xff] }
 0x638   : > { %v12684_v9 = vpop.eup %8260  ;;  %v5840_v31 = vadd.f32 1.0, %v8259_v60  ;;  %8280 = vpow2.f32 %v7131_v44  ;;  %v5226_v55 = vadd.f32 %v12438_v33, %v14456_v3 }
 0x639   : > { %14453 = vst [vmem:[#allocation126_spill] sm:$0xff] %v12684_v9  ;;  %v12688_v38 = vpop.eup %8262  ;;  %8282 = vpow2.f32 %v7132_v8  ;;  %v14457_v9 = vld [vmem:[#allocation24_spill] sm:$0xff]  ;;  %v5228_v8 = vadd.f32 %v12438_v33, %v14459_v1  ;;  %v7139_v17 = vmul.f32 -1.442695, %v5225_v53 }
 0x63a   : > { %v12692_v14 = vpop.eup %8264  ;;  %8284 = vrcp.f32 %v5840_v31  ;;  %v5227_v45 = vadd.f32 %v12438_v33, %v14457_v9  ;;  %v14460_v31 = vld [vmem:[#allocation29_spill] sm:$0xff]  ;;  %v7140_v5 = vmul.f32 -1.442695, %v5226_v55 }
 0x63b   : > { %v12696_v60 = vpop.eup %8266  ;;  %8286 = vpow2.f32 %v7133_v47  ;;  %v5229_v3 = vadd.f32 %v12438_v33, %v14460_v31  ;;  %v5230_v47 = vadd.f32 %v12438_v33, %v14461_v54  ;;  %v7142_v53 = vmul.f32 -1.442695, %v5228_v8 }
 0x63c   : > { %v12700_v44 = vpop.eup %8268  ;;  %8288 = vpow2.f32 %v7134_v37  ;;  %v7141_v20 = vmul.f32 -1.442695, %v5227_v45  ;;  %v5233_v54 = vadd.f32 %v12438_v33, %v14467_v10 }
 0x63d   : > { %14458 = vst [vmem:[#allocation38_spill] sm:$0xff] %v12700_v44  ;;  %v12704_v42 = vpop.eup %8270  ;;  %8290 = vpow2.f32 %v7135_v32  ;;  %v14463_v44 = vld [vmem:[#allocation36_spill] sm:$0xff]  ;;  %v5232_v32 = vadd.f32 %v12438_v33, %v14465_v26  ;;  %v7143_v55 = vmul.f32 -1.442695, %v5229_v3  ;;  %v7144_v45 = vmul.f32 -1.442695, %v5230_v47 }
 0x63e   : > { %v12708_v21 = vpop.eup %8272  ;;  %8292 = vpow2.f32 %v7136_v48  ;;  %v5231_v1 = vadd.f32 %v12438_v33, %v14463_v44  ;;  %v7147_v47 = vmul.f32 -1.442695, %v5233_v54 }
 0x63f   : > { %v12712_v9 = vpop.eup %8274  ;;  %8294 = vpow2.f32 %v7137_v0  ;;  %v7146_v3 = vmul.f32 -1.442695, %v5232_v32 }
 0x640   : > { %14462 = vst [vmem:[#allocation39_spill] sm:$0xff] %v12712_v9  ;;  %v12716_v37 = vpop.eup %8276  ;;  %8296 = vpow2.f32 %v7138_v36  ;;  %v14469_v9 = vld [vmem:[#allocation41_spill] sm:$0xff]  ;;  %v7145_v8 = vmul.f32 -1.442695, %v5231_v1 }
 0x641   : > { %14464 = vst [vmem:[#allocation128_spill] sm:$0xff] %v12716_v37  ;;  %v12720_v31 = vpop.eup %8278  ;;  %8298 = vpow2.f32 %v7139_v17  ;;  %v5234_v0 = vadd.f32 %v12438_v33, %v14469_v9  ;;  %v14470_v37 = vld [vmem:[#allocation44_spill] sm:$0xff] }
 0x642   : > { %14466 = vst [vmem:[#allocation127_spill] sm:$0xff] %v12720_v31  ;;  %v12724_v48 = vpop.eup %8280  ;;  %8300 = vpow2.f32 %v7140_v5  ;;  %v5235_v26 = vadd.f32 %v12438_v33, %v14470_v37  ;;  %v14472_v31 = vld [vmem:[#allocation45_spill] sm:$0xff] }
 0x643   : > { %14468 = vst [vmem:[#allocation42_spill] sm:$0xff] %v12724_v48  ;;  %v12728_v44 = vpop.eup %8282  ;;  %8302 = vpow2.f32 %v7141_v20  ;;  %v5236_v10 = vadd.f32 %v12438_v33, %v14472_v31  ;;  %v14474_v48 = vld [vmem:[#allocation48_spill] sm:$0xff]  ;;  %v5238_v20 = vadd.f32 %v12438_v33, %v12193_v56  ;;  %v7148_v1 = vmul.f32 -1.442695, %v5234_v0 }
 0x644   : > { %v12732_v36 = vpop.eup %8284  ;;  %8304 = vpow2.f32 %v7142_v53  ;;  %v5237_v5 = vadd.f32 %v12438_v33, %v14474_v48  ;;  %v7149_v32 = vmul.f32 -1.442695, %v5235_v26  ;;  %v5241_v56 = vadd.f32 %v12438_v33, %v12209_v2 }
 0x645   : > { %14471 = vst [vmem:[#allocation43_spill] sm:$0xff] %v12732_v36  ;;  %v12736_v17 = vpop.eup %8286  ;;  %8306 = vpow2.f32 %v7143_v55  ;;  %v14475_v36 = vld [vmem:[#allocation49_spill] sm:$0xff]  ;;  %v7150_v54 = vmul.f32 -1.442695, %v5236_v10  ;;  %v7152_v26 = vmul.f32 -1.442695, %v5238_v20  ;;  %v5244_v2 = vadd.f32 %v12438_v33, %v12224_v12 }
 0x646   : > { %14473 = vst [vmem:[#allocation130_spill] sm:$0xff] %v12736_v17  ;;  %v12740_v9 = vpop.eup %8288  ;;  %8308 = vpow2.f32 %v7144_v45  ;;  %v5239_v53 = vadd.f32 %v12438_v33, %v14475_v36  ;;  %v14477_v17 = vld [vmem:[#allocation52_spill] sm:$0xff]  ;;  %v7151_v0 = vmul.f32 -1.442695, %v5237_v5  ;;  %v7155_v20 = vmul.f32 -1.442695, %v5241_v56 }
 0x647   : > { %v12744_v37 = vpop.eup %8290  ;;  %8310 = vpow2.f32 %v7145_v8  ;;  %v5240_v55 = vadd.f32 %v12438_v33, %v14477_v17  ;;  %v5242_v8 = vadd.f32 %v12438_v33, %v12213_v61  ;;  %v7158_v56 = vmul.f32 -1.442695, %v5244_v2 }
 0x648   : > { %v12748_v31 = vpop.eup %8292  ;;  %8312 = vpow2.f32 %v7146_v3  ;;  %v7153_v10 = vmul.f32 -1.442695, %v5239_v53 }
 0x649   : > { %14476 = vst [vmem:[#allocation46_spill] sm:$0xff] %v12748_v31  ;;  %v12752_v48 = vpop.eup %8294  ;;  %8314 = vpow2.f32 %v7147_v47  ;;  %v14480_v31 = vld [vmem:[#allocation53_spill] sm:$0xff]  ;;  %v7154_v5 = vmul.f32 -1.442695, %v5240_v55  ;;  %v7156_v53 = vmul.f32 -1.442695, %v5242_v8 }
 0x64a   : > { %v12756_v45 = vpop.eup %8296  ;;  %8316 = vpow2.f32 %v7148_v1  ;;  %v5243_v3 = vadd.f32 %v12438_v33, %v14480_v31 }
 0x64b   : > { %14478 = vst [vmem:[#allocation129_spill] sm:$0xff] %v12756_v45  ;;  %v12760_v36 = vpop.eup %8298  ;;  %8318 = vpow2.f32 %v7149_v32  ;;  %v14483_v45 = vld [vmem:[#allocation56_spill] sm:$0xff] }
 0x64c   : > { %14479 = vst [vmem:[#allocation47_spill] sm:$0xff] %v12760_v36  ;;  %v12764_v17 = vpop.eup %8300  ;;  %8320 = vpow2.f32 %v7150_v54  ;;  %v5245_v61 = vadd.f32 %v12438_v33, %v14483_v45  ;;  %v14484_v36 = vld [vmem:[#allocation57_spill] sm:$0xff]  ;;  %v7157_v55 = vmul.f32 -1.442695, %v5243_v3 }
 0x64d   : > { %14481 = vst [vmem:[#allocation132_spill] sm:$0xff] %v12764_v17  ;;  %v12768_v47 = vpop.eup %8302  ;;  %8322 = vpow2.f32 %v7151_v0  ;;  %v5246_v32 = vadd.f32 %v12438_v33, %v14484_v36  ;;  %v14485_v17 = vld [vmem:[#allocation60_spill] sm:$0xff] }
 0x64e   : > { %14482 = vst [vmem:[#allocation50_spill] sm:$0xff] %v12768_v47  ;;  %v12772_v1 = vpop.eup %8304  ;;  %8324 = vpow2.f32 %v7152_v26  ;;  %v5247_v12 = vadd.f32 %v12438_v33, %v14485_v17  ;;  %v14487_v47 = vld [vmem:[#allocation61_spill] sm:$0xff]  ;;  %v5249_v26 = vadd.f32 %v12438_v33, %v12246_v58  ;;  %v7159_v8 = vmul.f32 -1.442695, %v5245_v61 }
 0x64f   : > { %v12776_v31 = vpop.eup %8306  ;;  %8326 = vpow2.f32 %v7153_v10  ;;  %v5248_v0 = vadd.f32 %v12438_v33, %v14487_v47  ;;  %v5250_v10 = vadd.f32 %v12438_v33, %v12252_v18  ;;  %v7160_v3 = vmul.f32 -1.442695, %v5246_v32 }
 0x650   : > { %v12780_v54 = vpop.eup %8308  ;;  %8328 = vpow2.f32 %v7154_v5  ;;  %v7161_v2 = vmul.f32 -1.442695, %v5247_v12  ;;  %v7163_v32 = vmul.f32 -1.442695, %v5249_v26 }
 0x651   : > { %14486 = vst [vmem:[#allocation131_spill] sm:$0xff] %v12780_v54  ;;  %v12784_v45 = vpop.eup %8310  ;;  %8330 = vpow2.f32 %v7155_v20  ;;  %v14491_v54 = vld [vmem:[#allocation64_spill] sm:$0xff]  ;;  %v7162_v61 = vmul.f32 -1.442695, %v5248_v0  ;;  %v7164_v12 = vmul.f32 -1.442695, %v5250_v10 }
 0x652   : > { %14488 = vst [vmem:[#allocation51_spill] sm:$0xff] %v12784_v45  ;;  %v12788_v36 = vpop.eup %8312  ;;  %8332 = vpow2.f32 %v7156_v53  ;;  %v5251_v5 = vadd.f32 %v12438_v33, %v14491_v54  ;;  %v14493_v45 = vld [vmem:[#allocation65_spill] sm:$0xff] }
 0x653   : > { %14489 = vst [vmem:[#allocation134_spill] sm:$0xff] %v12788_v36  ;;  %v12792_v17 = vpop.eup %8314  ;;  %8334 = vpow2.f32 %v7157_v55  ;;  %v5252_v58 = vadd.f32 %v12438_v33, %v14493_v45  ;;  %v14495_v36 = vld [vmem:[#allocation68_spill] sm:$0xff] }
 0x654   : > { %14490 = vst [vmem:[#allocation54_spill] sm:$0xff] %v12792_v17  ;;  %v12796_v47 = vpop.eup %8316  ;;  %8336 = vpow2.f32 %v7158_v56  ;;  %v5253_v18 = vadd.f32 %v12438_v33, %v14495_v36  ;;  %v14496_v17 = vld [vmem:[#allocation69_spill] sm:$0xff]  ;;  %v7165_v0 = vmul.f32 -1.442695, %v5251_v5 }
 0x655   : > { %14492 = vst [vmem:[#allocation133_spill] sm:$0xff] %v12796_v47  ;;  %v12800_v20 = vpop.eup %8318  ;;  %8338 = vpow2.f32 %v7159_v8  ;;  %v5254_v55 = vadd.f32 %v12438_v33, %v14496_v17  ;;  %v14497_v47 = vld [vmem:[#allocation72_spill] sm:$0xff]  ;;  %v7166_v26 = vmul.f32 -1.442695, %v5252_v58 }
 0x656   : > { %14494 = vst [vmem:[#allocation55_spill] sm:$0xff] %v12800_v20  ;;  %v12804_v53 = vpop.eup %8320  ;;  %8340 = vpow2.f32 %v7160_v3  ;;  %v5255_v56 = vadd.f32 %v12438_v33, %v14497_v47  ;;  %v14499_v20 = vld [vmem:[#allocation73_spill] sm:$0xff]  ;;  %v5257_v3 = vadd.f32 %v12438_v33, %v12294_v16  ;;  %v7167_v10 = vmul.f32 -1.442695, %v5253_v18 }
 0x657   : > { %v12808_v54 = vpop.eup %8322  ;;  %8342 = vpow2.f32 %v7161_v2  ;;  %v5256_v8 = vadd.f32 %v12438_v33, %v14499_v20  ;;  %v5258_v2 = vadd.f32 %v12438_v33, %v12303_v22  ;;  %v7168_v5 = vmul.f32 -1.442695, %v5254_v55 }
 0x658   : > { %v12812_v45 = vpop.eup %8324  ;;  %8344 = vpow2.f32 %v7162_v61  ;;  %v5259_v61 = vadd.f32 %v12438_v33, %v12308_v11  ;;  %v7169_v58 = vmul.f32 -1.442695, %v5255_v56  ;;  %v5260_v16 = vadd.f32 %v12438_v33, %v12317_v7 }
 0x659   : > { %14498 = vst [vmem:[#allocation136_spill] sm:$0xff] %v12812_v45  ;;  %v12816_v36 = vpop.eup %8326  ;;  %8346 = vpow2.f32 %v7163_v32  ;;  %v7170_v18 = vmul.f32 -1.442695, %v5256_v8  ;;  %v5261_v22 = vadd.f32 %v12438_v33, %v12326_v52  ;;  %v7171_v55 = vmul.f32 -1.442695, %v5257_v3 }
 0x65a   : > { %14500 = vst [vmem:[#allocation58_spill] sm:$0xff] %v12816_v36  ;;  %v12820_v17 = vpop.eup %8328  ;;  %8348 = vpow2.f32 %v7164_v12  ;;  %v5262_v11 = vadd.f32 %v12438_v33, %v12335_v13  ;;  %v7172_v56 = vmul.f32 -1.442695, %v5258_v2  ;;  %v7173_v8 = vmul.f32 -1.442695, %v5259_v61 }
 0x65b   : > { %14501 = vst [vmem:[#allocation135_spill] sm:$0xff] %v12820_v17  ;;  %v12824_v47 = vpop.eup %8330  ;;  %8350 = vpow2.f32 %v7165_v0  ;;  %v7174_v3 = vmul.f32 -1.442695, %v5260_v16  ;;  %v7175_v2 = vmul.f32 -1.442695, %v5261_v22 }
 0x65c   : > { %14502 = vst [vmem:[#allocation59_spill] sm:$0xff] %v12824_v47  ;;  %v12828_v20 = vpop.eup %8332  ;;  %8352 = vpow2.f32 %v7166_v26  ;;  %v7176_v61 = vmul.f32 -1.442695, %v5262_v11 }
 0x65d   : > { %14503 = vst [vmem:[#allocation138_spill] sm:$0xff] %v12828_v20  ;;  %v12832_v32 = vpop.eup %8334  ;;  %8354 = vpow2.f32 %v7167_v10  ;;  %v14507_v20 = vld [vmem:[#allocation76_spill] sm:$0xff] }
 0x65e   : > { %14504 = vst [vmem:[#allocation62_spill] sm:$0xff] %v12832_v32  ;;  %v12836_v12 = vpop.eup %8336  ;;  %8356 = vpow2.f32 %v7168_v5  ;;  %v5263_v7 = vadd.f32 %v12438_v33, %v14507_v20  ;;  %v14509_v32 = vld [vmem:[#allocation77_spill] sm:$0xff] }
 0x65f   : > { %14505 = vst [vmem:[#allocation137_spill] sm:$0xff] %v12836_v12  ;;  %v12840_v0 = vpop.eup %8338  ;;  %8358 = vpow2.f32 %v7169_v58  ;;  %v5264_v52 = vadd.f32 %v12438_v33, %v14509_v32  ;;  %v14511_v12 = vld [vmem:[#allocation80_spill] sm:$0xff] }
 0x660   : > { %14506 = vst [vmem:[#allocation63_spill] sm:$0xff] %v12840_v0  ;;  %v12844_v26 = vpop.eup %8340  ;;  %8360 = vpow2.f32 %v7170_v18  ;;  %v5265_v13 = vadd.f32 %v12438_v33, %v14511_v12  ;;  %v14513_v0 = vld [vmem:[#allocation81_spill] sm:$0xff]  ;;  %v7177_v16 = vmul.f32 -1.442695, %v5263_v7 }
 0x661   : > { %14508 = vst [vmem:[#allocation140_spill] sm:$0xff] %v12844_v26  ;;  %v12848_v10 = vpop.eup %8342  ;;  %8362 = vpow2.f32 %v7171_v55  ;;  %v5266_v58 = vadd.f32 %v12438_v33, %v14513_v0  ;;  %v14515_v26 = vld [vmem:[#allocation84_spill] sm:$0xff]  ;;  %v7178_v22 = vmul.f32 -1.442695, %v5264_v52 }
 0x662   : > { %14510 = vst [vmem:[#allocation66_spill] sm:$0xff] %v12848_v10  ;;  %v12852_v5 = vpop.eup %8344  ;;  %8364 = vpow2.f32 %v7172_v56  ;;  %v5267_v18 = vadd.f32 %v12438_v33, %v14515_v26  ;;  %v14517_v10 = vld [vmem:[#allocation85_spill] sm:$0xff]  ;;  %v7179_v11 = vmul.f32 -1.442695, %v5265_v13 }
 0x663   : > { %14512 = vst [vmem:[#allocation139_spill] sm:$0xff] %v12852_v5  ;;  %v12856_v20 = vpop.eup %8346  ;;  %8366 = vpow2.f32 %v7173_v8  ;;  %v5268_v55 = vadd.f32 %v12438_v33, %v14517_v10  ;;  %v14519_v5 = vld [vmem:[#allocation88_spill] sm:$0xff]  ;;  %v7180_v7 = vmul.f32 -1.442695, %v5266_v58 }
 0x664   : > { %14514 = vst [vmem:[#allocation67_spill] sm:$0xff] %v12856_v20  ;;  %v12860_v32 = vpop.eup %8348  ;;  %8368 = vpow2.f32 %v7174_v3  ;;  %v5269_v56 = vadd.f32 %v12438_v33, %v14519_v5  ;;  %v14521_v20 = vld [vmem:[#allocation89_spill] sm:$0xff]  ;;  %v7181_v52 = vmul.f32 -1.442695, %v5267_v18 }
 0x665   : > { %14516 = vst [vmem:[#allocation142_spill] sm:$0xff] %v12860_v32  ;;  %v12864_v12 = vpop.eup %8350  ;;  %8370 = vpow2.f32 %v7175_v2  ;;  %v5270_v8 = vadd.f32 %v12438_v33, %v14521_v20  ;;  %v14523_v32 = vld [vmem:[#allocation92_spill] sm:$0xff]  ;;  %v7182_v13 = vmul.f32 -1.442695, %v5268_v55 }
 0x666   : > { %14518 = vst [vmem:[#allocation70_spill] sm:$0xff] %v12864_v12  ;;  %v12868_v0 = vpop.eup %8352  ;;  %8372 = vpow2.f32 %v7176_v61  ;;  %v5271_v3 = vadd.f32 %v12438_v33, %v14523_v32  ;;  %v14525_v12 = vld [vmem:[#allocation93_spill] sm:$0xff]  ;;  %v7183_v58 = vmul.f32 -1.442695, %v5269_v56  ;;  %v6286_v56 = vadd.s32 4294967224, %v10057_v4 }
 0x667   : > { %14520 = vst [vmem:[#allocation141_spill] sm:$0xff] %v12868_v0  ;;  %v12872_v26 = vpop.eup %8354  ;;  %8374 = vpow2.f32 %v7177_v16  ;;  %v5272_v2 = vadd.f32 %v12438_v33, %v14525_v12  ;;  %v14527_v0 = vld [vmem:[#allocation96_spill] sm:$0xff]  ;;  %v7184_v18 = vmul.f32 -1.442695, %v5270_v8  ;;  %v6279_v12 = vadd.s32 4294967232, %v10057_v4 }
 0x668   : > { %14522 = vst [vmem:[#allocation71_spill] sm:$0xff] %v12872_v26  ;;  %v12876_v10 = vpop.eup %8356  ;;  %8376 = vpow2.f32 %v7178_v22  ;;  %v5273_v61 = vadd.f32 %v12438_v33, %v14527_v0  ;;  %v14529_v26 = vld [vmem:[#allocation97_spill] sm:$0xff]  ;;  %v14531_v22 = vld [vmem:[#allocation100_spill] sm:$0xff]  ;;  %v6300_v8 = vadd.s32 4294967208, %v10057_v4 }
 0x669   : > { %14524 = vst [vmem:[#allocation144_spill] sm:$0xff] %v12876_v10  ;;  %v12880_v5 = vpop.eup %8358  ;;  %8378 = vpow2.f32 %v7179_v11  ;;  %v5274_v16 = vadd.f32 %v12438_v33, %v14529_v26  ;;  %v5275_v55 = vadd.f32 %v12438_v33, %v14531_v22  ;;  %v14533_v11 = vld [vmem:[#allocation101_spill] sm:$0xff]  ;;  %v7186_v26 = vmul.f32 -1.442695, %v5272_v2 }
 0x66a   : > { %14526 = vst [vmem:[#allocation74_spill] sm:$0xff] %v12880_v5  ;;  %v12884_v20 = vpop.eup %8360  ;;  %8380 = vpow2.f32 %v7180_v7  ;;  %v7185_v5 = vmul.f32 -1.442695, %v5271_v3  ;;  %v5276_v0 = vadd.f32 %v12438_v33, %v14533_v11  ;;  %v7187_v22 = vmul.f32 -1.442695, %v5273_v61 }
 0x66b   : > { %14528 = vst [vmem:[#allocation143_spill] sm:$0xff] %v12884_v20  ;;  %v12888_v32 = vpop.eup %8362  ;;  %8382 = vpow2.f32 %v7181_v52  ;;  %v6314_v3 = vadd.s32 4294967192, %v10057_v4  ;;  %v7188_v11 = vmul.f32 -1.442695, %v5274_v16  ;;  %v6293_v2 = vadd.s32 4294967216, %v10057_v4 }
 0x66c   : > { %14530 = vst [vmem:[#allocation75_spill] sm:$0xff] %v12888_v32  ;;  %v12893_v10 = vpop.eup %8364  ;;  %8384 = vpow2.f32 %v7182_v13  ;;  %v14535_v32 = vld [vmem:[#allocation104_spill] sm:$0xff]  ;;  %v6321_v61 = vadd.s32 4294967184, %v10057_v4  ;;  %v6307_v16 = vadd.s32 4294967200, %v10057_v4 }
 0x66d   : > { %14532 = vst [vmem:[#allocation146_spill] sm:$0xff] %v12893_v10  ;;  %v12898_v7 = vpop.eup %8366  ;;  %v5277_v20 = vadd.f32 %v12438_v33, %v14535_v32  ;;  %8386 = vpow2.f32 %v7183_v58  ;;  %v14537_v10 = vld [vmem:[#allocation105_spill] sm:$0xff]  ;;  %v7189_v32 = vmul.f32 -1.442695, %v5275_v55  ;;  %v12928_v55 = vsub.s32 %v6286_v56, %v12454_v46 }
 0x66e   : > { %14534 = vst [vmem:[#allocation78_spill] sm:$0xff] %v12898_v7  ;;  %v12903_v52 = vpop.eup %8368  ;;  %v5278_v47 = vadd.f32 %v12438_v33, %v14537_v10  ;;  %8388 = vpow2.f32 %v7184_v18  ;;  %v14539_v7 = vld [vmem:[#allocation108_spill] sm:$0xff]  ;;  %v7190_v10 = vmul.f32 -1.442695, %v5276_v0  ;;  %v12933_v0 = vsub.s32 %v6300_v8, %v12454_v46 }
 0x66f   : > { %14536 = vst [vmem:[#allocation145_spill] sm:$0xff] %v12903_v52  ;;  %v12908_v13 = vpop.eup %8370  ;;  %v5279_v17 = vadd.f32 %v12438_v33, %v14539_v7  ;;  %8390 = vpow2.f32 %v7185_v5  ;;  %v14540_v52 = vld [vmem:[#allocation109_spill] sm:$0xff]  ;;  %v7191_v45 = vmul.f32 -1.442695, %v5277_v20  ;;  %v12925_v5 = vsub.s32 %v6279_v12, %v12454_v46 }
 0x670   : > { %14538 = vst [vmem:[#allocation79_spill] sm:$0xff] %v12908_v13  ;;  %v12913_v58 = vpop.eup %8372  ;;  %v5280_v36 = vadd.f32 %v12438_v33, %v14540_v52  ;;  %8392 = vpow2.f32 %v7186_v26  ;;  %v6328_v13 = vadd.s32 4294967176, %v10057_v4  ;;  %v7192_v33 = vmul.f32 -1.442695, %v5278_v47 }
 0x671   : > { %v12918_v18 = vpop.eup %8374  ;;  %8394 = vpow2.f32 %v7187_v22  ;;  %v12936_v52 = vsub.s32 %v6314_v3, %v12454_v46  ;;  %v7193_v4 = vmul.f32 -1.442695, %v5279_v17  ;;  %v12941_v12 = vsub.s32 %v6293_v2, %v12454_v46 }
 0x672   : > { %v12922_v7 = vpop.eup %8376  ;;  %8396 = vpow2.f32 %v7188_v11  ;;  %v12944_v56 = vsub.s32 %v6321_v61, %v12454_v46  ;;  %v7194_v47 = vmul.f32 -1.442695, %v5280_v36  ;;  %v12949_v8 = vsub.s32 %v6307_v16, %v12454_v46 }
 0x673   : > { %v12930_v26 = vpop.eup %8378  ;;  %14541 = vst [vmem:[#allocation148_spill] sm:$0xff] %v12936_v52  ;;  %8398 = vpow2.f32 %v7189_v32  ;;  %14542 = vst [vmem:[#allocation82_spill] sm:$0xff] %v12941_v12  ;;  %v12952_v3 = vsub.s32 %v6328_v13, %v12454_v46  ;;  %v5714_v17 = vadd.f32 1.0, %v12609_v51  ;;  %v6836_v2 = vrot.slane %v12560_v6, %v12487_v57 }
 0x674   : > { %v12938_v20 = vpop.eup %8380  ;;  %14543 = vst [vmem:[#allocation147_spill] sm:$0xff] %v12944_v56  ;;  %8400 = vpow2.f32 %v7190_v10  ;;  %v6693_v32 = vrot.slane %v12563_v19, %v12925_v5  ;;  %v5715_v36 = vadd.f32 1.0, %v12637_v41  ;;  %v6767_v46 = vrot.slane %v12566_v29, %v12533_v49 }
 0x675   : > { %v12946_v22 = vpop.eup %8382  ;;  %14544 = vst [vmem:[#allocation83_spill] sm:$0xff] %v12952_v3  ;;  %8402 = vpow2.f32 %v7191_v45  ;;  %v5716_v51 = vadd.f32 1.0, %v12646_v50  ;;  %v6841_v6 = vrot.slane %v12569_v15, %v12529_v62  ;;  %v6698_v19 = vrot.slane %v12571_v27, %v12928_v55 }
 0x676   : > { %v12955_v11 = vpop.eup %8384  ;;  %8404 = vpow2.f32 %v7192_v33  ;;  %v5717_v41 = vadd.f32 1.0, %v12650_v63  ;;  %v5718_v29 = vadd.f32 1.0, %v12654_v25  ;;  %v6837_v50 = vsel %vm6263_vm8, %v6836_v2, %v12546_v59  ;;  %v14550_v33 = vld [vmem:[#allocation22_spill] sm:$0xff]  ;;  %v14553_v2 = vld [vmem:[#allocation119_spill] sm:$0xff] }
 0x677   : > { %v12962_v61 = vpop.eup %8386  ;;  %8406 = vpow2.f32 %v7193_v4  ;;  %v6694_v15 = vsel %vm6284_vm11, %v6693_v32, %v12551_v39  ;;  %v5719_v27 = vadd.f32 1.0, %v12662_v34  ;;  %v6768_v63 = vsel %vm6277_vm10, %v6767_v46, %v12555_v28  ;;  %v14555_v46 = vld [vmem:[#allocation115_spill] sm:$0xff] }
 0x678   : > { %14545 = vst [vmem:[#allocation150_spill] sm:$0xff] %v12962_v61  ;;  %v12967_v45 = vpop.eup %8388  ;;  %8408 = vpow2.f32 %v7194_v47  ;;  %v6772_v25 = vrot.slane %v14550_v33, %v12925_v5  ;;  %v5720_v4 = vadd.f32 1.0, %v12674_v23  ;;  %v6842_v59 = vsel %vm6270_vm9, %v6841_v6, %v6837_v50  ;;  %v14583_v61 = vld [vmem:[#allocation51_spill] sm:$0xff] }
 0x679   : > { %14546 = vst [vmem:[#allocation86_spill] sm:$0xff] %v12967_v45  ;;  %v12974_v13 = vpop.eup %8390  ;;  %8410 = vrcp.f32 %v5714_v17  ;;  %v6699_v39 = vsel %vm6291_vm12, %v6698_v19, %v6694_v15  ;;  %v5721_v34 = vadd.f32 1.0, %v12678_v35  ;;  %v6846_v28 = vrot.slane %v14553_v2, %v12533_v49 }
 0x67a   : > { %14547 = vst [vmem:[#allocation149_spill] sm:$0xff] %v12974_v13  ;;  %v12977_v10 = vpop.eup %8392  ;;  %8412 = vrcp.f32 %v5715_v36  ;;  %v6703_v32 = vrot.slane %v12591_v30, %v12941_v12  ;;  %v5722_v23 = vadd.f32 1.0, %v12688_v38  ;;  %v6777_v35 = vrot.slane %v12598_v40, %v12928_v55  ;;  %v14557_v30 = vld [vmem:[#allocation23_spill] sm:$0xff] }
 0x67b   : > { %14548 = vst [vmem:[#allocation87_spill] sm:$0xff] %v12977_v10  ;;  %v12984_v16 = vpop.eup %8394  ;;  %8414 = vrcp.f32 %v5716_v51  ;;  %v5723_v6 = vadd.f32 1.0, %v12692_v14  ;;  %v5724_v38 = vadd.f32 1.0, %v12696_v60  ;;  %v6851_v40 = vrot.slane %v12611_v43, %v12925_v5  ;;  %v14562_v43 = vld [vmem:[#allocation39_spill] sm:$0xff] }
 0x67c   : > { %14549 = vst [vmem:[#allocation152_spill] sm:$0xff] %v12984_v16  ;;  %v12991_v47 = vpop.eup %8396  ;;  %8416 = vrcp.f32 %v5717_v41  ;;  %v6773_v41 = vsel %vm6284_vm11, %v6772_v25, %v6768_v63  ;;  %v5725_v14 = vadd.f32 1.0, %v12704_v42  ;;  %v6847_v63 = vsel %vm6277_vm10, %v6846_v28, %v6842_v59  ;;  %v14568_v59 = vld [vmem:[#allocation120_spill] sm:$0xff]  ;;  %v14580_v16 = vld [vmem:[#allocation50_spill] sm:$0xff] }
 0x67d   : > { %14551 = vst [vmem:[#allocation90_spill] sm:$0xff] %v12991_v47  ;;  %v12996_v17 = vpop.eup %8398  ;;  %8418 = vrcp.f32 %v5718_v29  ;;  %v6704_v33 = vsel %vm6298_vm13, %v6703_v32, %v6699_v39  ;;  %v5726_v60 = vadd.f32 1.0, %v12708_v21  ;;  %v6778_v51 = vsel %vm6291_vm12, %v6777_v35, %v6773_v41  ;;  %v14564_v39 = vld [vmem:[#allocation27_spill] sm:$0xff]  ;;  %v14566_v35 = vld [vmem:[#allocation121_spill] sm:$0xff]  ;;  %v14569_v28 = vld [vmem:[#allocation124_spill] sm:$0xff] }
 0x67e   : > { %14552 = vst [vmem:[#allocation151_spill] sm:$0xff] %v12996_v17  ;;  %v13003_v36 = vpop.eup %8400  ;;  %8420 = vrcp.f32 %v5719_v27  ;;  %v5727_v50 = vadd.f32 1.0, %v14562_v43  ;;  %v14565_v21 = vld [vmem:[#allocation127_spill] sm:$0xff]  ;;  %v13044_v2 = vsel %vm6284_vm11, %v6851_v40, %v6847_v63  ;;  %v6708_v41 = vrot.slane %v14566_v35, %v12933_v0  ;;  %v14570_v40 = vld [vmem:[#allocation34_spill] sm:$0xff] }
 0x67f   : > { %14554 = vst [vmem:[#allocation91_spill] sm:$0xff] %v13003_v36  ;;  %v13010_v19 = vpop.eup %8402  ;;  %8422 = vrcp.f32 %v5720_v4  ;;  %v14561_v4 = vld [vmem:[#allocation26_spill] sm:$0xff]  ;;  %v5728_v32 = vadd.f32 1.0, %v14565_v21  ;;  %v6713_v21 = vrot.slane %v14569_v28, %v12949_v8  ;;  %v6861_v63 = vrot.slane %v14570_v40, %v12941_v12  ;;  %v14571_v35 = vld [vmem:[#allocation35_spill] sm:$0xff] }
 0x680   : > { %14556 = vst [vmem:[#allocation154_spill] sm:$0xff] %v13010_v19  ;;  %v13016_v29 = vpop.eup %8404  ;;  %8424 = vrcp.f32 %v5721_v34  ;;  %v14563_v34 = vld [vmem:[#allocation118_spill] sm:$0xff]  ;;  %v5733_v40 = vadd.f32 1.0, %v12744_v37  ;;  %v5739_v10 = vadd.f32 1.0, %v14580_v16  ;;  %v5740_v13 = vadd.f32 1.0, %v12772_v1 }
 0x681   : > { %14558 = vst [vmem:[#allocation94_spill] sm:$0xff] %v13016_v29  ;;  %v13023_v27 = vpop.eup %8406  ;;  %8426 = vrcp.f32 %v5722_v23  ;;  %v14574_v28 = vld [vmem:[#allocation126_spill] sm:$0xff] }
 0x682   : > { %14559 = vst [vmem:[#allocation153_spill] sm:$0xff] %v13023_v27  ;;  %v13028_v25 = vpop.eup %8408  ;;  %8428 = vrcp.f32 %v5723_v6  ;;  %v14567_v6 = vld [vmem:[#allocation42_spill] sm:$0xff] }
 0x683   : > { %14560 = vst [vmem:[#allocation95_spill] sm:$0xff] %v13028_v25  ;;  %v13034_v42 = vpop.eup %8410  ;;  %8430 = vrcp.f32 %v5724_v38  ;;  %v5729_v43 = vadd.f32 1.0, %v14567_v6  ;;  %v6782_v25 = vrot.slane %v14568_v59, %v12941_v12  ;;  %v5730_v38 = vadd.f32 1.0, %v12728_v44  ;;  %v14577_v59 = vld [vmem:[#allocation47_spill] sm:$0xff] }
 0x684   : > { %v13041_v23 = vpop.eup %8412  ;;  %8432 = vrcp.f32 %v5725_v14  ;;  %v14572_v14 = vld [vmem:[#allocation130_spill] sm:$0xff]  ;;  %v5735_v44 = vadd.f32 1.0, %v12752_v48  ;;  %v5737_v12 = vadd.f32 1.0, %v14577_v59  ;;  %v5741_v48 = vadd.f32 1.0, %v12776_v31 }
 0x685   : > { %v13049_v15 = vpop.eup %8414  ;;  %8434 = vrcp.f32 %v5726_v60  ;;  %v5731_v29 = vadd.f32 1.0, %v14572_v14  ;;  %v5732_v60 = vadd.f32 1.0, %v12740_v9  ;;  %v14576_v9 = vld [vmem:[#allocation129_spill] sm:$0xff]  ;;  %v6783_v16 = vsel %vm6298_vm13, %v6782_v25, %v6778_v51  ;;  %v14589_v51 = vld [vmem:[#allocation38_spill] sm:$0xff] }
 0x686   : > { %v13056_v27 = vpop.eup %8416  ;;  %8436 = vrcp.f32 %v5727_v50  ;;  %v14575_v50 = vld [vmem:[#allocation46_spill] sm:$0xff]  ;;  %v6728_v25 = vrot.slane %v14589_v51, %v12952_v3 }
 0x687   : > { %v13063_v19 = vpop.eup %8418  ;;  %8438 = vrcp.f32 %v5728_v32  ;;  %v5734_v6 = vadd.f32 1.0, %v14575_v50  ;;  %v5736_v32 = vadd.f32 1.0, %v14576_v9  ;;  %v14582_v9 = vld [vmem:[#allocation131_spill] sm:$0xff] }
 0x688   : > { %v13070_v17 = vpop.eup %8420  ;;  %8440 = vrcp.f32 %v5729_v43  ;;  %v14579_v43 = vld [vmem:[#allocation132_spill] sm:$0xff]  ;;  %v5742_v45 = vadd.f32 1.0, %v14582_v9 }
 0x689   : > { %v13073_v14 = vpop.eup %8422  ;;  %8442 = vrcp.f32 %v5730_v38  ;;  %v5738_v47 = vadd.f32 1.0, %v14579_v43  ;;  %v6709_v38 = vsel %vm6305_vm15, %v6708_v41, %v6704_v33  ;;  %v5743_v43 = vadd.f32 1.0, %v14583_v61  ;;  %v14584_v33 = vld [vmem:[#allocation134_spill] sm:$0xff] }
 0x68a   : > { %v13076_v36 = vpop.eup %8424  ;;  %8444 = vrcp.f32 %v5731_v29  ;;  %v6714_v59 = vsel %vm6312_vm0, %v6713_v21, %v6709_v38  ;;  %v5744_v41 = vadd.f32 1.0, %v14584_v33  ;;  %v14587_v21 = vld [vmem:[#allocation55_spill] sm:$0xff]  ;;  %v14588_v61 = vrot.slane %v12587_v24, %v12936_v52  ;;  %v14594_v33 = vld [vmem:[#allocation112_spill] sm:$0xff] }
 0x68b   : > { %v13081_v37 = vpop.eup %8426  ;;  %8446 = vrcp.f32 %v5732_v60  ;;  %v5747_v38 = vadd.f32 1.0, %v14587_v21  ;;  %v6229_v21 = vrot.slane %v13034_v42, %v14594_v33 }
 0x68c   : > { %14578 = vst [vmem:[#allocation156_spill] sm:$0xff] %v13081_v37  ;;  %v13086_v50 = vpop.eup %8428  ;;  %8448 = vrcp.f32 %v5733_v40  ;;  %v14586_v37 = vld [vmem:[#allocation133_spill] sm:$0xff] }
 0x68d   : > { %14581 = vst [vmem:[#allocation98_spill] sm:$0xff] %v13086_v50  ;;  %v13091_v29 = vpop.eup %8430  ;;  %8450 = vrcp.f32 %v5734_v6  ;;  %v14585_v50 = vld [vmem:[#allocation54_spill] sm:$0xff]  ;;  %v5746_v31 = vadd.f32 1.0, %v14586_v37  ;;  %v6719_v6 = vsel %vm6319_vm1, %v14588_v61, %v6714_v59  ;;  %v14595_v61 = vld [vmem:[#allocation113_spill] sm:$0xff] }
 0x68e   : > { %v13096_v60 = vpop.eup %8432  ;;  %v5745_v1 = vadd.f32 1.0, %v14585_v50  ;;  %8452 = vrcp.f32 %v5735_v44  ;;  %v5748_v50 = vadd.f32 1.0, %v12804_v53  ;;  %v14591_v44 = vrot.slane %v14557_v30, %v12933_v0 }
 0x68f   : > { %v13101_v40 = vpop.eup %8434  ;;  %8454 = vrcp.f32 %v5736_v32  ;;  %v14592_v32 = vrot.slane %v14555_v46, %v12928_v55  ;;  %v6234_v53 = vrot.slane %v13041_v23, %v14595_v61  ;;  %v14597_v46 = vrot.slane %v14563_v34, %v12944_v56 }
 0x690   : > { %v13110_v9 = vpop.eup %8436  ;;  %8456 = vrcp.f32 %v5737_v12  ;;  %v6788_v37 = vsel %vm6305_vm15, %v14591_v44, %v6783_v16  ;;  %v5749_v16 = vadd.f32 1.0, %v12808_v54  ;;  %v14599_v44 = vld [vmem:[#allocation136_spill] sm:$0xff]  ;;  %v14601_v54 = vrot.slane %v14574_v28, %v12936_v52 }
 0x691   : > { %14590 = vst [vmem:[#allocation155_spill] sm:$0xff] %v13110_v9  ;;  %v6857_v24 = vsel %vm6291_vm12, %v14592_v32, %v13044_v2  ;;  %v13122_v59 = vpop.eup %8438  ;;  %8458 = vrcp.f32 %v5738_v47  ;;  %v6724_v2 = vsel %vm6326_vm2, %v14597_v46, %v6719_v6  ;;  %v14598_v47 = vrot.slane %v14571_v35, %v12949_v8  ;;  %v14603_v6 = vld [vmem:[#allocation58_spill] sm:$0xff]  ;;  %v14606_v46 = vld [vmem:[#allocation135_spill] sm:$0xff]  ;;  %v14628_v9 = vld [vmem:[#allocation144_spill] sm:$0xff] }
 0x692   : > { %14593 = vst [vmem:[#allocation99_spill] sm:$0xff] %v13122_v59  ;;  %v6862_v12 = vsel %vm6298_vm13, %v6861_v63, %v6857_v24  ;;  %v13129_v30 = vpop.eup %8440  ;;  %8460 = vrcp.f32 %v5739_v10  ;;  %v5750_v23 = vadd.f32 1.0, %v14599_v44  ;;  %v13142_v63 = vsel %vm6333_vm3, %v6728_v25, %v6724_v2  ;;  %v14604_v35 = vld [vmem:[#allocation18_spill] sm:$0xff] }
 0x693   : > { %14596 = vst [vmem:[#allocation158_spill] sm:$0xff] %v13129_v30  ;;  %v6793_v42 = vsel %vm6312_vm0, %v14598_v47, %v6788_v37  ;;  %v8443_v51 = vpop.eup %8442  ;;  %8462 = vrcp.f32 %v5740_v13  ;;  %14600 = vst [vmem:[#allocation102_spill] sm:$0xff] %v13142_v63  ;;  %v5751_v32 = vadd.f32 1.0, %v14603_v6  ;;  %v6241_v37 = vrot.slane %v13049_v15, %v14604_v35  ;;  %v14609_v15 = vld [vmem:[#allocation138_spill] sm:$0xff] }
 0x694   : > { %v13148_v10 = vsel %vm6319_vm1, %v14601_v54, %v6793_v42  ;;  %v8445_v34 = vpop.eup %8444  ;;  %8464 = vrcp.f32 %v5741_v48  ;;  %v14605_v24 = vrot.slane %v14561_v4, %v12933_v0  ;;  %v5752_v2 = vadd.f32 1.0, %v14606_v46  ;;  %v14608_v48 = vld [vmem:[#allocation59_spill] sm:$0xff]  ;;  %v14610_v63 = vld [vmem:[#allocation62_spill] sm:$0xff] }
 0x695   : > { %14602 = vst [vmem:[#allocation157_spill] sm:$0xff] %v13148_v10  ;;  %v13157_v25 = vpop.eup %8446  ;;  %8466 = vrcp.f32 %v5742_v45  ;;  %v6236_v28 = vsel %vm6235_vm14, %v6234_v53, %v6229_v21  ;;  %v5753_v54 = vadd.f32 1.0, %v14608_v48  ;;  %v5754_v6 = vadd.f32 1.0, %v14609_v15  ;;  %v14615_v15 = vld [vmem:[#allocation63_spill] sm:$0xff]  ;;  %v14617_v47 = vld [vmem:[#allocation66_spill] sm:$0xff] }
 0x696   : > { %v6867_v13 = vsel %vm6305_vm15, %v14605_v24, %v6862_v12  ;;  %v13163_v44 = vpop.eup %8448  ;;  %v5755_v4 = vadd.f32 1.0, %v14610_v63  ;;  %8468 = vrcp.f32 %v5743_v43  ;;  %v14611_v24 = vld [vmem:[#allocation137_spill] sm:$0xff]  ;;  %v14612_v45 = vrot.slane %v14564_v39, %v12949_v8  ;;  %v14616_v63 = vld [vmem:[#allocation140_spill] sm:$0xff]  ;;  %v14619_v46 = vld [vmem:[#allocation19_spill] sm:$0xff] }
 0x697   : > { %v13168_v12 = vpop.eup %8450  ;;  %v5756_v10 = vadd.f32 1.0, %v14611_v24  ;;  %8470 = vrcp.f32 %v5744_v41  ;;  %v5757_v42 = vadd.f32 1.0, %v14615_v15  ;;  %v13183_v43 = vadd.f32 1.0, %v14616_v63  ;;  %v14620_v15 = vld [vmem:[#allocation67_spill] sm:$0xff] }
 0x698   : > { %v13175_v21 = vsel %vm6312_vm0, %v14612_v45, %v6867_v13  ;;  %v13179_v48 = vpop.eup %8452  ;;  %8472 = vrcp.f32 %v5745_v1  ;;  %v6243_v24 = vsel %vm6242_vm5, %v6241_v37, %v6236_v28  ;;  %v13189_v39 = vadd.f32 1.0, %v14617_v47  ;;  %v14618_v13 = vld [vmem:[#allocation139_spill] sm:$0xff]  ;;  %v14621_v47 = vld [vmem:[#allocation142_spill] sm:$0xff] }
 0x699   : > { %14613 = vst [vmem:[#allocation103_spill] sm:$0xff] %v13175_v21  ;;  %v13186_v41 = vpop.eup %8454  ;;  %v13192_v45 = vadd.f32 1.0, %v14618_v13  ;;  %8474 = vrcp.f32 %v5746_v31  ;;  %v6248_v53 = vrot.slane %v13056_v27, %v14619_v46  ;;  %v13199_v63 = vadd.f32 1.0, %v14620_v15  ;;  %v14622_v13 = vld [vmem:[#allocation70_spill] sm:$0xff]  ;;  %v14624_v15 = vld [vmem:[#allocation141_spill] sm:$0xff] }
 0x69a   : > { %v13196_v21 = vpop.eup %8456  ;;  %8476 = vrcp.f32 %v5747_v38  ;;  %v6338_v1 = vrot.slane %v8443_v51, %v14594_v33  ;;  %v6342_v37 = vrot.slane %v8445_v34, %v14595_v61  ;;  %v13206_v30 = vadd.f32 1.0, %v14621_v47  ;;  %v14625_v38 = vld [vmem:[#allocation71_spill] sm:$0xff]  ;;  %v14626_v34 = vld [vmem:[#allocation116_spill] sm:$0xff] }
 0x69b   : > { %v13203_v28 = vpop.eup %8458  ;;  %v13209_v31 = vadd.f32 1.0, %v14622_v13  ;;  %8478 = vrcp.f32 %v5748_v50  ;;  %v6250_v27 = vsel %vm6249_vm6, %v6248_v53, %v6243_v24  ;;  %v13215_v59 = vadd.f32 1.0, %v14624_v15  ;;  %v14629_v50 = vld [vmem:[#allocation74_spill] sm:$0xff]  ;;  %v14631_v15 = vld [vmem:[#allocation143_spill] sm:$0xff] }
 0x69c   : > { %v13212_v3 = vpop.eup %8460  ;;  %v13218_v51 = vadd.f32 1.0, %v14625_v38  ;;  %8480 = vrcp.f32 %v5749_v16  ;;  %v6255_v56 = vrot.slane %v13063_v19, %v14626_v34  ;;  %v13225_v13 = vadd.f32 1.0, %v14628_v9  ;;  %v14632_v9 = vld [vmem:[#allocation75_spill] sm:$0xff] }
 0x69d   : > { %14623 = vst [vmem:[#allocation160_spill] sm:$0xff] %v13212_v3  ;;  %v13222_v47 = vpop.eup %8462  ;;  %v13228_v52 = vadd.f32 1.0, %v14629_v50  ;;  %8482 = vrcp.f32 %v5750_v23  ;;  %v6347_v53 = vrot.slane %v13157_v25, %v14604_v35  ;;  %v13235_v38 = vadd.f32 1.0, %v14631_v15  ;;  %v14633_v50 = vld [vmem:[#allocation146_spill] sm:$0xff] }
 0x69e   : > { %14627 = vst [vmem:[#allocation106_spill] sm:$0xff] %v13222_v47  ;;  %v13232_v24 = vpop.eup %8464  ;;  %8484 = vrcp.f32 %v5751_v32  ;;  %v6257_v19 = vsel %vm6256_vm7, %v6255_v56, %v6250_v27  ;;  %v6343_v16 = vsel %vm6235_vm14, %v6342_v37, %v6338_v1  ;;  %v13242_v3 = vadd.f32 1.0, %v14632_v9  ;;  %v14635_v15 = vld [vmem:[#allocation78_spill] sm:$0xff]  ;;  %v14636_v56 = vld [vmem:[#allocation145_spill] sm:$0xff]  ;;  %v14637_v1 = vld [vmem:[#allocation79_spill] sm:$0xff] }
 0x69f   : > { %14630 = vst [vmem:[#allocation159_spill] sm:$0xff] %v13232_v24  ;;  %v13239_v47 = vpop.eup %8466  ;;  %v13245_v23 = vadd.f32 1.0, %v14633_v50  ;;  %8486 = vrcp.f32 %v5752_v2  ;;  %v6262_v25 = vrot.slane %v13070_v17, %v12487_v57  ;;  %v13252_v32 = vadd.f32 1.0, %v14635_v15 }
 0x6a0   : > { %v13249_v24 = vpop.eup %8468  ;;  %v13255_v27 = vadd.f32 1.0, %v14636_v56  ;;  %v13258_v37 = vadd.f32 1.0, %v14637_v1  ;;  %8488 = vrcp.f32 %v5753_v54  ;;  %v13263_v50 = vadd.f32 1.0, %v12913_v58 }
 0x6a1   : > { %14634 = vst [vmem:[#allocation107_spill] sm:$0xff] %v13249_v24  ;;  %v13260_v9 = vpop.eup %8470  ;;  %8490 = vrcp.f32 %v5754_v6  ;;  %v6264_v17 = vsel %vm6263_vm8, %v6262_v25, %v6257_v19  ;;  %v6348_v2 = vsel %vm6242_vm5, %v6347_v53, %v6343_v16  ;;  %v13270_v15 = vadd.f32 1.0, %v12918_v18 }
 0x6a2   : > { %v13267_v24 = vpop.eup %8472  ;;  %8492 = vrcp.f32 %v5755_v4  ;;  %v6269_v56 = vrot.slane %v13073_v14, %v12529_v62  ;;  %v6352_v54 = vrot.slane %v13163_v44, %v14619_v46  ;;  %v13277_v58 = vadd.f32 1.0, %v12922_v7 }
 0x6a3   : > { %v8475_v1 = vpop.eup %8474  ;;  %v13280_v6 = vadd.f32 1.0, %v12930_v26  ;;  %v13283_v53 = vadd.f32 1.0, %v12938_v20  ;;  %8494 = vrcp.f32 %v5756_v10  ;;  %v6276_v7 = vrot.slane %v13076_v36, %v12533_v49 }
 0x6a4   : > { %v8477_v18 = vpop.eup %8476  ;;  %8496 = vrcp.f32 %v5757_v42  ;;  %v6271_v4 = vsel %vm6270_vm9, %v6269_v56, %v6264_v17  ;;  %v6353_v14 = vsel %vm6249_vm6, %v6352_v54, %v6348_v2  ;;  %v6417_v19 = vrot.slane %v8475_v1, %v14594_v33  ;;  %v14639_v1 = vld [vmem:[#allocation150_spill] sm:$0xff] }
 0x6a5   : > { %v8479_v44 = vpop.eup %8478  ;;  %8498 = vrcp.f32 %v13183_v43  ;;  %v6357_v26 = vrot.slane %v13168_v12, %v14626_v34  ;;  %v6421_v20 = vrot.slane %v8477_v18, %v14595_v61  ;;  %v13295_v42 = vadd.f32 1.0, %v12946_v22  ;;  %v14638_v22 = vld [vmem:[#allocation156_spill] sm:$0xff]  ;;  %v14640_v18 = vld [vmem:[#allocation86_spill] sm:$0xff] }
 0x6a6   : > { %v8481_v10 = vpop.eup %8480  ;;  %v13298_v16 = vadd.f32 1.0, %v12955_v11  ;;  %8500 = vrcp.f32 %v13189_v39  ;;  %v6426_v25 = vrot.slane %v8479_v44, %v14604_v35  ;;  %v6278_v36 = vsel %vm6277_vm10, %v6276_v7, %v6271_v4 }
 0x6a7   : > { %v8483_v43 = vpop.eup %8482  ;;  %8502 = vrcp.f32 %v13192_v45  ;;  %v6358_v12 = vsel %vm6256_vm7, %v6357_v26, %v6353_v14  ;;  %v6422_v17 = vsel %vm6235_vm14, %v6421_v20, %v6417_v19  ;;  %v6283_v11 = vrot.slane %v14638_v22, %v12925_v5  ;;  %v14641_v19 = vld [vmem:[#allocation149_spill] sm:$0xff]  ;;  %v14642_v20 = vld [vmem:[#allocation98_spill] sm:$0xff]  ;;  %v14643_v22 = vld [vmem:[#allocation87_spill] sm:$0xff] }
 0x6a8   : > { %v8485_v2 = vpop.eup %8484  ;;  %8504 = vrcp.f32 %v13199_v63  ;;  %v6362_v39 = vrot.slane %v13179_v48, %v12487_v57  ;;  %v6427_v56 = vsel %vm6242_vm5, %v6426_v25, %v6422_v17  ;;  %v13313_v45 = vadd.f32 1.0, %v14639_v1 }
 0x6a9   : > { %v8487_v54 = vpop.eup %8486  ;;  %v13316_v4 = vadd.f32 1.0, %v14640_v18  ;;  %8506 = vrcp.f32 %v13206_v30  ;;  %v6431_v14 = vrot.slane %v8481_v10, %v14619_v46  ;;  %v13323_v44 = vadd.f32 1.0, %v14641_v19 }
 0x6aa   : > { %v13320_v63 = vpop.eup %8488  ;;  %8508 = vrcp.f32 %v13209_v31  ;;  %v6285_v48 = vsel %vm6284_vm11, %v6283_v11, %v6278_v36  ;;  %v6363_v7 = vsel %vm6263_vm8, %v6362_v39, %v6358_v12  ;;  %v6290_v30 = vrot.slane %v14642_v20, %v12928_v55  ;;  %v14644_v36 = vld [vmem:[#allocation152_spill] sm:$0xff]  ;;  %v14645_v39 = vld [vmem:[#allocation90_spill] sm:$0xff] }
 0x6ab   : > { %v13328_v26 = vpop.eup %8490  ;;  %8510 = vrcp.f32 %v13215_v59  ;;  %v6367_v10 = vrot.slane %v13186_v41, %v12529_v62  ;;  %v6432_v25 = vsel %vm6249_vm6, %v6431_v14, %v6427_v56  ;;  %v13339_v31 = vadd.f32 1.0, %v14643_v22  ;;  %v14646_v14 = vld [vmem:[#allocation82_spill] sm:$0xff]  ;;  %v14647_v22 = vld [vmem:[#allocation151_spill] sm:$0xff] }
 0x6ac   : > { %v13336_v17 = vpop.eup %8492  ;;  %v13342_v11 = vadd.f32 1.0, %v14644_v36  ;;  %8512 = vrcp.f32 %v13218_v51  ;;  %v6436_v59 = vrot.slane %v8483_v43, %v14626_v34  ;;  %v13349_v1 = vadd.f32 1.0, %v14645_v39 }
 0x6ad   : > { %v13346_v12 = vpop.eup %8494  ;;  %8514 = vrcp.f32 %v13225_v13  ;;  %v6292_v41 = vsel %vm6291_vm12, %v6290_v30, %v6285_v48  ;;  %v6368_v56 = vsel %vm6270_vm9, %v6367_v10, %v6363_v7  ;;  %v6297_v51 = vrot.slane %v13091_v29, %v14646_v14  ;;  %v14648_v48 = vld [vmem:[#allocation91_spill] sm:$0xff]  ;;  %v14649_v29 = vld [vmem:[#allocation154_spill] sm:$0xff] }
 0x6ae   : > { %v13354_v18 = vpop.eup %8496  ;;  %8516 = vrcp.f32 %v13228_v52  ;;  %v6372_v43 = vrot.slane %v13196_v21, %v12533_v49  ;;  %v6437_v19 = vsel %vm6256_vm7, %v6436_v59, %v6432_v25  ;;  %v13365_v13 = vadd.f32 1.0, %v14647_v22  ;;  %v14650_v22 = vld [vmem:[#allocation94_spill] sm:$0xff] }
 0x6af   : > { %v13362_v20 = vpop.eup %8498  ;;  %v13368_v30 = vadd.f32 1.0, %v14648_v48  ;;  %8518 = vrcp.f32 %v13235_v38  ;;  %v6441_v52 = vrot.slane %v8485_v2, %v12487_v57  ;;  %v13375_v10 = vadd.f32 1.0, %v14649_v29  ;;  %v14652_v48 = vld [vmem:[#allocation160_spill] sm:$0xff] }
 0x6b0   : > { %v13372_v7 = vpop.eup %8500  ;;  %8520 = vrcp.f32 %v13242_v3  ;;  %v6299_v21 = vsel %vm6298_vm13, %v6297_v51, %v6292_v41  ;;  %v6373_v25 = vsel %vm6277_vm10, %v6372_v43, %v6368_v56  ;;  %v6304_v38 = vrot.slane %v13096_v60, %v12933_v0  ;;  %v14651_v41 = vld [vmem:[#allocation153_spill] sm:$0xff] }
 0x6b1   : > { %v13380_v36 = vpop.eup %8502  ;;  %8522 = vrcp.f32 %v13245_v23  ;;  %v6377_v2 = vrot.slane %v13203_v28, %v12925_v5  ;;  %v6442_v59 = vsel %vm6263_vm8, %v6441_v52, %v6437_v19  ;;  %v13391_v3 = vadd.f32 1.0, %v14650_v22 }
 0x6b2   : > { %v13388_v39 = vpop.eup %8504  ;;  %v13394_v51 = vadd.f32 1.0, %v14651_v41  ;;  %8524 = vrcp.f32 %v13252_v32  ;;  %v6446_v23 = vrot.slane %v8487_v54, %v12529_v62  ;;  %v6306_v60 = vsel %vm6305_vm15, %v6304_v38, %v6299_v21  ;;  %v14654_v21 = vld [vmem:[#allocation155_spill] sm:$0xff] }
 0x6b3   : > { %v8507_v56 = vpop.eup %8506  ;;  %8526 = vrcp.f32 %v13255_v27  ;;  %v6311_v28 = vrot.slane %v13101_v40, %v12949_v8  ;;  %v6378_v43 = vsel %vm6284_vm11, %v6377_v2, %v6373_v25  ;;  %v6382_v52 = vrot.slane %v14652_v48, %v12928_v55  ;;  %v14653_v27 = vld [vmem:[#allocation148_spill] sm:$0xff] }
 0x6b4   : > { %v8509_v19 = vpop.eup %8508  ;;  %8528 = vrcp.f32 %v13258_v37  ;;  %v6447_v32 = vsel %vm6270_vm9, %v6446_v23, %v6442_v59  ;;  %v6496_v54 = vrot.slane %v8507_v56, %v14594_v33  ;;  %v6318_v38 = vrot.slane %v14654_v21, %v14653_v27  ;;  %v14655_v59 = vld [vmem:[#allocation106_spill] sm:$0xff] }
 0x6b5   : > { %v8511_v29 = vpop.eup %8510  ;;  %8530 = vrcp.f32 %v13263_v50  ;;  %v6451_v40 = vrot.slane %v13320_v63, %v12533_v49  ;;  %v6500_v25 = vrot.slane %v8509_v19, %v14595_v61  ;;  %v6383_v37 = vsel %vm6291_vm12, %v6382_v52, %v6378_v43 }
 0x6b6   : > { %v8513_v2 = vpop.eup %8512  ;;  %8532 = vrcp.f32 %v13270_v15  ;;  %v6387_v22 = vrot.slane %v14655_v59, %v14646_v14  ;;  %v6505_v41 = vrot.slane %v8511_v29, %v14604_v35  ;;  %v6456_v15 = vrot.slane %v13328_v26, %v12925_v5  ;;  %v14656_v59 = vld [vmem:[#allocation159_spill] sm:$0xff] }
 0x6b7   : > { %v8515_v23 = vpop.eup %8514  ;;  %8534 = vrcp.f32 %v13277_v58  ;;  %v6452_v50 = vsel %vm6277_vm10, %v6451_v40, %v6447_v32  ;;  %v6501_v56 = vsel %vm6235_vm14, %v6500_v25, %v6496_v54  ;;  %v6510_v63 = vrot.slane %v8513_v2, %v14619_v46 }
 0x6b8   : > { %v8517_v19 = vpop.eup %8516  ;;  %8536 = vrcp.f32 %v13280_v6  ;;  %v6506_v43 = vsel %vm6242_vm5, %v6505_v41, %v6501_v56  ;;  %v6515_v48 = vrot.slane %v8515_v23, %v14626_v34  ;;  %v6388_v58 = vsel %vm6298_vm13, %v6387_v22, %v6383_v37 }
 0x6b9   : > { %v8519_v52 = vpop.eup %8518  ;;  %8538 = vrcp.f32 %v13283_v53  ;;  %v6511_v32 = vsel %vm6249_vm6, %v6510_v63, %v6506_v43  ;;  %v6520_v54 = vrot.slane %v8517_v19, %v12487_v57  ;;  %v6457_v6 = vsel %vm6284_vm11, %v6456_v15, %v6452_v50  ;;  %v14657_v63 = vld [vmem:[#allocation95_spill] sm:$0xff] }
 0x6ba   : > { %v8521_v29 = vpop.eup %8520  ;;  %8540 = vrcp.f32 %v13295_v42  ;;  %v6516_v26 = vsel %vm6256_vm7, %v6515_v48, %v6511_v32  ;;  %v6525_v21 = vrot.slane %v8519_v52, %v12529_v62  ;;  %v6461_v53 = vrot.slane %v13336_v17, %v12928_v55  ;;  %v14659_v52 = vld [vmem:[#allocation99_spill] sm:$0xff] }
 0x6bb   : > { %v8523_v40 = vpop.eup %8522  ;;  %8542 = vrcp.f32 %v13298_v16  ;;  %v6521_v25 = vsel %vm6263_vm8, %v6520_v54, %v6516_v26  ;;  %v6530_v2 = vrot.slane %v8521_v29, %v12533_v49  ;;  %v6313_v42 = vsel %vm6312_vm0, %v6311_v28, %v6306_v60 }
 0x6bc   : > { %v8525_v37 = vpop.eup %8524  ;;  %8544 = vrcp.f32 %v13313_v45  ;;  %v6392_v22 = vrot.slane %v14656_v59, %v12933_v0  ;;  %v6526_v41 = vsel %vm6270_vm9, %v6525_v21, %v6521_v25  ;;  %v6462_v16 = vsel %vm6291_vm12, %v6461_v53, %v6457_v6  ;;  %v14662_v21 = vld [vmem:[#allocation107_spill] sm:$0xff] }
 0x6bd   : > { %v8527_v23 = vpop.eup %8526  ;;  %8546 = vrcp.f32 %v13316_v4  ;;  %v6531_v17 = vsel %vm6277_vm10, %v6530_v2, %v6526_v41  ;;  %v6535_v50 = vrot.slane %v8523_v40, %v12925_v5  ;;  %v5792_v19 = vadd.f32 1.0, %v14657_v63 }
 0x6be   : > { %v8529_v56 = vpop.eup %8528  ;;  %8548 = vrcp.f32 %v13323_v44  ;;  %v6393_v45 = vsel %vm6305_vm15, %v6392_v22, %v6388_v58  ;;  %v6466_v60 = vrot.slane %v13346_v12, %v14646_v14  ;;  %v6320_v4 = vsel %vm6319_vm1, %v6318_v38, %v6313_v42  ;;  %v14658_v44 = vld [vmem:[#allocation147_spill] sm:$0xff]  ;;  %v14661_v38 = vld [vmem:[#allocation158_spill] sm:$0xff] }
 0x6bf   : > { %v13455_v28 = vpop.eup %8530  ;;  %8550 = vrcp.f32 %v13339_v31  ;;  %v6397_v15 = vrot.slane %v13239_v47, %v12949_v8  ;;  %v6536_v43 = vsel %vm6284_vm11, %v6535_v50, %v6531_v17  ;;  %v6325_v58 = vrot.slane %v14659_v52, %v14658_v44  ;;  %v14660_v31 = vld [vmem:[#allocation83_spill] sm:$0xff] }
 0x6c0   : > { %v13462_v48 = vpop.eup %8532  ;;  %8552 = vrcp.f32 %v13342_v11  ;;  %v6467_v12 = vsel %vm6298_vm13, %v6466_v60, %v6462_v16  ;;  %v6540_v32 = vrot.slane %v8525_v37, %v12928_v55  ;;  %v6332_v47 = vrot.slane %v14661_v38, %v14660_v31 }
 0x6c1   : > { %v13469_v54 = vpop.eup %8534  ;;  %8554 = vrcp.f32 %v13349_v1  ;;  %v6398_v29 = vsel %vm6312_vm0, %v6397_v15, %v6393_v45  ;;  %v6471_v6 = vrot.slane %v13354_v18, %v12933_v0  ;;  %v6327_v26 = vsel %vm6326_vm2, %v6325_v58, %v6320_v4 }
 0x6c2   : > { %v13477_v11 = vpop.eup %8536  ;;  %8556 = vrcp.f32 %v13365_v13  ;;  %v6402_v40 = vrot.slane %v14662_v21, %v14653_v27  ;;  %v6541_v53 = vsel %vm6291_vm12, %v6540_v32, %v6536_v43  ;;  %v6407_v25 = vrot.slane %v13260_v9, %v14658_v44 }
 0x6c3   : > { %v8539_v1 = vpop.eup %8538  ;;  %8558 = vrcp.f32 %v13368_v30  ;;  %v6472_v2 = vsel %vm6305_vm15, %v6471_v6, %v6467_v12  ;;  %v6545_v18 = vrot.slane %v8527_v23, %v14646_v14  ;;  %v6476_v42 = vrot.slane %v13362_v20, %v12949_v8 }
 0x6c4   : > { %v8541_v37 = vpop.eup %8540  ;;  %8560 = vrcp.f32 %v13375_v10  ;;  %v6403_v13 = vsel %vm6319_vm1, %v6402_v40, %v6398_v29  ;;  %v6575_v59 = vrot.slane %v8539_v1, %v14594_v33  ;;  %v6412_v9 = vrot.slane %v13267_v24, %v14660_v31 }
 0x6c5   : > { %v8543_v22 = vpop.eup %8542  ;;  %8562 = vrcp.f32 %v13391_v3  ;;  %v6546_v30 = vsel %vm6298_vm13, %v6545_v18, %v6541_v53  ;;  %v6579_v41 = vrot.slane %v8541_v37, %v14595_v61  ;;  %v6477_v10 = vsel %vm6312_vm0, %v6476_v42, %v6472_v2 }
 0x6c6   : > { %v8545_v23 = vpop.eup %8544  ;;  %8564 = vrcp.f32 %v13394_v51  ;;  %v6550_v16 = vrot.slane %v8529_v56, %v12933_v0  ;;  %v6584_v20 = vrot.slane %v8543_v22, %v14604_v35  ;;  %v6481_v3 = vrot.slane %v13372_v7, %v14653_v27  ;;  %v14665_v22 = vld [vmem:[#allocation128_spill] sm:$0xff] }
 0x6c7   : > { %v8547_v33 = vpop.eup %8546  ;;  %8566 = vrcp.f32 %v5792_v19  ;;  %v6580_v24 = vsel %vm6235_vm14, %v6579_v41, %v6575_v59  ;;  %v6589_v17 = vrot.slane %v8545_v23, %v14619_v46  ;;  %v6408_v61 = vsel %vm6326_vm2, %v6407_v25, %v6403_v13  ;;  %v14663_v13 = vld [vmem:[#allocation30_spill] sm:$0xff]  ;;  %v14664_v59 = vld [vmem:[#allocation103_spill] sm:$0xff] }
 0x6c8   : > { %v8549_v50 = vpop.eup %8548  ;;  %v6551_v51 = vsel %vm6305_vm15, %v6550_v16, %v6546_v30  ;;  %v6585_v63 = vsel %vm6242_vm5, %v6584_v20, %v6580_v24  ;;  %v6594_v56 = vrot.slane %v8547_v33, %v14626_v34  ;;  %v6482_v35 = vsel %vm6319_vm1, %v6481_v3, %v6477_v10  ;;  %v14667_v3 = vld [vmem:[#allocation157_spill] sm:$0xff] }
 0x6c9   : > { %v8551_v45 = vpop.eup %8550  ;;  %v6555_v7 = vrot.slane %v13455_v28, %v12949_v8  ;;  %v6590_v19 = vsel %vm6249_vm6, %v6589_v17, %v6585_v63  ;;  %v6599_v46 = vrot.slane %v8549_v50, %v12487_v57  ;;  %v6334_v4 = vsel %vm6333_vm3, %v6332_v47, %v6327_v26  ;;  %v14668_v17 = vld [vmem:[#allocation43_spill] sm:$0xff] }
 0x6ca   : > { %v8553_v60 = vpop.eup %8552  ;;  %v6486_v15 = vrot.slane %v13380_v36, %v14658_v44  ;;  %v6595_v43 = vsel %vm6256_vm7, %v6594_v56, %v6590_v19  ;;  %v6604_v34 = vrot.slane %v8551_v45, %v12529_v62  ;;  %v6413_v58 = vsel %vm6333_vm3, %v6412_v9, %v6408_v61  ;;  %v14671_v56 = vld [vmem:[#allocation125_spill] sm:$0xff] }
 0x6cb   : > { %v8555_v52 = vpop.eup %8554  ;;  %v6556_v12 = vsel %vm6312_vm0, %v6555_v7, %v6551_v51  ;;  %v6600_v28 = vsel %vm6263_vm8, %v6599_v46, %v6595_v43  ;;  %v6609_v32 = vrot.slane %v8553_v60, %v12533_v49  ;;  %v6560_v36 = vrot.slane %v13462_v48, %v14653_v27  ;;  %v14670_v51 = vld [vmem:[#allocation123_spill] sm:$0xff] }
 0x6cc   : > { %v8557_v57 = vpop.eup %8556  ;;  %v6487_v38 = vsel %vm6326_vm2, %v6486_v15, %v6482_v35  ;;  %v6605_v47 = vsel %vm6270_vm9, %v6604_v34, %v6600_v28  ;;  %v6614_v62 = vrot.slane %v8555_v52, %v12925_v5  ;;  %v6491_v6 = vrot.slane %v13388_v39, %v14660_v31  ;;  %v14673_v7 = vld [vmem:[#allocation31_spill] sm:$0xff]  ;;  %v14674_v15 = vld [vmem:[#allocation102_spill] sm:$0xff] }
 0x6cd   : > { %v8559_v29 = vpop.eup %8558  ;;  %v6610_v26 = vsel %vm6277_vm10, %v6609_v32, %v6605_v47  ;;  %v6619_v49 = vrot.slane %v8557_v57, %v12928_v55  ;;  %vm6890_vm14 = vcmask 1042434   ;;  %v6561_v40 = vsel %vm6319_vm1, %v6560_v36, %v6556_v12 }
 0x6ce   : > { %v8561_v21 = vpop.eup %8560  ;;  %v6615_v53 = vsel %vm6284_vm11, %v6614_v62, %v6610_v26  ;;  %v6624_v48 = vrot.slane %v8559_v29, %v14646_v14  ;;  %v6889_v1 = vsel %vm6888_vm4, %v6413_v58, %v6334_v4  ;;  %v6492_v5 = vsel %vm6333_vm3, %v6491_v6, %v6487_v38 }
 0x6cf   : > { %v8563_v25 = vpop.eup %8562  ;;  %v6565_v39 = vrot.slane %v13469_v54, %v14658_v44  ;;  %v6620_v55 = vsel %vm6291_vm12, %v6619_v49, %v6615_v53  ;;  %v6629_v2 = vrot.slane %v8561_v21, %v12933_v0  ;;  %v6802_v42 = vrot.slane %v14663_v13, %v14658_v44 }
 0x6d0   : > { %v8565_v18 = vpop.eup %8564  ;;  %v6625_v37 = vsel %vm6298_vm13, %v6624_v48, %v6620_v55  ;;  %v6634_v14 = vrot.slane %v8563_v25, %v12949_v8  ;;  %v14666_v9 = vrot.slane %v14665_v22, %v14653_v27  ;;  %vm6892_vm5 = vcmask 1043459  }
 0x6d1   : > { %v8567_v41 = vpop.eup %8566  ;;  %v6566_v54 = vsel %vm6326_vm2, %v6565_v39, %v6561_v40  ;;  %v6630_v23 = vsel %vm6305_vm15, %v6629_v2, %v6625_v37  ;;  %v6639_v0 = vrot.slane %v8565_v18, %v14653_v27  ;;  %v6570_v8 = vrot.slane %v13477_v11, %v14660_v31 }
 0x6d2   : > { %v6877_v30 = vsel %vm6319_vm1, %v14666_v9, %v14664_v59  ;;  %v6635_v10 = vsel %vm6312_vm0, %v6634_v14, %v6630_v23  ;;  %v6644_v16 = vrot.slane %v8567_v41, %v14658_v44  ;;  %v6891_v20 = vsel %vm6890_vm14, %v6492_v5, %v6889_v1 }
 0x6d3   : > { %v6640_v33 = vsel %vm6319_vm1, %v6639_v0, %v6635_v10  ;;  %v6803_v24 = vsel %vm6326_vm2, %v6802_v42, %v14667_v3  ;;  %v14669_v50 = vrot.slane %v14668_v17, %v14658_v44  ;;  %vm6894_vm6 = vcmask 1044484  }
 0x6d4   : > { %v6571_v11 = vsel %vm6333_vm3, %v6570_v8, %v6566_v54  ;;  %v6645_v61 = vsel %vm6326_vm2, %v6644_v16, %v6640_v33  ;;  %v6886_v63 = vrot.slane %v14670_v51, %v14660_v31  ;;  %vm6896_vm7 = vcmask 1045509  }
 0x6d5   : > { %v6882_v27 = vsel %vm6326_vm2, %v14669_v50, %v6877_v30  ;;  %v14672_v45 = vrot.slane %v14671_v56, %v14660_v31  ;;  %v6807_v44 = vrot.slane %v14673_v7, %v14660_v31  ;;  %v6893_v19 = vsel %vm6892_vm5, %v6571_v11, %v6891_v20 }
 0x6d6   : > { %vm6898_vm8 = vcmask 1046534   ;;  %v6887_v46 = vsel %vm6333_vm3, %v6886_v63, %v6882_v27  ;;  %vm6900_vm9 = vcmask 1047559  }
 0x6d7   : > { %v6650_v35 = vsel %vm6333_vm3, %v14672_v45, %v6645_v61  ;;  %v6808_v4 = vsel %vm6333_vm3, %v6807_v44, %v6803_v24 }
 0x6d8   : > { %v6895_v60 = vsel %vm6894_vm6, %v6650_v35, %v6893_v19 }
 0x6d9   : > { %v6897_v43 = vsel %vm6896_vm7, %v14674_v15, %v6895_v60 }
 0x6da   : > { %v6899_v34 = vsel %vm6898_vm8, %v6808_v4, %v6897_v43 }
 0x6db   : > { %v6901_v31 = vsel %vm6900_vm9, %v6887_v46, %v6899_v34 }
 0x6dc   : > { %6903 = vst [vmem:[%s274_s16] sm:$0xff] %v6901_v31 }
 0x6dd   : > { %8712 = shalt.err (!%p8709_p3)
}
 0x6de   : > { %s8713_s14 = scalar_lea.hbm %s13590_s20, 128  ;;  %s8717_s9 = scalar_lea.hbm %s13641_s7, 256 }
 0x6df   : > { %p8714_p4 = scmp.ne.s32.totalorder %s13590_s20, %s8713_s14  ;;  %p8718_p9 = scmp.lt.u32.totalorder %s13590_s20, %s13641_s7 }
 0x6e0   : > { %p8719_p10 = scmp.lt.u32.totalorder %s8717_s9, %s8713_s14  ;;  %p8721_p12 = scmp.lt.u32.totalorder %s8713_s14, %s13590_s20 }
 0x6e1   : > { %p8715_p7 = pnand %p8714_p4, %p8846_p5 }
 0x6e2   : > { %p8720_p11 = por %p8719_p10, %p8718_p9 }
 0x6e3   : > { %p8716_p8 = pneg %p8715_p7 }
 0x6e4   : > { %p8722_p13 = por %p8721_p12, %p8720_p11 }
 0x6e6   : > { %p8723_p0 = pnand %p8722_p13, %p8716_p8 }
 0x6e8   : > { %8726 = shalt.err (!%p8723_p0)
}
 0x6e9   : > { %7988 = dma.vmem_to_hbm [thread:$0]  (%p8846_p5), %s13592_s19, 128, %s13590_s20, %s6905_s21  }
 0x6ea PF: > { %p7994_p1 = scmp.ge.s32.totalorder %s8761_s29, 2  ;;  %s6930_s16 = sand.u32 1, %s8749_s26  }
 0x6eb   : > { %s6931_s17 = scalar_lea.sflag [#allocation4], %s6930_s16 }
 0x6ec   : > { %p7991_p2 = pnand %p7994_p1, %p8850_p6 }
 0x6ee   : > { %8744 = dma.done.wait (!%p7991_p2), %s6931_s17, 128  }
 0x6ef   : > { %8746 = vsyncadd (!%p7991_p2), %s6931_s17, 4294967168  ;;  %p19_p3 = scmp.ge.s32.totalorder %s8834_s8, 4   ;;  %s14675_s26 = smov %s8753_s27 }
 0x6f0   : > { %s14676_s27 = smov %s8757_s28  ;;  %s14677_s28 = smov %s8844_s11 }
 0x6f1   : > { %s14678_s29 = smov %s8834_s8  ;;  %21 = sbr.rel (!%p19_p3) target bundleno = 6 (0x6), region = 83 }
 0x6f8   :  { %6936 = vsyncpa [#allocation4], 1 }
 0x6f9   :  { %6938 = vsyncpa [#allocation4 + $0x1], 1 }

</bundles_post_ra>
